<compile_context>
chip_gen: v7x
topology: tpu7x:2x2x1
jax: 0.10.0
libtpu: 0.0.40
codegen_flags: <defaults>
</compile_context>

<pallas_src>
import numpy as np
import jax
import jax.numpy as jnp
from jax.experimental import pallas as pl
from jax.experimental.pallas import tpu as pltpu

EPS = 1e-3

CIN, COUT = 112, 672
H = W = 14
HO = WO = 7
CIN_P = 128                     # 112 -> 128 (lane-dense matmul LHS)
COUT_P = 768                    # 672 -> 768 (multiple of 128)
CBLK = 256                      # output-channel block per grid step (768 = 3 * 256)
RDEC, CDEC = 9, 16              # decomposed padded image: r in [0,9), c padded 9 -> 16
PROWS = 2 * 2 * RDEC * CDEC     # 576 decomposed pixel rows
N_REAL1 = float(H * W)          # 196 real pixels for BN-1 batch stats
N_REAL2 = float(HO * WO)        # 49 output pixels for BN-2 batch stats


def fused_kernel(x_ref, mask_ref, w1_ref, g1_ref, b1_ref, w2_ref, g2_ref, b2_ref,
                 o_ref, dec_ref):
    # x_ref   : [576, 128]  decomposed input pixels, row p = ((ph*2+pw)*9 + r)*16 + c
    # mask_ref: [576, 1]    1.0 on real-pixel rows, 0.0 on pad rows
    # w1_ref  : [128, C]    1x1-conv weight column block
    # g1/b1   : [1, C]      BN1 affine
    # w2_ref  : [5, 5, C]   depthwise taps
    # g2/b2   : [1, C]      BN2 affine
    # o_ref   : [7, 7, C]
    # dec_ref : VMEM scratch [2, 2, 9, 16, C]; dec[ph,pw,r,c,:] == act_pad[2r+ph, 2c+pw, :]
    C = o_ref.shape[-1]

    # ---- stage 1: 1x1 conv (matmul over pixels) + BN(batch stats) + ReLU ----
    y = jnp.dot(x_ref[...], w1_ref[...], preferred_element_type=jnp.float32)   # [576, C]
    # Pad rows of x are exactly zero, so their conv output is exactly zero and the sums
    # below equal the sums over the 196 real pixels (single-pass sum / sum-of-squares).
    s1 = jnp.sum(y, axis=0, keepdims=True)
    s2 = jnp.sum(y * y, axis=0, keepdims=True)
    mean1 = s1 * (1.0 / N_REAL1)
    var1 = jnp.maximum(s2 * (1.0 / N_REAL1) - mean1 * mean1, 0.0)
    scale1 = g1_ref[...] * jax.lax.rsqrt(var1 + EPS)
    shift1 = b1_ref[...] - mean1 * scale1
    # re-zero pad rows after BN+ReLU (they are the zero padding of the depthwise conv)
    a = jnp.maximum(y * scale1 + shift1, 0.0) * mask_ref[...]                  # [576, C]

    # scatter into the 5-D parity-decomposed scratch (36 tile-aligned [16, C] stores;
    # avoids any in-kernel relayout/reshape of the big activation tensor)
    for q in range(2 * 2 * RDEC):
        ph, pw_, r = q // (2 * RDEC), (q // RDEC) % 2, q % RDEC
        dec_ref[ph, pw_, r, :, :] = a[q * CDEC:(q + 1) * CDEC, :]

    # ---- stage 2: depthwise 5x5, stride 2, pad 2 + BN(batch stats) + ReLU ----
    acc = jnp.zeros((HO, WO, C), jnp.float32)
    for kw in range(5):
        pw_, mw = kw % 2, kw // 2
        # one sublane-offset slice per kw; ph / r indexing below is on leading dims
        slab = dec_ref[:, pw_, :, mw:mw + WO, :]                               # [2, 9, 7, C]
        for kh in range(5):
            ph, mh = kh % 2, kh // 2
            patch = slab[ph, mh:mh + HO, :, :]                                 # [7, 7, C]
            tap = w2_ref[kh, kw, :].reshape(1, 1, C)
            acc = acc + patch * tap

    t1 = jnp.sum(acc, axis=(0, 1), keepdims=True)
    t2 = jnp.sum(acc * acc, axis=(0, 1), keepdims=True)
    mean2 = t1 * (1.0 / N_REAL2)
    var2 = jnp.maximum(t2 * (1.0 / N_REAL2) - mean2 * mean2, 0.0)
    scale2 = g2_ref[...].reshape(1, 1, C) * jax.lax.rsqrt(var2 + EPS)
    shift2 = b2_ref[...].reshape(1, 1, C) - mean2 * scale2
    o_ref[...] = jnp.maximum(acc * scale2 + shift2, 0.0)


def make_padmask():
    # real pixel  <=>  padded row/col in [2, 16)  <=>  r in [1, 8) and c in [1, 8)
    m = np.zeros((2, 2, RDEC, CDEC, 1), np.float32)
    m[:, :, 1:1 + HO, 1:1 + WO, :] = 1.0
    return jnp.asarray(m.reshape(PROWS, 1))


def prepare_params(w1, g1, b1, w2, g2, b2):
    """One-time (outside the jitted hot path) weight layout transforms + channel padding."""
    w1m = jnp.transpose(w1.reshape(COUT, CIN), (1, 0))                 # [112, 672]
    w1m = jnp.pad(w1m, ((0, CIN_P - CIN), (0, COUT_P - COUT)))         # [128, 768]
    w2m = jnp.transpose(w2.reshape(COUT, 5, 5), (1, 2, 0))             # [5, 5, 672]
    w2m = jnp.pad(w2m, ((0, 0), (0, 0), (0, COUT_P - COUT)))           # [5, 5, 768]

    def pad_vec(v):  # padded channels: gamma=0 / beta=0 -> stay exactly 0 through BN+ReLU
        return jnp.pad(v.reshape(1, COUT), ((0, 0), (0, COUT_P - COUT)))

    return w1m, w2m, pad_vec(g1), pad_vec(b1), pad_vec(g2), pad_vec(b2)


def forward(x_nchw, mask, w1m, w2m, g1p, b1p, g2p, b2p):
    """x_nchw: [1, 112, 14, 14] f32 -> [1, 672, 7, 7] f32 (NCHW)."""
    # pad(2) + parity-decompose the (small, 112-ch) input so the stride-2 depthwise conv
    # only needs contiguous static slices in-kernel
    x_hwc = jnp.transpose(x_nchw[0], (1, 2, 0))                                 # [14,14,112]
    x_pad = jnp.pad(x_hwc, ((2, 2), (2, 2), (0, 0)))                            # [18,18,112]
    x_dec = x_pad.reshape(RDEC, 2, RDEC, 2, CIN).transpose(1, 3, 0, 2, 4)       # [2,2,9,9,112]
    x_dec = jnp.pad(x_dec, ((0, 0), (0, 0), (0, 0),
                            (0, CDEC - RDEC), (0, CIN_P - CIN)))                # [2,2,9,16,128]
    x2d = x_dec.reshape(PROWS, CIN_P)                                           # [576,128]

    out = pl.pallas_call(
        fused_kernel,
        out_shape=jax.ShapeDtypeStruct((HO, WO, COUT_P), jnp.float32),
        grid=(COUT_P // CBLK,),
        in_specs=[
            pl.BlockSpec((PROWS, CIN_P), lambda c: (0, 0)),     # x2d (same block each step)
            pl.BlockSpec((PROWS, 1), lambda c: (0, 0)),         # mask
            pl.BlockSpec((CIN_P, CBLK), lambda c: (0, c)),      # w1 column block
            pl.BlockSpec((1, CBLK), lambda c: (0, c)),          # g1
            pl.BlockSpec((1, CBLK), lambda c: (0, c)),          # b1
            pl.BlockSpec((5, 5, CBLK), lambda c: (0, 0, c)),    # w2 channel block
            pl.BlockSpec((1, CBLK), lambda c: (0, c)),          # g2
            pl.BlockSpec((1, CBLK), lambda c: (0, c)),          # b2
        ],
        out_specs=pl.BlockSpec((HO, WO, CBLK), lambda c: (0, 0, c)),
        scratch_shapes=[pltpu.VMEM((2, 2, RDEC, CDEC, CBLK), jnp.float32)],
        compiler_params=pltpu.CompilerParams(dimension_semantics=("parallel",)),
    )(x2d, mask, w1m, g1p, b1p, w2m, g2p, b2p)

    y = out[:, :, :COUT]                                                        # [7,7,672]
    return jnp.transpose(y, (2, 0, 1))[None]                                    # [1,672,7,7]


def reference(x, w1, g1, b1, w2, g2, b2):
    """Pure-JAX reference with the same training-mode BN semantics."""
    def bn(t, g, b):
        m = jnp.mean(t, axis=(0, 2, 3), keepdims=True)
        v = jnp.mean(jnp.square(t - m), axis=(0, 2, 3), keepdims=True)
        return (t - m) * (g.reshape(1, -1, 1, 1) * jax.lax.rsqrt(v + EPS)) \
            + b.reshape(1, -1, 1, 1)

    y = jax.lax.conv_general_dilated(
        x, w1, window_strides=(1, 1), padding='VALID',
        dimension_numbers=('NCHW', 'OIHW', 'NCHW'),
        precision=jax.lax.Precision.HIGHEST)
    y = jnp.maximum(bn(y, g1, b1), 0.0)
    z = jax.lax.conv_general_dilated(
        y, w2, window_strides=(2, 2), padding=((2, 2), (2, 2)),
        dimension_numbers=('NCHW', 'OIHW', 'NCHW'),
        feature_group_count=COUT,
        precision=jax.lax.Precision.HIGHEST)
    return jnp.maximum(bn(z, g2, b2), 0.0)


if __name__ == "__main__":
    key = jax.random.PRNGKey(0)
    ks = jax.random.split(key, 7)

    # deterministic synthetic parameters (shapes from the module __init__)
    x = jax.random.normal(ks[0], (1, CIN, H, W), jnp.float32)
    w1 = jax.random.normal(ks[1], (COUT, CIN, 1, 1), jnp.float32) * 0.1   # conv2d49
    g1 = 1.0 + 0.1 * jax.random.normal(ks[2], (COUT,), jnp.float32)       # bn49 gamma
    b1 = 0.1 * jax.random.normal(ks[3], (COUT,), jnp.float32)             # bn49 beta
    w2 = jax.random.normal(ks[4], (COUT, 1, 5, 5), jnp.float32) * 0.1     # conv2d50 (dw)
    g2 = 1.0 + 0.1 * jax.random.normal(ks[5], (COUT,), jnp.float32)       # bn50 gamma
    b2 = 0.1 * jax.random.normal(ks[6], (COUT,), jnp.float32)             # bn50 beta

    mask = make_padmask()
    params = prepare_params(w1, g1, b1, w2, g2, b2)   # layout transforms outside hot path

    out = jax.jit(forward)(x, mask, *params)
    jax.block_until_ready(out)
    assert out.shape == (1, COUT, HO, WO), out.shape
    assert bool(jnp.all(out >= 0.0))  # ReLU output

    ref = reference(x, w1, g1, b1, w2, g2, b2)
    err = float(jnp.max(jnp.abs(out - ref)))
    assert err < 1e-2, f"max abs error vs reference: {err}"

    print("KERNEL_OK")
</pallas_src>

<mosaic_0001>
module attributes {stable_mosaic.version = 11 : i64} {
  func.func @fused_kernel(%arg0: i32, %arg1: memref<576x128xf32, #tpu.memory_space<vmem>>, %arg2: memref<576x1xf32, #tpu.memory_space<vmem>>, %arg3: memref<128x256xf32, #tpu.memory_space<vmem>>, %arg4: memref<1x256xf32, #tpu.memory_space<vmem>>, %arg5: memref<1x256xf32, #tpu.memory_space<vmem>>, %arg6: memref<5x5x256xf32, #tpu.memory_space<vmem>>, %arg7: memref<1x256xf32, #tpu.memory_space<vmem>>, %arg8: memref<1x256xf32, #tpu.memory_space<vmem>>, %arg9: memref<7x7x256xf32, #tpu.memory_space<vmem>>, %arg10: memref<2x2x9x16x256xf32, #tpu.memory_space<vmem>>) attributes {dimension_semantics = [#tpu.dimension_semantics<parallel>], iteration_bounds = array<i64: 3>, scalar_prefetch = 0 : i64, scratch_operands = 1 : i64, tpu.core_type = #tpu.core_type<tc>, window_params = [{pipeline_mode = #tpu.pipeline_mode<synchronous>, transform_indices = @transform_0, window_bounds = array<i64: 576, 128>}, {pipeline_mode = #tpu.pipeline_mode<synchronous>, transform_indices = @transform_1, window_bounds = array<i64: 576, 1>}, {transform_indices = @transform_2, window_bounds = array<i64: 128, 256>}, {transform_indices = @transform_3, window_bounds = array<i64: 1, 256>}, {transform_indices = @transform_4, window_bounds = array<i64: 1, 256>}, {transform_indices = @transform_5, window_bounds = array<i64: 5, 5, 256>}, {transform_indices = @transform_6, window_bounds = array<i64: 1, 256>}, {transform_indices = @transform_7, window_bounds = array<i64: 1, 256>}, {transform_indices = @transform_8, window_bounds = array<i64: 7, 7, 256>}]} {
    %c0 = arith.constant 0 : index
    %c0_0 = arith.constant 0 : index
    %0 = vector.load %arg1[%c0, %c0_0] : memref<576x128xf32, #tpu.memory_space<vmem>>, vector<576x128xf32>
    %c0_1 = arith.constant 0 : index
    %c0_2 = arith.constant 0 : index
    %1 = vector.load %arg3[%c0_1, %c0_2] : memref<128x256xf32, #tpu.memory_space<vmem>>, vector<128x256xf32>
    %cst = arith.constant dense<0.000000e+00> : vector<576x256xf32>
    %2 = tpu.matmul %0, %1, %cst {dimension_numbers = #tpu.dot_dimension_numbers<[1], [0], [0], [1], [0, 0, 1, 1], [], []>} : vector<576x128xf32>, vector<128x256xf32>, vector<576x256xf32> -> vector<576x256xf32>
    %cst_3 = arith.constant dense<0.000000e+00> : vector<256xf32>
    %3 = vector.multi_reduction <add>, %2, %cst_3 [0] : vector<576x256xf32> to vector<256xf32>
    %4 = vector.shape_cast %3 : vector<256xf32> to vector<1x256xf32>
    %5 = arith.mulf %2, %2 : vector<576x256xf32>
    %cst_4 = arith.constant dense<0.000000e+00> : vector<256xf32>
    %6 = vector.multi_reduction <add>, %5, %cst_4 [0] : vector<576x256xf32> to vector<256xf32>
    %7 = vector.shape_cast %6 : vector<256xf32> to vector<1x256xf32>
    %cst_5 = arith.constant 0.00510204071 : f32
    %8 = vector.broadcast %cst_5 : f32 to vector<1x256xf32>
    %9 = arith.mulf %4, %8 : vector<1x256xf32>
    %cst_6 = arith.constant 0.00510204071 : f32
    %10 = vector.broadcast %cst_6 : f32 to vector<1x256xf32>
    %11 = arith.mulf %7, %10 : vector<1x256xf32>
    %12 = arith.mulf %9, %9 : vector<1x256xf32>
    %13 = arith.subf %11, %12 : vector<1x256xf32>
    %cst_7 = arith.constant 0.000000e+00 : f32
    %14 = vector.broadcast %cst_7 : f32 to vector<1x256xf32>
    %15 = arith.maximumf %13, %14 : vector<1x256xf32>
    %c0_8 = arith.constant 0 : index
    %c0_9 = arith.constant 0 : index
    %16 = vector.load %arg4[%c0_8, %c0_9] : memref<1x256xf32, #tpu.memory_space<vmem>>, vector<1x256xf32>
    %cst_10 = arith.constant 1.000000e-03 : f32
    %17 = vector.broadcast %cst_10 : f32 to vector<1x256xf32>
    %18 = arith.addf %15, %17 : vector<1x256xf32>
    %19 = math.rsqrt %18 : vector<1x256xf32>
    %20 = arith.mulf %16, %19 : vector<1x256xf32>
    %c0_11 = arith.constant 0 : index
    %c0_12 = arith.constant 0 : index
    %21 = vector.load %arg5[%c0_11, %c0_12] : memref<1x256xf32, #tpu.memory_space<vmem>>, vector<1x256xf32>
    %22 = arith.mulf %9, %20 : vector<1x256xf32>
    %23 = arith.subf %21, %22 : vector<1x256xf32>
    %24 = vector.broadcast %20 : vector<1x256xf32> to vector<576x256xf32>
    %25 = arith.mulf %2, %24 : vector<576x256xf32>
    %26 = vector.broadcast %23 : vector<1x256xf32> to vector<576x256xf32>
    %27 = arith.addf %25, %26 : vector<576x256xf32>
    %cst_13 = arith.constant 0.000000e+00 : f32
    %28 = vector.broadcast %cst_13 : f32 to vector<576x256xf32>
    %29 = arith.maximumf %27, %28 : vector<576x256xf32>
    %c0_14 = arith.constant 0 : index
    %c0_15 = arith.constant 0 : index
    %30 = vector.load %arg2[%c0_14, %c0_15] : memref<576x1xf32, #tpu.memory_space<vmem>>, vector<576x1xf32>
    %31 = vector.broadcast %30 : vector<576x1xf32> to vector<576x256xf32>
    %32 = arith.mulf %29, %31 : vector<576x256xf32>
    %33 = vector.extract_strided_slice %32 {offsets = [0, 0], sizes = [16, 256], strides = [1, 1]} : vector<576x256xf32> to vector<16x256xf32>
    %c0_16 = arith.constant 0 : index
    %c0_17 = arith.constant 0 : index
    %c0_18 = arith.constant 0 : index
    %c0_19 = arith.constant 0 : index
    %c0_20 = arith.constant 0 : index
    %34 = vector.load %arg10[%c0_16, %c0_17, %c0_18, %c0_19, %c0_20] : memref<2x2x9x16x256xf32, #tpu.memory_space<vmem>>, vector<1x1x1x16x256xf32>
    %35 = vector.shape_cast %34 : vector<1x1x1x16x256xf32> to vector<16x256xf32>
    %36 = vector.shape_cast %33 : vector<16x256xf32> to vector<1x1x1x16x256xf32>
    tpu.vector_store %arg10[%c0_16, %c0_17, %c0_18, %c0_19, %c0_20], %36 {strides = array<i32>} : memref<2x2x9x16x256xf32, #tpu.memory_space<vmem>>, vector<1x1x1x16x256xf32>,
    %37 = vector.extract_strided_slice %32 {offsets = [16, 0], sizes = [16, 256], strides = [1, 1]} : vector<576x256xf32> to vector<16x256xf32>
    %c0_21 = arith.constant 0 : index
    %c0_22 = arith.constant 0 : index
    %c1 = arith.constant 1 : index
    %c0_23 = arith.constant 0 : index
    %c0_24 = arith.constant 0 : index
    %38 = vector.load %arg10[%c0_21, %c0_22, %c1, %c0_23, %c0_24] : memref<2x2x9x16x256xf32, #tpu.memory_space<vmem>>, vector<1x1x1x16x256xf32>
    %39 = vector.shape_cast %38 : vector<1x1x1x16x256xf32> to vector<16x256xf32>
    %40 = vector.shape_cast %37 : vector<16x256xf32> to vector<1x1x1x16x256xf32>
    tpu.vector_store %arg10[%c0_21, %c0_22, %c1, %c0_23, %c0_24], %40 {strides = array<i32>} : memref<2x2x9x16x256xf32, #tpu.memory_space<vmem>>, vector<1x1x1x16x256xf32>,
    %41 = vector.extract_strided_slice %32 {offsets = [32, 0], sizes = [16, 256], strides = [1, 1]} : vector<576x256xf32> to vector<16x256xf32>
    %c0_25 = arith.constant 0 : index
    %c0_26 = arith.constant 0 : index
    %c2 = arith.constant 2 : index
    %c0_27 = arith.constant 0 : index
    %c0_28 = arith.constant 0 : index
    %42 = vector.load %arg10[%c0_25, %c0_26, %c2, %c0_27, %c0_28] : memref<2x2x9x16x256xf32, #tpu.memory_space<vmem>>, vector<1x1x1x16x256xf32>
    %43 = vector.shape_cast %42 : vector<1x1x1x16x256xf32> to vector<16x256xf32>
    %44 = vector.shape_cast %41 : vector<16x256xf32> to vector<1x1x1x16x256xf32>
    tpu.vector_store %arg10[%c0_25, %c0_26, %c2, %c0_27, %c0_28], %44 {strides = array<i32>} : memref<2x2x9x16x256xf32, #tpu.memory_space<vmem>>, vector<1x1x1x16x256xf32>,
    %45 = vector.extract_strided_slice %32 {offsets = [48, 0], sizes = [16, 256], strides = [1, 1]} : vector<576x256xf32> to vector<16x256xf32>
    %c0_29 = arith.constant 0 : index
    %c0_30 = arith.constant 0 : index
    %c3 = arith.constant 3 : index
    %c0_31 = arith.constant 0 : index
    %c0_32 = arith.constant 0 : index
    %46 = vector.load %arg10[%c0_29, %c0_30, %c3, %c0_31, %c0_32] : memref<2x2x9x16x256xf32, #tpu.memory_space<vmem>>, vector<1x1x1x16x256xf32>
    %47 = vector.shape_cast %46 : vector<1x1x1x16x256xf32> to vector<16x256xf32>
    %48 = vector.shape_cast %45 : vector<16x256xf32> to vector<1x1x1x16x256xf32>
    tpu.vector_store %arg10[%c0_29, %c0_30, %c3, %c0_31, %c0_32], %48 {strides = array<i32>} : memref<2x2x9x16x256xf32, #tpu.memory_space<vmem>>, vector<1x1x1x16x256xf32>,
    %49 = vector.extract_strided_slice %32 {offsets = [64, 0], sizes = [16, 256], strides = [1, 1]} : vector<576x256xf32> to vector<16x256xf32>
    %c0_33 = arith.constant 0 : index
    %c0_34 = arith.constant 0 : index
    %c4 = arith.constant 4 : index
    %c0_35 = arith.constant 0 : index
    %c0_36 = arith.constant 0 : index
    %50 = vector.load %arg10[%c0_33, %c0_34, %c4, %c0_35, %c0_36] : memref<2x2x9x16x256xf32, #tpu.memory_space<vmem>>, vector<1x1x1x16x256xf32>
    %51 = vector.shape_cast %50 : vector<1x1x1x16x256xf32> to vector<16x256xf32>
    %52 = vector.shape_cast %49 : vector<16x256xf32> to vector<1x1x1x16x256xf32>
    tpu.vector_store %arg10[%c0_33, %c0_34, %c4, %c0_35, %c0_36], %52 {strides = array<i32>} : memref<2x2x9x16x256xf32, #tpu.memory_space<vmem>>, vector<1x1x1x16x256xf32>,
    %53 = vector.extract_strided_slice %32 {offsets = [80, 0], sizes = [16, 256], strides = [1, 1]} : vector<576x256xf32> to vector<16x256xf32>
    %c0_37 = arith.constant 0 : index
    %c0_38 = arith.constant 0 : index
    %c5 = arith.constant 5 : index
    %c0_39 = arith.constant 0 : index
    %c0_40 = arith.constant 0 : index
    %54 = vector.load %arg10[%c0_37, %c0_38, %c5, %c0_39, %c0_40] : memref<2x2x9x16x256xf32, #tpu.memory_space<vmem>>, vector<1x1x1x16x256xf32>
    %55 = vector.shape_cast %54 : vector<1x1x1x16x256xf32> to vector<16x256xf32>
    %56 = vector.shape_cast %53 : vector<16x256xf32> to vector<1x1x1x16x256xf32>
    tpu.vector_store %arg10[%c0_37, %c0_38, %c5, %c0_39, %c0_40], %56 {strides = array<i32>} : memref<2x2x9x16x256xf32, #tpu.memory_space<vmem>>, vector<1x1x1x16x256xf32>,
    %57 = vector.extract_strided_slice %32 {offsets = [96, 0], sizes = [16, 256], strides = [1, 1]} : vector<576x256xf32> to vector<16x256xf32>
    %c0_41 = arith.constant 0 : index
    %c0_42 = arith.constant 0 : index
    %c6 = arith.constant 6 : index
    %c0_43 = arith.constant 0 : index
    %c0_44 = arith.constant 0 : index
    %58 = vector.load %arg10[%c0_41, %c0_42, %c6, %c0_43, %c0_44] : memref<2x2x9x16x256xf32, #tpu.memory_space<vmem>>, vector<1x1x1x16x256xf32>
    %59 = vector.shape_cast %58 : vector<1x1x1x16x256xf32> to vector<16x256xf32>
    %60 = vector.shape_cast %57 : vector<16x256xf32> to vector<1x1x1x16x256xf32>
    tpu.vector_store %arg10[%c0_41, %c0_42, %c6, %c0_43, %c0_44], %60 {strides = array<i32>} : memref<2x2x9x16x256xf32, #tpu.memory_space<vmem>>, vector<1x1x1x16x256xf32>,
    %61 = vector.extract_strided_slice %32 {offsets = [112, 0], sizes = [16, 256], strides = [1, 1]} : vector<576x256xf32> to vector<16x256xf32>
    %c0_45 = arith.constant 0 : index
    %c0_46 = arith.constant 0 : index
    %c7 = arith.constant 7 : index
    %c0_47 = arith.constant 0 : index
    %c0_48 = arith.constant 0 : index
    %62 = vector.load %arg10[%c0_45, %c0_46, %c7, %c0_47, %c0_48] : memref<2x2x9x16x256xf32, #tpu.memory_space<vmem>>, vector<1x1x1x16x256xf32>
    %63 = vector.shape_cast %62 : vector<1x1x1x16x256xf32> to vector<16x256xf32>
    %64 = vector.shape_cast %61 : vector<16x256xf32> to vector<1x1x1x16x256xf32>
    tpu.vector_store %arg10[%c0_45, %c0_46, %c7, %c0_47, %c0_48], %64 {strides = array<i32>} : memref<2x2x9x16x256xf32, #tpu.memory_space<vmem>>, vector<1x1x1x16x256xf32>,
    %65 = vector.extract_strided_slice %32 {offsets = [128, 0], sizes = [16, 256], strides = [1, 1]} : vector<576x256xf32> to vector<16x256xf32>
    %c0_49 = arith.constant 0 : index
    %c0_50 = arith.constant 0 : index
    %c8 = arith.constant 8 : index
    %c0_51 = arith.constant 0 : index
    %c0_52 = arith.constant 0 : index
    %66 = vector.load %arg10[%c0_49, %c0_50, %c8, %c0_51, %c0_52] : memref<2x2x9x16x256xf32, #tpu.memory_space<vmem>>, vector<1x1x1x16x256xf32>
    %67 = vector.shape_cast %66 : vector<1x1x1x16x256xf32> to vector<16x256xf32>
    %68 = vector.shape_cast %65 : vector<16x256xf32> to vector<1x1x1x16x256xf32>
    tpu.vector_store %arg10[%c0_49, %c0_50, %c8, %c0_51, %c0_52], %68 {strides = array<i32>} : memref<2x2x9x16x256xf32, #tpu.memory_space<vmem>>, vector<1x1x1x16x256xf32>,
    %69 = vector.extract_strided_slice %32 {offsets = [144, 0], sizes = [16, 256], strides = [1, 1]} : vector<576x256xf32> to vector<16x256xf32>
    %c0_53 = arith.constant 0 : index
    %c1_54 = arith.constant 1 : index
    %c0_55 = arith.constant 0 : index
    %c0_56 = arith.constant 0 : index
    %c0_57 = arith.constant 0 : index
    %70 = vector.load %arg10[%c0_53, %c1_54, %c0_55, %c0_56, %c0_57] : memref<2x2x9x16x256xf32, #tpu.memory_space<vmem>>, vector<1x1x1x16x256xf32>
    %71 = vector.shape_cast %70 : vector<1x1x1x16x256xf32> to vector<16x256xf32>
    %72 = vector.shape_cast %69 : vector<16x256xf32> to vector<1x1x1x16x256xf32>
    tpu.vector_store %arg10[%c0_53, %c1_54, %c0_55, %c0_56, %c0_57], %72 {strides = array<i32>} : memref<2x2x9x16x256xf32, #tpu.memory_space<vmem>>, vector<1x1x1x16x256xf32>,
    %73 = vector.extract_strided_slice %32 {offsets = [160, 0], sizes = [16, 256], strides = [1, 1]} : vector<576x256xf32> to vector<16x256xf32>
    %c0_58 = arith.constant 0 : index
    %c1_59 = arith.constant 1 : index
    %c1_60 = arith.constant 1 : index
    %c0_61 = arith.constant 0 : index
    %c0_62 = arith.constant 0 : index
    %74 = vector.load %arg10[%c0_58, %c1_59, %c1_60, %c0_61, %c0_62] : memref<2x2x9x16x256xf32, #tpu.memory_space<vmem>>, vector<1x1x1x16x256xf32>
    %75 = vector.shape_cast %74 : vector<1x1x1x16x256xf32> to vector<16x256xf32>
    %76 = vector.shape_cast %73 : vector<16x256xf32> to vector<1x1x1x16x256xf32>
    tpu.vector_store %arg10[%c0_58, %c1_59, %c1_60, %c0_61, %c0_62], %76 {strides = array<i32>} : memref<2x2x9x16x256xf32, #tpu.memory_space<vmem>>, vector<1x1x1x16x256xf32>,
    %77 = vector.extract_strided_slice %32 {offsets = [176, 0], sizes = [16, 256], strides = [1, 1]} : vector<576x256xf32> to vector<16x256xf32>
    %c0_63 = arith.constant 0 : index
    %c1_64 = arith.constant 1 : index
    %c2_65 = arith.constant 2 : index
    %c0_66 = arith.constant 0 : index
    %c0_67 = arith.constant 0 : index
    %78 = vector.load %arg10[%c0_63, %c1_64, %c2_65, %c0_66, %c0_67] : memref<2x2x9x16x256xf32, #tpu.memory_space<vmem>>, vector<1x1x1x16x256xf32>
    %79 = vector.shape_cast %78 : vector<1x1x1x16x256xf32> to vector<16x256xf32>
    %80 = vector.shape_cast %77 : vector<16x256xf32> to vector<1x1x1x16x256xf32>
    tpu.vector_store %arg10[%c0_63, %c1_64, %c2_65, %c0_66, %c0_67], %80 {strides = array<i32>} : memref<2x2x9x16x256xf32, #tpu.memory_space<vmem>>, vector<1x1x1x16x256xf32>,
    %81 = vector.extract_strided_slice %32 {offsets = [192, 0], sizes = [16, 256], strides = [1, 1]} : vector<576x256xf32> to vector<16x256xf32>
    %c0_68 = arith.constant 0 : index
    %c1_69 = arith.constant 1 : index
    %c3_70 = arith.constant 3 : index
    %c0_71 = arith.constant 0 : index
    %c0_72 = arith.constant 0 : index
    %82 = vector.load %arg10[%c0_68, %c1_69, %c3_70, %c0_71, %c0_72] : memref<2x2x9x16x256xf32, #tpu.memory_space<vmem>>, vector<1x1x1x16x256xf32>
    %83 = vector.shape_cast %82 : vector<1x1x1x16x256xf32> to vector<16x256xf32>
    %84 = vector.shape_cast %81 : vector<16x256xf32> to vector<1x1x1x16x256xf32>
    tpu.vector_store %arg10[%c0_68, %c1_69, %c3_70, %c0_71, %c0_72], %84 {strides = array<i32>} : memref<2x2x9x16x256xf32, #tpu.memory_space<vmem>>, vector<1x1x1x16x256xf32>,
    %85 = vector.extract_strided_slice %32 {offsets = [208, 0], sizes = [16, 256], strides = [1, 1]} : vector<576x256xf32> to vector<16x256xf32>
    %c0_73 = arith.constant 0 : index
    %c1_74 = arith.constant 1 : index
    %c4_75 = arith.constant 4 : index
    %c0_76 = arith.constant 0 : index
    %c0_77 = arith.constant 0 : index
    %86 = vector.load %arg10[%c0_73, %c1_74, %c4_75, %c0_76, %c0_77] : memref<2x2x9x16x256xf32, #tpu.memory_space<vmem>>, vector<1x1x1x16x256xf32>
    %87 = vector.shape_cast %86 : vector<1x1x1x16x256xf32> to vector<16x256xf32>
    %88 = vector.shape_cast %85 : vector<16x256xf32> to vector<1x1x1x16x256xf32>
    tpu.vector_store %arg10[%c0_73, %c1_74, %c4_75, %c0_76, %c0_77], %88 {strides = array<i32>} : memref<2x2x9x16x256xf32, #tpu.memory_space<vmem>>, vector<1x1x1x16x256xf32>,
    %89 = vector.extract_strided_slice %32 {offsets = [224, 0], sizes = [16, 256], strides = [1, 1]} : vector<576x256xf32> to vector<16x256xf32>
    %c0_78 = arith.constant 0 : index
    %c1_79 = arith.constant 1 : index
    %c5_80 = arith.constant 5 : index
    %c0_81 = arith.constant 0 : index
    %c0_82 = arith.constant 0 : index
    %90 = vector.load %arg10[%c0_78, %c1_79, %c5_80, %c0_81, %c0_82] : memref<2x2x9x16x256xf32, #tpu.memory_space<vmem>>, vector<1x1x1x16x256xf32>
    %91 = vector.shape_cast %90 : vector<1x1x1x16x256xf32> to vector<16x256xf32>
    %92 = vector.shape_cast %89 : vector<16x256xf32> to vector<1x1x1x16x256xf32>
    tpu.vector_store %arg10[%c0_78, %c1_79, %c5_80, %c0_81, %c0_82], %92 {strides = array<i32>} : memref<2x2x9x16x256xf32, #tpu.memory_space<vmem>>, vector<1x1x1x16x256xf32>,
    %93 = vector.extract_strided_slice %32 {offsets = [240, 0], sizes = [16, 256], strides = [1, 1]} : vector<576x256xf32> to vector<16x256xf32>
    %c0_83 = arith.constant 0 : index
    %c1_84 = arith.constant 1 : index
    %c6_85 = arith.constant 6 : index
    %c0_86 = arith.constant 0 : index
    %c0_87 = arith.constant 0 : index
    %94 = vector.load %arg10[%c0_83, %c1_84, %c6_85, %c0_86, %c0_87] : memref<2x2x9x16x256xf32, #tpu.memory_space<vmem>>, vector<1x1x1x16x256xf32>
    %95 = vector.shape_cast %94 : vector<1x1x1x16x256xf32> to vector<16x256xf32>
    %96 = vector.shape_cast %93 : vector<16x256xf32> to vector<1x1x1x16x256xf32>
    tpu.vector_store %arg10[%c0_83, %c1_84, %c6_85, %c0_86, %c0_87], %96 {strides = array<i32>} : memref<2x2x9x16x256xf32, #tpu.memory_space<vmem>>, vector<1x1x1x16x256xf32>,
    %97 = vector.extract_strided_slice %32 {offsets = [256, 0], sizes = [16, 256], strides = [1, 1]} : vector<576x256xf32> to vector<16x256xf32>
    %c0_88 = arith.constant 0 : index
    %c1_89 = arith.constant 1 : index
    %c7_90 = arith.constant 7 : index
    %c0_91 = arith.constant 0 : index
    %c0_92 = arith.constant 0 : index
    %98 = vector.load %arg10[%c0_88, %c1_89, %c7_90, %c0_91, %c0_92] : memref<2x2x9x16x256xf32, #tpu.memory_space<vmem>>, vector<1x1x1x16x256xf32>
    %99 = vector.shape_cast %98 : vector<1x1x1x16x256xf32> to vector<16x256xf32>
    %100 = vector.shape_cast %97 : vector<16x256xf32> to vector<1x1x1x16x256xf32>
    tpu.vector_store %arg10[%c0_88, %c1_89, %c7_90, %c0_91, %c0_92], %100 {strides = array<i32>} : memref<2x2x9x16x256xf32, #tpu.memory_space<vmem>>, vector<1x1x1x16x256xf32>,
    %101 = vector.extract_strided_slice %32 {offsets = [272, 0], sizes = [16, 256], strides = [1, 1]} : vector<576x256xf32> to vector<16x256xf32>
    %c0_93 = arith.constant 0 : index
    %c1_94 = arith.constant 1 : index
    %c8_95 = arith.constant 8 : index
    %c0_96 = arith.constant 0 : index
    %c0_97 = arith.constant 0 : index
    %102 = vector.load %arg10[%c0_93, %c1_94, %c8_95, %c0_96, %c0_97] : memref<2x2x9x16x256xf32, #tpu.memory_space<vmem>>, vector<1x1x1x16x256xf32>
    %103 = vector.shape_cast %102 : vector<1x1x1x16x256xf32> to vector<16x256xf32>
    %104 = vector.shape_cast %101 : vector<16x256xf32> to vector<1x1x1x16x256xf32>
    tpu.vector_store %arg10[%c0_93, %c1_94, %c8_95, %c0_96, %c0_97], %104 {strides = array<i32>} : memref<2x2x9x16x256xf32, #tpu.memory_space<vmem>>, vector<1x1x1x16x256xf32>,
    %105 = vector.extract_strided_slice %32 {offsets = [288, 0], sizes = [16, 256], strides = [1, 1]} : vector<576x256xf32> to vector<16x256xf32>
    %c1_98 = arith.constant 1 : index
    %c0_99 = arith.constant 0 : index
    %c0_100 = arith.constant 0 : index
    %c0_101 = arith.constant 0 : index
    %c0_102 = arith.constant 0 : index
    %106 = vector.load %arg10[%c1_98, %c0_99, %c0_100, %c0_101, %c0_102] : memref<2x2x9x16x256xf32, #tpu.memory_space<vmem>>, vector<1x1x1x16x256xf32>
    %107 = vector.shape_cast %106 : vector<1x1x1x16x256xf32> to vector<16x256xf32>
    %108 = vector.shape_cast %105 : vector<16x256xf32> to vector<1x1x1x16x256xf32>
    tpu.vector_store %arg10[%c1_98, %c0_99, %c0_100, %c0_101, %c0_102], %108 {strides = array<i32>} : memref<2x2x9x16x256xf32, #tpu.memory_space<vmem>>, vector<1x1x1x16x256xf32>,
    %109 = vector.extract_strided_slice %32 {offsets = [304, 0], sizes = [16, 256], strides = [1, 1]} : vector<576x256xf32> to vector<16x256xf32>
    %c1_103 = arith.constant 1 : index
    %c0_104 = arith.constant 0 : index
    %c1_105 = arith.constant 1 : index
    %c0_106 = arith.constant 0 : index
    %c0_107 = arith.constant 0 : index
    %110 = vector.load %arg10[%c1_103, %c0_104, %c1_105, %c0_106, %c0_107] : memref<2x2x9x16x256xf32, #tpu.memory_space<vmem>>, vector<1x1x1x16x256xf32>
    %111 = vector.shape_cast %110 : vector<1x1x1x16x256xf32> to vector<16x256xf32>
    %112 = vector.shape_cast %109 : vector<16x256xf32> to vector<1x1x1x16x256xf32>
    tpu.vector_store %arg10[%c1_103, %c0_104, %c1_105, %c0_106, %c0_107], %112 {strides = array<i32>} : memref<2x2x9x16x256xf32, #tpu.memory_space<vmem>>, vector<1x1x1x16x256xf32>,
    %113 = vector.extract_strided_slice %32 {offsets = [320, 0], sizes = [16, 256], strides = [1, 1]} : vector<576x256xf32> to vector<16x256xf32>
    %c1_108 = arith.constant 1 : index
    %c0_109 = arith.constant 0 : index
    %c2_110 = arith.constant 2 : index
    %c0_111 = arith.constant 0 : index
    %c0_112 = arith.constant 0 : index
    %114 = vector.load %arg10[%c1_108, %c0_109, %c2_110, %c0_111, %c0_112] : memref<2x2x9x16x256xf32, #tpu.memory_space<vmem>>, vector<1x1x1x16x256xf32>
    %115 = vector.shape_cast %114 : vector<1x1x1x16x256xf32> to vector<16x256xf32>
    %116 = vector.shape_cast %113 : vector<16x256xf32> to vector<1x1x1x16x256xf32>
    tpu.vector_store %arg10[%c1_108, %c0_109, %c2_110, %c0_111, %c0_112], %116 {strides = array<i32>} : memref<2x2x9x16x256xf32, #tpu.memory_space<vmem>>, vector<1x1x1x16x256xf32>,
    %117 = vector.extract_strided_slice %32 {offsets = [336, 0], sizes = [16, 256], strides = [1, 1]} : vector<576x256xf32> to vector<16x256xf32>
    %c1_113 = arith.constant 1 : index
    %c0_114 = arith.constant 0 : index
    %c3_115 = arith.constant 3 : index
    %c0_116 = arith.constant 0 : index
    %c0_117 = arith.constant 0 : index
    %118 = vector.load %arg10[%c1_113, %c0_114, %c3_115, %c0_116, %c0_117] : memref<2x2x9x16x256xf32, #tpu.memory_space<vmem>>, vector<1x1x1x16x256xf32>
    %119 = vector.shape_cast %118 : vector<1x1x1x16x256xf32> to vector<16x256xf32>
    %120 = vector.shape_cast %117 : vector<16x256xf32> to vector<1x1x1x16x256xf32>
    tpu.vector_store %arg10[%c1_113, %c0_114, %c3_115, %c0_116, %c0_117], %120 {strides = array<i32>} : memref<2x2x9x16x256xf32, #tpu.memory_space<vmem>>, vector<1x1x1x16x256xf32>,
    %121 = vector.extract_strided_slice %32 {offsets = [352, 0], sizes = [16, 256], strides = [1, 1]} : vector<576x256xf32> to vector<16x256xf32>
    %c1_118 = arith.constant 1 : index
    %c0_119 = arith.constant 0 : index
    %c4_120 = arith.constant 4 : index
    %c0_121 = arith.constant 0 : index
    %c0_122 = arith.constant 0 : index
    %122 = vector.load %arg10[%c1_118, %c0_119, %c4_120, %c0_121, %c0_122] : memref<2x2x9x16x256xf32, #tpu.memory_space<vmem>>, vector<1x1x1x16x256xf32>
    %123 = vector.shape_cast %122 : vector<1x1x1x16x256xf32> to vector<16x256xf32>
    %124 = vector.shape_cast %121 : vector<16x256xf32> to vector<1x1x1x16x256xf32>
    tpu.vector_store %arg10[%c1_118, %c0_119, %c4_120, %c0_121, %c0_122], %124 {strides = array<i32>} : memref<2x2x9x16x256xf32, #tpu.memory_space<vmem>>, vector<1x1x1x16x256xf32>,
    %125 = vector.extract_strided_slice %32 {offsets = [368, 0], sizes = [16, 256], strides = [1, 1]} : vector<576x256xf32> to vector<16x256xf32>
    %c1_123 = arith.constant 1 : index
    %c0_124 = arith.constant 0 : index
    %c5_125 = arith.constant 5 : index
    %c0_126 = arith.constant 0 : index
    %c0_127 = arith.constant 0 : index
    %126 = vector.load %arg10[%c1_123, %c0_124, %c5_125, %c0_126, %c0_127] : memref<2x2x9x16x256xf32, #tpu.memory_space<vmem>>, vector<1x1x1x16x256xf32>
    %127 = vector.shape_cast %126 : vector<1x1x1x16x256xf32> to vector<16x256xf32>
    %128 = vector.shape_cast %125 : vector<16x256xf32> to vector<1x1x1x16x256xf32>
    tpu.vector_store %arg10[%c1_123, %c0_124, %c5_125, %c0_126, %c0_127], %128 {strides = array<i32>} : memref<2x2x9x16x256xf32, #tpu.memory_space<vmem>>, vector<1x1x1x16x256xf32>,
    %129 = vector.extract_strided_slice %32 {offsets = [384, 0], sizes = [16, 256], strides = [1, 1]} : vector<576x256xf32> to vector<16x256xf32>
    %c1_128 = arith.constant 1 : index
    %c0_129 = arith.constant 0 : index
    %c6_130 = arith.constant 6 : index
    %c0_131 = arith.constant 0 : index
    %c0_132 = arith.constant 0 : index
    %130 = vector.load %arg10[%c1_128, %c0_129, %c6_130, %c0_131, %c0_132] : memref<2x2x9x16x256xf32, #tpu.memory_space<vmem>>, vector<1x1x1x16x256xf32>
    %131 = vector.shape_cast %130 : vector<1x1x1x16x256xf32> to vector<16x256xf32>
    %132 = vector.shape_cast %129 : vector<16x256xf32> to vector<1x1x1x16x256xf32>
    tpu.vector_store %arg10[%c1_128, %c0_129, %c6_130, %c0_131, %c0_132], %132 {strides = array<i32>} : memref<2x2x9x16x256xf32, #tpu.memory_space<vmem>>, vector<1x1x1x16x256xf32>,
    %133 = vector.extract_strided_slice %32 {offsets = [400, 0], sizes = [16, 256], strides = [1, 1]} : vector<576x256xf32> to vector<16x256xf32>
    %c1_133 = arith.constant 1 : index
    %c0_134 = arith.constant 0 : index
    %c7_135 = arith.constant 7 : index
    %c0_136 = arith.constant 0 : index
    %c0_137 = arith.constant 0 : index
    %134 = vector.load %arg10[%c1_133, %c0_134, %c7_135, %c0_136, %c0_137] : memref<2x2x9x16x256xf32, #tpu.memory_space<vmem>>, vector<1x1x1x16x256xf32>
    %135 = vector.shape_cast %134 : vector<1x1x1x16x256xf32> to vector<16x256xf32>
    %136 = vector.shape_cast %133 : vector<16x256xf32> to vector<1x1x1x16x256xf32>
    tpu.vector_store %arg10[%c1_133, %c0_134, %c7_135, %c0_136, %c0_137], %136 {strides = array<i32>} : memref<2x2x9x16x256xf32, #tpu.memory_space<vmem>>, vector<1x1x1x16x256xf32>,
    %137 = vector.extract_strided_slice %32 {offsets = [416, 0], sizes = [16, 256], strides = [1, 1]} : vector<576x256xf32> to vector<16x256xf32>
    %c1_138 = arith.constant 1 : index
    %c0_139 = arith.constant 0 : index
    %c8_140 = arith.constant 8 : index
    %c0_141 = arith.constant 0 : index
    %c0_142 = arith.constant 0 : index
    %138 = vector.load %arg10[%c1_138, %c0_139, %c8_140, %c0_141, %c0_142] : memref<2x2x9x16x256xf32, #tpu.memory_space<vmem>>, vector<1x1x1x16x256xf32>
    %139 = vector.shape_cast %138 : vector<1x1x1x16x256xf32> to vector<16x256xf32>
    %140 = vector.shape_cast %137 : vector<16x256xf32> to vector<1x1x1x16x256xf32>
    tpu.vector_store %arg10[%c1_138, %c0_139, %c8_140, %c0_141, %c0_142], %140 {strides = array<i32>} : memref<2x2x9x16x256xf32, #tpu.memory_space<vmem>>, vector<1x1x1x16x256xf32>,
    %141 = vector.extract_strided_slice %32 {offsets = [432, 0], sizes = [16, 256], strides = [1, 1]} : vector<576x256xf32> to vector<16x256xf32>
    %c1_143 = arith.constant 1 : index
    %c1_144 = arith.constant 1 : index
    %c0_145 = arith.constant 0 : index
    %c0_146 = arith.constant 0 : index
    %c0_147 = arith.constant 0 : index
    %142 = vector.load %arg10[%c1_143, %c1_144, %c0_145, %c0_146, %c0_147] : memref<2x2x9x16x256xf32, #tpu.memory_space<vmem>>, vector<1x1x1x16x256xf32>
    %143 = vector.shape_cast %142 : vector<1x1x1x16x256xf32> to vector<16x256xf32>
    %144 = vector.shape_cast %141 : vector<16x256xf32> to vector<1x1x1x16x256xf32>
    tpu.vector_store %arg10[%c1_143, %c1_144, %c0_145, %c0_146, %c0_147], %144 {strides = array<i32>} : memref<2x2x9x16x256xf32, #tpu.memory_space<vmem>>, vector<1x1x1x16x256xf32>,
    %145 = vector.extract_strided_slice %32 {offsets = [448, 0], sizes = [16, 256], strides = [1, 1]} : vector<576x256xf32> to vector<16x256xf32>
    %c1_148 = arith.constant 1 : index
    %c1_149 = arith.constant 1 : index
    %c1_150 = arith.constant 1 : index
    %c0_151 = arith.constant 0 : index
    %c0_152 = arith.constant 0 : index
    %146 = vector.load %arg10[%c1_148, %c1_149, %c1_150, %c0_151, %c0_152] : memref<2x2x9x16x256xf32, #tpu.memory_space<vmem>>, vector<1x1x1x16x256xf32>
    %147 = vector.shape_cast %146 : vector<1x1x1x16x256xf32> to vector<16x256xf32>
    %148 = vector.shape_cast %145 : vector<16x256xf32> to vector<1x1x1x16x256xf32>
    tpu.vector_store %arg10[%c1_148, %c1_149, %c1_150, %c0_151, %c0_152], %148 {strides = array<i32>} : memref<2x2x9x16x256xf32, #tpu.memory_space<vmem>>, vector<1x1x1x16x256xf32>,
    %149 = vector.extract_strided_slice %32 {offsets = [464, 0], sizes = [16, 256], strides = [1, 1]} : vector<576x256xf32> to vector<16x256xf32>
    %c1_153 = arith.constant 1 : index
    %c1_154 = arith.constant 1 : index
    %c2_155 = arith.constant 2 : index
    %c0_156 = arith.constant 0 : index
    %c0_157 = arith.constant 0 : index
    %150 = vector.load %arg10[%c1_153, %c1_154, %c2_155, %c0_156, %c0_157] : memref<2x2x9x16x256xf32, #tpu.memory_space<vmem>>, vector<1x1x1x16x256xf32>
    %151 = vector.shape_cast %150 : vector<1x1x1x16x256xf32> to vector<16x256xf32>
    %152 = vector.shape_cast %149 : vector<16x256xf32> to vector<1x1x1x16x256xf32>
    tpu.vector_store %arg10[%c1_153, %c1_154, %c2_155, %c0_156, %c0_157], %152 {strides = array<i32>} : memref<2x2x9x16x256xf32, #tpu.memory_space<vmem>>, vector<1x1x1x16x256xf32>,
    %153 = vector.extract_strided_slice %32 {offsets = [480, 0], sizes = [16, 256], strides = [1, 1]} : vector<576x256xf32> to vector<16x256xf32>
    %c1_158 = arith.constant 1 : index
    %c1_159 = arith.constant 1 : index
    %c3_160 = arith.constant 3 : index
    %c0_161 = arith.constant 0 : index
    %c0_162 = arith.constant 0 : index
    %154 = vector.load %arg10[%c1_158, %c1_159, %c3_160, %c0_161, %c0_162] : memref<2x2x9x16x256xf32, #tpu.memory_space<vmem>>, vector<1x1x1x16x256xf32>
    %155 = vector.shape_cast %154 : vector<1x1x1x16x256xf32> to vector<16x256xf32>
    %156 = vector.shape_cast %153 : vector<16x256xf32> to vector<1x1x1x16x256xf32>
    tpu.vector_store %arg10[%c1_158, %c1_159, %c3_160, %c0_161, %c0_162], %156 {strides = array<i32>} : memref<2x2x9x16x256xf32, #tpu.memory_space<vmem>>, vector<1x1x1x16x256xf32>,
    %157 = vector.extract_strided_slice %32 {offsets = [496, 0], sizes = [16, 256], strides = [1, 1]} : vector<576x256xf32> to vector<16x256xf32>
    %c1_163 = arith.constant 1 : index
    %c1_164 = arith.constant 1 : index
    %c4_165 = arith.constant 4 : index
    %c0_166 = arith.constant 0 : index
    %c0_167 = arith.constant 0 : index
    %158 = vector.load %arg10[%c1_163, %c1_164, %c4_165, %c0_166, %c0_167] : memref<2x2x9x16x256xf32, #tpu.memory_space<vmem>>, vector<1x1x1x16x256xf32>
    %159 = vector.shape_cast %158 : vector<1x1x1x16x256xf32> to vector<16x256xf32>
    %160 = vector.shape_cast %157 : vector<16x256xf32> to vector<1x1x1x16x256xf32>
    tpu.vector_store %arg10[%c1_163, %c1_164, %c4_165, %c0_166, %c0_167], %160 {strides = array<i32>} : memref<2x2x9x16x256xf32, #tpu.memory_space<vmem>>, vector<1x1x1x16x256xf32>,
    %161 = vector.extract_strided_slice %32 {offsets = [512, 0], sizes = [16, 256], strides = [1, 1]} : vector<576x256xf32> to vector<16x256xf32>
    %c1_168 = arith.constant 1 : index
    %c1_169 = arith.constant 1 : index
    %c5_170 = arith.constant 5 : index
    %c0_171 = arith.constant 0 : index
    %c0_172 = arith.constant 0 : index
    %162 = vector.load %arg10[%c1_168, %c1_169, %c5_170, %c0_171, %c0_172] : memref<2x2x9x16x256xf32, #tpu.memory_space<vmem>>, vector<1x1x1x16x256xf32>
    %163 = vector.shape_cast %162 : vector<1x1x1x16x256xf32> to vector<16x256xf32>
    %164 = vector.shape_cast %161 : vector<16x256xf32> to vector<1x1x1x16x256xf32>
    tpu.vector_store %arg10[%c1_168, %c1_169, %c5_170, %c0_171, %c0_172], %164 {strides = array<i32>} : memref<2x2x9x16x256xf32, #tpu.memory_space<vmem>>, vector<1x1x1x16x256xf32>,
    %165 = vector.extract_strided_slice %32 {offsets = [528, 0], sizes = [16, 256], strides = [1, 1]} : vector<576x256xf32> to vector<16x256xf32>
    %c1_173 = arith.constant 1 : index
    %c1_174 = arith.constant 1 : index
    %c6_175 = arith.constant 6 : index
    %c0_176 = arith.constant 0 : index
    %c0_177 = arith.constant 0 : index
    %166 = vector.load %arg10[%c1_173, %c1_174, %c6_175, %c0_176, %c0_177] : memref<2x2x9x16x256xf32, #tpu.memory_space<vmem>>, vector<1x1x1x16x256xf32>
    %167 = vector.shape_cast %166 : vector<1x1x1x16x256xf32> to vector<16x256xf32>
    %168 = vector.shape_cast %165 : vector<16x256xf32> to vector<1x1x1x16x256xf32>
    tpu.vector_store %arg10[%c1_173, %c1_174, %c6_175, %c0_176, %c0_177], %168 {strides = array<i32>} : memref<2x2x9x16x256xf32, #tpu.memory_space<vmem>>, vector<1x1x1x16x256xf32>,
    %169 = vector.extract_strided_slice %32 {offsets = [544, 0], sizes = [16, 256], strides = [1, 1]} : vector<576x256xf32> to vector<16x256xf32>
    %c1_178 = arith.constant 1 : index
    %c1_179 = arith.constant 1 : index
    %c7_180 = arith.constant 7 : index
    %c0_181 = arith.constant 0 : index
    %c0_182 = arith.constant 0 : index
    %170 = vector.load %arg10[%c1_178, %c1_179, %c7_180, %c0_181, %c0_182] : memref<2x2x9x16x256xf32, #tpu.memory_space<vmem>>, vector<1x1x1x16x256xf32>
    %171 = vector.shape_cast %170 : vector<1x1x1x16x256xf32> to vector<16x256xf32>
    %172 = vector.shape_cast %169 : vector<16x256xf32> to vector<1x1x1x16x256xf32>
    tpu.vector_store %arg10[%c1_178, %c1_179, %c7_180, %c0_181, %c0_182], %172 {strides = array<i32>} : memref<2x2x9x16x256xf32, #tpu.memory_space<vmem>>, vector<1x1x1x16x256xf32>,
    %173 = vector.extract_strided_slice %32 {offsets = [560, 0], sizes = [16, 256], strides = [1, 1]} : vector<576x256xf32> to vector<16x256xf32>
    %c1_183 = arith.constant 1 : index
    %c1_184 = arith.constant 1 : index
    %c8_185 = arith.constant 8 : index
    %c0_186 = arith.constant 0 : index
    %c0_187 = arith.constant 0 : index
    %174 = vector.load %arg10[%c1_183, %c1_184, %c8_185, %c0_186, %c0_187] : memref<2x2x9x16x256xf32, #tpu.memory_space<vmem>>, vector<1x1x1x16x256xf32>
    %175 = vector.shape_cast %174 : vector<1x1x1x16x256xf32> to vector<16x256xf32>
    %176 = vector.shape_cast %173 : vector<16x256xf32> to vector<1x1x1x16x256xf32>
    tpu.vector_store %arg10[%c1_183, %c1_184, %c8_185, %c0_186, %c0_187], %176 {strides = array<i32>} : memref<2x2x9x16x256xf32, #tpu.memory_space<vmem>>, vector<1x1x1x16x256xf32>,
    %cst_188 = arith.constant 0.000000e+00 : f32
    %177 = vector.broadcast %cst_188 : f32 to vector<7x7x256xf32>
    %c0_189 = arith.constant 0 : index
    %c0_190 = arith.constant 0 : index
    %c0_191 = arith.constant 0 : index
    %c0_192 = arith.constant 0 : index
    %c0_193 = arith.constant 0 : index
    %178 = vector.load %arg10[%c0_189, %c0_190, %c0_191, %c0_192, %c0_193] : memref<2x2x9x16x256xf32, #tpu.memory_space<vmem>>, vector<2x1x9x7x256xf32>
    %179 = vector.shape_cast %178 : vector<2x1x9x7x256xf32> to vector<2x9x7x256xf32>
    %180 = vector.extract_strided_slice %179 {offsets = [0, 0, 0, 0], sizes = [1, 7, 7, 256], strides = [1, 1, 1, 1]} : vector<2x9x7x256xf32> to vector<1x7x7x256xf32>
    %181 = vector.shape_cast %180 : vector<1x7x7x256xf32> to vector<7x7x256xf32>
    %c0_194 = arith.constant 0 : index
    %c0_195 = arith.constant 0 : index
    %c0_196 = arith.constant 0 : index
    %182 = vector.load %arg6[%c0_194, %c0_195, %c0_196] : memref<5x5x256xf32, #tpu.memory_space<vmem>>, vector<1x1x256xf32>
    %183 = vector.shape_cast %182 : vector<1x1x256xf32> to vector<256xf32>
    %184 = vector.shape_cast %183 : vector<256xf32> to vector<1x1x256xf32>
    %185 = vector.broadcast %184 : vector<1x1x256xf32> to vector<7x7x256xf32>
    %186 = arith.mulf %181, %185 : vector<7x7x256xf32>
    %187 = arith.addf %177, %186 : vector<7x7x256xf32>
    %188 = vector.extract_strided_slice %179 {offsets = [1, 0, 0, 0], sizes = [1, 7, 7, 256], strides = [1, 1, 1, 1]} : vector<2x9x7x256xf32> to vector<1x7x7x256xf32>
    %189 = vector.shape_cast %188 : vector<1x7x7x256xf32> to vector<7x7x256xf32>
    %c1_197 = arith.constant 1 : index
    %c0_198 = arith.constant 0 : index
    %c0_199 = arith.constant 0 : index
    %190 = vector.load %arg6[%c1_197, %c0_198, %c0_199] : memref<5x5x256xf32, #tpu.memory_space<vmem>>, vector<1x1x256xf32>
    %191 = vector.shape_cast %190 : vector<1x1x256xf32> to vector<256xf32>
    %192 = vector.shape_cast %191 : vector<256xf32> to vector<1x1x256xf32>
    %193 = vector.broadcast %192 : vector<1x1x256xf32> to vector<7x7x256xf32>
    %194 = arith.mulf %189, %193 : vector<7x7x256xf32>
    %195 = arith.addf %187, %194 : vector<7x7x256xf32>
    %196 = vector.extract_strided_slice %179 {offsets = [0, 1, 0, 0], sizes = [1, 7, 7, 256], strides = [1, 1, 1, 1]} : vector<2x9x7x256xf32> to vector<1x7x7x256xf32>
    %197 = vector.shape_cast %196 : vector<1x7x7x256xf32> to vector<7x7x256xf32>
    %c2_200 = arith.constant 2 : index
    %c0_201 = arith.constant 0 : index
    %c0_202 = arith.constant 0 : index
    %198 = vector.load %arg6[%c2_200, %c0_201, %c0_202] : memref<5x5x256xf32, #tpu.memory_space<vmem>>, vector<1x1x256xf32>
    %199 = vector.shape_cast %198 : vector<1x1x256xf32> to vector<256xf32>
    %200 = vector.shape_cast %199 : vector<256xf32> to vector<1x1x256xf32>
    %201 = vector.broadcast %200 : vector<1x1x256xf32> to vector<7x7x256xf32>
    %202 = arith.mulf %197, %201 : vector<7x7x256xf32>
    %203 = arith.addf %195, %202 : vector<7x7x256xf32>
    %204 = vector.extract_strided_slice %179 {offsets = [1, 1, 0, 0], sizes = [1, 7, 7, 256], strides = [1, 1, 1, 1]} : vector<2x9x7x256xf32> to vector<1x7x7x256xf32>
    %205 = vector.shape_cast %204 : vector<1x7x7x256xf32> to vector<7x7x256xf32>
    %c3_203 = arith.constant 3 : index
    %c0_204 = arith.constant 0 : index
    %c0_205 = arith.constant 0 : index
    %206 = vector.load %arg6[%c3_203, %c0_204, %c0_205] : memref<5x5x256xf32, #tpu.memory_space<vmem>>, vector<1x1x256xf32>
    %207 = vector.shape_cast %206 : vector<1x1x256xf32> to vector<256xf32>
    %208 = vector.shape_cast %207 : vector<256xf32> to vector<1x1x256xf32>
    %209 = vector.broadcast %208 : vector<1x1x256xf32> to vector<7x7x256xf32>
    %210 = arith.mulf %205, %209 : vector<7x7x256xf32>
    %211 = arith.addf %203, %210 : vector<7x7x256xf32>
    %212 = vector.extract_strided_slice %179 {offsets = [0, 2, 0, 0], sizes = [1, 7, 7, 256], strides = [1, 1, 1, 1]} : vector<2x9x7x256xf32> to vector<1x7x7x256xf32>
    %213 = vector.shape_cast %212 : vector<1x7x7x256xf32> to vector<7x7x256xf32>
    %c4_206 = arith.constant 4 : index
    %c0_207 = arith.constant 0 : index
    %c0_208 = arith.constant 0 : index
    %214 = vector.load %arg6[%c4_206, %c0_207, %c0_208] : memref<5x5x256xf32, #tpu.memory_space<vmem>>, vector<1x1x256xf32>
    %215 = vector.shape_cast %214 : vector<1x1x256xf32> to vector<256xf32>
    %216 = vector.shape_cast %215 : vector<256xf32> to vector<1x1x256xf32>
    %217 = vector.broadcast %216 : vector<1x1x256xf32> to vector<7x7x256xf32>
    %218 = arith.mulf %213, %217 : vector<7x7x256xf32>
    %219 = arith.addf %211, %218 : vector<7x7x256xf32>
    %c0_209 = arith.constant 0 : index
    %c1_210 = arith.constant 1 : index
    %c0_211 = arith.constant 0 : index
    %c0_212 = arith.constant 0 : index
    %c0_213 = arith.constant 0 : index
    %220 = vector.load %arg10[%c0_209, %c1_210, %c0_211, %c0_212, %c0_213] : memref<2x2x9x16x256xf32, #tpu.memory_space<vmem>>, vector<2x1x9x7x256xf32>
    %221 = vector.shape_cast %220 : vector<2x1x9x7x256xf32> to vector<2x9x7x256xf32>
    %222 = vector.extract_strided_slice %221 {offsets = [0, 0, 0, 0], sizes = [1, 7, 7, 256], strides = [1, 1, 1, 1]} : vector<2x9x7x256xf32> to vector<1x7x7x256xf32>
    %223 = vector.shape_cast %222 : vector<1x7x7x256xf32> to vector<7x7x256xf32>
    %c0_214 = arith.constant 0 : index
    %c1_215 = arith.constant 1 : index
    %c0_216 = arith.constant 0 : index
    %224 = vector.load %arg6[%c0_214, %c1_215, %c0_216] : memref<5x5x256xf32, #tpu.memory_space<vmem>>, vector<1x1x256xf32>
    %225 = vector.shape_cast %224 : vector<1x1x256xf32> to vector<256xf32>
    %226 = vector.shape_cast %225 : vector<256xf32> to vector<1x1x256xf32>
    %227 = vector.broadcast %226 : vector<1x1x256xf32> to vector<7x7x256xf32>
    %228 = arith.mulf %223, %227 : vector<7x7x256xf32>
    %229 = arith.addf %219, %228 : vector<7x7x256xf32>
    %230 = vector.extract_strided_slice %221 {offsets = [1, 0, 0, 0], sizes = [1, 7, 7, 256], strides = [1, 1, 1, 1]} : vector<2x9x7x256xf32> to vector<1x7x7x256xf32>
    %231 = vector.shape_cast %230 : vector<1x7x7x256xf32> to vector<7x7x256xf32>
    %c1_217 = arith.constant 1 : index
    %c1_218 = arith.constant 1 : index
    %c0_219 = arith.constant 0 : index
    %232 = vector.load %arg6[%c1_217, %c1_218, %c0_219] : memref<5x5x256xf32, #tpu.memory_space<vmem>>, vector<1x1x256xf32>
    %233 = vector.shape_cast %232 : vector<1x1x256xf32> to vector<256xf32>
    %234 = vector.shape_cast %233 : vector<256xf32> to vector<1x1x256xf32>
    %235 = vector.broadcast %234 : vector<1x1x256xf32> to vector<7x7x256xf32>
    %236 = arith.mulf %231, %235 : vector<7x7x256xf32>
    %237 = arith.addf %229, %236 : vector<7x7x256xf32>
    %238 = vector.extract_strided_slice %221 {offsets = [0, 1, 0, 0], sizes = [1, 7, 7, 256], strides = [1, 1, 1, 1]} : vector<2x9x7x256xf32> to vector<1x7x7x256xf32>
    %239 = vector.shape_cast %238 : vector<1x7x7x256xf32> to vector<7x7x256xf32>
    %c2_220 = arith.constant 2 : index
    %c1_221 = arith.constant 1 : index
    %c0_222 = arith.constant 0 : index
    %240 = vector.load %arg6[%c2_220, %c1_221, %c0_222] : memref<5x5x256xf32, #tpu.memory_space<vmem>>, vector<1x1x256xf32>
    %241 = vector.shape_cast %240 : vector<1x1x256xf32> to vector<256xf32>
    %242 = vector.shape_cast %241 : vector<256xf32> to vector<1x1x256xf32>
    %243 = vector.broadcast %242 : vector<1x1x256xf32> to vector<7x7x256xf32>
    %244 = arith.mulf %239, %243 : vector<7x7x256xf32>
    %245 = arith.addf %237, %244 : vector<7x7x256xf32>
    %246 = vector.extract_strided_slice %221 {offsets = [1, 1, 0, 0], sizes = [1, 7, 7, 256], strides = [1, 1, 1, 1]} : vector<2x9x7x256xf32> to vector<1x7x7x256xf32>
    %247 = vector.shape_cast %246 : vector<1x7x7x256xf32> to vector<7x7x256xf32>
    %c3_223 = arith.constant 3 : index
    %c1_224 = arith.constant 1 : index
    %c0_225 = arith.constant 0 : index
    %248 = vector.load %arg6[%c3_223, %c1_224, %c0_225] : memref<5x5x256xf32, #tpu.memory_space<vmem>>, vector<1x1x256xf32>
    %249 = vector.shape_cast %248 : vector<1x1x256xf32> to vector<256xf32>
    %250 = vector.shape_cast %249 : vector<256xf32> to vector<1x1x256xf32>
    %251 = vector.broadcast %250 : vector<1x1x256xf32> to vector<7x7x256xf32>
    %252 = arith.mulf %247, %251 : vector<7x7x256xf32>
    %253 = arith.addf %245, %252 : vector<7x7x256xf32>
    %254 = vector.extract_strided_slice %221 {offsets = [0, 2, 0, 0], sizes = [1, 7, 7, 256], strides = [1, 1, 1, 1]} : vector<2x9x7x256xf32> to vector<1x7x7x256xf32>
    %255 = vector.shape_cast %254 : vector<1x7x7x256xf32> to vector<7x7x256xf32>
    %c4_226 = arith.constant 4 : index
    %c1_227 = arith.constant 1 : index
    %c0_228 = arith.constant 0 : index
    %256 = vector.load %arg6[%c4_226, %c1_227, %c0_228] : memref<5x5x256xf32, #tpu.memory_space<vmem>>, vector<1x1x256xf32>
    %257 = vector.shape_cast %256 : vector<1x1x256xf32> to vector<256xf32>
    %258 = vector.shape_cast %257 : vector<256xf32> to vector<1x1x256xf32>
    %259 = vector.broadcast %258 : vector<1x1x256xf32> to vector<7x7x256xf32>
    %260 = arith.mulf %255, %259 : vector<7x7x256xf32>
    %261 = arith.addf %253, %260 : vector<7x7x256xf32>
    %c0_229 = arith.constant 0 : index
    %c0_230 = arith.constant 0 : index
    %c0_231 = arith.constant 0 : index
    %c1_232 = arith.constant 1 : index
    %c0_233 = arith.constant 0 : index
    %262 = vector.load %arg10[%c0_229, %c0_230, %c0_231, %c1_232, %c0_233] : memref<2x2x9x16x256xf32, #tpu.memory_space<vmem>>, vector<2x1x9x7x256xf32>
    %263 = vector.shape_cast %262 : vector<2x1x9x7x256xf32> to vector<2x9x7x256xf32>
    %264 = vector.extract_strided_slice %263 {offsets = [0, 0, 0, 0], sizes = [1, 7, 7, 256], strides = [1, 1, 1, 1]} : vector<2x9x7x256xf32> to vector<1x7x7x256xf32>
    %265 = vector.shape_cast %264 : vector<1x7x7x256xf32> to vector<7x7x256xf32>
    %c0_234 = arith.constant 0 : index
    %c2_235 = arith.constant 2 : index
    %c0_236 = arith.constant 0 : index
    %266 = vector.load %arg6[%c0_234, %c2_235, %c0_236] : memref<5x5x256xf32, #tpu.memory_space<vmem>>, vector<1x1x256xf32>
    %267 = vector.shape_cast %266 : vector<1x1x256xf32> to vector<256xf32>
    %268 = vector.shape_cast %267 : vector<256xf32> to vector<1x1x256xf32>
    %269 = vector.broadcast %268 : vector<1x1x256xf32> to vector<7x7x256xf32>
    %270 = arith.mulf %265, %269 : vector<7x7x256xf32>
    %271 = arith.addf %261, %270 : vector<7x7x256xf32>
    %272 = vector.extract_strided_slice %263 {offsets = [1, 0, 0, 0], sizes = [1, 7, 7, 256], strides = [1, 1, 1, 1]} : vector<2x9x7x256xf32> to vector<1x7x7x256xf32>
    %273 = vector.shape_cast %272 : vector<1x7x7x256xf32> to vector<7x7x256xf32>
    %c1_237 = arith.constant 1 : index
    %c2_238 = arith.constant 2 : index
    %c0_239 = arith.constant 0 : index
    %274 = vector.load %arg6[%c1_237, %c2_238, %c0_239] : memref<5x5x256xf32, #tpu.memory_space<vmem>>, vector<1x1x256xf32>
    %275 = vector.shape_cast %274 : vector<1x1x256xf32> to vector<256xf32>
    %276 = vector.shape_cast %275 : vector<256xf32> to vector<1x1x256xf32>
    %277 = vector.broadcast %276 : vector<1x1x256xf32> to vector<7x7x256xf32>
    %278 = arith.mulf %273, %277 : vector<7x7x256xf32>
    %279 = arith.addf %271, %278 : vector<7x7x256xf32>
    %280 = vector.extract_strided_slice %263 {offsets = [0, 1, 0, 0], sizes = [1, 7, 7, 256], strides = [1, 1, 1, 1]} : vector<2x9x7x256xf32> to vector<1x7x7x256xf32>
    %281 = vector.shape_cast %280 : vector<1x7x7x256xf32> to vector<7x7x256xf32>
    %c2_240 = arith.constant 2 : index
    %c2_241 = arith.constant 2 : index
    %c0_242 = arith.constant 0 : index
    %282 = vector.load %arg6[%c2_240, %c2_241, %c0_242] : memref<5x5x256xf32, #tpu.memory_space<vmem>>, vector<1x1x256xf32>
    %283 = vector.shape_cast %282 : vector<1x1x256xf32> to vector<256xf32>
    %284 = vector.shape_cast %283 : vector<256xf32> to vector<1x1x256xf32>
    %285 = vector.broadcast %284 : vector<1x1x256xf32> to vector<7x7x256xf32>
    %286 = arith.mulf %281, %285 : vector<7x7x256xf32>
    %287 = arith.addf %279, %286 : vector<7x7x256xf32>
    %288 = vector.extract_strided_slice %263 {offsets = [1, 1, 0, 0], sizes = [1, 7, 7, 256], strides = [1, 1, 1, 1]} : vector<2x9x7x256xf32> to vector<1x7x7x256xf32>
    %289 = vector.shape_cast %288 : vector<1x7x7x256xf32> to vector<7x7x256xf32>
    %c3_243 = arith.constant 3 : index
    %c2_244 = arith.constant 2 : index
    %c0_245 = arith.constant 0 : index
    %290 = vector.load %arg6[%c3_243, %c2_244, %c0_245] : memref<5x5x256xf32, #tpu.memory_space<vmem>>, vector<1x1x256xf32>
    %291 = vector.shape_cast %290 : vector<1x1x256xf32> to vector<256xf32>
    %292 = vector.shape_cast %291 : vector<256xf32> to vector<1x1x256xf32>
    %293 = vector.broadcast %292 : vector<1x1x256xf32> to vector<7x7x256xf32>
    %294 = arith.mulf %289, %293 : vector<7x7x256xf32>
    %295 = arith.addf %287, %294 : vector<7x7x256xf32>
    %296 = vector.extract_strided_slice %263 {offsets = [0, 2, 0, 0], sizes = [1, 7, 7, 256], strides = [1, 1, 1, 1]} : vector<2x9x7x256xf32> to vector<1x7x7x256xf32>
    %297 = vector.shape_cast %296 : vector<1x7x7x256xf32> to vector<7x7x256xf32>
    %c4_246 = arith.constant 4 : index
    %c2_247 = arith.constant 2 : index
    %c0_248 = arith.constant 0 : index
    %298 = vector.load %arg6[%c4_246, %c2_247, %c0_248] : memref<5x5x256xf32, #tpu.memory_space<vmem>>, vector<1x1x256xf32>
    %299 = vector.shape_cast %298 : vector<1x1x256xf32> to vector<256xf32>
    %300 = vector.shape_cast %299 : vector<256xf32> to vector<1x1x256xf32>
    %301 = vector.broadcast %300 : vector<1x1x256xf32> to vector<7x7x256xf32>
    %302 = arith.mulf %297, %301 : vector<7x7x256xf32>
    %303 = arith.addf %295, %302 : vector<7x7x256xf32>
    %c0_249 = arith.constant 0 : index
    %c1_250 = arith.constant 1 : index
    %c0_251 = arith.constant 0 : index
    %c1_252 = arith.constant 1 : index
    %c0_253 = arith.constant 0 : index
    %304 = vector.load %arg10[%c0_249, %c1_250, %c0_251, %c1_252, %c0_253] : memref<2x2x9x16x256xf32, #tpu.memory_space<vmem>>, vector<2x1x9x7x256xf32>
    %305 = vector.shape_cast %304 : vector<2x1x9x7x256xf32> to vector<2x9x7x256xf32>
    %306 = vector.extract_strided_slice %305 {offsets = [0, 0, 0, 0], sizes = [1, 7, 7, 256], strides = [1, 1, 1, 1]} : vector<2x9x7x256xf32> to vector<1x7x7x256xf32>
    %307 = vector.shape_cast %306 : vector<1x7x7x256xf32> to vector<7x7x256xf32>
    %c0_254 = arith.constant 0 : index
    %c3_255 = arith.constant 3 : index
    %c0_256 = arith.constant 0 : index
    %308 = vector.load %arg6[%c0_254, %c3_255, %c0_256] : memref<5x5x256xf32, #tpu.memory_space<vmem>>, vector<1x1x256xf32>
    %309 = vector.shape_cast %308 : vector<1x1x256xf32> to vector<256xf32>
    %310 = vector.shape_cast %309 : vector<256xf32> to vector<1x1x256xf32>
    %311 = vector.broadcast %310 : vector<1x1x256xf32> to vector<7x7x256xf32>
    %312 = arith.mulf %307, %311 : vector<7x7x256xf32>
    %313 = arith.addf %303, %312 : vector<7x7x256xf32>
    %314 = vector.extract_strided_slice %305 {offsets = [1, 0, 0, 0], sizes = [1, 7, 7, 256], strides = [1, 1, 1, 1]} : vector<2x9x7x256xf32> to vector<1x7x7x256xf32>
    %315 = vector.shape_cast %314 : vector<1x7x7x256xf32> to vector<7x7x256xf32>
    %c1_257 = arith.constant 1 : index
    %c3_258 = arith.constant 3 : index
    %c0_259 = arith.constant 0 : index
    %316 = vector.load %arg6[%c1_257, %c3_258, %c0_259] : memref<5x5x256xf32, #tpu.memory_space<vmem>>, vector<1x1x256xf32>
    %317 = vector.shape_cast %316 : vector<1x1x256xf32> to vector<256xf32>
    %318 = vector.shape_cast %317 : vector<256xf32> to vector<1x1x256xf32>
    %319 = vector.broadcast %318 : vector<1x1x256xf32> to vector<7x7x256xf32>
    %320 = arith.mulf %315, %319 : vector<7x7x256xf32>
    %321 = arith.addf %313, %320 : vector<7x7x256xf32>
    %322 = vector.extract_strided_slice %305 {offsets = [0, 1, 0, 0], sizes = [1, 7, 7, 256], strides = [1, 1, 1, 1]} : vector<2x9x7x256xf32> to vector<1x7x7x256xf32>
    %323 = vector.shape_cast %322 : vector<1x7x7x256xf32> to vector<7x7x256xf32>
    %c2_260 = arith.constant 2 : index
    %c3_261 = arith.constant 3 : index
    %c0_262 = arith.constant 0 : index
    %324 = vector.load %arg6[%c2_260, %c3_261, %c0_262] : memref<5x5x256xf32, #tpu.memory_space<vmem>>, vector<1x1x256xf32>
    %325 = vector.shape_cast %324 : vector<1x1x256xf32> to vector<256xf32>
    %326 = vector.shape_cast %325 : vector<256xf32> to vector<1x1x256xf32>
    %327 = vector.broadcast %326 : vector<1x1x256xf32> to vector<7x7x256xf32>
    %328 = arith.mulf %323, %327 : vector<7x7x256xf32>
    %329 = arith.addf %321, %328 : vector<7x7x256xf32>
    %330 = vector.extract_strided_slice %305 {offsets = [1, 1, 0, 0], sizes = [1, 7, 7, 256], strides = [1, 1, 1, 1]} : vector<2x9x7x256xf32> to vector<1x7x7x256xf32>
    %331 = vector.shape_cast %330 : vector<1x7x7x256xf32> to vector<7x7x256xf32>
    %c3_263 = arith.constant 3 : index
    %c3_264 = arith.constant 3 : index
    %c0_265 = arith.constant 0 : index
    %332 = vector.load %arg6[%c3_263, %c3_264, %c0_265] : memref<5x5x256xf32, #tpu.memory_space<vmem>>, vector<1x1x256xf32>
    %333 = vector.shape_cast %332 : vector<1x1x256xf32> to vector<256xf32>
    %334 = vector.shape_cast %333 : vector<256xf32> to vector<1x1x256xf32>
    %335 = vector.broadcast %334 : vector<1x1x256xf32> to vector<7x7x256xf32>
    %336 = arith.mulf %331, %335 : vector<7x7x256xf32>
    %337 = arith.addf %329, %336 : vector<7x7x256xf32>
    %338 = vector.extract_strided_slice %305 {offsets = [0, 2, 0, 0], sizes = [1, 7, 7, 256], strides = [1, 1, 1, 1]} : vector<2x9x7x256xf32> to vector<1x7x7x256xf32>
    %339 = vector.shape_cast %338 : vector<1x7x7x256xf32> to vector<7x7x256xf32>
    %c4_266 = arith.constant 4 : index
    %c3_267 = arith.constant 3 : index
    %c0_268 = arith.constant 0 : index
    %340 = vector.load %arg6[%c4_266, %c3_267, %c0_268] : memref<5x5x256xf32, #tpu.memory_space<vmem>>, vector<1x1x256xf32>
    %341 = vector.shape_cast %340 : vector<1x1x256xf32> to vector<256xf32>
    %342 = vector.shape_cast %341 : vector<256xf32> to vector<1x1x256xf32>
    %343 = vector.broadcast %342 : vector<1x1x256xf32> to vector<7x7x256xf32>
    %344 = arith.mulf %339, %343 : vector<7x7x256xf32>
    %345 = arith.addf %337, %344 : vector<7x7x256xf32>
    %c0_269 = arith.constant 0 : index
    %c0_270 = arith.constant 0 : index
    %c0_271 = arith.constant 0 : index
    %c2_272 = arith.constant 2 : index
    %c0_273 = arith.constant 0 : index
    %346 = vector.load %arg10[%c0_269, %c0_270, %c0_271, %c2_272, %c0_273] : memref<2x2x9x16x256xf32, #tpu.memory_space<vmem>>, vector<2x1x9x7x256xf32>
    %347 = vector.shape_cast %346 : vector<2x1x9x7x256xf32> to vector<2x9x7x256xf32>
    %348 = vector.extract_strided_slice %347 {offsets = [0, 0, 0, 0], sizes = [1, 7, 7, 256], strides = [1, 1, 1, 1]} : vector<2x9x7x256xf32> to vector<1x7x7x256xf32>
    %349 = vector.shape_cast %348 : vector<1x7x7x256xf32> to vector<7x7x256xf32>
    %c0_274 = arith.constant 0 : index
    %c4_275 = arith.constant 4 : index
    %c0_276 = arith.constant 0 : index
    %350 = vector.load %arg6[%c0_274, %c4_275, %c0_276] : memref<5x5x256xf32, #tpu.memory_space<vmem>>, vector<1x1x256xf32>
    %351 = vector.shape_cast %350 : vector<1x1x256xf32> to vector<256xf32>
    %352 = vector.shape_cast %351 : vector<256xf32> to vector<1x1x256xf32>
    %353 = vector.broadcast %352 : vector<1x1x256xf32> to vector<7x7x256xf32>
    %354 = arith.mulf %349, %353 : vector<7x7x256xf32>
    %355 = arith.addf %345, %354 : vector<7x7x256xf32>
    %356 = vector.extract_strided_slice %347 {offsets = [1, 0, 0, 0], sizes = [1, 7, 7, 256], strides = [1, 1, 1, 1]} : vector<2x9x7x256xf32> to vector<1x7x7x256xf32>
    %357 = vector.shape_cast %356 : vector<1x7x7x256xf32> to vector<7x7x256xf32>
    %c1_277 = arith.constant 1 : index
    %c4_278 = arith.constant 4 : index
    %c0_279 = arith.constant 0 : index
    %358 = vector.load %arg6[%c1_277, %c4_278, %c0_279] : memref<5x5x256xf32, #tpu.memory_space<vmem>>, vector<1x1x256xf32>
    %359 = vector.shape_cast %358 : vector<1x1x256xf32> to vector<256xf32>
    %360 = vector.shape_cast %359 : vector<256xf32> to vector<1x1x256xf32>
    %361 = vector.broadcast %360 : vector<1x1x256xf32> to vector<7x7x256xf32>
    %362 = arith.mulf %357, %361 : vector<7x7x256xf32>
    %363 = arith.addf %355, %362 : vector<7x7x256xf32>
    %364 = vector.extract_strided_slice %347 {offsets = [0, 1, 0, 0], sizes = [1, 7, 7, 256], strides = [1, 1, 1, 1]} : vector<2x9x7x256xf32> to vector<1x7x7x256xf32>
    %365 = vector.shape_cast %364 : vector<1x7x7x256xf32> to vector<7x7x256xf32>
    %c2_280 = arith.constant 2 : index
    %c4_281 = arith.constant 4 : index
    %c0_282 = arith.constant 0 : index
    %366 = vector.load %arg6[%c2_280, %c4_281, %c0_282] : memref<5x5x256xf32, #tpu.memory_space<vmem>>, vector<1x1x256xf32>
    %367 = vector.shape_cast %366 : vector<1x1x256xf32> to vector<256xf32>
    %368 = vector.shape_cast %367 : vector<256xf32> to vector<1x1x256xf32>
    %369 = vector.broadcast %368 : vector<1x1x256xf32> to vector<7x7x256xf32>
    %370 = arith.mulf %365, %369 : vector<7x7x256xf32>
    %371 = arith.addf %363, %370 : vector<7x7x256xf32>
    %372 = vector.extract_strided_slice %347 {offsets = [1, 1, 0, 0], sizes = [1, 7, 7, 256], strides = [1, 1, 1, 1]} : vector<2x9x7x256xf32> to vector<1x7x7x256xf32>
    %373 = vector.shape_cast %372 : vector<1x7x7x256xf32> to vector<7x7x256xf32>
    %c3_283 = arith.constant 3 : index
    %c4_284 = arith.constant 4 : index
    %c0_285 = arith.constant 0 : index
    %374 = vector.load %arg6[%c3_283, %c4_284, %c0_285] : memref<5x5x256xf32, #tpu.memory_space<vmem>>, vector<1x1x256xf32>
    %375 = vector.shape_cast %374 : vector<1x1x256xf32> to vector<256xf32>
    %376 = vector.shape_cast %375 : vector<256xf32> to vector<1x1x256xf32>
    %377 = vector.broadcast %376 : vector<1x1x256xf32> to vector<7x7x256xf32>
    %378 = arith.mulf %373, %377 : vector<7x7x256xf32>
    %379 = arith.addf %371, %378 : vector<7x7x256xf32>
    %380 = vector.extract_strided_slice %347 {offsets = [0, 2, 0, 0], sizes = [1, 7, 7, 256], strides = [1, 1, 1, 1]} : vector<2x9x7x256xf32> to vector<1x7x7x256xf32>
    %381 = vector.shape_cast %380 : vector<1x7x7x256xf32> to vector<7x7x256xf32>
    %c4_286 = arith.constant 4 : index
    %c4_287 = arith.constant 4 : index
    %c0_288 = arith.constant 0 : index
    %382 = vector.load %arg6[%c4_286, %c4_287, %c0_288] : memref<5x5x256xf32, #tpu.memory_space<vmem>>, vector<1x1x256xf32>
    %383 = vector.shape_cast %382 : vector<1x1x256xf32> to vector<256xf32>
    %384 = vector.shape_cast %383 : vector<256xf32> to vector<1x1x256xf32>
    %385 = vector.broadcast %384 : vector<1x1x256xf32> to vector<7x7x256xf32>
    %386 = arith.mulf %381, %385 : vector<7x7x256xf32>
    %387 = arith.addf %379, %386 : vector<7x7x256xf32>
    %cst_289 = arith.constant dense<0.000000e+00> : vector<256xf32>
    %388 = vector.multi_reduction <add>, %387, %cst_289 [0, 1] : vector<7x7x256xf32> to vector<256xf32>
    %389 = vector.shape_cast %388 : vector<256xf32> to vector<1x1x256xf32>
    %390 = arith.mulf %387, %387 : vector<7x7x256xf32>
    %cst_290 = arith.constant dense<0.000000e+00> : vector<256xf32>
    %391 = vector.multi_reduction <add>, %390, %cst_290 [0, 1] : vector<7x7x256xf32> to vector<256xf32>
    %392 = vector.shape_cast %391 : vector<256xf32> to vector<1x1x256xf32>
    %cst_291 = arith.constant 0.0204081628 : f32
    %393 = vector.broadcast %cst_291 : f32 to vector<1x1x256xf32>
    %394 = arith.mulf %389, %393 : vector<1x1x256xf32>
    %cst_292 = arith.constant 0.0204081628 : f32
    %395 = vector.broadcast %cst_292 : f32 to vector<1x1x256xf32>
    %396 = arith.mulf %392, %395 : vector<1x1x256xf32>
    %397 = arith.mulf %394, %394 : vector<1x1x256xf32>
    %398 = arith.subf %396, %397 : vector<1x1x256xf32>
    %cst_293 = arith.constant 0.000000e+00 : f32
    %399 = vector.broadcast %cst_293 : f32 to vector<1x1x256xf32>
    %400 = arith.maximumf %398, %399 : vector<1x1x256xf32>
    %c0_294 = arith.constant 0 : index
    %c0_295 = arith.constant 0 : index
    %401 = vector.load %arg7[%c0_294, %c0_295] : memref<1x256xf32, #tpu.memory_space<vmem>>, vector<1x256xf32>
    %402 = vector.shape_cast %401 : vector<1x256xf32> to vector<1x1x256xf32>
    %cst_296 = arith.constant 1.000000e-03 : f32
    %403 = vector.broadcast %cst_296 : f32 to vector<1x1x256xf32>
    %404 = arith.addf %400, %403 : vector<1x1x256xf32>
    %405 = math.rsqrt %404 : vector<1x1x256xf32>
    %406 = arith.mulf %402, %405 : vector<1x1x256xf32>
    %c0_297 = arith.constant 0 : index
    %c0_298 = arith.constant 0 : index
    %407 = vector.load %arg8[%c0_297, %c0_298] : memref<1x256xf32, #tpu.memory_space<vmem>>, vector<1x256xf32>
    %408 = vector.shape_cast %407 : vector<1x256xf32> to vector<1x1x256xf32>
    %409 = arith.mulf %394, %406 : vector<1x1x256xf32>
    %410 = arith.subf %408, %409 : vector<1x1x256xf32>
    %411 = vector.broadcast %406 : vector<1x1x256xf32> to vector<7x7x256xf32>
    %412 = arith.mulf %387, %411 : vector<7x7x256xf32>
    %413 = vector.broadcast %410 : vector<1x1x256xf32> to vector<7x7x256xf32>
    %414 = arith.addf %412, %413 : vector<7x7x256xf32>
    %cst_299 = arith.constant 0.000000e+00 : f32
    %415 = vector.broadcast %cst_299 : f32 to vector<7x7x256xf32>
    %416 = arith.maximumf %414, %415 : vector<7x7x256xf32>
    %c0_300 = arith.constant 0 : index
    %c0_301 = arith.constant 0 : index
    %c0_302 = arith.constant 0 : index
    %417 = vector.load %arg9[%c0_300, %c0_301, %c0_302] : memref<7x7x256xf32, #tpu.memory_space<vmem>>, vector<7x7x256xf32>
    tpu.vector_store %arg9[%c0_300, %c0_301, %c0_302], %416 {strides = array<i32>} : memref<7x7x256xf32, #tpu.memory_space<vmem>>, vector<7x7x256xf32>,
    return
  }
  func.func @transform_0(%arg0: i32) -> (i32, i32) {
    %c0_i32 = arith.constant 0 : i32
    %c0_i32_0 = arith.constant 0 : i32
    %c0_i32_1 = arith.constant 0 : i32
    return %c0_i32, %c0_i32_0 : i32, i32
  }
  func.func @transform_1(%arg0: i32) -> (i32, i32) {
    %c0_i32 = arith.constant 0 : i32
    %c0_i32_0 = arith.constant 0 : i32
    %c0_i32_1 = arith.constant 0 : i32
    return %c0_i32, %c0_i32_0 : i32, i32
  }
  func.func @transform_2(%arg0: i32) -> (i32, i32) {
    %c0_i32 = arith.constant 0 : i32
    %c0_i32_0 = arith.constant 0 : i32
    return %c0_i32, %arg0 : i32, i32
  }
  func.func @transform_3(%arg0: i32) -> (i32, i32) {
    %c0_i32 = arith.constant 0 : i32
    %c0_i32_0 = arith.constant 0 : i32
    return %c0_i32, %arg0 : i32, i32
  }
  func.func @transform_4(%arg0: i32) -> (i32, i32) {
    %c0_i32 = arith.constant 0 : i32
    %c0_i32_0 = arith.constant 0 : i32
    return %c0_i32, %arg0 : i32, i32
  }
  func.func @transform_5(%arg0: i32) -> (i32, i32, i32) {
    %c0_i32 = arith.constant 0 : i32
    %c0_i32_0 = arith.constant 0 : i32
    %c0_i32_1 = arith.constant 0 : i32
    return %c0_i32, %c0_i32_0, %arg0 : i32, i32, i32
  }
  func.func @transform_6(%arg0: i32) -> (i32, i32) {
    %c0_i32 = arith.constant 0 : i32
    %c0_i32_0 = arith.constant 0 : i32
    return %c0_i32, %arg0 : i32, i32
  }
  func.func @transform_7(%arg0: i32) -> (i32, i32) {
    %c0_i32 = arith.constant 0 : i32
    %c0_i32_0 = arith.constant 0 : i32
    return %c0_i32, %arg0 : i32, i32
  }
  func.func @transform_8(%arg0: i32) -> (i32, i32, i32) {
    %c0_i32 = arith.constant 0 : i32
    %c0_i32_0 = arith.constant 0 : i32
    %c0_i32_1 = arith.constant 0 : i32
    return %c0_i32, %c0_i32_0, %arg0 : i32, i32, i32
  }
}

</mosaic_0001>

<bundles_post_ra>
// kernel: forward.1
= control target key start
LH: loop header
LB: loop body
LE: loop exit
PB: predicated region body
PF: predicated region fallthrough
CT: control target
= control target key end

     0   :  { %s5586_s27 = smov 0   ;;  %s5588_s28 = smov 0   ;;  %s9724_s0 = inlined_call_operand.vmem [shape: f32[576,128], index: 0, kind: input, shape index: {}]   ;;  %s9725_s1 = inlined_call_operand.vmem [shape: f32[576,1], index: 1, kind: input, shape index: {}]   ;;  %s9726_s2 = inlined_call_operand.vmem [shape: f32[128,768], index: 2, kind: input, shape index: {}]   ;;  %s9727_s3 = inlined_call_operand.vmem [shape: f32[1,768], index: 3, kind: input, shape index: {}]   ;;  %s9728_s4 = inlined_call_operand.vmem [shape: f32[1,768], index: 4, kind: input, shape index: {}]   ;;  %s9729_s5 = inlined_call_operand.vmem [shape: f32[5,5,768], index: 5, kind: input, shape index: {}]   ;;  %s9730_s6 = inlined_call_operand.vmem [shape: f32[1,768], index: 6, kind: input, shape index: {}]   ;;  %s9731_s7 = inlined_call_operand.vmem [shape: f32[1,768], index: 7, kind: input, shape index: {}]   ;;  %s9732_s8 = inlined_call_operand.vmem [shape: f32[7,7,768], index: 8, kind: output, shape index: {}]  }
   0x1   :  { %s5590_s29 = smov 0  }
   0x2 LB: > { %s5602_s30 = sadd.s32 4294967295, %s5536_s29   ;;  %s5605_s9 = sadd.s32 1, %s5536_s29   ;;  %s5536_s29 = sphi %s5590_s29, %s10993_s29   ;;  %s5532_s28 = sphi %s5588_s28, %s10992_s28   ;;  %s5528_s27 = sphi %s5586_s27, %s10991_s27  }
   0x3   : > { %s64_s10 = ssub.s32 %s5536_s29, %s5605_s9  ;;  %s67_s11 = sadd.s32 1, %s5532_s28 }
   0x4   : > { %p65_p0 = scmp.eq.s32.totalorder %s64_s10, 0  ;;  %p74_p1 = scmp.ne.s32.totalorder %s5532_s28, %s5528_s27 }
   0x5   : > { %p75_p2 = scmp.eq.s32.totalorder %s5536_s29, 0  ;;  %p234_p3 = scmp.eq.s32.totalorder %s5602_s30, 2 }
   0x6   : > { %s5615_s12 = scalar_select %p65_p0, %s5532_s28, %s67_s11  }
   0x7   : > { %p5617_p4 = por %p75_p2, %p74_p1  ;;  %p5621_p5 = por %p234_p3, %p74_p1 }
   0x8   : > { %p5383_p6 = scmp.ge.s32.totalorder %s5536_s29, 3 }
   0xa   : > { %262 = sbr.rel (%p5383_p6) target bundleno = 47 (0x2f), region = 24 }
  0x11   : > { %265 = sbr.rel (!%p5617_p4) target bundleno = 37 (0x25), region = 28  ;;  %s267_s15 = sand.u32 (%p5617_p4), 1, %s5532_s28  }
  0x12   : > { %s5423_s16 = sshll.u32 (%p5617_p4), %s5536_s29, 4  ;;  %s5384_s17 = sshll.u32 (%p5617_p4), %s267_s15, 8 }
  0x13   : > { %s5633_s20 = scalar_lea.vmem (%p5617_p4), %s9726_s2, %s5423_s16  ;;  %s5638_s21 = scalar_lea.vmem (%p5617_p4), [#allocation3], %s5384_s17 }
  0x14   : > { %v285_v0 = vld [vmem:[%s5633_s20] sm:$0xff] (%p5617_p4)  ;;  %v287_v1 = vld [vmem:[%s5633_s20 + $0x8] sm:$0xff] (%p5617_p4)  ;;  %v289_v2 = vld [vmem:[%s5633_s20 + $0x30] sm:$0xff] (%p5617_p4) }
  0x15   : > { %286 = vst [vmem:[%s5638_s21] sm:$0xff] (%p5617_p4), %v285_v0  ;;  %288 = vst [vmem:[%s5638_s21 + $0x8] sm:$0xff] (%p5617_p4), %v287_v1  ;;  %v291_v3 = vld [vmem:[%s5633_s20 + $0x38] sm:$0xff] (%p5617_p4)  ;;  %v293_v4 = vld [vmem:[%s5633_s20 + $0x60] sm:$0xff] (%p5617_p4) }
  0x16   : > { %290 = vst [vmem:[%s5638_s21 + $0x10] sm:$0xff] (%p5617_p4), %v289_v2  ;;  %v295_v5 = vld [vmem:[%s5633_s20 + $0x68] sm:$0xff] (%p5617_p4)  ;;  %292 = vst [vmem:[%s5638_s21 + $0x18] sm:$0xff] (%p5617_p4), %v291_v3  ;;  %v297_v6 = vld [vmem:[%s5633_s20 + $0x90] sm:$0xff] (%p5617_p4) }
  0x17   : > { %294 = vst [vmem:[%s5638_s21 + $0x20] sm:$0xff] (%p5617_p4), %v293_v4  ;;  %296 = vst [vmem:[%s5638_s21 + $0x28] sm:$0xff] (%p5617_p4), %v295_v5  ;;  %v299_v7 = vld [vmem:[%s5633_s20 + $0x98] sm:$0xff] (%p5617_p4)  ;;  %v301_v8 = vld [vmem:[%s5633_s20 + $0xc0] sm:$0xff] (%p5617_p4) }
  0x18   : > { %298 = vst [vmem:[%s5638_s21 + $0x30] sm:$0xff] %v297_v6  ;;  %300 = vst [vmem:[%s5638_s21 + $0x38] sm:$0xff] %v299_v7  ;;  %v303_v9 = vld [vmem:[%s5633_s20 + $0xc8] sm:$0xff]  ;;  %v305_v10 = vld [vmem:[%s5633_s20 + $0xf0] sm:$0xff] }
  0x19   : > { %302 = vst [vmem:[%s5638_s21 + $0x40] sm:$0xff] %v301_v8  ;;  %v307_v11 = vld [vmem:[%s5633_s20 + $0xf8] sm:$0xff]  ;;  %304 = vst [vmem:[%s5638_s21 + $0x48] sm:$0xff] %v303_v9  ;;  %v309_v12 = vld [vmem:[%s5633_s20 + $0x120] sm:$0xff] }
  0x1a   : > { %306 = vst [vmem:[%s5638_s21 + $0x50] sm:$0xff] %v305_v10  ;;  %308 = vst [vmem:[%s5638_s21 + $0x58] sm:$0xff] %v307_v11  ;;  %v311_v13 = vld [vmem:[%s5633_s20 + $0x128] sm:$0xff]  ;;  %v313_v14 = vld [vmem:[%s5633_s20 + $0x150] sm:$0xff] }
  0x1b   : > { %310 = vst [vmem:[%s5638_s21 + $0x60] sm:$0xff] %v309_v12  ;;  %312 = vst [vmem:[%s5638_s21 + $0x68] sm:$0xff] %v311_v13  ;;  %v315_v15 = vld [vmem:[%s5633_s20 + $0x158] sm:$0xff]  ;;  %v317_v16 = vld [vmem:[%s5633_s20 + $0x180] sm:$0xff] }
  0x1c   : > { %314 = vst [vmem:[%s5638_s21 + $0x70] sm:$0xff] %v313_v14  ;;  %v319_v17 = vld [vmem:[%s5633_s20 + $0x188] sm:$0xff]  ;;  %316 = vst [vmem:[%s5638_s21 + $0x78] sm:$0xff] %v315_v15  ;;  %v321_v18 = vld [vmem:[%s5633_s20 + $0x1b0] sm:$0xff] }
  0x1d   : > { %318 = vst [vmem:[%s5638_s21 + $0x80] sm:$0xff] %v317_v16  ;;  %320 = vst [vmem:[%s5638_s21 + $0x88] sm:$0xff] %v319_v17  ;;  %v323_v19 = vld [vmem:[%s5633_s20 + $0x1b8] sm:$0xff]  ;;  %v325_v20 = vld [vmem:[%s5633_s20 + $0x1e0] sm:$0xff] }
  0x1e   : > { %322 = vst [vmem:[%s5638_s21 + $0x90] sm:$0xff] %v321_v18  ;;  %324 = vst [vmem:[%s5638_s21 + $0x98] sm:$0xff] %v323_v19  ;;  %v327_v21 = vld [vmem:[%s5633_s20 + $0x1e8] sm:$0xff]  ;;  %v329_v22 = vld [vmem:[%s5633_s20 + $0x210] sm:$0xff] }
  0x1f   : > { %326 = vst [vmem:[%s5638_s21 + $0xa0] sm:$0xff] %v325_v20  ;;  %v331_v23 = vld [vmem:[%s5633_s20 + $0x218] sm:$0xff]  ;;  %328 = vst [vmem:[%s5638_s21 + $0xa8] sm:$0xff] %v327_v21  ;;  %v333_v24 = vld [vmem:[%s5633_s20 + $0x240] sm:$0xff] }
  0x20   : > { %330 = vst [vmem:[%s5638_s21 + $0xb0] sm:$0xff] %v329_v22  ;;  %332 = vst [vmem:[%s5638_s21 + $0xb8] sm:$0xff] %v331_v23  ;;  %v335_v25 = vld [vmem:[%s5633_s20 + $0x248] sm:$0xff]  ;;  %v337_v26 = vld [vmem:[%s5633_s20 + $0x270] sm:$0xff] }
  0x21   : > { %334 = vst [vmem:[%s5638_s21 + $0xc0] sm:$0xff] %v333_v24  ;;  %336 = vst [vmem:[%s5638_s21 + $0xc8] sm:$0xff] %v335_v25  ;;  %v339_v27 = vld [vmem:[%s5633_s20 + $0x278] sm:$0xff]  ;;  %v341_v28 = vld [vmem:[%s5633_s20 + $0x2a0] sm:$0xff] }
  0x22   : > { %338 = vst [vmem:[%s5638_s21 + $0xd0] sm:$0xff] %v337_v26  ;;  %v343_v29 = vld [vmem:[%s5633_s20 + $0x2a8] sm:$0xff]  ;;  %340 = vst [vmem:[%s5638_s21 + $0xd8] sm:$0xff] %v339_v27  ;;  %v345_v30 = vld [vmem:[%s5633_s20 + $0x2d0] sm:$0xff] }
  0x23   : > { %342 = vst [vmem:[%s5638_s21 + $0xe0] sm:$0xff] %v341_v28  ;;  %344 = vst [vmem:[%s5638_s21 + $0xe8] sm:$0xff] %v343_v29  ;;  %v347_v31 = vld [vmem:[%s5633_s20 + $0x2d8] sm:$0xff] }
  0x24   : > { %346 = vst [vmem:[%s5638_s21 + $0xf0] sm:$0xff] %v345_v30  ;;  %348 = vst [vmem:[%s5638_s21 + $0xf8] sm:$0xff] %v347_v31 }
  0x25 PF: > { %370 = sbr.rel (!%p5617_p4) target bundleno = 47 (0x2f), region = 59  ;;  %s372_s22 = sand.u32 (%p5617_p4), 1, %s5532_s28  }
  0x26   : > { %s5424_s23 = sshll.u32 (%p5617_p4), %s5536_s29, 4  ;;  %s5474_s24 = smul.u32 (%p5617_p4), 80, %s372_s22 }
  0x27   : > { %s377_s10 = scalar_lea.vmem (%p5617_p4), %s9729_s5, %s5424_s23 }
  0x28   : > { %v390_v32 = vld [vmem:[%s377_s10] sm:$0xff] (%p5617_p4)  ;;  %v392_v33 = vld [vmem:[%s377_s10 + $0x8] sm:$0xff] (%p5617_p4)  ;;  %v394_v34 = vld [vmem:[%s377_s10 + $0x30] sm:$0xff] (%p5617_p4)  ;;  %s374_s11 = scalar_lea.vmem (%p5617_p4), [#allocation4], %s5474_s24 }
  0x29   : > { %v396_v35 = vld [vmem:[%s377_s10 + $0x38] sm:$0xff] (%p5617_p4)  ;;  %v398_v36 = vld [vmem:[%s377_s10 + $0x60] sm:$0xff] (%p5617_p4)  ;;  %v400_v37 = vld [vmem:[%s377_s10 + $0x68] sm:$0xff] (%p5617_p4)  ;;  %391 = vst [vmem:[%s374_s11] sm:$0xff] (%p5617_p4), %v390_v32 }
  0x2a   : > { %393 = vst [vmem:[%s374_s11 + $0x8] sm:$0xff] (%p5617_p4), %v392_v33  ;;  %395 = vst [vmem:[%s374_s11 + $0x10] sm:$0xff] (%p5617_p4), %v394_v34  ;;  %v402_v38 = vld [vmem:[%s377_s10 + $0x90] sm:$0xff] (%p5617_p4)  ;;  %v404_v39 = vld [vmem:[%s377_s10 + $0x98] sm:$0xff] (%p5617_p4) }
  0x2b   : > { %397 = vst [vmem:[%s374_s11 + $0x18] sm:$0xff] (%p5617_p4), %v396_v35  ;;  %399 = vst [vmem:[%s374_s11 + $0x20] sm:$0xff] (%p5617_p4), %v398_v36  ;;  %v406_v40 = vld [vmem:[%s377_s10 + $0xc0] sm:$0xff] (%p5617_p4)  ;;  %v408_v41 = vld [vmem:[%s377_s10 + $0xc8] sm:$0xff] (%p5617_p4) }
  0x2c   : > { %401 = vst [vmem:[%s374_s11 + $0x28] sm:$0xff] %v400_v37  ;;  %403 = vst [vmem:[%s374_s11 + $0x30] sm:$0xff] %v402_v38 }
  0x2d   : > { %405 = vst [vmem:[%s374_s11 + $0x38] sm:$0xff] %v404_v39  ;;  %407 = vst [vmem:[%s374_s11 + $0x40] sm:$0xff] %v406_v40 }
  0x2e   : > { %409 = vst [vmem:[%s374_s11 + $0x48] sm:$0xff] %v408_v41 }
  0x2f PF: > { %p5389_p7 = scmp.ge.s32.totalorder %s5536_s29, 1  ;;  %p430_p8 = scmp.lt.s32.totalorder %s5536_s29, 4 }
  0x31   : > { %p431_p9 = pnand %p5389_p7, %p430_p8 }
  0x33   : > { %434 = sbr.rel (%p431_p9) target bundleno = 1126 (0x466), region = 90 }
  0x3a   : > { %s5711_s13 = sand.u32 1, %s5528_s27   ;;  %v5538_v42 = vmov 0.0   ;;  %v519_v27 = vld [vmem:[%s9724_s0] sm:$0xff]  ;;  %v520_v29 = vld [vmem:[%s9724_s0 + $0x8] sm:$0xff]  ;;  %v521_v31 = vld [vmem:[%s9724_s0 + $0x10] sm:$0xff]  ;;  %v5539_v39 = vmov 0  }
  0x3b   : > { %s5390_s15 = sshll.u32 %s5711_s13, 8  ;;  %687 = vmatprep.mubr.f32.mxu0 %v5538_v42  ;;  %903 = vmatprep.mubr.f32.mxu1 %v5538_v42  ;;  %v555_v28 = vld [vmem:[%s9724_s0 + $0x120] sm:$0xff]  ;;  %v556_v30 = vld [vmem:[%s9724_s0 + $0x128] sm:$0xff]  ;;  %v557_v32 = vld [vmem:[%s9724_s0 + $0x130] sm:$0xff]  ;;  %s5391_s27 = sshll.u32 %s5602_s30, 1  ;;  %vm4349_vm0 = vcmask 1045504  }
  0x3c   : > { %s5716_s16 = scalar_lea.vmem [#allocation3], %s5390_s15  ;;  %v522_v33 = vld [vmem:[%s9724_s0 + $0x18] sm:$0xff]  ;;  %v523_v35 = vld [vmem:[%s9724_s0 + $0x20] sm:$0xff]  ;;  %v2084_v38 = vld [vmem:[%s9725_s1 + $0x10] sm:$0xff]  ;;  %5504 = vset.pattern.permute.xlu0 %v5539_v39  ;;  %5505 = vset.pattern.permute.xlu1 %v5539_v39  ;;  %p498_p10 = scmp.lt.s32.totalorder %s5391_s27, 5  ;;  %vm4976_vm1 = vcmask 1046528  }
  0x3d   : > { %v592_v43 = vld [vmem:[%s5716_s16 + $0x8] sm:$0xff]  ;;  %v594_v44 = vld [vmem:[%s5716_s16 + $0x18] sm:$0xff]  ;;  %v591_v45 = vld [vmem:[%s5716_s16] sm:$0xff]  ;;  %2166 = vperm.xlu1 %5505, %v2084_v38   ;;  %s5475_s22 = smul.u32 80, %s5711_s13 }
  0x3e   : > { %v5426_v46 = vpack.c.bf16 %v594_v44, %v592_v43  ;;  %v593_v47 = vld [vmem:[%s5716_s16 + $0x10] sm:$0xff]  ;;  %v596_v48 = vld [vmem:[%s5716_s16 + $0x28] sm:$0xff]  ;;  %v598_v49 = vld [vmem:[%s5716_s16 + $0x38] sm:$0xff]  ;;  %s10995_s27 = smov (!%p498_p10, %s5391_s27), 5 }
  0x3f   : > { %v5428_v50 = vpack.c.bf16 %v593_v47, %v591_v45  ;;  %v5430_v51 = vpack.c.bf16 %v598_v49, %v596_v48  ;;  %v595_v52 = vld [vmem:[%s5716_s16 + $0x20] sm:$0xff]  ;;  %v597_v53 = vld [vmem:[%s5716_s16 + $0x30] sm:$0xff]  ;;  %v600_v54 = vld [vmem:[%s5716_s16 + $0x48] sm:$0xff]  ;;  %s500_s18 = scalar_lea.vmem %s9727_s3, %s10995_s27  ;;  %s505_s21 = scalar_lea.vmem %s9728_s4, %s10995_s27 }
  0x40   : > { %5427 = vmatprep.subr.bf16.mxu0 %v5426_v46  ;;  %v602_v55 = vld [vmem:[%s5716_s16 + $0x58] sm:$0xff]  ;;  %5458 = vmatprep.subr.bf16.mxu1 %v5426_v46  ;;  %v5432_v56 = vpack.c.bf16 %v597_v53, %v595_v52  ;;  %v599_v58 = vld [vmem:[%s5716_s16 + $0x40] sm:$0xff]  ;;  %v601_v59 = vld [vmem:[%s5716_s16 + $0x50] sm:$0xff]  ;;  %s7378_s23 = scalar_lea.vmem [#allocation4], %s5475_s22  ;;  %s511_s26 = scalar_lea.vmem %s9730_s6, %s10995_s27 }
  0x41   : > { %5429 = vmatpush1.bf16.msra.mxu0 %v5428_v50  ;;  %5466 = vmatpush1.bf16.msra.mxu1 %v5428_v50  ;;  %v5434_v57 = vpack.c.bf16 %v602_v55, %v600_v54  ;;  %v604_v60 = vld [vmem:[%s5716_s16 + $0x68] sm:$0xff]  ;;  %v606_v61 = vld [vmem:[%s5716_s16 + $0x78] sm:$0xff]  ;;  %v5436_v62 = vpack.c.bf16 %v601_v59, %v599_v58  ;;  %v603_v0 = vld [vmem:[%s5716_s16 + $0x60] sm:$0xff]  ;;  %s516_s15 = scalar_lea.vmem %s9731_s7, %s10995_s27 }
  0x42   : > { %5431 = vmatprep.subr.bf16.mxu0 %v5430_v51  ;;  %5459 = vmatprep.subr.bf16.mxu1 %v5430_v51  ;;  %v5438_v63 = vpack.c.bf16 %v606_v61, %v604_v60  ;;  %v605_v1 = vld [vmem:[%s5716_s16 + $0x70] sm:$0xff]  ;;  %v608_v2 = vld [vmem:[%s5716_s16 + $0x88] sm:$0xff]  ;;  %v610_v3 = vld [vmem:[%s5716_s16 + $0x98] sm:$0xff] }
  0x43   : > { %v5440_v4 = vpack.c.bf16 %v605_v1, %v603_v0  ;;  %v5442_v5 = vpack.c.bf16 %v610_v3, %v608_v2  ;;  %v607_v6 = vld [vmem:[%s5716_s16 + $0x80] sm:$0xff]  ;;  %v609_v7 = vld [vmem:[%s5716_s16 + $0x90] sm:$0xff]  ;;  %v612_v8 = vld [vmem:[%s5716_s16 + $0xa8] sm:$0xff] }
  0x44   : > { %v614_v9 = vld [vmem:[%s5716_s16 + $0xb8] sm:$0xff]  ;;  %v5444_v10 = vpack.c.bf16 %v609_v7, %v607_v6  ;;  %v611_v12 = vld [vmem:[%s5716_s16 + $0xa0] sm:$0xff]  ;;  %v613_v13 = vld [vmem:[%s5716_s16 + $0xb0] sm:$0xff] }
  0x45   : > { %5433 = vmatpush1.bf16.msra.mxu0 %v5432_v56  ;;  %5467 = vmatpush1.bf16.msra.mxu1 %v5432_v56  ;;  %v5446_v11 = vpack.c.bf16 %v614_v9, %v612_v8  ;;  %v616_v14 = vld [vmem:[%s5716_s16 + $0xc8] sm:$0xff]  ;;  %v618_v15 = vld [vmem:[%s5716_s16 + $0xd8] sm:$0xff]  ;;  %v5448_v16 = vpack.c.bf16 %v613_v13, %v611_v12  ;;  %v615_v18 = vld [vmem:[%s5716_s16 + $0xc0] sm:$0xff] }
  0x46   : > { %5435 = vmatprep.subr.bf16.mxu0 %v5434_v57  ;;  %5460 = vmatprep.subr.bf16.mxu1 %v5434_v57  ;;  %v5450_v17 = vpack.c.bf16 %v618_v15, %v616_v14  ;;  %v617_v19 = vld [vmem:[%s5716_s16 + $0xd0] sm:$0xff]  ;;  %v620_v20 = vld [vmem:[%s5716_s16 + $0xe8] sm:$0xff]  ;;  %v622_v21 = vld [vmem:[%s5716_s16 + $0xf8] sm:$0xff] }
  0x47   : > { %v5452_v22 = vpack.c.bf16 %v617_v19, %v615_v18  ;;  %v5454_v23 = vpack.c.bf16 %v622_v21, %v620_v20  ;;  %v619_v24 = vld [vmem:[%s5716_s16 + $0xe0] sm:$0xff]  ;;  %v621_v25 = vld [vmem:[%s5716_s16 + $0xf0] sm:$0xff]  ;;  %v558_v34 = vld [vmem:[%s9724_s0 + $0x138] sm:$0xff]  ;;  %s5476_s16 = smul.u32 112, %s5711_s13  ;;  %s5425_s13 = sshll.u32 (%p5621_p5), %s5602_s30, 4 }
  0x48   : > { %v5456_v26 = vpack.c.bf16 %v621_v25, %v619_v24  ;;  %v559_v36 = vld [vmem:[%s9724_s0 + $0x140] sm:$0xff]  ;;  %v2083_v40 = vld [vmem:[%s9725_s1 + $0x8] sm:$0xff]  ;;  %v2085_v41 = vld [vmem:[%s9725_s1 + $0x18] sm:$0xff] }
  0x49   : > { %5437 = vmatpush1.bf16.msra.mxu0 %v5436_v62  ;;  %5468 = vmatpush1.bf16.msra.mxu1 %v5436_v62  ;;  %v2082_v37 = vld [vmem:[%s9725_s1] sm:$0xff]  ;;  %v524_v43 = vld [vmem:[%s9724_s0 + $0x28] sm:$0xff]  ;;  %v525_v47 = vld [vmem:[%s9724_s0 + $0x30] sm:$0xff]  ;;  %s9678_s27 = scalar_lea.vmem [#allocation5], %s5476_s16 }
  0x4a   : > { %5439 = vmatprep.subr.bf16.mxu0 %v5438_v63  ;;  %5461 = vmatprep.subr.bf16.mxu1 %v5438_v63  ;;  %v560_v44 = vld [vmem:[%s9724_s0 + $0x148] sm:$0xff]  ;;  %v2086_v45 = vld [vmem:[%s9725_s1 + $0x20] sm:$0xff]  ;;  %v561_v48 = vld [vmem:[%s9724_s0 + $0x150] sm:$0xff] }
  0x4b   : > { %2156 = vperm.xlu0 %5504, %v2082_v37   ;;  %2171 = vperm.xlu1 %5505, %v2085_v41   ;;  %v2087_v46 = vld [vmem:[%s9725_s1 + $0x28] sm:$0xff]  ;;  %v2088_v49 = vld [vmem:[%s9725_s1 + $0x30] sm:$0xff]  ;;  %v2089_v50 = vld [vmem:[%s9725_s1 + $0x38] sm:$0xff] }
  0x4c   : > { %v526_v51 = vld [vmem:[%s9724_s0 + $0x38] sm:$0xff]  ;;  %v2090_v53 = vld [vmem:[%s9725_s1 + $0x40] sm:$0xff]  ;;  %v2091_v54 = vld [vmem:[%s9725_s1 + $0x48] sm:$0xff] }
  0x4d   : > { %5441 = vmatpush1.bf16.msra.mxu0 %v5440_v4  ;;  %5469 = vmatpush1.bf16.msra.mxu1 %v5440_v4  ;;  %v562_v52 = vld [vmem:[%s9724_s0 + $0x158] sm:$0xff]  ;;  %v527_v55 = vld [vmem:[%s9724_s0 + $0x40] sm:$0xff]  ;;  %v2092_v57 = vld [vmem:[%s9725_s1 + $0x50] sm:$0xff] }
  0x4e   : > { %5443 = vmatprep.subr.bf16.mxu0 %v5442_v5  ;;  %5462 = vmatprep.subr.bf16.mxu1 %v5442_v5  ;;  %v563_v56 = vld [vmem:[%s9724_s0 + $0x160] sm:$0xff]  ;;  %v2093_v58 = vld [vmem:[%s9725_s1 + $0x58] sm:$0xff]  ;;  %v528_v59 = vld [vmem:[%s9724_s0 + $0x48] sm:$0xff] }
  0x4f   : > { %2161 = vperm.xlu0 %5504, %v2083_v40   ;;  %2181 = vperm.xlu1 %5505, %v2087_v46   ;;  %v564_v60 = vld [vmem:[%s9724_s0 + $0x168] sm:$0xff]  ;;  %v2094_v61 = vld [vmem:[%s9725_s1 + $0x60] sm:$0xff]  ;;  %v529_v63 = vld [vmem:[%s9724_s0 + $0x50] sm:$0xff] }
  0x50   : > { %v2095_v62 = vld [vmem:[%s9725_s1 + $0x68] sm:$0xff]  ;;  %v565_v0 = vld [vmem:[%s9724_s0 + $0x170] sm:$0xff]  ;;  %v2097_v2 = vld [vmem:[%s9725_s1 + $0x78] sm:$0xff] }
  0x51   : > { %5445 = vmatpush1.bf16.msra.mxu0 %v5444_v10  ;;  %5470 = vmatpush1.bf16.msra.mxu1 %v5444_v10  ;;  %v2096_v1 = vld [vmem:[%s9725_s1 + $0x70] sm:$0xff]  ;;  %v530_v3 = vld [vmem:[%s9724_s0 + $0x58] sm:$0xff]  ;;  %v2098_v5 = vld [vmem:[%s9725_s1 + $0x80] sm:$0xff] }
  0x52   : > { %5447 = vmatprep.subr.bf16.mxu0 %v5446_v11  ;;  %5463 = vmatprep.subr.bf16.mxu1 %v5446_v11  ;;  %v566_v4 = vld [vmem:[%s9724_s0 + $0x178] sm:$0xff]  ;;  %v2099_v6 = vld [vmem:[%s9725_s1 + $0x88] sm:$0xff]  ;;  %v531_v7 = vld [vmem:[%s9724_s0 + $0x60] sm:$0xff] }
  0x53   : > { %2176 = vperm.xlu0 %5504, %v2086_v45   ;;  %2191 = vperm.xlu1 %5505, %v2089_v50   ;;  %v567_v8 = vld [vmem:[%s9724_s0 + $0x180] sm:$0xff]  ;;  %v2100_v9 = vld [vmem:[%s9725_s1 + $0x90] sm:$0xff]  ;;  %v2101_v10 = vld [vmem:[%s9725_s1 + $0x98] sm:$0xff] }
  0x54   : > { %v532_v11 = vld [vmem:[%s9724_s0 + $0x68] sm:$0xff]  ;;  %v2102_v13 = vld [vmem:[%s9725_s1 + $0xa0] sm:$0xff]  ;;  %v533_v15 = vld [vmem:[%s9724_s0 + $0x70] sm:$0xff] }
  0x55   : > { %5449 = vmatpush1.bf16.msra.mxu0 %v5448_v16  ;;  %5471 = vmatpush1.bf16.msra.mxu1 %v5448_v16  ;;  %v568_v12 = vld [vmem:[%s9724_s0 + $0x188] sm:$0xff]  ;;  %v569_v16 = vld [vmem:[%s9724_s0 + $0x190] sm:$0xff]  ;;  %v2118_v18 = vld [vmem:[%s9725_s1 + $0x120] sm:$0xff] }
  0x56   : > { %5451 = vmatprep.subr.bf16.mxu0 %v5450_v17  ;;  %5464 = vmatprep.subr.bf16.mxu1 %v5450_v17  ;;  %v2103_v14 = vld [vmem:[%s9725_s1 + $0xa8] sm:$0xff]  ;;  %v2104_v17 = vld [vmem:[%s9725_s1 + $0xb0] sm:$0xff]  ;;  %v534_v19 = vld [vmem:[%s9724_s0 + $0x78] sm:$0xff] }
  0x57   : > { %2186 = vperm.xlu0 %5504, %v2088_v49   ;;  %2201 = vperm.xlu1 %5505, %v2091_v54   ;;  %v570_v20 = vld [vmem:[%s9724_s0 + $0x198] sm:$0xff]  ;;  %v2120_v21 = vld [vmem:[%s9725_s1 + $0x130] sm:$0xff]  ;;  %v571_v24 = vld [vmem:[%s9724_s0 + $0x1a0] sm:$0xff] }
  0x58   : > { %v2124_v25 = vld [vmem:[%s9725_s1 + $0x150] sm:$0xff]  ;;  %v2130_v40 = vld [vmem:[%s9725_s1 + $0x180] sm:$0xff] }
  0x59   : > { %5453 = vmatpush1.bf16.msra.mxu0 %v5452_v22  ;;  %5472 = vmatpush1.bf16.msra.mxu1 %v5452_v22  ;;  %v2122_v22 = vld [vmem:[%s9725_s1 + $0x140] sm:$0xff]  ;;  %v2128_v37 = vld [vmem:[%s9725_s1 + $0x170] sm:$0xff] }
  0x5a   : > { %5455 = vmatprep.subr.bf16.mxu0 %v5454_v23  ;;  %5465 = vmatprep.subr.bf16.mxu1 %v5454_v23  ;;  %v535_v23 = vld [vmem:[%s9724_s0 + $0x80] sm:$0xff]  ;;  %v541_v38 = vld [vmem:[%s9724_s0 + $0xb0] sm:$0xff] }
  0x5b   : > { %2196 = vperm.xlu0 %5504, %v2090_v53   ;;  %2211 = vperm.xlu1 %5505, %v2093_v58   ;;  %v577_v39 = vld [vmem:[%s9724_s0 + $0x1d0] sm:$0xff]  ;;  %v2138_v45 = vld [vmem:[%s9725_s1 + $0x1c0] sm:$0xff] }
  0x5c   : > { %v2136_v41 = vld [vmem:[%s9725_s1 + $0x1b0] sm:$0xff]  ;;  %v2106_v46 = vld [vmem:[%s9725_s1 + $0xc0] sm:$0xff] }
  0x5d   : > { %5457 = vmatpush1.bf16.msra.mxu0 %v5456_v26  ;;  %5473 = vmatpush1.bf16.msra.mxu1 %v5456_v26  ;;  %v2126_v26 = vld [vmem:[%s9725_s1 + $0x160] sm:$0xff]  ;;  %v2140_v49 = vld [vmem:[%s9725_s1 + $0x1d0] sm:$0xff] }
  0x5e   : > { %v2108_v50 = vld [vmem:[%s9725_s1 + $0xd0] sm:$0xff]  ;;  %v2142_v54 = vld [vmem:[%s9725_s1 + $0x1e0] sm:$0xff] }
  0x5f   : > { %2206 = vperm.xlu0 %5504, %v2092_v57   ;;  %2221 = vperm.xlu1 %5505, %v2095_v62   ;;  %v2132_v53 = vld [vmem:[%s9725_s1 + $0x190] sm:$0xff]  ;;  %v2110_v57 = vld [vmem:[%s9725_s1 + $0xe0] sm:$0xff] }
  0x60   : > { %688 = vmatmul.mubr.f32.vlgmr.msra.gmra.mrb[0].mxu0 %v519_v27  ;;  %904 = vmatmul.mubr.f32.vlgmr.msra.gmra.mrb[0].mxu1 %v555_v28  ;;  %v536_v27 = vld [vmem:[%s9724_s0 + $0x88] sm:$0xff]  ;;  %v2144_v58 = vld [vmem:[%s9725_s1 + $0x1f0] sm:$0xff]  ;;  %v2146_v62 = vld [vmem:[%s9725_s1 + $0x200] sm:$0xff] }
  0x61   : > { %693 = vmatprep.mubr.f32.mxu0 %v5538_v42  ;;  %909 = vmatprep.mubr.f32.mxu1 %v5538_v42  ;;  %v572_v28 = vld [vmem:[%s9724_s0 + $0x1a8] sm:$0xff] }
  0x63   : > { %2216 = vperm.xlu0 %5504, %v2094_v61   ;;  %2231 = vperm.xlu1 %5505, %v2097_v2   ;;  %v2112_v61 = vld [vmem:[%s9725_s1 + $0xf0] sm:$0xff]  ;;  %v2114_v2 = vld [vmem:[%s9725_s1 + $0x100] sm:$0xff] }
  0x64   : > { %694 = vmatmul.mubr.f32.gmra.mrb[2].mxu0 %v520_v29  ;;  %910 = vmatmul.mubr.f32.gmra.mrb[2].mxu1 %v556_v30  ;;  %v537_v29 = vld [vmem:[%s9724_s0 + $0x90] sm:$0xff] }
  0x65   : > { %699 = vmatprep.mubr.f32.mxu0 %v5538_v42  ;;  %915 = vmatprep.mubr.f32.mxu1 %v5538_v42  ;;  %v573_v30 = vld [vmem:[%s9724_s0 + $0x1b0] sm:$0xff] }
  0x67   : > { %2226 = vperm.xlu0 %5504, %v2096_v1   ;;  %2241 = vperm.xlu1 %5505, %v2099_v6   ;;  %v2148_v1 = vld [vmem:[%s9725_s1 + $0x210] sm:$0xff] }
  0x68   : > { %700 = vmatmul.mubr.f32.gmra.mrb[4].mxu0 %v521_v31  ;;  %916 = vmatmul.mubr.f32.gmra.mrb[4].mxu1 %v557_v32  ;;  %v538_v31 = vld [vmem:[%s9724_s0 + $0x98] sm:$0xff]  ;;  %v2116_v6 = vld [vmem:[%s9725_s1 + $0x110] sm:$0xff] }
  0x69   : > { %705 = vmatprep.mubr.f32.mxu0 %v5538_v42  ;;  %921 = vmatprep.mubr.f32.mxu1 %v5538_v42  ;;  %v574_v32 = vld [vmem:[%s9724_s0 + $0x1b8] sm:$0xff] }
  0x6b   : > { %2236 = vperm.xlu0 %5504, %v2098_v5   ;;  %2251 = vperm.xlu1 %5505, %v2101_v10   ;;  %v2150_v5 = vld [vmem:[%s9725_s1 + $0x220] sm:$0xff]  ;;  %v2121_v10 = vld [vmem:[%s9725_s1 + $0x138] sm:$0xff] }
  0x6c   : > { %706 = vmatmul.mubr.f32.gmra.mrb[6].mxu0 %v522_v33  ;;  %922 = vmatmul.mubr.f32.gmra.mrb[6].mxu1 %v558_v34  ;;  %v539_v33 = vld [vmem:[%s9724_s0 + $0xa0] sm:$0xff] }
  0x6d   : > { %711 = vmatprep.mubr.f32.mxu0 %v5538_v42  ;;  %927 = vmatprep.mubr.f32.mxu1 %v5538_v42  ;;  %v575_v34 = vld [vmem:[%s9724_s0 + $0x1c0] sm:$0xff] }
  0x6f   : > { %2246 = vperm.xlu0 %5504, %v2100_v9   ;;  %2261 = vperm.xlu1 %5505, %v2103_v14   ;;  %v2119_v9 = vld [vmem:[%s9725_s1 + $0x128] sm:$0xff]  ;;  %v2125_v14 = vld [vmem:[%s9725_s1 + $0x158] sm:$0xff] }
  0x70   : > { %712 = vmatmul.mubr.f32.gmra.mrb[8].mxu0 %v523_v35  ;;  %928 = vmatmul.mubr.f32.gmra.mrb[8].mxu1 %v559_v36  ;;  %v540_v35 = vld [vmem:[%s9724_s0 + $0xa8] sm:$0xff] }
  0x71   : > { %717 = vmatprep.mubr.f32.mxu0 %v5538_v42  ;;  %933 = vmatprep.mubr.f32.mxu1 %v5538_v42  ;;  %v576_v36 = vld [vmem:[%s9724_s0 + $0x1c8] sm:$0xff] }
  0x73   : > { %2256 = vperm.xlu0 %5504, %v2102_v13   ;;  %2336 = vperm.xlu1 %5505, %v2118_v18   ;;  %v2123_v13 = vld [vmem:[%s9725_s1 + $0x148] sm:$0xff]  ;;  %v2129_v18 = vld [vmem:[%s9725_s1 + $0x178] sm:$0xff] }
  0x74   : > { %718 = vmatmul.mubr.f32.gmra.mrb[10].mxu0 %v524_v43  ;;  %934 = vmatmul.mubr.f32.gmra.mrb[10].mxu1 %v560_v44  ;;  %v542_v43 = vld [vmem:[%s9724_s0 + $0xb8] sm:$0xff] }
  0x75   : > { %723 = vmatprep.mubr.f32.mxu0 %v5538_v42  ;;  %939 = vmatprep.mubr.f32.mxu1 %v5538_v42  ;;  %v578_v44 = vld [vmem:[%s9724_s0 + $0x1d8] sm:$0xff] }
  0x77   : > { %2266 = vperm.xlu0 %5504, %v2104_v17   ;;  %2356 = vperm.xlu1 %5505, %v2122_v22   ;;  %v2127_v17 = vld [vmem:[%s9725_s1 + $0x168] sm:$0xff]  ;;  %v2133_v22 = vld [vmem:[%s9725_s1 + $0x198] sm:$0xff] }
  0x78   : > { %724 = vmatmul.mubr.f32.gmra.mrb[12].mxu0 %v525_v47  ;;  %940 = vmatmul.mubr.f32.gmra.mrb[12].mxu1 %v561_v48  ;;  %v543_v47 = vld [vmem:[%s9724_s0 + $0xc0] sm:$0xff] }
  0x79   : > { %729 = vmatprep.mubr.f32.mxu0 %v5538_v42  ;;  %945 = vmatprep.mubr.f32.mxu1 %v5538_v42  ;;  %v579_v48 = vld [vmem:[%s9724_s0 + $0x1e0] sm:$0xff] }
  0x7b   : > { %2346 = vperm.xlu0 %5504, %v2120_v21   ;;  %2376 = vperm.xlu1 %5505, %v2126_v26   ;;  %v2131_v21 = vld [vmem:[%s9725_s1 + $0x188] sm:$0xff] }
  0x7c   : > { %730 = vmatmul.mubr.f32.gmra.mrb[14].mxu0 %v526_v51  ;;  %946 = vmatmul.mubr.f32.gmra.mrb[14].mxu1 %v562_v52  ;;  %v544_v51 = vld [vmem:[%s9724_s0 + $0xc8] sm:$0xff] }
  0x7d   : > { %735 = vmatprep.mubr.f32.mxu0 %v5538_v42  ;;  %951 = vmatprep.mubr.f32.mxu1 %v5538_v42  ;;  %v580_v52 = vld [vmem:[%s9724_s0 + $0x1e8] sm:$0xff] }
  0x7e   : > { %v2107_v26 = vld [vmem:[%s9725_s1 + $0xc8] sm:$0xff] }
  0x7f   : > { %2366 = vperm.xlu0 %5504, %v2124_v25   ;;  %2396 = vperm.xlu1 %5505, %v2130_v40   ;;  %v2105_v25 = vld [vmem:[%s9725_s1 + $0xb8] sm:$0xff]  ;;  %v2147_v40 = vld [vmem:[%s9725_s1 + $0x208] sm:$0xff] }
  0x80   : > { %736 = vmatmul.mubr.f32.gmra.mrb[16].mxu0 %v527_v55  ;;  %952 = vmatmul.mubr.f32.gmra.mrb[16].mxu1 %v563_v56  ;;  %v545_v55 = vld [vmem:[%s9724_s0 + $0xd0] sm:$0xff] }
  0x81   : > { %741 = vmatprep.mubr.f32.mxu0 %v5538_v42  ;;  %957 = vmatprep.mubr.f32.mxu1 %v5538_v42  ;;  %v581_v56 = vld [vmem:[%s9724_s0 + $0x1f0] sm:$0xff] }
  0x83   : > { %2386 = vperm.xlu0 %5504, %v2128_v37   ;;  %2436 = vperm.xlu1 %5505, %v2138_v45   ;;  %v2141_v37 = vld [vmem:[%s9725_s1 + $0x1d8] sm:$0xff] }
  0x84   : > { %742 = vmatmul.mubr.f32.gmra.mrb[18].mxu0 %v528_v59  ;;  %958 = vmatmul.mubr.f32.gmra.mrb[18].mxu1 %v564_v60  ;;  %v546_v59 = vld [vmem:[%s9724_s0 + $0xd8] sm:$0xff] }
  0x85   : > { %747 = vmatprep.mubr.f32.mxu0 %v5538_v42  ;;  %963 = vmatprep.mubr.f32.mxu1 %v5538_v42  ;;  %v582_v60 = vld [vmem:[%s9724_s0 + $0x1f8] sm:$0xff] }
  0x86   : > { %v2153_v45 = vld [vmem:[%s9725_s1 + $0x238] sm:$0xff] }
  0x87   : > { %2426 = vperm.xlu0 %5504, %v2136_v41   ;;  %2446 = vperm.xlu1 %5505, %v2140_v49   ;;  %v2149_v41 = vld [vmem:[%s9725_s1 + $0x218] sm:$0xff] }
  0x88   : > { %748 = vmatmul.mubr.f32.gmra.mrb[20].mxu0 %v529_v63  ;;  %964 = vmatmul.mubr.f32.gmra.mrb[20].mxu1 %v565_v0  ;;  %v547_v63 = vld [vmem:[%s9724_s0 + $0xe0] sm:$0xff] }
  0x89   : > { %753 = vmatprep.mubr.f32.mxu0 %v5538_v42  ;;  %969 = vmatprep.mubr.f32.mxu1 %v5538_v42  ;;  %v583_v0 = vld [vmem:[%s9724_s0 + $0x200] sm:$0xff] }
  0x8b   : > { %2276 = vperm.xlu0 %5504, %v2106_v46   ;;  %2406 = vperm.xlu1 %5505, %v2132_v53  }
  0x8c   : > { %754 = vmatmul.mubr.f32.gmra.mrb[22].mxu0 %v530_v3  ;;  %970 = vmatmul.mubr.f32.gmra.mrb[22].mxu1 %v566_v4  ;;  %v548_v3 = vld [vmem:[%s9724_s0 + $0xe8] sm:$0xff] }
  0x8d   : > { %759 = vmatprep.mubr.f32.mxu0 %v5538_v42  ;;  %975 = vmatprep.mubr.f32.mxu1 %v5538_v42  ;;  %v584_v4 = vld [vmem:[%s9724_s0 + $0x208] sm:$0xff] }
  0x8f   : > { %2286 = vperm.xlu0 %5504, %v2108_v50   ;;  %2296 = vperm.xlu1 %5505, %v2110_v57  }
  0x90   : > { %760 = vmatmul.mubr.f32.gmra.mrb[24].mxu0 %v531_v7  ;;  %976 = vmatmul.mubr.f32.gmra.mrb[24].mxu1 %v567_v8  ;;  %v549_v7 = vld [vmem:[%s9724_s0 + $0xf0] sm:$0xff] }
  0x91   : > { %765 = vmatprep.mubr.f32.mxu0 %v5538_v42  ;;  %981 = vmatprep.mubr.f32.mxu1 %v5538_v42  ;;  %v585_v8 = vld [vmem:[%s9724_s0 + $0x210] sm:$0xff] }
  0x93   : > { %2456 = vperm.xlu0 %5504, %v2142_v54   ;;  %2306 = vperm.xlu1 %5505, %v2112_v61  }
  0x94   : > { %766 = vmatmul.mubr.f32.gmra.mrb[26].mxu0 %v532_v11  ;;  %982 = vmatmul.mubr.f32.gmra.mrb[26].mxu1 %v568_v12  ;;  %v550_v11 = vld [vmem:[%s9724_s0 + $0xf8] sm:$0xff] }
  0x95   : > { %771 = vmatprep.mubr.f32.mxu0 %v5538_v42  ;;  %987 = vmatprep.mubr.f32.mxu1 %v5538_v42  ;;  %v586_v12 = vld [vmem:[%s9724_s0 + $0x218] sm:$0xff] }
  0x97   : > { %2466 = vperm.xlu0 %5504, %v2144_v58   ;;  %2486 = vperm.xlu1 %5505, %v2148_v1  }
  0x98   : > { %772 = vmatmul.mubr.f32.gmra.mrb[28].mxu0 %v533_v15  ;;  %988 = vmatmul.mubr.f32.gmra.mrb[28].mxu1 %v569_v16  ;;  %v551_v15 = vld [vmem:[%s9724_s0 + $0x100] sm:$0xff] }
  0x99   : > { %777 = vmatprep.mubr.f32.mxu0 %v5538_v42  ;;  %993 = vmatprep.mubr.f32.mxu1 %v5538_v42  ;;  %v587_v16 = vld [vmem:[%s9724_s0 + $0x220] sm:$0xff] }
  0x9b   : > { %2476 = vperm.xlu0 %5504, %v2146_v62   ;;  %2496 = vperm.xlu1 %5505, %v2150_v5  }
  0x9c   : > { %778 = vmatmul.mubr.f32.gmra.mrb[30].mxu0 %v534_v19  ;;  %994 = vmatmul.mubr.f32.gmra.mrb[30].mxu1 %v570_v20  ;;  %v552_v19 = vld [vmem:[%s9724_s0 + $0x108] sm:$0xff] }
  0x9d   : > { %783 = vmatprep.mubr.f32.mxu0 %v5538_v42  ;;  %999 = vmatprep.mubr.f32.mxu1 %v5538_v42  ;;  %v588_v20 = vld [vmem:[%s9724_s0 + $0x228] sm:$0xff] }
  0x9f   : > { %2316 = vperm.xlu0 %5504, %v2114_v2   ;;  %2341 = vperm.xlu1 %5505, %v2119_v9  }
  0xa0   : > { %784 = vmatmul.mubr.f32.gmra.mrb[32].mxu0 %v535_v23  ;;  %1000 = vmatmul.mubr.f32.gmra.mrb[32].mxu1 %v571_v24  ;;  %v553_v23 = vld [vmem:[%s9724_s0 + $0x110] sm:$0xff] }
  0xa1   : > { %789 = vmatprep.mubr.f32.mxu0 %v5538_v42  ;;  %1005 = vmatprep.mubr.f32.mxu1 %v5538_v42  ;;  %v589_v24 = vld [vmem:[%s9724_s0 + $0x230] sm:$0xff] }
  0xa3   : > { %2326 = vperm.xlu0 %5504, %v2116_v6   ;;  %2361 = vperm.xlu1 %5505, %v2123_v13  }
  0xa4   : > { %790 = vmatmul.mubr.f32.gmra.mrb[34].mxu0 %v536_v27  ;;  %1006 = vmatmul.mubr.f32.gmra.mrb[34].mxu1 %v572_v28  ;;  %v554_v27 = vld [vmem:[%s9724_s0 + $0x118] sm:$0xff] }
  0xa5   : > { %795 = vmatprep.mubr.f32.mxu0 %v5538_v42  ;;  %1011 = vmatprep.mubr.f32.mxu1 %v5538_v42  ;;  %v590_v28 = vld [vmem:[%s9724_s0 + $0x238] sm:$0xff] }
  0xa7   : > { %2351 = vperm.xlu0 %5504, %v2121_v10   ;;  %2381 = vperm.xlu1 %5505, %v2127_v17  }
  0xa8   : > { %796 = vmatmul.mubr.f32.gmra.mrb[36].mxu0 %v537_v29  ;;  %1012 = vmatmul.mubr.f32.gmra.mrb[36].mxu1 %v573_v30  ;;  %v2109_v29 = vld [vmem:[%s9725_s1 + $0xd8] sm:$0xff]  ;;  %v2111_v30 = vld [vmem:[%s9725_s1 + $0xe8] sm:$0xff] }
  0xa9   : > { %801 = vmatprep.mubr.f32.mxu0 %v5538_v42  ;;  %1017 = vmatprep.mubr.f32.mxu1 %v5538_v42 }
  0xab   : > { %2371 = vperm.xlu0 %5504, %v2125_v14   ;;  %2401 = vperm.xlu1 %5505, %v2131_v21  }
  0xac   : > { %802 = vmatmul.mubr.f32.gmra.mrb[38].mxu0 %v538_v31  ;;  %1018 = vmatmul.mubr.f32.gmra.mrb[38].mxu1 %v574_v32  ;;  %v2115_v31 = vld [vmem:[%s9725_s1 + $0x108] sm:$0xff]  ;;  %v2117_v32 = vld [vmem:[%s9725_s1 + $0x118] sm:$0xff] }
  0xad   : > { %807 = vmatprep.mubr.f32.mxu0 %v5538_v42  ;;  %1023 = vmatprep.mubr.f32.mxu1 %v5538_v42 }
  0xaf   : > { %2391 = vperm.xlu0 %5504, %v2129_v18   ;;  %2271 = vperm.xlu1 %5505, %v2105_v25  }
  0xb0   : > { %808 = vmatmul.mubr.f32.gmra.mrb[40].mxu0 %v539_v33  ;;  %1024 = vmatmul.mubr.f32.gmra.mrb[40].mxu1 %v575_v34  ;;  %v2134_v33 = vld [vmem:[%s9725_s1 + $0x1a0] sm:$0xff]  ;;  %v2135_v34 = vld [vmem:[%s9725_s1 + $0x1a8] sm:$0xff] }
  0xb1   : > { %813 = vmatprep.mubr.f32.mxu0 %v5538_v42  ;;  %1029 = vmatprep.mubr.f32.mxu1 %v5538_v42 }
  0xb3   : > { %2411 = vperm.xlu0 %5504, %v2133_v22   ;;  %2291 = vperm.xlu1 %5505, %v2109_v29  }
  0xb4   : > { %814 = vmatmul.mubr.f32.gmra.mrb[42].mxu0 %v540_v35  ;;  %1030 = vmatmul.mubr.f32.gmra.mrb[42].mxu1 %v576_v36  ;;  %v2137_v35 = vld [vmem:[%s9725_s1 + $0x1b8] sm:$0xff]  ;;  %v2139_v36 = vld [vmem:[%s9725_s1 + $0x1c8] sm:$0xff] }
  0xb5   : > { %819 = vmatprep.mubr.f32.mxu0 %v5538_v42  ;;  %1035 = vmatprep.mubr.f32.mxu1 %v5538_v42 }
  0xb7   : > { %2281 = vperm.xlu0 %5504, %v2107_v26  }
  0xb8   : > { %820 = vmatmul.mubr.f32.gmra.mrb[44].mxu0 %v541_v38  ;;  %1036 = vmatmul.mubr.f32.gmra.mrb[44].mxu1 %v577_v39  ;;  %v2143_v38 = vld [vmem:[%s9725_s1 + $0x1e8] sm:$0xff]  ;;  %v2145_v39 = vld [vmem:[%s9725_s1 + $0x1f8] sm:$0xff] }
  0xb9   : > { %825 = vmatprep.mubr.f32.mxu0 %v5538_v42  ;;  %1041 = vmatprep.mubr.f32.mxu1 %v5538_v42 }
  0xbb   : > { %2301 = vperm.xlu0 %5504, %v2111_v30  }
  0xbc   : > { %826 = vmatmul.mubr.f32.gmra.mrb[46].mxu0 %v542_v43  ;;  %1042 = vmatmul.mubr.f32.gmra.mrb[46].mxu1 %v578_v44  ;;  %v2151_v43 = vld [vmem:[%s9725_s1 + $0x228] sm:$0xff]  ;;  %v2152_v44 = vld [vmem:[%s9725_s1 + $0x230] sm:$0xff] }
  0xbd   : > { %831 = vmatprep.mubr.f32.mxu0 %v5538_v42  ;;  %1047 = vmatprep.mubr.f32.mxu1 %v5538_v42 }
  0xbf   : > { %2321 = vperm.xlu0 %5504, %v2115_v31  }
  0xc0   : > { %832 = vmatmul.mubr.f32.gmra.mrb[48].mxu0 %v543_v47  ;;  %1048 = vmatmul.mubr.f32.gmra.mrb[48].mxu1 %v579_v48 }
  0xc1   : > { %837 = vmatprep.mubr.f32.mxu0 %v5538_v42  ;;  %1053 = vmatprep.mubr.f32.mxu1 %v5538_v42 }
  0xc3   : > { %2416 = vperm.xlu0 %5504, %v2134_v33  }
  0xc4   : > { %838 = vmatmul.mubr.f32.gmra.mrb[50].mxu0 %v544_v51  ;;  %1054 = vmatmul.mubr.f32.gmra.mrb[50].mxu1 %v580_v52 }
  0xc5   : > { %843 = vmatprep.mubr.f32.mxu0 %v5538_v42  ;;  %1059 = vmatprep.mubr.f32.mxu1 %v5538_v42 }
  0xc7   : > { %2431 = vperm.xlu0 %5504, %v2137_v35  }
  0xc8   : > { %844 = vmatmul.mubr.f32.gmra.mrb[52].mxu0 %v545_v55  ;;  %1060 = vmatmul.mubr.f32.gmra.mrb[52].mxu1 %v581_v56 }
  0xc9   : > { %849 = vmatprep.mubr.f32.mxu0 %v5538_v42  ;;  %1065 = vmatprep.mubr.f32.mxu1 %v5538_v42 }
  0xcb   : > { %2451 = vperm.xlu0 %5504, %v2141_v37  }
  0xcc   : > { %850 = vmatmul.mubr.f32.gmra.mrb[54].mxu0 %v546_v59  ;;  %1066 = vmatmul.mubr.f32.gmra.mrb[54].mxu1 %v582_v60 }
  0xcd   : > { %855 = vmatprep.mubr.f32.mxu0 %v5538_v42  ;;  %1071 = vmatprep.mubr.f32.mxu1 %v5538_v42 }
  0xcf   : > { %2471 = vperm.xlu0 %5504, %v2145_v39  }
  0xd0   : > { %856 = vmatmul.mubr.f32.gmra.mrb[56].mxu0 %v547_v63  ;;  %1072 = vmatmul.mubr.f32.gmra.mrb[56].mxu1 %v583_v0 }
  0xd1   : > { %861 = vmatprep.mubr.f32.mxu0 %v5538_v42  ;;  %1077 = vmatprep.mubr.f32.mxu1 %v5538_v42 }
  0xd3   : > { %2491 = vperm.xlu0 %5504, %v2149_v41  }
  0xd4   : > { %862 = vmatmul.mubr.f32.gmra.mrb[58].mxu0 %v548_v3  ;;  %1078 = vmatmul.mubr.f32.gmra.mrb[58].mxu1 %v584_v4 }
  0xd5   : > { %867 = vmatprep.mubr.f32.mxu0 %v5538_v42  ;;  %1083 = vmatprep.mubr.f32.mxu1 %v5538_v42 }
  0xd7   : > { %2506 = vperm.xlu0 %5504, %v2152_v44  }
  0xd8   : > { %868 = vmatmul.mubr.f32.gmra.mrb[60].mxu0 %v549_v7  ;;  %1084 = vmatmul.mubr.f32.gmra.mrb[60].mxu1 %v585_v8 }
  0xd9   : > { %873 = vmatprep.mubr.f32.mxu0 %v5538_v42  ;;  %1089 = vmatprep.mubr.f32.mxu1 %v5538_v42 }
  0xdc   : > { %874 = vmatmul.mubr.f32.gmra.mrb[62].mxu0 %v550_v11  ;;  %1090 = vmatmul.mubr.f32.gmra.mrb[62].mxu1 %v586_v12 }
  0xdd   : > { %879 = vmatprep.mubr.f32.mxu0 %v5538_v42  ;;  %1095 = vmatprep.mubr.f32.mxu1 %v5538_v42 }
  0xe0   : > { %880 = vmatmul.mubr.f32.gmra.mrb[64].mxu0 %v551_v15  ;;  %1096 = vmatmul.mubr.f32.gmra.mrb[64].mxu1 %v587_v16 }
  0xe1   : > { %885 = vmatprep.mubr.f32.mxu0 %v5538_v42  ;;  %1101 = vmatprep.mubr.f32.mxu1 %v5538_v42 }
  0xe4   : > { %886 = vmatmul.mubr.f32.gmra.mrb[66].mxu0 %v552_v19  ;;  %1102 = vmatmul.mubr.f32.gmra.mrb[66].mxu1 %v588_v20 }
  0xe5   : > { %891 = vmatprep.mubr.f32.mxu0 %v5538_v42  ;;  %1107 = vmatprep.mubr.f32.mxu1 %v5538_v42 }
  0xe8   : > { %892 = vmatmul.mubr.f32.gmra.mrb[68].mxu0 %v553_v23  ;;  %1108 = vmatmul.mubr.f32.gmra.mrb[68].mxu1 %v589_v24 }
  0xe9   : > { %897 = vmatprep.mubr.f32.mxu0 %v5538_v42  ;;  %1113 = vmatprep.mubr.f32.mxu1 %v5538_v42  ;;  %v2113_v42 = vld [vmem:[%s9725_s1 + $0xf8] sm:$0xff] }
  0xea   : > { %2311 = vperm.xlu1 %5505, %v2113_v42  }
  0xec   : > { %898 = vmatmul.mubr.f32.gmra.mrb[70].mxu0 %v554_v27  ;;  %1114 = vmatmul.mubr.f32.gmra.mrb[70].mxu1 %v590_v28 }
  0xee   : > { %2331 = vperm.xlu1 %5505, %v2117_v32  }
  0xf2   : > { %2421 = vperm.xlu1 %5505, %v2135_v34  }
  0xf6   : > { %2441 = vperm.xlu1 %5505, %v2139_v36  }
  0xfa   : > { %2461 = vperm.xlu1 %5505, %v2143_v38  }
  0xfe   : > { %2481 = vperm.xlu1 %5505, %v2147_v40  }
 0x102   : > { %2501 = vperm.xlu1 %5505, %v2151_v43  }
 0x106   : > { %2511 = vperm.xlu1 %5505, %v2153_v45  }
 0x133   : > { %v6252_v46 = vpop.f32.mrb[0].mxu0  ;;  %v6254_v47 = vpop.f32.mrb[0].mxu1 }
 0x134   : > { %10088 = vst [vmem:[#allocation6_spill] sm:$0xff] %v6252_v46  ;;  %v6256_v48 = vpop.f32.mrb[1].mxu0  ;;  %v6258_v49 = vpop.f32.mrb[1].mxu1  ;;  %v1274_v52 = vmul.f32 %v6252_v46, %v6252_v46 }
 0x135   : > { %10089 = vst [vmem:[#allocation7_spill] sm:$0xff] %v6256_v48  ;;  %v1275_v57 = vmul.f32 %v6256_v48, %v6256_v48 }
 0x137   : > { %v6260_v50 = vpop.f32.mrb[2].mxu0  ;;  %v6262_v51 = vpop.f32.mrb[2].mxu1 }
 0x138   : > { %10090 = vst [vmem:[#allocation8_spill] sm:$0xff] %v6260_v50  ;;  %v1120_v53 = vadd.f32 %v6260_v50, %v6252_v46  ;;  %v1276_v54 = vmul.f32 %v6260_v50, %v6260_v50  ;;  %v6270_v55 = vpop.f32.mrb[3].mxu0  ;;  %v6272_v56 = vpop.f32.mrb[3].mxu1 }
 0x139   : > { %10091 = vst [vmem:[#allocation9_spill] sm:$0xff] %v6270_v55  ;;  %v1197_v58 = vadd.f32 %v6270_v55, %v6256_v48  ;;  %v1277_v59 = vmul.f32 %v6270_v55, %v6270_v55 }
 0x13a   : > { %v1418_v60 = vadd.f32 %v1276_v54, %v1274_v52 }
 0x13b   : > { %v1495_v61 = vadd.f32 %v1277_v59, %v1275_v57  ;;  %v6280_v62 = vpop.f32.mrb[4].mxu0  ;;  %v6282_v63 = vpop.f32.mrb[4].mxu1 }
 0x13c   : > { %10092 = vst [vmem:[#allocation10_spill] sm:$0xff] %v6280_v62  ;;  %v1121_v0 = vadd.f32 %v1120_v53, %v6280_v62  ;;  %v1278_v1 = vmul.f32 %v6280_v62, %v6280_v62  ;;  %v6287_v2 = vpop.f32.mrb[5].mxu0  ;;  %v6289_v3 = vpop.f32.mrb[5].mxu1 }
 0x13d   : > { %10093 = vst [vmem:[#allocation11_spill] sm:$0xff] %v6287_v2  ;;  %v1198_v4 = vadd.f32 %v1197_v58, %v6287_v2  ;;  %v1279_v5 = vmul.f32 %v6287_v2, %v6287_v2 }
 0x13e   : > { %v1419_v6 = vadd.f32 %v1418_v60, %v1278_v1 }
 0x13f   : > { %v1496_v7 = vadd.f32 %v1495_v61, %v1279_v5  ;;  %v6294_v8 = vpop.f32.mrb[6].mxu0  ;;  %v6296_v9 = vpop.f32.mrb[6].mxu1 }
 0x140   : > { %10094 = vst [vmem:[#allocation12_spill] sm:$0xff] %v6294_v8  ;;  %v1122_v10 = vadd.f32 %v1121_v0, %v6294_v8  ;;  %v1280_v11 = vmul.f32 %v6294_v8, %v6294_v8  ;;  %v6301_v12 = vpop.f32.mrb[7].mxu0  ;;  %v6303_v13 = vpop.f32.mrb[7].mxu1 }
 0x141   : > { %10095 = vst [vmem:[#allocation13_spill] sm:$0xff] %v6301_v12  ;;  %v1199_v14 = vadd.f32 %v1198_v4, %v6301_v12  ;;  %v1281_v15 = vmul.f32 %v6301_v12, %v6301_v12 }
 0x142   : > { %v1420_v16 = vadd.f32 %v1419_v6, %v1280_v11 }
 0x143   : > { %v1497_v17 = vadd.f32 %v1496_v7, %v1281_v15  ;;  %v6308_v18 = vpop.f32.mrb[8].mxu0  ;;  %v6310_v19 = vpop.f32.mrb[8].mxu1 }
 0x144   : > { %10096 = vst [vmem:[#allocation14_spill] sm:$0xff] %v6308_v18  ;;  %v1123_v20 = vadd.f32 %v1122_v10, %v6308_v18  ;;  %v1282_v21 = vmul.f32 %v6308_v18, %v6308_v18  ;;  %v6315_v22 = vpop.f32.mrb[9].mxu0  ;;  %v6317_v23 = vpop.f32.mrb[9].mxu1 }
 0x145   : > { %10097 = vst [vmem:[#allocation15_spill] sm:$0xff] %v6315_v22  ;;  %v1200_v24 = vadd.f32 %v1199_v14, %v6315_v22  ;;  %v1283_v25 = vmul.f32 %v6315_v22, %v6315_v22 }
 0x146   : > { %v1421_v26 = vadd.f32 %v1420_v16, %v1282_v21 }
 0x147   : > { %v1498_v27 = vadd.f32 %v1497_v17, %v1283_v25  ;;  %v6322_v28 = vpop.f32.mrb[10].mxu0  ;;  %v6324_v29 = vpop.f32.mrb[10].mxu1 }
 0x148   : > { %10098 = vst [vmem:[#allocation16_spill] sm:$0xff] %v6322_v28  ;;  %v1124_v30 = vadd.f32 %v1123_v20, %v6322_v28  ;;  %v1284_v42 = vmul.f32 %v6322_v28, %v6322_v28  ;;  %v6329_v31 = vpop.f32.mrb[11].mxu0  ;;  %v6331_v32 = vpop.f32.mrb[11].mxu1 }
 0x149   : > { %10099 = vst [vmem:[#allocation17_spill] sm:$0xff] %v6329_v31  ;;  %v1201_v33 = vadd.f32 %v1200_v24, %v6329_v31  ;;  %v1285_v34 = vmul.f32 %v6329_v31, %v6329_v31 }
 0x14a   : > { %v1422_v35 = vadd.f32 %v1421_v26, %v1284_v42 }
 0x14b   : > { %v1499_v36 = vadd.f32 %v1498_v27, %v1285_v34  ;;  %v6336_v37 = vpop.f32.mrb[12].mxu0  ;;  %v6338_v38 = vpop.f32.mrb[12].mxu1 }
 0x14c   : > { %10100 = vst [vmem:[#allocation18_spill] sm:$0xff] %v6336_v37  ;;  %v1125_v39 = vadd.f32 %v1124_v30, %v6336_v37  ;;  %v1286_v40 = vmul.f32 %v6336_v37, %v6336_v37  ;;  %v6343_v41 = vpop.f32.mrb[13].mxu0  ;;  %v6345_v43 = vpop.f32.mrb[13].mxu1 }
 0x14d   : > { %10101 = vst [vmem:[#allocation19_spill] sm:$0xff] %v6343_v41  ;;  %v1202_v44 = vadd.f32 %v1201_v33, %v6343_v41  ;;  %v1287_v45 = vmul.f32 %v6343_v41, %v6343_v41 }
 0x14e   : > { %v1423_v52 = vadd.f32 %v1422_v35, %v1286_v40 }
 0x14f   : > { %v1500_v53 = vadd.f32 %v1499_v36, %v1287_v45  ;;  %v6350_v54 = vpop.f32.mrb[14].mxu0  ;;  %v6352_v57 = vpop.f32.mrb[14].mxu1 }
 0x150   : > { %10102 = vst [vmem:[#allocation20_spill] sm:$0xff] %v6350_v54  ;;  %v1126_v58 = vadd.f32 %v1125_v39, %v6350_v54  ;;  %v1288_v59 = vmul.f32 %v6350_v54, %v6350_v54  ;;  %v6357_v60 = vpop.f32.mrb[15].mxu0  ;;  %v6359_v61 = vpop.f32.mrb[15].mxu1 }
 0x151   : > { %10103 = vst [vmem:[#allocation21_spill] sm:$0xff] %v6357_v60  ;;  %v1203_v0 = vadd.f32 %v1202_v44, %v6357_v60  ;;  %v1289_v1 = vmul.f32 %v6357_v60, %v6357_v60 }
 0x152   : > { %v1424_v4 = vadd.f32 %v1423_v52, %v1288_v59 }
 0x153   : > { %v1501_v5 = vadd.f32 %v1500_v53, %v1289_v1  ;;  %v6364_v6 = vpop.f32.mrb[16].mxu0  ;;  %v6366_v7 = vpop.f32.mrb[16].mxu1 }
 0x154   : > { %10104 = vst [vmem:[#allocation22_spill] sm:$0xff] %v6364_v6  ;;  %v1127_v10 = vadd.f32 %v1126_v58, %v6364_v6  ;;  %v1290_v11 = vmul.f32 %v6364_v6, %v6364_v6  ;;  %v6371_v14 = vpop.f32.mrb[17].mxu0  ;;  %v6373_v15 = vpop.f32.mrb[17].mxu1 }
 0x155   : > { %10105 = vst [vmem:[#allocation23_spill] sm:$0xff] %v6371_v14  ;;  %v1204_v16 = vadd.f32 %v1203_v0, %v6371_v14  ;;  %v1291_v17 = vmul.f32 %v6371_v14, %v6371_v14 }
 0x156   : > { %v1425_v20 = vadd.f32 %v1424_v4, %v1290_v11 }
 0x157   : > { %v1502_v21 = vadd.f32 %v1501_v5, %v1291_v17  ;;  %v6378_v24 = vpop.f32.mrb[18].mxu0  ;;  %v6380_v25 = vpop.f32.mrb[18].mxu1 }
 0x158   : > { %10106 = vst [vmem:[#allocation24_spill] sm:$0xff] %v6378_v24  ;;  %v1128_v26 = vadd.f32 %v1127_v10, %v6378_v24  ;;  %v1292_v27 = vmul.f32 %v6378_v24, %v6378_v24  ;;  %v6385_v30 = vpop.f32.mrb[19].mxu0  ;;  %v6387_v42 = vpop.f32.mrb[19].mxu1 }
 0x159   : > { %10107 = vst [vmem:[#allocation25_spill] sm:$0xff] %v6385_v30  ;;  %v1205_v33 = vadd.f32 %v1204_v16, %v6385_v30  ;;  %v1293_v34 = vmul.f32 %v6385_v30, %v6385_v30 }
 0x15a   : > { %v1426_v35 = vadd.f32 %v1425_v20, %v1292_v27 }
 0x15b   : > { %v1503_v36 = vadd.f32 %v1502_v21, %v1293_v34  ;;  %v6392_v39 = vpop.f32.mrb[20].mxu0  ;;  %v6394_v40 = vpop.f32.mrb[20].mxu1 }
 0x15c   : > { %10108 = vst [vmem:[#allocation26_spill] sm:$0xff] %v6392_v39  ;;  %v1129_v44 = vadd.f32 %v1128_v26, %v6392_v39  ;;  %v1294_v45 = vmul.f32 %v6392_v39, %v6392_v39  ;;  %v6399_v52 = vpop.f32.mrb[21].mxu0  ;;  %v6401_v53 = vpop.f32.mrb[21].mxu1 }
 0x15d   : > { %10109 = vst [vmem:[#allocation27_spill] sm:$0xff] %v6399_v52  ;;  %v1206_v58 = vadd.f32 %v1205_v33, %v6399_v52  ;;  %v1295_v59 = vmul.f32 %v6399_v52, %v6399_v52 }
 0x15e   : > { %v1427_v0 = vadd.f32 %v1426_v35, %v1294_v45 }
 0x15f   : > { %v1504_v1 = vadd.f32 %v1503_v36, %v1295_v59  ;;  %v6406_v4 = vpop.f32.mrb[22].mxu0  ;;  %v6408_v5 = vpop.f32.mrb[22].mxu1 }
 0x160   : > { %10110 = vst [vmem:[#allocation28_spill] sm:$0xff] %v6406_v4  ;;  %v1130_v10 = vadd.f32 %v1129_v44, %v6406_v4  ;;  %v1296_v11 = vmul.f32 %v6406_v4, %v6406_v4  ;;  %v6413_v16 = vpop.f32.mrb[23].mxu0  ;;  %v6415_v17 = vpop.f32.mrb[23].mxu1 }
 0x161   : > { %10111 = vst [vmem:[#allocation29_spill] sm:$0xff] %v6413_v16  ;;  %v1207_v20 = vadd.f32 %v1206_v58, %v6413_v16  ;;  %v1297_v21 = vmul.f32 %v6413_v16, %v6413_v16 }
 0x162   : > { %v1428_v26 = vadd.f32 %v1427_v0, %v1296_v11 }
 0x163   : > { %v1505_v27 = vadd.f32 %v1504_v1, %v1297_v21  ;;  %v6420_v33 = vpop.f32.mrb[24].mxu0  ;;  %v6422_v34 = vpop.f32.mrb[24].mxu1 }
 0x164   : > { %10112 = vst [vmem:[#allocation30_spill] sm:$0xff] %v6420_v33  ;;  %v1131_v35 = vadd.f32 %v1130_v10, %v6420_v33  ;;  %v1298_v36 = vmul.f32 %v6420_v33, %v6420_v33  ;;  %v6427_v44 = vpop.f32.mrb[25].mxu0  ;;  %v6429_v45 = vpop.f32.mrb[25].mxu1 }
 0x165   : > { %10113 = vst [vmem:[#allocation31_spill] sm:$0xff] %v6427_v44  ;;  %v1208_v58 = vadd.f32 %v1207_v20, %v6427_v44  ;;  %v1299_v59 = vmul.f32 %v6427_v44, %v6427_v44 }
 0x166   : > { %v1429_v0 = vadd.f32 %v1428_v26, %v1298_v36 }
 0x167   : > { %v1506_v1 = vadd.f32 %v1505_v27, %v1299_v59  ;;  %v6434_v11 = vpop.f32.mrb[26].mxu0  ;;  %v6436_v21 = vpop.f32.mrb[26].mxu1 }
 0x168   : > { %10114 = vst [vmem:[#allocation32_spill] sm:$0xff] %v6434_v11  ;;  %v1132_v10 = vadd.f32 %v1131_v35, %v6434_v11  ;;  %v1300_v33 = vmul.f32 %v6434_v11, %v6434_v11  ;;  %v6441_v4 = vpop.f32.mrb[27].mxu0  ;;  %v6443_v16 = vpop.f32.mrb[27].mxu1 }
 0x169   : > { %10115 = vst [vmem:[#allocation33_spill] sm:$0xff] %v6441_v4  ;;  %v1209_v20 = vadd.f32 %v1208_v58, %v6441_v4  ;;  %v1301_v44 = vmul.f32 %v6441_v4, %v6441_v4 }
 0x16a   : > { %v1430_v26 = vadd.f32 %v1429_v0, %v1300_v33 }
 0x16b   : > { %v1507_v27 = vadd.f32 %v1506_v1, %v1301_v44  ;;  %v6448_v36 = vpop.f32.mrb[28].mxu0  ;;  %v6450_v59 = vpop.f32.mrb[28].mxu1 }
 0x16c   : > { %10116 = vst [vmem:[#allocation34_spill] sm:$0xff] %v6448_v36  ;;  %v1133_v35 = vadd.f32 %v1132_v10, %v6448_v36  ;;  %v1302_v11 = vmul.f32 %v6448_v36, %v6448_v36  ;;  %v6455_v39 = vpop.f32.mrb[29].mxu0  ;;  %v6457_v24 = vpop.f32.mrb[29].mxu1 }
 0x16d   : > { %10117 = vst [vmem:[#allocation35_spill] sm:$0xff] %v6455_v39  ;;  %v1210_v58 = vadd.f32 %v1209_v20, %v6455_v39  ;;  %v1303_v4 = vmul.f32 %v6455_v39, %v6455_v39 }
 0x16e   : > { %v1431_v33 = vadd.f32 %v1430_v26, %v1302_v11 }
 0x16f   : > { %v1508_v44 = vadd.f32 %v1507_v27, %v1303_v4  ;;  %v6462_v0 = vpop.f32.mrb[30].mxu0  ;;  %v6464_v1 = vpop.f32.mrb[30].mxu1 }
 0x170   : > { %10118 = vst [vmem:[#allocation36_spill] sm:$0xff] %v6462_v0  ;;  %v1134_v10 = vadd.f32 %v1133_v35, %v6462_v0  ;;  %v1304_v36 = vmul.f32 %v6462_v0, %v6462_v0  ;;  %v6469_v52 = vpop.f32.mrb[31].mxu0  ;;  %v6471_v6 = vpop.f32.mrb[31].mxu1 }
 0x171   : > { %10119 = vst [vmem:[#allocation37_spill] sm:$0xff] %v6469_v52  ;;  %v1211_v20 = vadd.f32 %v1210_v58, %v6469_v52  ;;  %v1305_v39 = vmul.f32 %v6469_v52, %v6469_v52 }
 0x172   : > { %v1432_v11 = vadd.f32 %v1431_v33, %v1304_v36 }
 0x173   : > { %v1509_v4 = vadd.f32 %v1508_v44, %v1305_v39  ;;  %v6476_v26 = vpop.f32.mrb[32].mxu0  ;;  %v6478_v27 = vpop.f32.mrb[32].mxu1 }
 0x174   : > { %10120 = vst [vmem:[#allocation38_spill] sm:$0xff] %v6476_v26  ;;  %v1135_v35 = vadd.f32 %v1134_v10, %v6476_v26  ;;  %v1306_v0 = vmul.f32 %v6476_v26, %v6476_v26  ;;  %v6483_v54 = vpop.f32.mrb[33].mxu0  ;;  %v6485_v30 = vpop.f32.mrb[33].mxu1 }
 0x175   : > { %10121 = vst [vmem:[#allocation39_spill] sm:$0xff] %v6483_v54  ;;  %v1212_v58 = vadd.f32 %v1211_v20, %v6483_v54  ;;  %v1307_v52 = vmul.f32 %v6483_v54, %v6483_v54 }
 0x176   : > { %v1433_v36 = vadd.f32 %v1432_v11, %v1306_v0 }
 0x177   : > { %v1510_v39 = vadd.f32 %v1509_v4, %v1307_v52  ;;  %v6490_v33 = vpop.f32.mrb[34].mxu0  ;;  %v6492_v44 = vpop.f32.mrb[34].mxu1 }
 0x178   : > { %10122 = vst [vmem:[#allocation40_spill] sm:$0xff] %v6490_v33  ;;  %v1136_v10 = vadd.f32 %v1135_v35, %v6490_v33  ;;  %v1308_v26 = vmul.f32 %v6490_v33, %v6490_v33  ;;  %v6497_v14 = vpop.f32.mrb[35].mxu0  ;;  %v6499_v37 = vpop.f32.mrb[35].mxu1 }
 0x179   : > { %10123 = vst [vmem:[#allocation41_spill] sm:$0xff] %v6497_v14  ;;  %v1213_v20 = vadd.f32 %v1212_v58, %v6497_v14  ;;  %v1309_v54 = vmul.f32 %v6497_v14, %v6497_v14 }
 0x17a   : > { %v1434_v0 = vadd.f32 %v1433_v36, %v1308_v26 }
 0x17b   : > { %v1511_v52 = vadd.f32 %v1510_v39, %v1309_v54  ;;  %v6504_v11 = vpop.f32.mrb[36].mxu0  ;;  %v6506_v4 = vpop.f32.mrb[36].mxu1 }
 0x17c   : > { %10124 = vst [vmem:[#allocation42_spill] sm:$0xff] %v6504_v11  ;;  %v1137_v35 = vadd.f32 %v1136_v10, %v6504_v11  ;;  %v1310_v33 = vmul.f32 %v6504_v11, %v6504_v11  ;;  %v6511_v28 = vpop.f32.mrb[37].mxu0  ;;  %v6513_v60 = vpop.f32.mrb[37].mxu1 }
 0x17d   : > { %10125 = vst [vmem:[#allocation43_spill] sm:$0xff] %v6511_v28  ;;  %v1214_v58 = vadd.f32 %v1213_v20, %v6511_v28  ;;  %v1311_v14 = vmul.f32 %v6511_v28, %v6511_v28 }
 0x17e   : > { %v1435_v26 = vadd.f32 %v1434_v0, %v1310_v33 }
 0x17f   : > { %v1512_v54 = vadd.f32 %v1511_v52, %v1311_v14  ;;  %v803_v36 = vpop.f32.mrb[38].mxu0  ;;  %v6518_v39 = vpop.f32.mrb[38].mxu1 }
 0x180   : > { %v1138_v41 = vadd.f32 %v1137_v35, %v803_v36  ;;  %v1312_v18 = vmul.f32 %v803_v36, %v803_v36  ;;  %v805_v10 = vpop.f32.mrb[39].mxu0  ;;  %v6520_v31 = vpop.f32.mrb[39].mxu1 }
 0x181   : > { %v1215_v11 = vadd.f32 %v1214_v58, %v805_v10  ;;  %v1313_v22 = vmul.f32 %v805_v10, %v805_v10 }
 0x182   : > { %v1436_v8 = vadd.f32 %v1435_v26, %v1312_v18 }
 0x183   : > { %v1513_v62 = vadd.f32 %v1512_v54, %v1313_v22  ;;  %v6522_v12 = vpop.f32.mrb[40].mxu0  ;;  %v6524_v20 = vpop.f32.mrb[40].mxu1 }
 0x184   : > { %10126 = vst [vmem:[#allocation44_spill] sm:$0xff] %v6522_v12  ;;  %v1139_v28 = vadd.f32 %v1138_v41, %v6522_v12  ;;  %v1314_v14 = vmul.f32 %v6522_v12, %v6522_v12  ;;  %v6529_v33 = vpop.f32.mrb[41].mxu0  ;;  %v6531_v0 = vpop.f32.mrb[41].mxu1 }
 0x185   : > { %10127 = vst [vmem:[#allocation45_spill] sm:$0xff] %v6529_v33  ;;  %v1216_v52 = vadd.f32 %v1215_v11, %v6529_v33  ;;  %v1315_v35 = vmul.f32 %v6529_v33, %v6529_v33 }
 0x186   : > { %v1437_v18 = vadd.f32 %v1436_v8, %v1314_v14 }
 0x187   : > { %v1514_v22 = vadd.f32 %v1513_v62, %v1315_v35  ;;  %v815_v58 = vpop.f32.mrb[42].mxu0  ;;  %v6536_v26 = vpop.f32.mrb[42].mxu1 }
 0x188   : > { %v1140_v54 = vadd.f32 %v1139_v28, %v815_v58  ;;  %v1316_v36 = vmul.f32 %v815_v58, %v815_v58  ;;  %v817_v41 = vpop.f32.mrb[43].mxu0  ;;  %v6538_v10 = vpop.f32.mrb[43].mxu1 }
 0x189   : > { %10128 = vst [vmem:[#allocation46_spill] sm:$0xff] %v6538_v10  ;;  %v1217_v12 = vadd.f32 %v1216_v52, %v817_v41  ;;  %v1317_v50 = vmul.f32 %v817_v41, %v817_v41 }
 0x18a   : > { %v1438_v46 = vadd.f32 %v1437_v18, %v1316_v36 }
 0x18b   : > { %v1515_v2 = vadd.f32 %v1514_v22, %v1317_v50  ;;  %v6540_v55 = vpop.f32.mrb[44].mxu0  ;;  %v6542_v11 = vpop.f32.mrb[44].mxu1 }
 0x18c   : > { %10129 = vst [vmem:[#allocation47_spill] sm:$0xff] %v6540_v55  ;;  %10130 = vst [vmem:[#allocation48_spill] sm:$0xff] %v6542_v11  ;;  %v1141_v33 = vadd.f32 %v1140_v54, %v6540_v55  ;;  %v1318_v62 = vmul.f32 %v6540_v55, %v6540_v55  ;;  %v6547_v8 = vpop.f32.mrb[45].mxu0  ;;  %v6549_v28 = vpop.f32.mrb[45].mxu1 }
 0x18d   : > { %10131 = vst [vmem:[#allocation49_spill] sm:$0xff] %v6547_v8  ;;  %10132 = vst [vmem:[#allocation50_spill] sm:$0xff] %v6549_v28  ;;  %v1218_v14 = vadd.f32 %v1217_v12, %v6547_v8  ;;  %v1319_v52 = vmul.f32 %v6547_v8, %v6547_v8 }
 0x18e   : > { %v1439_v35 = vadd.f32 %v1438_v46, %v1318_v62 }
 0x18f   : > { %v1516_v50 = vadd.f32 %v1515_v2, %v1319_v52  ;;  %v827_v18 = vpop.f32.mrb[46].mxu0  ;;  %v6554_v22 = vpop.f32.mrb[46].mxu1 }
 0x190   : > { %10133 = vst [vmem:[#allocation51_spill] sm:$0xff] %v6554_v22  ;;  %v1142_v58 = vadd.f32 %v1141_v33, %v827_v18  ;;  %v1320_v36 = vmul.f32 %v827_v18, %v827_v18  ;;  %v829_v54 = vpop.f32.mrb[47].mxu0  ;;  %v6556_v41 = vpop.f32.mrb[47].mxu1 }
 0x191   : > { %10134 = vst [vmem:[#allocation52_spill] sm:$0xff] %v6556_v41  ;;  %v1219_v55 = vadd.f32 %v1218_v14, %v829_v54  ;;  %v1321_v48 = vmul.f32 %v829_v54, %v829_v54 }
 0x192   : > { %v1440_v11 = vadd.f32 %v1439_v35, %v1320_v36 }
 0x193   : > { %v1517_v10 = vadd.f32 %v1516_v50, %v1321_v48  ;;  %v6558_v28 = vpop.f32.mrb[48].mxu0  ;;  %v6560_v12 = vpop.f32.mrb[48].mxu1 }
 0x194   : > { %10135 = vst [vmem:[#allocation53_spill] sm:$0xff] %v6558_v28  ;;  %10136 = vst [vmem:[#allocation54_spill] sm:$0xff] %v6560_v12  ;;  %v1143_v8 = vadd.f32 %v1142_v58, %v6558_v28  ;;  %v1322_v46 = vmul.f32 %v6558_v28, %v6558_v28  ;;  %v6565_v2 = vpop.f32.mrb[49].mxu0  ;;  %v6567_v33 = vpop.f32.mrb[49].mxu1 }
 0x195   : > { %10137 = vst [vmem:[#allocation55_spill] sm:$0xff] %v6565_v2  ;;  %10138 = vst [vmem:[#allocation56_spill] sm:$0xff] %v6567_v33  ;;  %v1220_v62 = vadd.f32 %v1219_v55, %v6565_v2  ;;  %v1323_v14 = vmul.f32 %v6565_v2, %v6565_v2 }
 0x196   : > { %v1441_v52 = vadd.f32 %v1440_v11, %v1322_v46 }
 0x197   : > { %v1518_v48 = vadd.f32 %v1517_v10, %v1323_v14  ;;  %v839_v35 = vpop.f32.mrb[50].mxu0  ;;  %v6572_v50 = vpop.f32.mrb[50].mxu1 }
 0x198   : > { %10139 = vst [vmem:[#allocation57_spill] sm:$0xff] %v6572_v50  ;;  %v1144_v18 = vadd.f32 %v1143_v8, %v839_v35  ;;  %v1324_v36 = vmul.f32 %v839_v35, %v839_v35  ;;  %v841_v58 = vpop.f32.mrb[51].mxu0  ;;  %v6574_v54 = vpop.f32.mrb[51].mxu1 }
 0x199   : > { %10140 = vst [vmem:[#allocation58_spill] sm:$0xff] %v6574_v54  ;;  %v1221_v28 = vadd.f32 %v1220_v62, %v841_v58  ;;  %v1325_v12 = vmul.f32 %v841_v58, %v841_v58 }
 0x19a   : > { %v1442_v41 = vadd.f32 %v1441_v52, %v1324_v36 }
 0x19b   : > { %v1519_v22 = vadd.f32 %v1518_v48, %v1325_v12  ;;  %v6576_v33 = vpop.f32.mrb[52].mxu0  ;;  %v6578_v55 = vpop.f32.mrb[52].mxu1 }
 0x19c   : > { %10141 = vst [vmem:[#allocation59_spill] sm:$0xff] %v6576_v33  ;;  %10142 = vst [vmem:[#allocation60_spill] sm:$0xff] %v6578_v55  ;;  %v1145_v2 = vadd.f32 %v1144_v18, %v6576_v33  ;;  %v1326_v10 = vmul.f32 %v6576_v33, %v6576_v33  ;;  %v6583_v11 = vpop.f32.mrb[53].mxu0  ;;  %v6585_v8 = vpop.f32.mrb[53].mxu1 }
 0x19d   : > { %10143 = vst [vmem:[#allocation61_spill] sm:$0xff] %v6583_v11  ;;  %10144 = vst [vmem:[#allocation62_spill] sm:$0xff] %v6585_v8  ;;  %v1222_v46 = vadd.f32 %v1221_v28, %v6583_v11  ;;  %v1327_v62 = vmul.f32 %v6583_v11, %v6583_v11 }
 0x19e   : > { %v1443_v14 = vadd.f32 %v1442_v41, %v1326_v10 }
 0x19f   : > { %v1520_v12 = vadd.f32 %v1519_v22, %v1327_v62  ;;  %v851_v52 = vpop.f32.mrb[54].mxu0  ;;  %v6590_v48 = vpop.f32.mrb[54].mxu1 }
 0x1a0   : > { %10145 = vst [vmem:[#allocation63_spill] sm:$0xff] %v6590_v48  ;;  %v1146_v35 = vadd.f32 %v1145_v2, %v851_v52  ;;  %v1328_v36 = vmul.f32 %v851_v52, %v851_v52  ;;  %v853_v18 = vpop.f32.mrb[55].mxu0  ;;  %v6592_v58 = vpop.f32.mrb[55].mxu1 }
 0x1a1   : > { %10146 = vst [vmem:[#allocation64_spill] sm:$0xff] %v6592_v58  ;;  %v1223_v33 = vadd.f32 %v1222_v46, %v853_v18  ;;  %v1329_v55 = vmul.f32 %v853_v18, %v853_v18 }
 0x1a2   : > { %v1444_v54 = vadd.f32 %v1443_v14, %v1328_v36 }
 0x1a3   : > { %v1521_v50 = vadd.f32 %v1520_v12, %v1329_v55  ;;  %v6594_v8 = vpop.f32.mrb[56].mxu0  ;;  %v6596_v28 = vpop.f32.mrb[56].mxu1 }
 0x1a4   : > { %10147 = vst [vmem:[#allocation65_spill] sm:$0xff] %v6594_v8  ;;  %10148 = vst [vmem:[#allocation66_spill] sm:$0xff] %v6596_v28  ;;  %v1147_v11 = vadd.f32 %v1146_v35, %v6594_v8  ;;  %v1330_v22 = vmul.f32 %v6594_v8, %v6594_v8  ;;  %v6601_v41 = vpop.f32.mrb[57].mxu0  ;;  %v6603_v2 = vpop.f32.mrb[57].mxu1 }
 0x1a5   : > { %10149 = vst [vmem:[#allocation67_spill] sm:$0xff] %v6601_v41  ;;  %10150 = vst [vmem:[#allocation68_spill] sm:$0xff] %v6603_v2  ;;  %v1224_v10 = vadd.f32 %v1223_v33, %v6601_v41  ;;  %v1331_v46 = vmul.f32 %v6601_v41, %v6601_v41 }
 0x1a6   : > { %v1445_v62 = vadd.f32 %v1444_v54, %v1330_v22 }
 0x1a7   : > { %v1522_v55 = vadd.f32 %v1521_v50, %v1331_v46  ;;  %v863_v14 = vpop.f32.mrb[58].mxu0  ;;  %v6608_v12 = vpop.f32.mrb[58].mxu1 }
 0x1a8   : > { %10151 = vst [vmem:[#allocation69_spill] sm:$0xff] %v6608_v12  ;;  %v1148_v52 = vadd.f32 %v1147_v11, %v863_v14  ;;  %v1332_v36 = vmul.f32 %v863_v14, %v863_v14  ;;  %v865_v35 = vpop.f32.mrb[59].mxu0  ;;  %v6610_v18 = vpop.f32.mrb[59].mxu1 }
 0x1a9   : > { %10152 = vst [vmem:[#allocation70_spill] sm:$0xff] %v6610_v18  ;;  %v1225_v8 = vadd.f32 %v1224_v10, %v865_v35  ;;  %v1333_v28 = vmul.f32 %v865_v35, %v865_v35 }
 0x1aa   : > { %v1446_v58 = vadd.f32 %v1445_v62, %v1332_v36 }
 0x1ab   : > { %v1523_v48 = vadd.f32 %v1522_v55, %v1333_v28  ;;  %v6612_v2 = vpop.f32.mrb[60].mxu0  ;;  %v6614_v33 = vpop.f32.mrb[60].mxu1 }
 0x1ac   : > { %10153 = vst [vmem:[#allocation71_spill] sm:$0xff] %v6612_v2  ;;  %10154 = vst [vmem:[#allocation72_spill] sm:$0xff] %v6614_v33  ;;  %v1149_v41 = vadd.f32 %v1148_v52, %v6612_v2  ;;  %v1334_v50 = vmul.f32 %v6612_v2, %v6612_v2  ;;  %v6619_v54 = vpop.f32.mrb[61].mxu0  ;;  %v6621_v11 = vpop.f32.mrb[61].mxu1 }
 0x1ad   : > { %10155 = vst [vmem:[#allocation73_spill] sm:$0xff] %v6619_v54  ;;  %10156 = vst [vmem:[#allocation74_spill] sm:$0xff] %v6621_v11  ;;  %v1226_v22 = vadd.f32 %v1225_v8, %v6619_v54  ;;  %v1335_v10 = vmul.f32 %v6619_v54, %v6619_v54 }
 0x1ae   : > { %v1447_v46 = vadd.f32 %v1446_v58, %v1334_v50 }
 0x1af   : > { %v1524_v28 = vadd.f32 %v1523_v48, %v1335_v10  ;;  %v875_v62 = vpop.f32.mrb[62].mxu0  ;;  %v6626_v55 = vpop.f32.mrb[62].mxu1 }
 0x1b0   : > { %10157 = vst [vmem:[#allocation75_spill] sm:$0xff] %v6626_v55  ;;  %v1150_v14 = vadd.f32 %v1149_v41, %v875_v62  ;;  %v1336_v36 = vmul.f32 %v875_v62, %v875_v62  ;;  %v877_v52 = vpop.f32.mrb[63].mxu0  ;;  %v6628_v35 = vpop.f32.mrb[63].mxu1 }
 0x1b1   : > { %10158 = vst [vmem:[#allocation76_spill] sm:$0xff] %v6628_v35  ;;  %v1227_v2 = vadd.f32 %v1226_v22, %v877_v52  ;;  %v1337_v33 = vmul.f32 %v877_v52, %v877_v52 }
 0x1b2   : > { %v1448_v18 = vadd.f32 %v1447_v46, %v1336_v36 }
 0x1b3   : > { %v1525_v12 = vadd.f32 %v1524_v28, %v1337_v33  ;;  %v6630_v11 = vpop.f32.mrb[64].mxu0  ;;  %v6632_v8 = vpop.f32.mrb[64].mxu1 }
 0x1b4   : > { %10159 = vst [vmem:[#allocation77_spill] sm:$0xff] %v6630_v11  ;;  %10160 = vst [vmem:[#allocation78_spill] sm:$0xff] %v6632_v8  ;;  %v1151_v54 = vadd.f32 %v1150_v14, %v6630_v11  ;;  %v1338_v48 = vmul.f32 %v6630_v11, %v6630_v11  ;;  %v6637_v58 = vpop.f32.mrb[65].mxu0  ;;  %v6639_v41 = vpop.f32.mrb[65].mxu1 }
 0x1b5   : > { %10161 = vst [vmem:[#allocation79_spill] sm:$0xff] %v6637_v58  ;;  %10162 = vst [vmem:[#allocation80_spill] sm:$0xff] %v6639_v41  ;;  %v1228_v50 = vadd.f32 %v1227_v2, %v6637_v58  ;;  %v1339_v22 = vmul.f32 %v6637_v58, %v6637_v58 }
 0x1b6   : > { %v1449_v10 = vadd.f32 %v1448_v18, %v1338_v48 }
 0x1b7   : > { %v1526_v33 = vadd.f32 %v1525_v12, %v1339_v22  ;;  %v887_v46 = vpop.f32.mrb[66].mxu0  ;;  %v6644_v28 = vpop.f32.mrb[66].mxu1 }
 0x1b8   : > { %v1152_v62 = vadd.f32 %v1151_v54, %v887_v46  ;;  %v1340_v36 = vmul.f32 %v887_v46, %v887_v46  ;;  %v889_v14 = vpop.f32.mrb[67].mxu0  ;;  %v6646_v52 = vpop.f32.mrb[67].mxu1 }
 0x1b9   : > { %10163 = vst [vmem:[#allocation81_spill] sm:$0xff] %v6646_v52  ;;  %v1229_v11 = vadd.f32 %v1228_v50, %v889_v14  ;;  %v1341_v8 = vmul.f32 %v889_v14, %v889_v14 }
 0x1ba   : > { %v1450_v35 = vadd.f32 %v1449_v10, %v1340_v36 }
 0x1bb   : > { %v1527_v55 = vadd.f32 %v1526_v33, %v1341_v8  ;;  %v6648_v41 = vpop.f32.mrb[68].mxu0  ;;  %v6650_v2 = vpop.f32.mrb[68].mxu1 }
 0x1bc   : > { %10164 = vst [vmem:[#allocation82_spill] sm:$0xff] %v6648_v41  ;;  %10165 = vst [vmem:[#allocation83_spill] sm:$0xff] %v6650_v2  ;;  %v1153_v58 = vadd.f32 %v1152_v62, %v6648_v41  ;;  %v1342_v12 = vmul.f32 %v6648_v41, %v6648_v41  ;;  %v6655_v18 = vpop.f32.mrb[69].mxu0  ;;  %v6657_v54 = vpop.f32.mrb[69].mxu1 }
 0x1bd   : > { %10166 = vst [vmem:[#allocation84_spill] sm:$0xff] %v6655_v18  ;;  %10167 = vst [vmem:[#allocation85_spill] sm:$0xff] %v6657_v54  ;;  %v1230_v48 = vadd.f32 %v1229_v11, %v6655_v18  ;;  %v1343_v50 = vmul.f32 %v6655_v18, %v6655_v18  ;;  %v1346_v54 = vmul.f32 %v6254_v47, %v6254_v47 }
 0x1be   : > { %v1451_v22 = vadd.f32 %v1450_v35, %v1342_v12  ;;  %v1347_v35 = vmul.f32 %v6258_v49, %v6258_v49 }
 0x1bf   : > { %v1528_v8 = vadd.f32 %v1527_v55, %v1343_v50  ;;  %v899_v10 = vpop.f32.mrb[70].mxu0  ;;  %v6662_v33 = vpop.f32.mrb[70].mxu1 }
 0x1c0   : > { %v1154_v46 = vadd.f32 %v1153_v58, %v899_v10  ;;  %v1344_v36 = vmul.f32 %v899_v10, %v899_v10  ;;  %v901_v62 = vpop.f32.mrb[71].mxu0  ;;  %v6664_v14 = vpop.f32.mrb[71].mxu1  ;;  %v1348_v58 = vmul.f32 %v6262_v51, %v6262_v51 }
 0x1c1   : > { %v1231_v41 = vadd.f32 %v1230_v48, %v901_v62  ;;  %v1345_v2 = vmul.f32 %v901_v62, %v901_v62  ;;  %v1349_v48 = vmul.f32 %v6272_v56, %v6272_v56 }
 0x1c2   : > { %v1155_v11 = vadd.f32 %v1154_v46, %v6254_v47  ;;  %v1452_v52 = vadd.f32 %v1451_v22, %v1344_v36  ;;  %v1350_v22 = vmul.f32 %v6282_v63, %v6282_v63 }
 0x1c3   : > { %v1232_v55 = vadd.f32 %v1231_v41, %v6258_v49  ;;  %v1529_v12 = vadd.f32 %v1528_v8, %v1345_v2  ;;  %v1351_v41 = vmul.f32 %v6289_v3, %v6289_v3 }
 0x1c4   : > { %v1156_v50 = vadd.f32 %v1155_v11, %v6262_v51  ;;  %v1453_v10 = vadd.f32 %v1452_v52, %v1346_v54  ;;  %v1352_v52 = vmul.f32 %v6296_v9, %v6296_v9 }
 0x1c5   : > { %v1233_v62 = vadd.f32 %v1232_v55, %v6272_v56  ;;  %v1530_v18 = vadd.f32 %v1529_v12, %v1347_v35  ;;  %v1353_v35 = vmul.f32 %v6303_v13, %v6303_v13 }
 0x1c6   : > { %v1157_v46 = vadd.f32 %v1156_v50, %v6282_v63  ;;  %v1454_v36 = vadd.f32 %v1453_v10, %v1348_v58  ;;  %v1354_v58 = vmul.f32 %v6310_v19, %v6310_v19 }
 0x1c7   : > { %v1234_v2 = vadd.f32 %v1233_v62, %v6289_v3  ;;  %v1531_v8 = vadd.f32 %v1530_v18, %v1349_v48  ;;  %v1355_v18 = vmul.f32 %v6317_v23, %v6317_v23 }
 0x1c8   : > { %v1158_v54 = vadd.f32 %v1157_v46, %v6296_v9  ;;  %v1455_v11 = vadd.f32 %v1454_v36, %v1350_v22  ;;  %v1356_v22 = vmul.f32 %v6324_v29, %v6324_v29 }
 0x1c9   : > { %v1235_v55 = vadd.f32 %v1234_v2, %v6303_v13  ;;  %v1532_v12 = vadd.f32 %v1531_v8, %v1351_v41  ;;  %v1357_v41 = vmul.f32 %v6331_v32, %v6331_v32 }
 0x1ca   : > { %v1159_v50 = vadd.f32 %v1158_v54, %v6310_v19  ;;  %v1456_v10 = vadd.f32 %v1455_v11, %v1352_v52  ;;  %v1358_v52 = vmul.f32 %v6338_v38, %v6338_v38 }
 0x1cb   : > { %v1236_v48 = vadd.f32 %v1235_v55, %v6317_v23  ;;  %v1533_v62 = vadd.f32 %v1532_v12, %v1353_v35  ;;  %v1359_v35 = vmul.f32 %v6345_v43, %v6345_v43 }
 0x1cc   : > { %v1160_v46 = vadd.f32 %v1159_v50, %v6324_v29  ;;  %v1457_v36 = vadd.f32 %v1456_v10, %v1354_v58  ;;  %v1360_v58 = vmul.f32 %v6352_v57, %v6352_v57 }
 0x1cd   : > { %v1237_v2 = vadd.f32 %v1236_v48, %v6331_v32  ;;  %v1534_v8 = vadd.f32 %v1533_v62, %v1355_v18  ;;  %v1361_v18 = vmul.f32 %v6359_v61, %v6359_v61 }
 0x1ce   : > { %v1161_v54 = vadd.f32 %v1160_v46, %v6338_v38  ;;  %v1458_v11 = vadd.f32 %v1457_v36, %v1356_v22  ;;  %v1362_v22 = vmul.f32 %v6366_v7, %v6366_v7 }
 0x1cf   : > { %v1238_v55 = vadd.f32 %v1237_v2, %v6345_v43  ;;  %v1535_v12 = vadd.f32 %v1534_v8, %v1357_v41  ;;  %v1363_v41 = vmul.f32 %v6373_v15, %v6373_v15 }
 0x1d0   : > { %v1162_v50 = vadd.f32 %v1161_v54, %v6352_v57  ;;  %v1459_v10 = vadd.f32 %v1458_v11, %v1358_v52  ;;  %v1364_v52 = vmul.f32 %v6380_v25, %v6380_v25 }
 0x1d1   : > { %v1239_v48 = vadd.f32 %v1238_v55, %v6359_v61  ;;  %v1536_v62 = vadd.f32 %v1535_v12, %v1359_v35  ;;  %v1365_v35 = vmul.f32 %v6387_v42, %v6387_v42 }
 0x1d2   : > { %v1163_v46 = vadd.f32 %v1162_v50, %v6366_v7  ;;  %v1460_v36 = vadd.f32 %v1459_v10, %v1360_v58  ;;  %v1366_v58 = vmul.f32 %v6394_v40, %v6394_v40 }
 0x1d3   : > { %v1240_v2 = vadd.f32 %v1239_v48, %v6373_v15  ;;  %v1537_v8 = vadd.f32 %v1536_v62, %v1361_v18  ;;  %v1367_v18 = vmul.f32 %v6401_v53, %v6401_v53 }
 0x1d4   : > { %v1461_v54 = vadd.f32 %v1460_v36, %v1362_v22  ;;  %v1164_v11 = vadd.f32 %v1163_v46, %v6380_v25  ;;  %v1368_v22 = vmul.f32 %v6408_v5, %v6408_v5 }
 0x1d5   : > { %v1538_v55 = vadd.f32 %v1537_v8, %v1363_v41  ;;  %v1241_v12 = vadd.f32 %v1240_v2, %v6387_v42  ;;  %v1369_v41 = vmul.f32 %v6415_v17, %v6415_v17 }
 0x1d6   : > { %v1165_v50 = vadd.f32 %v1164_v11, %v6394_v40  ;;  %v1462_v10 = vadd.f32 %v1461_v54, %v1364_v52  ;;  %v1370_v52 = vmul.f32 %v6422_v34, %v6422_v34 }
 0x1d7   : > { %v1242_v48 = vadd.f32 %v1241_v12, %v6401_v53  ;;  %v1539_v62 = vadd.f32 %v1538_v55, %v1365_v35  ;;  %v1371_v35 = vmul.f32 %v6429_v45, %v6429_v45 }
 0x1d8   : > { %v1166_v46 = vadd.f32 %v1165_v50, %v6408_v5  ;;  %v1463_v36 = vadd.f32 %v1462_v10, %v1366_v58  ;;  %v1372_v58 = vmul.f32 %v6436_v21, %v6436_v21 }
 0x1d9   : > { %v1243_v2 = vadd.f32 %v1242_v48, %v6415_v17  ;;  %v1540_v8 = vadd.f32 %v1539_v62, %v1367_v18  ;;  %v1373_v18 = vmul.f32 %v6443_v16, %v6443_v16 }
 0x1da   : > { %v1167_v54 = vadd.f32 %v1166_v46, %v6422_v34  ;;  %v1464_v11 = vadd.f32 %v1463_v36, %v1368_v22  ;;  %v1374_v22 = vmul.f32 %v6450_v59, %v6450_v59 }
 0x1db   : > { %v1244_v55 = vadd.f32 %v1243_v2, %v6429_v45  ;;  %v1541_v12 = vadd.f32 %v1540_v8, %v1369_v41  ;;  %v1375_v41 = vmul.f32 %v6457_v24, %v6457_v24 }
 0x1dc   : > { %v1168_v50 = vadd.f32 %v1167_v54, %v6436_v21  ;;  %v1465_v10 = vadd.f32 %v1464_v11, %v1370_v52  ;;  %v1376_v52 = vmul.f32 %v6464_v1, %v6464_v1 }
 0x1dd   : > { %v1245_v48 = vadd.f32 %v1244_v55, %v6443_v16  ;;  %v1542_v62 = vadd.f32 %v1541_v12, %v1371_v35  ;;  %v1377_v35 = vmul.f32 %v6471_v6, %v6471_v6 }
 0x1de   : > { %v1169_v46 = vadd.f32 %v1168_v50, %v6450_v59  ;;  %v1466_v36 = vadd.f32 %v1465_v10, %v1372_v58  ;;  %v1378_v58 = vmul.f32 %v6478_v27, %v6478_v27 }
 0x1df   : > { %v1246_v2 = vadd.f32 %v1245_v48, %v6457_v24  ;;  %v1543_v8 = vadd.f32 %v1542_v62, %v1373_v18  ;;  %v1379_v18 = vmul.f32 %v6485_v30, %v6485_v30 }
 0x1e0   : > { %v1170_v54 = vadd.f32 %v1169_v46, %v6464_v1  ;;  %v1467_v11 = vadd.f32 %v1466_v36, %v1374_v22  ;;  %v1380_v22 = vmul.f32 %v6492_v44, %v6492_v44 }
 0x1e1   : > { %v1247_v55 = vadd.f32 %v1246_v2, %v6471_v6  ;;  %v1544_v12 = vadd.f32 %v1543_v8, %v1375_v41  ;;  %v1381_v41 = vmul.f32 %v6499_v37, %v6499_v37 }
 0x1e2   : > { %v1171_v50 = vadd.f32 %v1170_v54, %v6478_v27  ;;  %v1468_v10 = vadd.f32 %v1467_v11, %v1376_v52  ;;  %v1382_v52 = vmul.f32 %v6506_v4, %v6506_v4  ;;  %v1383_v11 = vmul.f32 %v6513_v60, %v6513_v60 }
 0x1e3   : > { %v1248_v48 = vadd.f32 %v1247_v55, %v6485_v30  ;;  %v1545_v62 = vadd.f32 %v1544_v12, %v1377_v35  ;;  %v1384_v12 = vmul.f32 %v6518_v39, %v6518_v39 }
 0x1e4   : > { %v1172_v46 = vadd.f32 %v1171_v50, %v6492_v44  ;;  %v1469_v36 = vadd.f32 %v1468_v10, %v1378_v58  ;;  %v1385_v50 = vmul.f32 %v6520_v31, %v6520_v31 }
 0x1e5   : > { %v1249_v2 = vadd.f32 %v1248_v48, %v6499_v37  ;;  %v1546_v8 = vadd.f32 %v1545_v62, %v1379_v18  ;;  %v1386_v48 = vmul.f32 %v6524_v20, %v6524_v20 }
 0x1e6   : > { %v1173_v27 = vadd.f32 %v1172_v46, %v6506_v4  ;;  %v1470_v54 = vadd.f32 %v1469_v36, %v1380_v22  ;;  %v1387_v46 = vmul.f32 %v6531_v0, %v6531_v0 }
 0x1e7   : > { %v1250_v30 = vadd.f32 %v1249_v2, %v6513_v60  ;;  %v1547_v35 = vadd.f32 %v1546_v8, %v1381_v41  ;;  %v1388_v41 = vmul.f32 %v6536_v26, %v6536_v26 }
 0x1e8   : > { %v1471_v44 = vadd.f32 %v1470_v54, %v1382_v52  ;;  %v1174_v55 = vadd.f32 %v1173_v27, %v6518_v39  ;;  %v10169_v54 = vld [vmem:[#allocation48_spill] sm:$0xff] }
 0x1e9   : > { %v1548_v37 = vadd.f32 %v1547_v35, %v1383_v11  ;;  %v1251_v58 = vadd.f32 %v1250_v30, %v6520_v31  ;;  %v10168_v31 = vld [vmem:[#allocation46_spill] sm:$0xff]  ;;  %v1390_v11 = vmul.f32 %v10169_v54, %v10169_v54 }
 0x1ea   : > { %v1472_v10 = vadd.f32 %v1471_v44, %v1384_v12  ;;  %v1175_v18 = vadd.f32 %v1174_v55, %v6524_v20  ;;  %v1389_v27 = vmul.f32 %v10168_v31, %v10168_v31  ;;  %v10170_v44 = vld [vmem:[#allocation50_spill] sm:$0xff] }
 0x1eb   : > { %v1549_v62 = vadd.f32 %v1548_v37, %v1385_v50  ;;  %v1252_v22 = vadd.f32 %v1251_v58, %v6531_v0  ;;  %v1391_v12 = vmul.f32 %v10170_v44, %v10170_v44 }
 0x1ec   : > { %v1473_v36 = vadd.f32 %v1472_v10, %v1386_v48  ;;  %v1176_v39 = vadd.f32 %v1175_v18, %v6536_v26  ;;  %v10171_v26 = vld [vmem:[#allocation51_spill] sm:$0xff]  ;;  %v10172_v18 = vld [vmem:[#allocation52_spill] sm:$0xff] }
 0x1ed   : > { %v1550_v2 = vadd.f32 %v1549_v62, %v1387_v46  ;;  %v1253_v8 = vadd.f32 %v1252_v22, %v10168_v31  ;;  %v1392_v50 = vmul.f32 %v10171_v26, %v10171_v26  ;;  %v1393_v62 = vmul.f32 %v10172_v18, %v10172_v18  ;;  %v10173_v46 = vld [vmem:[#allocation54_spill] sm:$0xff] }
 0x1ee   : > { %v1474_v52 = vadd.f32 %v1473_v36, %v1388_v41  ;;  %v1177_v30 = vadd.f32 %v1176_v39, %v10169_v54  ;;  %v1394_v39 = vmul.f32 %v10173_v46, %v10173_v46 }
 0x1ef   : > { %v1551_v35 = vadd.f32 %v1550_v2, %v1389_v27  ;;  %v1254_v55 = vadd.f32 %v1253_v8, %v10170_v44  ;;  %v10174_v2 = vld [vmem:[#allocation56_spill] sm:$0xff]  ;;  %v6816_v27 = vpop.permute.xlu0 %2156 }
 0x1f0   : > { %v1475_v37 = vadd.f32 %v1474_v52, %v1390_v11  ;;  %v1178_v58 = vadd.f32 %v1177_v30, %v10171_v26  ;;  %v1395_v8 = vmul.f32 %v10174_v2, %v10174_v2  ;;  %10175 = vst [vmem:[#allocation46_spill] sm:$0xff] %v6816_v27  ;;  %v10176_v30 = vld [vmem:[#allocation57_spill] sm:$0xff] }
 0x1f1   : > { %v1552_v10 = vadd.f32 %v1551_v35, %v1391_v12  ;;  %v1255_v48 = vadd.f32 %v1254_v55, %v10172_v18  ;;  %v1396_v35 = vmul.f32 %v10176_v30, %v10176_v30  ;;  %v10177_v12 = vld [vmem:[#allocation58_spill] sm:$0xff] }
 0x1f2   : > { %v1476_v22 = vadd.f32 %v1475_v37, %v1392_v50  ;;  %v1179_v36 = vadd.f32 %v1178_v58, %v10173_v46  ;;  %v1397_v26 = vmul.f32 %v10177_v12, %v10177_v12  ;;  %v10178_v50 = vld [vmem:[#allocation60_spill] sm:$0xff] }
 0x1f3   : > { %v1553_v41 = vadd.f32 %v1552_v10, %v1393_v62  ;;  %v1256_v31 = vadd.f32 %v1255_v48, %v10174_v2  ;;  %v1398_v18 = vmul.f32 %v10178_v50, %v10178_v50  ;;  %v10179_v62 = vld [vmem:[#allocation62_spill] sm:$0xff] }
 0x1f4   : > { %v1477_v52 = vadd.f32 %v1476_v22, %v1394_v39  ;;  %v1180_v11 = vadd.f32 %v1179_v36, %v10176_v30  ;;  %v1399_v36 = vmul.f32 %v10179_v62, %v10179_v62  ;;  %v10180_v30 = vld [vmem:[#allocation63_spill] sm:$0xff] }
 0x1f5   : > { %v1554_v55 = vadd.f32 %v1553_v41, %v1395_v8  ;;  %v1257_v37 = vadd.f32 %v1256_v31, %v10177_v12  ;;  %v1400_v31 = vmul.f32 %v10180_v30, %v10180_v30  ;;  %v6833_v8 = vpop.permute.xlu1 %2166 }
 0x1f6   : > { %v1478_v58 = vadd.f32 %v1477_v52, %v1396_v35  ;;  %v1181_v10 = vadd.f32 %v1180_v11, %v10178_v50  ;;  %10181 = vst [vmem:[#allocation50_spill] sm:$0xff] %v6833_v8  ;;  %v10182_v35 = vld [vmem:[#allocation64_spill] sm:$0xff] }
 0x1f7   : > { %v1555_v48 = vadd.f32 %v1554_v55, %v1397_v26  ;;  %v1258_v22 = vadd.f32 %v1257_v37, %v10179_v62  ;;  %v1401_v12 = vmul.f32 %v10182_v35, %v10182_v35  ;;  %v6838_v55 = vpop.permute.xlu0 %2161  ;;  %v10184_v26 = vld [vmem:[#allocation66_spill] sm:$0xff] }
 0x1f8   : > { %v1479_v39 = vadd.f32 %v1478_v58, %v1398_v18  ;;  %v1182_v41 = vadd.f32 %v1181_v10, %v10180_v30  ;;  %10183 = vst [vmem:[#allocation51_spill] sm:$0xff] %v6838_v55  ;;  %v1402_v58 = vmul.f32 %v10184_v26, %v10184_v26  ;;  %v10185_v18 = vld [vmem:[#allocation68_spill] sm:$0xff]  ;;  %v10187_v55 = vld [vmem:[#allocation70_spill] sm:$0xff] }
 0x1f9   : > { %v1556_v52 = vadd.f32 %v1555_v48, %v1399_v36  ;;  %v1259_v11 = vadd.f32 %v1258_v22, %v10182_v35  ;;  %v1403_v30 = vmul.f32 %v10185_v18, %v10185_v18  ;;  %v10186_v36 = vld [vmem:[#allocation69_spill] sm:$0xff] }
 0x1fa   : > { %v1480_v37 = vadd.f32 %v1479_v39, %v1400_v31  ;;  %v1183_v27 = vadd.f32 %v1182_v41, %v10184_v26  ;;  %v1404_v35 = vmul.f32 %v10186_v36, %v10186_v36  ;;  %v1405_v41 = vmul.f32 %v10187_v55, %v10187_v55  ;;  %v10188_v26 = vld [vmem:[#allocation72_spill] sm:$0xff] }
 0x1fb   : > { %v1557_v10 = vadd.f32 %v1556_v52, %v1401_v12  ;;  %v1260_v50 = vadd.f32 %v1259_v11, %v10185_v18  ;;  %v1406_v11 = vmul.f32 %v10188_v26, %v10188_v26  ;;  %v6855_v12 = vpop.permute.xlu1 %2171 }
 0x1fc   : > { %v1481_v48 = vadd.f32 %v1480_v37, %v1402_v58  ;;  %v1184_v22 = vadd.f32 %v1183_v27, %v10186_v36  ;;  %10189 = vst [vmem:[#allocation52_spill] sm:$0xff] %v6855_v12  ;;  %v10190_v58 = vld [vmem:[#allocation74_spill] sm:$0xff] }
 0x1fd   : > { %v1558_v8 = vadd.f32 %v1557_v10, %v1403_v30  ;;  %v1261_v39 = vadd.f32 %v1260_v50, %v10187_v55  ;;  %v1407_v36 = vmul.f32 %v10190_v58, %v10190_v58  ;;  %v6860_v10 = vpop.permute.xlu0 %2176  ;;  %v10192_v30 = vld [vmem:[#allocation75_spill] sm:$0xff] }
 0x1fe   : > { %v1482_v31 = vadd.f32 %v1481_v48, %v1404_v35  ;;  %v1185_v52 = vadd.f32 %v1184_v22, %v10188_v26  ;;  %10191 = vst [vmem:[#allocation56_spill] sm:$0xff] %v6860_v10  ;;  %v1408_v55 = vmul.f32 %v10192_v30, %v10192_v30  ;;  %v10193_v22 = vld [vmem:[#allocation76_spill] sm:$0xff] }
 0x1ff   : > { %v1559_v37 = vadd.f32 %v1558_v8, %v1405_v41  ;;  %v1262_v27 = vadd.f32 %v1261_v39, %v10190_v58  ;;  %v1409_v12 = vmul.f32 %v10193_v22, %v10193_v22  ;;  %v10194_v41 = vld [vmem:[#allocation78_spill] sm:$0xff]  ;;  %v10195_v10 = vld [vmem:[#allocation80_spill] sm:$0xff] }
 0x200   : > { %v1483_v50 = vadd.f32 %v1482_v31, %v1406_v11  ;;  %v1186_v18 = vadd.f32 %v1185_v52, %v10192_v30  ;;  %v1410_v26 = vmul.f32 %v10194_v41, %v10194_v41  ;;  %v1411_v52 = vmul.f32 %v10195_v10, %v10195_v10  ;;  %v10197_v30 = vld [vmem:[#allocation81_spill] sm:$0xff] }
 0x201   : > { %v1560_v48 = vadd.f32 %v1559_v37, %v1407_v36  ;;  %v1263_v35 = vadd.f32 %v1262_v27, %v10193_v22  ;;  %v1412_v27 = vmul.f32 %v6644_v28, %v6644_v28  ;;  %v6877_v36 = vpop.permute.xlu1 %2181  ;;  %v10199_v22 = vld [vmem:[#allocation83_spill] sm:$0xff] }
 0x202   : > { %v1484_v8 = vadd.f32 %v1483_v50, %v1408_v55  ;;  %v1187_v39 = vadd.f32 %v1186_v18, %v10194_v41  ;;  %10196 = vst [vmem:[#allocation57_spill] sm:$0xff] %v6877_v36  ;;  %v1413_v55 = vmul.f32 %v10197_v30, %v10197_v30 }
 0x203   : > { %v1561_v58 = vadd.f32 %v1560_v48, %v1409_v12  ;;  %v1264_v31 = vadd.f32 %v1263_v35, %v10195_v10  ;;  %v6882_v12 = vpop.permute.xlu0 %2186 }
 0x204   : > { %v1485_v11 = vadd.f32 %v1484_v8, %v1410_v26  ;;  %v1188_v37 = vadd.f32 %v1187_v39, %v6644_v28  ;;  %10198 = vst [vmem:[#allocation58_spill] sm:$0xff] %v6882_v12  ;;  %v1414_v26 = vmul.f32 %v10199_v22, %v10199_v22  ;;  %v1416_v8 = vmul.f32 %v6662_v33, %v6662_v33  ;;  %v10200_v39 = vld [vmem:[#allocation85_spill] sm:$0xff] }
 0x205   : > { %v1562_v50 = vadd.f32 %v1561_v58, %v1411_v52  ;;  %v1265_v18 = vadd.f32 %v1264_v31, %v10197_v30  ;;  %v1415_v58 = vmul.f32 %v10200_v39, %v10200_v39  ;;  %v1417_v31 = vmul.f32 %v6664_v14, %v6664_v14  ;;  %v6896_v12 = vpop.permute.xlu1 %2191 }
 0x206   : > { %v1486_v48 = vadd.f32 %v1485_v11, %v1412_v27  ;;  %v1189_v35 = vadd.f32 %v1188_v37, %v10199_v22  ;;  %10201 = vst [vmem:[#allocation63_spill] sm:$0xff] %v6896_v12  ;;  %v10237_v12 = vld [vmem:[#allocation16_spill] sm:$0xff] }
 0x207   : > { %v1563_v28 = vadd.f32 %v1562_v50, %v1413_v55  ;;  %v1266_v36 = vadd.f32 %v1265_v18, %v10200_v39  ;;  %v6898_v55 = vpop.permute.xlu0 %2196 }
 0x208   : > { %v1487_v52 = vadd.f32 %v1486_v48, %v1414_v26  ;;  %v1190_v11 = vadd.f32 %v1189_v35, %v6662_v33  ;;  %10202 = vst [vmem:[#allocation64_spill] sm:$0xff] %v6898_v55 }
 0x209   : > { %v1564_v27 = vadd.f32 %v1563_v28, %v1415_v58  ;;  %v1267_v37 = vadd.f32 %v1266_v36, %v6664_v14  ;;  %v6900_v28 = vpop.permute.xlu1 %2201 }
 0x20a   : > { %v1191_v30 = vrot.slane %v1190_v11, 4  ;;  %v1488_v22 = vadd.f32 %v1487_v52, %v1416_v8  ;;  %10203 = vst [vmem:[#allocation69_spill] sm:$0xff] %v6900_v28 }
 0x20b   : > { %v1268_v41 = vrot.slane %v1267_v37, 4  ;;  %v1565_v50 = vadd.f32 %v1564_v27, %v1417_v31  ;;  %v6902_v8 = vpop.permute.xlu0 %2206 }
 0x20c   : > { %v1192_v18 = vadd.f32 %v1191_v30, %v1190_v11  ;;  %v1489_v10 = vrot.slane %v1488_v22, 4  ;;  %10204 = vst [vmem:[#allocation70_spill] sm:$0xff] %v6902_v8 }
 0x20d   : > { %v1269_v39 = vadd.f32 %v1268_v41, %v1267_v37  ;;  %v1566_v46 = vrot.slane %v1565_v50, 4 }
 0x20e   : > { %v1193_v62 = vrot.slane %v1192_v18, 2  ;;  %v1490_v54 = vadd.f32 %v1489_v10, %v1488_v22  ;;  %v6904_v22 = vpop.permute.xlu1 %2211 }
 0x20f   : > { %v1270_v48 = vrot.slane %v1269_v39, 2  ;;  %v1567_v26 = vadd.f32 %v1566_v46, %v1565_v50  ;;  %10205 = vst [vmem:[#allocation75_spill] sm:$0xff] %v6904_v22  ;;  %v6906_v50 = vpop.permute.xlu0 %2216 }
 0x210   : > { %v1194_v33 = vadd.f32 %v1193_v62, %v1192_v18  ;;  %v1491_v35 = vrot.slane %v1490_v54, 2  ;;  %10206 = vst [vmem:[#allocation76_spill] sm:$0xff] %v6906_v50 }
 0x211   : > { %v1271_v14 = vadd.f32 %v1270_v48, %v1269_v39  ;;  %v1568_v36 = vrot.slane %v1567_v26, 2 }
 0x212   : > { %v1195_v58 = vrot.slane %v1194_v33, 1  ;;  %v1492_v31 = vadd.f32 %v1491_v35, %v1490_v54 }
 0x213   : > { %v1272_v52 = vrot.slane %v1271_v14, 1  ;;  %v1569_v27 = vadd.f32 %v1568_v36, %v1567_v26  ;;  %v6910_v36 = vpop.permute.xlu0 %2226 }
 0x214   : > { %v1196_v11 = vadd.f32 %v1195_v58, %v1194_v33  ;;  %v1493_v30 = vrot.slane %v1492_v31, 1  ;;  %v6908_v33 = vpop.permute.xlu1 %2221  ;;  %10208 = vst [vmem:[#allocation83_spill] sm:$0xff] %v6910_v36 }
 0x215   : > { %v1273_v41 = vadd.f32 %v1272_v52, %v1271_v14  ;;  %v1570_v37 = vrot.slane %v1569_v27, 1  ;;  %10207 = vst [vmem:[#allocation81_spill] sm:$0xff] %v6908_v33  ;;  %v5540_v52 = vmov 1966171168   ;;  %v10230_v33 = vld [vmem:[#allocation14_spill] sm:$0xff] }
 0x216   : > { %v1494_v55 = vadd.f32 %v1493_v30, %v1492_v31  ;;  %v1572_v10 = vmul.f32 0.0051020407, %v1196_v11  ;;  %v1593_v11 = vlaneseq }
 0x217   : > { %v1571_v46 = vadd.f32 %v1570_v37, %v1569_v27  ;;  %v1573_v62 = vmul.f32 0.0051020407, %v1273_v41  ;;  %v1591_v27 = vunpack.c.l.s4 %v5540_v52  ;;  %v6915_v30 = vpop.permute.xlu0 %2236 }
 0x218   : > { %v1574_v18 = vmul.f32 0.0051020407, %v1494_v55  ;;  %v1576_v39 = vmul.f32 %v1572_v10, %v1572_v10  ;;  %v6913_v55 = vpop.permute.xlu1 %2231  ;;  %10210 = vst [vmem:[#allocation86_spill] sm:$0xff] %v6915_v30  ;;  %v1594_v41 = vshrl.u32 %v1593_v11, 7  ;;  %v10223_v30 = vld [vmem:[#allocation13_spill] sm:$0xff] }
 0x219   : > { %v1575_v48 = vmul.f32 0.0051020407, %v1571_v46  ;;  %v1577_v8 = vmul.f32 %v1573_v62, %v1573_v62  ;;  %10209 = vst [vmem:[#allocation85_spill] sm:$0xff] %v6913_v55  ;;  %v10228_v55 = vld [vmem:[#allocation17_spill] sm:$0xff] }
 0x21a   : > { %v1578_v54 = vsub.f32 %v1574_v18, %v1576_v39  ;;  %v6933_v52 = vsub.s32 0, %v1594_v41 }
 0x21b   : > { %v1579_v35 = vsub.f32 %v1575_v48, %v1577_v8  ;;  %v1592_v8 = vunpack.c.0.s8 %v1591_v27  ;;  %v6921_v18 = vpop.permute.xlu0 %2246  ;;  %v6935_v27 = vsub.s32 1, %v1594_v41 }
 0x21c   : > { %v1580_v26 = vmax.f32 %v1578_v54, 0.0  ;;  %v6919_v37 = vpop.permute.xlu1 %2241  ;;  %10212 = vst [vmem:[#allocation88_spill] sm:$0xff] %v6921_v18  ;;  %10215 = vst [vmem:[#allocation91_spill] sm:$0xff] %v6933_v52 }
 0x21d   : > { %v1581_v14 = vmax.f32 %v1579_v35, 0.0  ;;  %10211 = vst [vmem:[#allocation87_spill] sm:$0xff] %v6919_v37  ;;  %v6923_v39 = vsub.s32 %v1592_v8, %v1594_v41  ;;  %10216 = vst [vmem:[#allocation92_spill] sm:$0xff] %v6935_v27  ;;  %v10219_v41 = vld [vmem:[#allocation9_spill] sm:$0xff] }
 0x21e   : > { %v1583_v58 = vadd.f32 0.001, %v1580_v26 }
 0x21f   : > { %v1584_v31 = vadd.f32 0.001, %v1581_v14  ;;  %10213 = vst [vmem:[#allocation89_spill] sm:$0xff] %v6923_v39  ;;  %v1582_v14 = vld [vmem:[%s500_s18] sm:$0x3]  ;;  %s5210_s18 = scalar_lea.vmem (%p5621_p5), %s9732_s8, %s5425_s13 }
 0x220   : > { %5506 = vrsqrt.f32 %v1583_v58  ;;  %v2252_v26 = vpop.permute.xlu1 %2251  ;;  %v6930_v58 = vpop.permute.xlu0 %2256 }
 0x221   : > { %5508 = vrsqrt.f32 %v1584_v31  ;;  %10214 = vst [vmem:[#allocation90_spill] sm:$0xff] %v6930_v58 }
 0x22a   : > { %v5507_v46 = vpop.eup %5506 }
 0x22b   : > { %v5509_v48 = vpop.eup %5508 }
 0x22c   : > { %v1589_v54 = vcombine.low %v5507_v46, %v5509_v48  ;;  %v2262_v46 = vpop.permute.xlu1 %2261  ;;  %v6943_v48 = vpop.permute.xlu0 %2266 }
 0x22d   : > { %10217 = vst [vmem:[#allocation93_spill] sm:$0xff] %v6943_v48  ;;  %v10221_v46 = vld [vmem:[#allocation6_spill] sm:$0xff] }
 0x22e   : > { %v1596_v35 = vrot.slane %v1589_v54, %v6923_v39 }
 0x230   : > { %v1603_v31 = vrot.slane %v1596_v35, %v6923_v39  ;;  %v10218_v35 = vld [vmem:[#allocation7_spill] sm:$0xff] }
 0x232   : > { %v1605_v11 = vmul.f32 %v1603_v31, %v1582_v14  ;;  %v10220_v31 = vld [vmem:[#allocation11_spill] sm:$0xff] }
 0x234   : > { %v6938_v8 = vrot.slane %v1605_v11, %v6933_v52  ;;  %v6941_v18 = vrot.slane %v1605_v11, %v6935_v27 }
 0x236   : > { %v1618_v54 = vmul.f32 %v6938_v8, %v1572_v10  ;;  %v1619_v26 = vmul.f32 %v6941_v18, %v1573_v62  ;;  %v6949_v58 = vmul.f32 %v6941_v18, %v10218_v35  ;;  %v6953_v14 = vmul.f32 %v6941_v18, %v10219_v41  ;;  %v10222_v10 = vld [vmem:[#allocation8_spill] sm:$0xff]  ;;  %v10224_v41 = vld [vmem:[#allocation10_spill] sm:$0xff] }
 0x237   : > { %v6957_v37 = vmul.f32 %v6941_v18, %v10220_v31  ;;  %v6961_v48 = vmul.f32 %v6938_v8, %v10221_v46  ;;  %v6965_v62 = vmul.f32 %v6938_v8, %v10222_v10  ;;  %v6969_v35 = vmul.f32 %v6941_v18, %v10223_v30  ;;  %v10226_v46 = vld [vmem:[#allocation15_spill] sm:$0xff] }
 0x238   : > { %v1622_v11 = vcombine.low %v1618_v54, %v1619_v26  ;;  %v6977_v31 = vmul.f32 %v6938_v8, %v10224_v41  ;;  %v10225_v54 = vld [vmem:[#allocation12_spill] sm:$0xff]  ;;  %v6985_v10 = vmul.f32 %v6941_v18, %v10226_v46  ;;  %v6989_v30 = vmul.f32 %v6941_v18, %v10228_v55  ;;  %v10232_v41 = vld [vmem:[#allocation19_spill] sm:$0xff]  ;;  %v7004_v46 = vpop.permute.xlu1 %2336 }
 0x239   : > { %v6981_v26 = vmul.f32 %v6938_v8, %v10225_v54  ;;  %v6994_v50 = vmul.f32 %v6938_v8, %v10230_v33  ;;  %v6998_v22 = vmul.f32 %v6941_v18, %v10232_v41  ;;  %v10234_v54 = vld [vmem:[#allocation21_spill] sm:$0xff]  ;;  %10236 = vst [vmem:[#allocation13_spill] sm:$0xff] %v7004_v46  ;;  %v7008_v55 = vmul.f32 %v6938_v8, %v10237_v12  ;;  %v10241_v33 = vld [vmem:[#allocation23_spill] sm:$0xff] }
 0x23a   : > { %10227 = vst [vmem:[#allocation7_spill] sm:$0xff] %v6985_v10  ;;  %10229 = vst [vmem:[#allocation9_spill] sm:$0xff] %v6989_v30  ;;  %v1629_v36 = vrot.slane %v1622_v11, %v6923_v39  ;;  %v7002_v28 = vmul.f32 %v6941_v18, %v10234_v54  ;;  %v10239_v30 = vld [vmem:[#allocation18_spill] sm:$0xff]  ;;  %v7016_v10 = vmul.f32 %v6941_v18, %v10241_v33  ;;  %v10243_v41 = vld [vmem:[#allocation25_spill] sm:$0xff]  ;;  %v7022_v54 = vpop.permute.xlu0 %2346 }
 0x23b   : > { %10231 = vst [vmem:[#allocation11_spill] sm:$0xff] %v6994_v50  ;;  %10233 = vst [vmem:[#allocation6_spill] sm:$0xff] %v6998_v22  ;;  %v7012_v11 = vmul.f32 %v6938_v8, %v10239_v30  ;;  %v7020_v22 = vmul.f32 %v6941_v18, %v10243_v41  ;;  %v10246_v50 = vld [vmem:[#allocation20_spill] sm:$0xff] }
 0x23c   : > { %10235 = vst [vmem:[#allocation8_spill] sm:$0xff] %v7002_v28  ;;  %10238 = vst [vmem:[#allocation10_spill] sm:$0xff] %v7008_v55  ;;  %v1606_v28 = vld [vmem:[%s505_s21] sm:$0x3]  ;;  %v1636_v46 = vrot.slane %v1629_v36, %v6923_v39  ;;  %v7027_v12 = vmul.f32 %v6938_v8, %v10246_v50  ;;  %v10255_v36 = vld [vmem:[#allocation29_spill] sm:$0xff] }
 0x23d   : > { %10240 = vst [vmem:[#allocation12_spill] sm:$0xff] %v7012_v11  ;;  %10242 = vst [vmem:[#allocation15_spill] sm:$0xff] %v7016_v10  ;;  %v10247_v55 = vld [vmem:[#allocation22_spill] sm:$0xff]  ;;  %v10249_v11 = vld [vmem:[#allocation27_spill] sm:$0xff]  ;;  %v7047_v50 = vmul.f32 %v6941_v18, %v10255_v36 }
 0x23e   : > { %10244 = vst [vmem:[#allocation17_spill] sm:$0xff] %v7020_v22  ;;  %10245 = vst [vmem:[#allocation14_spill] sm:$0xff] %v7022_v54  ;;  %v7031_v30 = vmul.f32 %v6938_v8, %v10247_v55  ;;  %v7035_v33 = vmul.f32 %v6941_v18, %v10249_v11  ;;  %v10251_v10 = vld [vmem:[#allocation24_spill] sm:$0xff]  ;;  %v10253_v54 = vld [vmem:[#allocation26_spill] sm:$0xff] }
 0x23f   : > { %v7039_v41 = vmul.f32 %v6938_v8, %v10251_v10  ;;  %v7043_v22 = vmul.f32 %v6938_v8, %v10253_v54  ;;  %10256 = vst [vmem:[#allocation23_spill] sm:$0xff] %v7047_v50  ;;  %v10257_v39 = vld [vmem:[#allocation31_spill] sm:$0xff]  ;;  %v7069_v50 = vsub.f32 %v1606_v28, %v1636_v46  ;;  %v10276_v46 = vld [vmem:[#allocation41_spill] sm:$0xff] }
 0x240   : > { %10248 = vst [vmem:[#allocation19_spill] sm:$0xff] %v7031_v30  ;;  %10250 = vst [vmem:[#allocation21_spill] sm:$0xff] %v7035_v33  ;;  %v7051_v55 = vmul.f32 %v6941_v18, %v10257_v39  ;;  %v10259_v30 = vld [vmem:[#allocation28_spill] sm:$0xff]  ;;  %v10261_v33 = vld [vmem:[#allocation30_spill] sm:$0xff] }
 0x241   : > { %10252 = vst [vmem:[#allocation16_spill] sm:$0xff] %v7039_v41  ;;  %10254 = vst [vmem:[#allocation18_spill] sm:$0xff] %v7043_v22  ;;  %v7055_v11 = vmul.f32 %v6938_v8, %v10259_v30  ;;  %v7059_v10 = vmul.f32 %v6938_v8, %v10261_v33  ;;  %v10263_v41 = vld [vmem:[#allocation33_spill] sm:$0xff]  ;;  %v10265_v22 = vld [vmem:[#allocation35_spill] sm:$0xff] }
 0x242   : > { %10258 = vst [vmem:[#allocation25_spill] sm:$0xff] %v7051_v55  ;;  %v7063_v54 = vmul.f32 %v6941_v18, %v10263_v41  ;;  %v7067_v36 = vmul.f32 %v6941_v18, %v10265_v22  ;;  %v10267_v39 = vld [vmem:[#allocation32_spill] sm:$0xff]  ;;  %v10268_v30 = vld [vmem:[#allocation37_spill] sm:$0xff]  ;;  %v10270_v33 = vld [vmem:[#allocation39_spill] sm:$0xff] }
 0x243   : > { %10260 = vst [vmem:[#allocation20_spill] sm:$0xff] %v7055_v11  ;;  %10262 = vst [vmem:[#allocation22_spill] sm:$0xff] %v7059_v10  ;;  %v7073_v55 = vmul.f32 %v6938_v8, %v10267_v39  ;;  %v7077_v11 = vmul.f32 %v6941_v18, %v10268_v30  ;;  %v7081_v10 = vmul.f32 %v6941_v18, %v10270_v33  ;;  %v10272_v41 = vld [vmem:[#allocation34_spill] sm:$0xff]  ;;  %v10274_v22 = vld [vmem:[#allocation36_spill] sm:$0xff] }
 0x244   : > { %10264 = vst [vmem:[#allocation27_spill] sm:$0xff] %v7063_v54  ;;  %10266 = vst [vmem:[#allocation24_spill] sm:$0xff] %v7067_v36  ;;  %v7085_v54 = vmul.f32 %v6938_v8, %v10272_v41  ;;  %v7089_v28 = vmul.f32 %v6938_v8, %v10274_v22  ;;  %v7093_v39 = vmul.f32 %v6941_v18, %v10276_v46  ;;  %v10278_v36 = vld [vmem:[#allocation43_spill] sm:$0xff]  ;;  %v10281_v33 = vld [vmem:[#allocation38_spill] sm:$0xff]  ;;  %v7113_v46 = vpop.permute.xlu0 %2366 }
 0x245   : > { %10269 = vst [vmem:[#allocation26_spill] sm:$0xff] %v7077_v11  ;;  %10271 = vst [vmem:[#allocation29_spill] sm:$0xff] %v7081_v10  ;;  %v7097_v30 = vmul.f32 %v6941_v18, %v10278_v36  ;;  %v7099_v11 = vpop.permute.xlu1 %2356  ;;  %v7103_v10 = vmul.f32 %v6938_v8, %v10281_v33  ;;  %v10283_v41 = vld [vmem:[#allocation40_spill] sm:$0xff]  ;;  %v10285_v22 = vld [vmem:[#allocation45_spill] sm:$0xff] }
 0x246   : > { %10273 = vst [vmem:[#allocation31_spill] sm:$0xff] %v7085_v54  ;;  %10275 = vst [vmem:[#allocation28_spill] sm:$0xff] %v7089_v28  ;;  %v7107_v54 = vmul.f32 %v6938_v8, %v10283_v41  ;;  %v7111_v28 = vmul.f32 %v6941_v18, %v10285_v22  ;;  %v10292_v33 = vld [vmem:[#allocation44_spill] sm:$0xff]  ;;  %v10294_v41 = vld [vmem:[#allocation55_spill] sm:$0xff] }
 0x247   : > { %10277 = vst [vmem:[#allocation30_spill] sm:$0xff] %v7093_v39  ;;  %10279 = vst [vmem:[#allocation33_spill] sm:$0xff] %v7097_v30  ;;  %v10288_v39 = vld [vmem:[#allocation42_spill] sm:$0xff]  ;;  %v10290_v30 = vld [vmem:[#allocation49_spill] sm:$0xff] }
 0x248   : > { %10280 = vst [vmem:[#allocation35_spill] sm:$0xff] %v7099_v11  ;;  %10282 = vst [vmem:[#allocation32_spill] sm:$0xff] %v7103_v10  ;;  %v7117_v36 = vmul.f32 %v6938_v8, %v10288_v39  ;;  %v7121_v11 = vmul.f32 %v6941_v18, %v10290_v30  ;;  %v7125_v10 = vmul.f32 %v6938_v8, %v10292_v33  ;;  %v10296_v22 = vld [vmem:[#allocation47_spill] sm:$0xff] }
 0x249   : > { %10284 = vst [vmem:[#allocation37_spill] sm:$0xff] %v7107_v54  ;;  %10286 = vst [vmem:[#allocation39_spill] sm:$0xff] %v7111_v28  ;;  %v7129_v54 = vmul.f32 %v6941_v18, %v10294_v41  ;;  %v7133_v28 = vmul.f32 %v6938_v8, %v10296_v22 }
 0x24a   : > { %10287 = vst [vmem:[#allocation34_spill] sm:$0xff] %v7113_v46  ;;  %10289 = vst [vmem:[#allocation36_spill] sm:$0xff] %v7117_v36  ;;  %v10298_v46 = vld [vmem:[#allocation61_spill] sm:$0xff] }
 0x24b   : > { %10291 = vst [vmem:[#allocation41_spill] sm:$0xff] %v7121_v11  ;;  %10293 = vst [vmem:[#allocation43_spill] sm:$0xff] %v7125_v10  ;;  %v7137_v39 = vmul.f32 %v6941_v18, %v10298_v46  ;;  %v10300_v36 = vld [vmem:[#allocation53_spill] sm:$0xff]  ;;  %v10302_v11 = vld [vmem:[#allocation67_spill] sm:$0xff] }
 0x24c   : > { %10295 = vst [vmem:[#allocation38_spill] sm:$0xff] %v7129_v54  ;;  %10297 = vst [vmem:[#allocation40_spill] sm:$0xff] %v7133_v28  ;;  %v7141_v30 = vmul.f32 %v6938_v8, %v10300_v36  ;;  %v7145_v33 = vmul.f32 %v6941_v18, %v10302_v11  ;;  %v10304_v10 = vld [vmem:[#allocation59_spill] sm:$0xff]  ;;  %v10306_v54 = vld [vmem:[#allocation73_spill] sm:$0xff]  ;;  %v7155_v28 = vpop.permute.xlu1 %2376  ;;  %v7165_v11 = vpop.permute.xlu0 %2386 }
 0x24d   : > { %10299 = vst [vmem:[#allocation45_spill] sm:$0xff] %v7137_v39  ;;  %v7149_v41 = vmul.f32 %v6938_v8, %v10304_v10  ;;  %v7153_v22 = vmul.f32 %v6941_v18, %v10306_v54  ;;  %10308 = vst [vmem:[#allocation47_spill] sm:$0xff] %v7155_v28  ;;  %v10309_v46 = vld [vmem:[#allocation65_spill] sm:$0xff]  ;;  %v10310_v36 = vld [vmem:[#allocation79_spill] sm:$0xff] }
 0x24e   : > { %10301 = vst [vmem:[#allocation42_spill] sm:$0xff] %v7141_v30  ;;  %10303 = vst [vmem:[#allocation49_spill] sm:$0xff] %v7145_v33  ;;  %v7159_v39 = vmul.f32 %v6938_v8, %v10309_v46  ;;  %v7163_v30 = vmul.f32 %v6941_v18, %v10310_v36  ;;  %v10313_v33 = vld [vmem:[#allocation71_spill] sm:$0xff]  ;;  %v7181_v46 = vmul.f32 %v6941_v18, %v6258_v49  ;;  %v10316_v36 = vld [vmem:[#allocation82_spill] sm:$0xff] }
 0x24f   : > { %10305 = vst [vmem:[#allocation44_spill] sm:$0xff] %v7149_v41  ;;  %10307 = vst [vmem:[#allocation55_spill] sm:$0xff] %v7153_v22  ;;  %v7169_v10 = vmul.f32 %v6938_v8, %v10313_v33  ;;  %v10314_v41 = vld [vmem:[#allocation84_spill] sm:$0xff]  ;;  %v10315_v22 = vld [vmem:[#allocation77_spill] sm:$0xff]  ;;  %v7189_v33 = vmul.f32 %v6941_v18, %v6272_v56  ;;  %v7201_v49 = vmul.f32 %v6938_v8, %v6262_v51 }
 0x250   : > { %10311 = vst [vmem:[#allocation61_spill] sm:$0xff] %v7163_v30  ;;  %10312 = vst [vmem:[#allocation53_spill] sm:$0xff] %v7165_v11  ;;  %v7173_v54 = vmul.f32 %v6941_v18, %v10314_v41  ;;  %v7177_v28 = vmul.f32 %v6938_v8, %v10315_v22  ;;  %v7185_v30 = vmul.f32 %v6938_v8, %v10316_v36  ;;  %v7227_v11 = vpop.permute.xlu1 %2396 }
 0x251   : > { %v7193_v41 = vmul.f32 %v6941_v18, %v6289_v3  ;;  %v7197_v22 = vmul.f32 %v6938_v8, %v6254_v47  ;;  %v7205_v36 = vmul.f32 %v6941_v18, %v6303_v13  ;;  %v7209_v56 = vmul.f32 %v6941_v18, %v6317_v23  ;;  %10317 = vst [vmem:[#allocation67_spill] sm:$0xff] %v7227_v11 }
 0x252   : > { %v7213_v3 = vmul.f32 %v6938_v8, %v6282_v63  ;;  %v7217_v47 = vmul.f32 %v6938_v8, %v6296_v9  ;;  %v7221_v51 = vmul.f32 %v6941_v18, %v6331_v32  ;;  %v7225_v13 = vmul.f32 %v6941_v18, %v6345_v43  ;;  %v7245_v43 = vpop.permute.xlu0 %2426 }
 0x253   : > { %v7231_v23 = vmul.f32 %v6938_v8, %v6310_v19  ;;  %v7235_v63 = vmul.f32 %v6938_v8, %v6324_v29  ;;  %v7239_v9 = vmul.f32 %v6941_v18, %v6359_v61  ;;  %v7243_v32 = vmul.f32 %v6941_v18, %v6373_v15  ;;  %10318 = vst [vmem:[#allocation59_spill] sm:$0xff] %v7245_v43 }
 0x254   : > { %v7249_v11 = vmul.f32 %v6938_v8, %v6338_v38  ;;  %v7253_v19 = vmul.f32 %v6938_v8, %v6352_v57  ;;  %v7257_v29 = vmul.f32 %v6941_v18, %v6387_v42  ;;  %v7261_v61 = vmul.f32 %v6941_v18, %v6401_v53  ;;  %v7320_v43 = vpop.permute.xlu1 %2436 }
 0x255   : > { %v7265_v15 = vmul.f32 %v6938_v8, %v6366_v7  ;;  %v7269_v38 = vmul.f32 %v6938_v8, %v6380_v25  ;;  %v7273_v57 = vmul.f32 %v6941_v18, %v6415_v17  ;;  %v7277_v42 = vmul.f32 %v6941_v18, %v6429_v45  ;;  %10320 = vst [vmem:[#allocation65_spill] sm:$0xff] %v7320_v43 }
 0x256   : > { %v7281_v53 = vmul.f32 %v6938_v8, %v6394_v40  ;;  %v7285_v7 = vmul.f32 %v6938_v8, %v6408_v5  ;;  %v7289_v25 = vmul.f32 %v6941_v18, %v6443_v16  ;;  %v7293_v17 = vmul.f32 %v6941_v18, %v6457_v24 }
 0x257   : > { %v7297_v45 = vmul.f32 %v6938_v8, %v6422_v34  ;;  %v7301_v40 = vmul.f32 %v6938_v8, %v6436_v21  ;;  %v7305_v5 = vmul.f32 %v6941_v18, %v6471_v6  ;;  %v7310_v16 = vmul.f32 %v6938_v8, %v6450_v59  ;;  %v7326_v6 = vpop.permute.xlu0 %2276 }
 0x258   : > { %v7314_v24 = vmul.f32 %v6938_v8, %v6464_v1  ;;  %v7318_v34 = vmul.f32 %v6941_v18, %v6513_v60  ;;  %v7324_v21 = vmul.f32 %v6941_v18, %v6531_v0  ;;  %10322 = vst [vmem:[#allocation71_spill] sm:$0xff] %v7326_v6  ;;  %v7330_v59 = vmul.f32 %v6938_v8, %v6506_v4  ;;  %v10326_v0 = vld [vmem:[#allocation48_spill] sm:$0xff]  ;;  %v10328_v6 = vld [vmem:[#allocation62_spill] sm:$0xff] }
 0x259   : > { %v7334_v1 = vmul.f32 %v6941_v18, %v10170_v44  ;;  %v7338_v60 = vmul.f32 %v6938_v8, %v6524_v20  ;;  %v7342_v43 = vmul.f32 %v6941_v18, %v10174_v2  ;;  %v7350_v4 = vmul.f32 %v6941_v18, %v10328_v6  ;;  %v10338_v6 = vld [vmem:[#allocation66_spill] sm:$0xff] }
 0x25a   : > { %10319 = vst [vmem:[#allocation73_spill] sm:$0xff] %v7318_v34  ;;  %10321 = vst [vmem:[#allocation79_spill] sm:$0xff] %v7324_v21  ;;  %v7346_v21 = vmul.f32 %v6938_v8, %v10326_v0  ;;  %v10330_v34 = vld [vmem:[#allocation54_spill] sm:$0xff] }
 0x25b   : > { %10323 = vst [vmem:[#allocation84_spill] sm:$0xff] %v7334_v1  ;;  %10324 = vst [vmem:[#allocation77_spill] sm:$0xff] %v7338_v60  ;;  %v7354_v44 = vmul.f32 %v6938_v8, %v10330_v34  ;;  %v10332_v1 = vld [vmem:[#allocation68_spill] sm:$0xff] }
 0x25c   : > { %10325 = vst [vmem:[#allocation82_spill] sm:$0xff] %v7342_v43  ;;  %10327 = vst [vmem:[#allocation48_spill] sm:$0xff] %v7346_v21  ;;  %v7358_v20 = vmul.f32 %v6941_v18, %v10332_v1  ;;  %v10334_v60 = vld [vmem:[#allocation60_spill] sm:$0xff]  ;;  %v10335_v43 = vld [vmem:[#allocation74_spill] sm:$0xff]  ;;  %v7368_v21 = vpop.permute.xlu1 %2446 }
 0x25d   : > { %10329 = vst [vmem:[#allocation62_spill] sm:$0xff] %v7350_v4  ;;  %10331 = vst [vmem:[#allocation54_spill] sm:$0xff] %v7354_v44  ;;  %v7362_v2 = vmul.f32 %v6938_v8, %v10334_v60  ;;  %v7366_v0 = vmul.f32 %v6941_v18, %v10335_v43  ;;  %v7372_v4 = vmul.f32 %v6938_v8, %v10338_v6  ;;  %v10339_v34 = vld [vmem:[#allocation80_spill] sm:$0xff]  ;;  %v7381_v60 = vpop.permute.xlu0 %2286 }
 0x25e   : > { %10333 = vst [vmem:[#allocation68_spill] sm:$0xff] %v7358_v20  ;;  %10337 = vst [vmem:[#allocation74_spill] sm:$0xff] %v7368_v21  ;;  %v7376_v44 = vmul.f32 %v6941_v18, %v10339_v34  ;;  %v2871_v1 = vld [vmem:[%s7378_s23] ss:$8 sm:$0x3]  ;;  %v7393_v6 = vrot.slane %v7069_v50, %v6933_v52  ;;  %v7397_v18 = vrot.slane %v7069_v50, %v6935_v27 }
 0x25f   : > { %10336 = vst [vmem:[#allocation60_spill] sm:$0xff] %v7366_v0  ;;  %10340 = vst [vmem:[#allocation66_spill] sm:$0xff] %v7381_v60  ;;  %v10341_v20 = vld [vmem:[#allocation72_spill] sm:$0xff]  ;;  %v10342_v0 = vld [vmem:[#allocation78_spill] sm:$0xff]  ;;  %v7400_v34 = vrot.slane %v2871_v1, %v6933_v52  ;;  %v7403_v60 = vrot.slane %v2871_v1, %v6935_v27 }
 0x260   : > { %v7385_v43 = vmul.f32 %v6938_v8, %v10341_v20  ;;  %v7389_v21 = vmul.f32 %v6938_v8, %v10342_v0  ;;  %v7407_v20 = vadd.f32 %v7393_v6, %v6961_v48  ;;  %v7411_v8 = vadd.f32 %v7397_v18, %v6949_v58 }
 0x261   : > { %10343 = vst [vmem:[#allocation80_spill] sm:$0xff] %v7400_v34  ;;  %10344 = vst [vmem:[#allocation72_spill] sm:$0xff] %v7403_v60  ;;  %v7415_v0 = vadd.f32 %v7393_v6, %v6965_v62  ;;  %v7419_v50 = vadd.f32 %v7397_v18, %v6953_v14  ;;  %v7423_v1 = vadd.f32 %v7393_v6, %v6977_v31  ;;  %v7437_v60 = vpop.permute.xlu1 %2406  ;;  %v10353_v14 = vld [vmem:[#allocation11_spill] sm:$0xff] }
 0x262   : > { %10345 = vst [vmem:[#allocation78_spill] sm:$0xff] %v7411_v8  ;;  %v7427_v48 = vadd.f32 %v7397_v18, %v6957_v37  ;;  %v7431_v58 = vadd.f32 %v7393_v6, %v6981_v26  ;;  %v7435_v62 = vadd.f32 %v7397_v18, %v6969_v35  ;;  %10352 = vst [vmem:[#allocation100_spill] sm:$0xff] %v7437_v60  ;;  %v10355_v31 = vld [vmem:[#allocation7_spill] sm:$0xff]  ;;  %v10357_v37 = vld [vmem:[#allocation10_spill] sm:$0xff]  ;;  %v7455_v35 = vpop.permute.xlu0 %2456 }
 0x263   : > { %10346 = vst [vmem:[#allocation94_spill] sm:$0xff] %v7415_v0  ;;  %10347 = vst [vmem:[#allocation95_spill] sm:$0xff] %v7419_v50  ;;  %v7441_v34 = vadd.f32 %v7393_v6, %v10353_v14  ;;  %v7445_v27 = vadd.f32 %v7397_v18, %v10355_v31  ;;  %v7449_v52 = vadd.f32 %v7393_v6, %v10357_v37  ;;  %v10359_v26 = vld [vmem:[#allocation9_spill] sm:$0xff]  ;;  %v10364_v14 = vld [vmem:[#allocation6_spill] sm:$0xff] }
 0x264   : > { %10348 = vst [vmem:[#allocation96_spill] sm:$0xff] %v7423_v1  ;;  %10349 = vst [vmem:[#allocation97_spill] sm:$0xff] %v7427_v48  ;;  %v7467_v31 = vadd.f32 %v7393_v6, %v7027_v12  ;;  %v10367_v37 = vld [vmem:[#allocation8_spill] sm:$0xff] }
 0x265   : > { %10350 = vst [vmem:[#allocation98_spill] sm:$0xff] %v7431_v58  ;;  %10351 = vst [vmem:[#allocation99_spill] sm:$0xff] %v7435_v62  ;;  %v7453_v58 = vadd.f32 %v7397_v18, %v10359_v26  ;;  %v10362_v62 = vld [vmem:[#allocation12_spill] sm:$0xff]  ;;  %v10369_v26 = vld [vmem:[#allocation19_spill] sm:$0xff] }
 0x266   : > { %10354 = vst [vmem:[#allocation11_spill] sm:$0xff] %v7441_v34  ;;  %10356 = vst [vmem:[#allocation7_spill] sm:$0xff] %v7445_v27  ;;  %v7459_v60 = vadd.f32 %v7393_v6, %v10362_v62  ;;  %v7463_v34 = vadd.f32 %v7397_v18, %v10364_v14 }
 0x267   : > { %10358 = vst [vmem:[#allocation10_spill] sm:$0xff] %v7449_v52  ;;  %10360 = vst [vmem:[#allocation9_spill] sm:$0xff] %v7453_v58  ;;  %v7471_v52 = vadd.f32 %v7397_v18, %v10367_v37  ;;  %v7475_v58 = vadd.f32 %v7393_v6, %v10369_v26 }
 0x268   : > { %10361 = vst [vmem:[#allocation101_spill] sm:$0xff] %v7455_v35  ;;  %10363 = vst [vmem:[#allocation12_spill] sm:$0xff] %v7459_v60  ;;  %v10371_v35 = vld [vmem:[#allocation15_spill] sm:$0xff]  ;;  %v10373_v60 = vld [vmem:[#allocation16_spill] sm:$0xff] }
 0x269   : > { %10365 = vst [vmem:[#allocation6_spill] sm:$0xff] %v7463_v34  ;;  %10366 = vst [vmem:[#allocation102_spill] sm:$0xff] %v7467_v31  ;;  %v7479_v62 = vadd.f32 %v7397_v18, %v10371_v35  ;;  %v7483_v14 = vadd.f32 %v7393_v6, %v10373_v60  ;;  %v10375_v34 = vld [vmem:[#allocation17_spill] sm:$0xff]  ;;  %v10377_v31 = vld [vmem:[#allocation18_spill] sm:$0xff] }
 0x26a   : > { %10368 = vst [vmem:[#allocation8_spill] sm:$0xff] %v7471_v52  ;;  %10370 = vst [vmem:[#allocation19_spill] sm:$0xff] %v7475_v58  ;;  %v7487_v12 = vadd.f32 %v7397_v18, %v10375_v34  ;;  %v7491_v37 = vadd.f32 %v7393_v6, %v10377_v31  ;;  %v10379_v52 = vld [vmem:[#allocation21_spill] sm:$0xff]  ;;  %v10381_v58 = vld [vmem:[#allocation20_spill] sm:$0xff] }
 0x26b   : > { %10372 = vst [vmem:[#allocation15_spill] sm:$0xff] %v7479_v62  ;;  %10374 = vst [vmem:[#allocation16_spill] sm:$0xff] %v7483_v14  ;;  %v7495_v26 = vadd.f32 %v7397_v18, %v10379_v52  ;;  %v7499_v35 = vadd.f32 %v7393_v6, %v10381_v58  ;;  %v10383_v62 = vld [vmem:[#allocation23_spill] sm:$0xff]  ;;  %v10385_v14 = vld [vmem:[#allocation22_spill] sm:$0xff]  ;;  %v7515_v52 = vadd.f32 %v7393_v6, %v7073_v55 }
 0x26c   : > { %10376 = vst [vmem:[#allocation17_spill] sm:$0xff] %v7487_v12  ;;  %10378 = vst [vmem:[#allocation18_spill] sm:$0xff] %v7491_v37  ;;  %v7503_v60 = vadd.f32 %v7397_v18, %v10383_v62  ;;  %v7507_v34 = vadd.f32 %v7393_v6, %v10385_v14  ;;  %v10387_v12 = vld [vmem:[#allocation25_spill] sm:$0xff] }
 0x26d   : > { %10380 = vst [vmem:[#allocation21_spill] sm:$0xff] %v7495_v26  ;;  %10382 = vst [vmem:[#allocation20_spill] sm:$0xff] %v7499_v35  ;;  %v7511_v31 = vadd.f32 %v7397_v18, %v10387_v12  ;;  %v10390_v26 = vld [vmem:[#allocation27_spill] sm:$0xff] }
 0x26e   : > { %10384 = vst [vmem:[#allocation23_spill] sm:$0xff] %v7503_v60  ;;  %10386 = vst [vmem:[#allocation22_spill] sm:$0xff] %v7507_v34  ;;  %v7519_v58 = vadd.f32 %v7397_v18, %v10390_v26  ;;  %v10392_v35 = vld [vmem:[#allocation31_spill] sm:$0xff]  ;;  %v10394_v60 = vld [vmem:[#allocation24_spill] sm:$0xff] }
 0x26f   : > { %10388 = vst [vmem:[#allocation25_spill] sm:$0xff] %v7511_v31  ;;  %10389 = vst [vmem:[#allocation103_spill] sm:$0xff] %v7515_v52  ;;  %v7523_v62 = vadd.f32 %v7393_v6, %v10392_v35  ;;  %v7527_v14 = vadd.f32 %v7397_v18, %v10394_v60  ;;  %v10396_v34 = vld [vmem:[#allocation28_spill] sm:$0xff]  ;;  %v10398_v31 = vld [vmem:[#allocation26_spill] sm:$0xff]  ;;  %v7537_v52 = vpop.permute.xlu1 %2296 }
 0x270   : > { %10391 = vst [vmem:[#allocation27_spill] sm:$0xff] %v7519_v58  ;;  %v7531_v12 = vadd.f32 %v7393_v6, %v10396_v34  ;;  %v7535_v55 = vadd.f32 %v7397_v18, %v10398_v31  ;;  %10400 = vst [vmem:[#allocation104_spill] sm:$0xff] %v7537_v52  ;;  %v10401_v26 = vld [vmem:[#allocation32_spill] sm:$0xff]  ;;  %v10403_v35 = vld [vmem:[#allocation29_spill] sm:$0xff]  ;;  %v7555_v31 = vpop.permute.xlu0 %2466 }
 0x271   : > { %10393 = vst [vmem:[#allocation31_spill] sm:$0xff] %v7523_v62  ;;  %10395 = vst [vmem:[#allocation24_spill] sm:$0xff] %v7527_v14  ;;  %v7541_v58 = vadd.f32 %v7393_v6, %v10401_v26  ;;  %v7545_v62 = vadd.f32 %v7397_v18, %v10403_v35  ;;  %v10405_v60 = vld [vmem:[#allocation37_spill] sm:$0xff]  ;;  %v10407_v34 = vld [vmem:[#allocation30_spill] sm:$0xff] }
 0x272   : > { %10397 = vst [vmem:[#allocation28_spill] sm:$0xff] %v7531_v12  ;;  %10399 = vst [vmem:[#allocation26_spill] sm:$0xff] %v7535_v55  ;;  %v7549_v14 = vadd.f32 %v7393_v6, %v10405_v60  ;;  %v7553_v12 = vadd.f32 %v7397_v18, %v10407_v34  ;;  %v10410_v55 = vld [vmem:[#allocation36_spill] sm:$0xff]  ;;  %v10412_v26 = vld [vmem:[#allocation33_spill] sm:$0xff] }
 0x273   : > { %10402 = vst [vmem:[#allocation32_spill] sm:$0xff] %v7541_v58  ;;  %10404 = vst [vmem:[#allocation29_spill] sm:$0xff] %v7545_v62  ;;  %v7559_v52 = vadd.f32 %v7393_v6, %v10410_v55  ;;  %v7563_v58 = vadd.f32 %v7397_v18, %v10412_v26  ;;  %v10414_v35 = vld [vmem:[#allocation43_spill] sm:$0xff]  ;;  %v10418_v34 = vld [vmem:[#allocation40_spill] sm:$0xff] }
 0x274   : > { %10406 = vst [vmem:[#allocation37_spill] sm:$0xff] %v7549_v14  ;;  %10408 = vst [vmem:[#allocation30_spill] sm:$0xff] %v7553_v12  ;;  %v7567_v62 = vadd.f32 %v7393_v6, %v10414_v35  ;;  %v10416_v60 = vld [vmem:[#allocation39_spill] sm:$0xff]  ;;  %v7575_v12 = vadd.f32 %v7393_v6, %v10418_v34 }
 0x275   : > { %10409 = vst [vmem:[#allocation105_spill] sm:$0xff] %v7555_v31  ;;  %10411 = vst [vmem:[#allocation36_spill] sm:$0xff] %v7559_v52  ;;  %v7571_v14 = vadd.f32 %v7397_v18, %v10416_v60  ;;  %v10420_v31 = vld [vmem:[#allocation41_spill] sm:$0xff]  ;;  %v10421_v52 = vld [vmem:[#allocation42_spill] sm:$0xff] }
 0x276   : > { %10413 = vst [vmem:[#allocation33_spill] sm:$0xff] %v7563_v58  ;;  %10415 = vst [vmem:[#allocation43_spill] sm:$0xff] %v7567_v62  ;;  %v7579_v55 = vadd.f32 %v7397_v18, %v10420_v31  ;;  %v7583_v26 = vadd.f32 %v7393_v6, %v10421_v52  ;;  %v10423_v58 = vld [vmem:[#allocation38_spill] sm:$0xff]  ;;  %v10424_v62 = vld [vmem:[#allocation44_spill] sm:$0xff]  ;;  %v7601_v31 = vadd.f32 %v7393_v6, %v7159_v39 }
 0x277   : > { %10417 = vst [vmem:[#allocation39_spill] sm:$0xff] %v7571_v14  ;;  %10419 = vst [vmem:[#allocation40_spill] sm:$0xff] %v7575_v12  ;;  %v7587_v35 = vadd.f32 %v7397_v18, %v10423_v58  ;;  %v7591_v60 = vadd.f32 %v7393_v6, %v10424_v62  ;;  %v10426_v14 = vld [vmem:[#allocation45_spill] sm:$0xff]  ;;  %v7597_v12 = vpop.permute.xlu1 %2306  ;;  %v7607_v58 = vpop.permute.xlu0 %2476  ;;  %v7611_v62 = vadd.f32 %v7393_v6, %v7169_v10 }
 0x278   : > { %10422 = vst [vmem:[#allocation41_spill] sm:$0xff] %v7583_v26  ;;  %v7595_v34 = vadd.f32 %v7397_v18, %v10426_v14  ;;  %10427 = vst [vmem:[#allocation38_spill] sm:$0xff] %v7597_v12  ;;  %v10429_v52 = vld [vmem:[#allocation49_spill] sm:$0xff]  ;;  %v7619_v12 = vadd.f32 %v7393_v6, %v7177_v28  ;;  %v7631_v10 = vadd.f32 %v7397_v18, %v7173_v54  ;;  %v10504_v27 = vld [vmem:[#allocation24_spill] sm:$0xff] }
 0x279   : > { %10425 = vst [vmem:[#allocation42_spill] sm:$0xff] %v7591_v60  ;;  %10428 = vst [vmem:[#allocation44_spill] sm:$0xff] %v7601_v31  ;;  %v7605_v26 = vadd.f32 %v7397_v18, %v10429_v52  ;;  %v10431_v60 = vld [vmem:[#allocation55_spill] sm:$0xff]  ;;  %v10432_v39 = vld [vmem:[#allocation61_spill] sm:$0xff]  ;;  %v7627_v52 = vadd.f32 %v7393_v6, %v7185_v30  ;;  %v7639_v28 = vadd.f32 %v7397_v18, %v7181_v46 }
 0x27a   : > { %10430 = vst [vmem:[#allocation45_spill] sm:$0xff] %v7607_v58  ;;  %v7615_v14 = vadd.f32 %v7397_v18, %v10431_v60  ;;  %v7623_v31 = vadd.f32 %v7397_v18, %v10432_v39  ;;  %v7635_v60 = vadd.f32 %v7393_v6, %v7197_v22  ;;  %v7643_v39 = vadd.f32 %v7393_v6, %v7201_v49  ;;  %v10507_v8 = vld [vmem:[#allocation32_spill] sm:$0xff] }
 0x27b   : > { %v7647_v30 = vadd.f32 %v7397_v18, %v7189_v33  ;;  %v7651_v54 = vadd.f32 %v7393_v6, %v7213_v3  ;;  %v7655_v22 = vadd.f32 %v7397_v18, %v7193_v41  ;;  %v7659_v46 = vadd.f32 %v7393_v6, %v7217_v47  ;;  %v7665_v58 = vpop.permute.xlu1 %2486 }
 0x27c   : > { %v7663_v49 = vadd.f32 %v7397_v18, %v7205_v36  ;;  %10433 = vst [vmem:[#allocation49_spill] sm:$0xff] %v7665_v58  ;;  %v7669_v33 = vadd.f32 %v7393_v6, %v7231_v23  ;;  %v7673_v3 = vadd.f32 %v7397_v18, %v7209_v56  ;;  %v7677_v41 = vadd.f32 %v7393_v6, %v7235_v63  ;;  %v7683_v36 = vpop.permute.xlu0 %2316 }
 0x27d   : > { %v7681_v47 = vadd.f32 %v7397_v18, %v7221_v51  ;;  %10434 = vst [vmem:[#allocation55_spill] sm:$0xff] %v7683_v36  ;;  %v7687_v58 = vadd.f32 %v7393_v6, %v7249_v11  ;;  %v7691_v23 = vadd.f32 %v7397_v18, %v7225_v13  ;;  %v7695_v56 = vadd.f32 %v7393_v6, %v7253_v19 }
 0x27e   : > { %v7699_v63 = vadd.f32 %v7397_v18, %v7239_v9  ;;  %v7703_v51 = vadd.f32 %v7393_v6, %v7265_v15  ;;  %v7707_v11 = vadd.f32 %v7397_v18, %v7243_v32  ;;  %v7711_v13 = vadd.f32 %v7393_v6, %v7269_v38  ;;  %v10516_v48 = vld [vmem:[#allocation39_spill] sm:$0xff]  ;;  %v10517_v37 = vld [vmem:[#allocation40_spill] sm:$0xff] }
 0x27f   : > { %v7715_v19 = vadd.f32 %v7397_v18, %v7257_v29  ;;  %v7719_v9 = vadd.f32 %v7393_v6, %v7281_v53  ;;  %v7723_v15 = vadd.f32 %v7397_v18, %v7261_v61  ;;  %v7727_v32 = vadd.f32 %v7393_v6, %v7285_v7  ;;  %v7765_v36 = vpop.permute.xlu1 %2496  ;;  %v10518_v0 = vld [vmem:[#allocation41_spill] sm:$0xff] }
 0x280   : > { %10435 = vst [vmem:[#allocation61_spill] sm:$0xff] %v7703_v51  ;;  %10436 = vst [vmem:[#allocation106_spill] sm:$0xff] %v7707_v11  ;;  %v7731_v38 = vadd.f32 %v7397_v18, %v7273_v57  ;;  %v7735_v29 = vadd.f32 %v7393_v6, %v7297_v45  ;;  %v7739_v53 = vadd.f32 %v7397_v18, %v7277_v42 }
 0x281   : > { %10437 = vst [vmem:[#allocation107_spill] sm:$0xff] %v7711_v13  ;;  %10438 = vst [vmem:[#allocation108_spill] sm:$0xff] %v7715_v19  ;;  %v7743_v61 = vadd.f32 %v7393_v6, %v7301_v40  ;;  %v7747_v7 = vadd.f32 %v7397_v18, %v7289_v25  ;;  %v7751_v57 = vadd.f32 %v7393_v6, %v7310_v16  ;;  %v7767_v25 = vpop.permute.xlu0 %2326  ;;  %v10541_v19 = vld [vmem:[#allocation78_spill] sm:$0xff] }
 0x282   : > { %10439 = vst [vmem:[#allocation109_spill] sm:$0xff] %v7719_v9  ;;  %10440 = vst [vmem:[#allocation110_spill] sm:$0xff] %v7723_v15  ;;  %v7755_v45 = vadd.f32 %v7397_v18, %v7293_v17  ;;  %v7759_v42 = vadd.f32 %v7393_v6, %v7314_v24  ;;  %v7763_v40 = vadd.f32 %v7397_v18, %v7305_v5  ;;  %v10542_v9 = vmax.f32 %v10541_v19, 0.0  ;;  %v10563_v13 = vld [vmem:[#allocation10_spill] sm:$0xff] }
 0x283   : > { %10441 = vst [vmem:[#allocation111_spill] sm:$0xff] %v7727_v32  ;;  %10442 = vst [vmem:[#allocation112_spill] sm:$0xff] %v7731_v38  ;;  %v7771_v16 = vadd.f32 %v7393_v6, %v7330_v59  ;;  %v10543_v32 = vld [vmem:[#allocation94_spill] sm:$0xff] }
 0x284   : > { %10443 = vst [vmem:[#allocation113_spill] sm:$0xff] %v7735_v29  ;;  %10444 = vst [vmem:[#allocation114_spill] sm:$0xff] %v7739_v53  ;;  %v10548_v53 = vld [vmem:[#allocation96_spill] sm:$0xff] }
 0x285   : > { %10445 = vst [vmem:[#allocation115_spill] sm:$0xff] %v7743_v61  ;;  %10446 = vst [vmem:[#allocation116_spill] sm:$0xff] %v7747_v7  ;;  %v10550_v61 = vld [vmem:[#allocation50_spill] sm:$0xff]  ;;  %v10565_v7 = vld [vmem:[#allocation57_spill] sm:$0xff] }
 0x286   : > { %10447 = vst [vmem:[#allocation117_spill] sm:$0xff] %v7751_v57  ;;  %10448 = vst [vmem:[#allocation118_spill] sm:$0xff] %v7755_v45  ;;  %v10454_v57 = vld [vmem:[#allocation73_spill] sm:$0xff] }
 0x287   : > { %10449 = vst [vmem:[#allocation119_spill] sm:$0xff] %v7759_v42  ;;  %10450 = vst [vmem:[#allocation120_spill] sm:$0xff] %v7763_v40  ;;  %v7775_v17 = vadd.f32 %v7397_v18, %v10454_v57  ;;  %v10456_v45 = vld [vmem:[#allocation77_spill] sm:$0xff]  ;;  %v10458_v42 = vld [vmem:[#allocation79_spill] sm:$0xff] }
 0x288   : > { %10451 = vst [vmem:[#allocation121_spill] sm:$0xff] %v7765_v36  ;;  %10452 = vst [vmem:[#allocation122_spill] sm:$0xff] %v7767_v25  ;;  %v7779_v24 = vadd.f32 %v7393_v6, %v10456_v45  ;;  %v7783_v5 = vadd.f32 %v7397_v18, %v10458_v42  ;;  %v10460_v40 = vld [vmem:[#allocation48_spill] sm:$0xff]  ;;  %v7803_v42 = vadd.f32 %v7393_v6, %v7362_v2 }
 0x289   : > { %10453 = vst [vmem:[#allocation123_spill] sm:$0xff] %v7771_v16  ;;  %10455 = vst [vmem:[#allocation73_spill] sm:$0xff] %v7775_v17  ;;  %v7787_v36 = vadd.f32 %v7393_v6, %v10460_v40  ;;  %v10462_v25 = vld [vmem:[#allocation84_spill] sm:$0xff]  ;;  %v10464_v16 = vld [vmem:[#allocation54_spill] sm:$0xff]  ;;  %v7823_v2 = vadd.f32 %v7393_v6, %v7385_v43 }
 0x28a   : > { %10457 = vst [vmem:[#allocation77_spill] sm:$0xff] %v7779_v24  ;;  %10459 = vst [vmem:[#allocation79_spill] sm:$0xff] %v7783_v5  ;;  %v7791_v59 = vadd.f32 %v7397_v18, %v10462_v25  ;;  %v7795_v57 = vadd.f32 %v7393_v6, %v10464_v16  ;;  %v10466_v17 = vld [vmem:[#allocation82_spill] sm:$0xff]  ;;  %v7813_v25 = vadd.f32 %v7393_v6, %v7372_v4  ;;  %v10473_v16 = vld [vmem:[#allocation68_spill] sm:$0xff] }
 0x28b   : > { %10461 = vst [vmem:[#allocation48_spill] sm:$0xff] %v7787_v36  ;;  %v7799_v45 = vadd.f32 %v7397_v18, %v10466_v17  ;;  %10468 = vst [vmem:[#allocation124_spill] sm:$0xff] %v7803_v42  ;;  %v10469_v5 = vld [vmem:[#allocation62_spill] sm:$0xff]  ;;  %v7809_v36 = vpop.permute.xlu1 %2341  ;;  %v7819_v17 = vpop.permute.xlu0 %2351  ;;  %v10477_v42 = vld [vmem:[#allocation60_spill] sm:$0xff]  ;;  %v7835_v4 = vadd.f32 %v7397_v18, %v7376_v44  ;;  %v10549_v44 = vmax.f32 %v10548_v53, 0.0 }
 0x28c   : > { %10463 = vst [vmem:[#allocation84_spill] sm:$0xff] %v7791_v59  ;;  %10465 = vst [vmem:[#allocation54_spill] sm:$0xff] %v7795_v57  ;;  %v7807_v40 = vadd.f32 %v7397_v18, %v10469_v5  ;;  %v7817_v57 = vadd.f32 %v7397_v18, %v10473_v16  ;;  %v7827_v5 = vadd.f32 %v7397_v18, %v10477_v42  ;;  %v10499_v16 = vld [vmem:[#allocation22_spill] sm:$0xff]  ;;  %v10546_v24 = vld [vmem:[#allocation95_spill] sm:$0xff] }
 0x28d   : > { %10467 = vst [vmem:[#allocation82_spill] sm:$0xff] %v7799_v45  ;;  %10471 = vst [vmem:[#allocation125_spill] sm:$0xff] %v7809_v36  ;;  %v7831_v36 = vadd.f32 %v7393_v6, %v7389_v21  ;;  %v10511_v42 = vld [vmem:[#allocation30_spill] sm:$0xff]  ;;  %v10558_v43 = vld [vmem:[#allocation11_spill] sm:$0xff] }
 0x28e   : > { %10470 = vst [vmem:[#allocation62_spill] sm:$0xff] %v7807_v40  ;;  %10472 = vst [vmem:[#allocation126_spill] sm:$0xff] %v7813_v25  ;;  %v10519_v25 = vld [vmem:[#allocation42_spill] sm:$0xff]  ;;  %v10560_v59 = vld [vmem:[#allocation56_spill] sm:$0xff] }
 0x28f   : > { %10474 = vst [vmem:[#allocation68_spill] sm:$0xff] %v7817_v57  ;;  %10475 = vst [vmem:[#allocation127_spill] sm:$0xff] %v7819_v17  ;;  %v7847_v18 = vpop.permute.xlu1 %2361  ;;  %v7853_v1 = vpop.permute.xlu0 %2371  ;;  %v10515_v17 = vld [vmem:[#allocation43_spill] sm:$0xff]  ;;  %v10540_v45 = vld [vmem:[#allocation46_spill] sm:$0xff] }
 0x290   : > { %10476 = vst [vmem:[#allocation128_spill] sm:$0xff] %v7823_v2  ;;  %10478 = vst [vmem:[#allocation60_spill] sm:$0xff] %v7827_v5  ;;  %v10520_v5 = vld [vmem:[#allocation44_spill] sm:$0xff]  ;;  %v10553_v6 = vld [vmem:[#allocation98_spill] sm:$0xff] }
 0x291   : > { %10479 = vst [vmem:[#allocation129_spill] sm:$0xff] %v7831_v36  ;;  %10480 = vst [vmem:[#allocation130_spill] sm:$0xff] %v7835_v4  ;;  %v10551_v4 = vld [vmem:[#allocation97_spill] sm:$0xff]  ;;  %v10554_v19 = vmax.f32 %v10553_v6, 0.0 }
 0x292   : > { %10484 = vst [vmem:[#allocation131_spill] sm:$0xff] %v7847_v18  ;;  %10489 = vst [vmem:[#allocation132_spill] sm:$0xff] %v7853_v1  ;;  %v10539_v18 = vmax.f32 %v7407_v20, 0.0  ;;  %v2515_v1 = vmul.f32 %v10540_v45, %v10542_v9  ;;  %v10552_v20 = vmax.f32 %v10551_v4, 0.0  ;;  %v10564_v4 = vmax.f32 %v10563_v13, 0.0  ;;  %v10573_v13 = vld [vmem:[#allocation102_spill] sm:$0xff] }
 0x293   : > { %v7875_v50 = vpop.permute.xlu1 %2381  ;;  %v7881_v36 = vpop.permute.xlu0 %2391 }
 0x294   : > { %10509 = vst [vmem:[#allocation22_spill] sm:$0xff] %v7875_v50  ;;  %10514 = vst [vmem:[#allocation24_spill] sm:$0xff] %v7881_v36  ;;  %v2514_v36 = vmul.f32 %v10540_v45, %v10539_v18  ;;  %v10547_v50 = vmax.f32 %v10546_v24, 0.0  ;;  %v2519_v18 = vmul.f32 %v10550_v61, %v10552_v20  ;;  %v10556_v45 = vld [vmem:[#allocation99_spill] sm:$0xff]  ;;  %v10559_v24 = vmax.f32 %v10558_v43, 0.0  ;;  %v10566_v20 = vld [vmem:[#allocation9_spill] sm:$0xff] }
 0x295   : > { %v10567_v6 = vmax.f32 %v10566_v20, 0.0  ;;  %2659 = vst [vmem:[#allocation2 + $0x8] sm:$0xff] %v2515_v1  ;;  %v10568_v43 = vld [vmem:[#allocation12_spill] sm:$0xff] }
 0x296   : > { %2658 = vst [vmem:[#allocation2] sm:$0xff] %v2514_v36  ;;  %v10576_v20 = vld [vmem:[#allocation8_spill] sm:$0xff]  ;;  %2664 = vst [vmem:[#allocation2 + $0x28] sm:$0xff] %v2519_v18 }
 0x297   : > { %v7893_v21 = vpop.permute.xlu1 %2401  ;;  %v7897_v57 = vpop.permute.xlu0 %2411  ;;  %v10577_v51 = vmax.f32 %v10576_v20, 0.0 }
 0x298   : > { %10521 = vst [vmem:[#allocation32_spill] sm:$0xff] %v7893_v21  ;;  %10522 = vst [vmem:[#allocation30_spill] sm:$0xff] %v7897_v57 }
 0x29b   : > { %v2272_v21 = vpop.permute.xlu1 %2271  ;;  %v2282_v2 = vpop.permute.xlu0 %2281 }
 0x29c   : > { %v2518_v21 = vmul.f32 %v10550_v61, %v10549_v44  ;;  %v2524_v61 = vmul.f32 %v10565_v7, %v10564_v4  ;;  %v10575_v4 = vld [vmem:[#allocation63_spill] sm:$0xff] }
 0x29d   : > { %v2529_v36 = vmul.f32 %v10575_v4, %v10577_v51 }
 0x29e   : > { %2663 = vst [vmem:[#allocation2 + $0x20] sm:$0xff] %v2518_v21  ;;  %2670 = vst [vmem:[#allocation2 + $0x50] sm:$0xff] %v2524_v61  ;;  %v10588_v21 = vld [vmem:[#allocation18_spill] sm:$0xff] }
 0x29f   : > { %v2292_v15 = vpop.permute.xlu1 %2291  ;;  %v2302_v57 = vpop.permute.xlu0 %2301  ;;  %v10589_v18 = vmax.f32 %v10588_v21, 0.0  ;;  %2676 = vst [vmem:[#allocation2 + $0x78] sm:$0xff] %v2529_v36  ;;  %v10602_v21 = vld [vmem:[#allocation103_spill] sm:$0xff]  ;;  %v10610_v36 = vmax.f32 %v10504_v27, 0.0 }
 0x2a0   : > { %v10544_v57 = vmax.f32 %v10543_v32, 0.0  ;;  %v10555_v15 = vld [vmem:[#allocation52_spill] sm:$0xff]  ;;  %v10557_v32 = vmax.f32 %v10556_v45, 0.0  ;;  %v10569_v45 = vmax.f32 %v10568_v43, 0.0 }
 0x2a1   : > { %v2520_v9 = vmul.f32 %v10555_v15, %v10554_v19  ;;  %v2525_v19 = vmul.f32 %v10565_v7, %v10567_v6 }
 0x2a3   : > { %v2312_v2 = vpop.permute.xlu1 %2311  ;;  %v2322_v40 = vpop.permute.xlu0 %2321  ;;  %2665 = vst [vmem:[#allocation2 + $0x30] sm:$0xff] %v2520_v9  ;;  %2671 = vst [vmem:[#allocation2 + $0x58] sm:$0xff] %v2525_v19  ;;  %v10590_v9 = vld [vmem:[#allocation70_spill] sm:$0xff]  ;;  %v10600_v19 = vld [vmem:[#allocation25_spill] sm:$0xff] }
 0x2a4   : > { %v10545_v2 = vld [vmem:[#allocation51_spill] sm:$0xff] }
 0x2a5   : > { %v2516_v38 = vmul.f32 %v10545_v2, %v10544_v57  ;;  %v2517_v40 = vmul.f32 %v10545_v2, %v10547_v50  ;;  %v2521_v57 = vmul.f32 %v10555_v15, %v10557_v32  ;;  %v2522_v50 = vmul.f32 %v10560_v59, %v10559_v24  ;;  %v10561_v2 = vld [vmem:[#allocation7_spill] sm:$0xff]  ;;  %v10570_v32 = vld [vmem:[#allocation58_spill] sm:$0xff] }
 0x2a6   : > { %v10562_v53 = vmax.f32 %v10561_v2, 0.0  ;;  %v2526_v24 = vmul.f32 %v10570_v32, %v10569_v45  ;;  %v10571_v2 = vld [vmem:[#allocation6_spill] sm:$0xff]  ;;  %v10583_v45 = vld [vmem:[#allocation16_spill] sm:$0xff] }
 0x2a7   : > { %2660 = vst [vmem:[#allocation2 + $0x10] sm:$0xff] %v2516_v38  ;;  %2661 = vst [vmem:[#allocation2 + $0x18] sm:$0xff] %v2517_v40  ;;  %v2332_v15 = vpop.permute.xlu1 %2331  ;;  %v10572_v29 = vmax.f32 %v10571_v2, 0.0  ;;  %v2417_v1 = vpop.permute.xlu0 %2416  ;;  %v10578_v38 = vld [vmem:[#allocation19_spill] sm:$0xff]  ;;  %v10580_v40 = vld [vmem:[#allocation64_spill] sm:$0xff] }
 0x2a8   : > { %v2523_v44 = vmul.f32 %v10560_v59, %v10562_v53  ;;  %v10574_v53 = vmax.f32 %v10573_v13, 0.0  ;;  %2666 = vst [vmem:[#allocation2 + $0x38] sm:$0xff] %v2521_v57  ;;  %v10579_v7 = vmax.f32 %v10578_v38, 0.0  ;;  %v10581_v15 = vld [vmem:[#allocation15_spill] sm:$0xff]  ;;  %v10585_v2 = vld [vmem:[#allocation69_spill] sm:$0xff]  ;;  %2668 = vst [vmem:[#allocation2 + $0x40] sm:$0xff] %v2522_v50  ;;  %v2534_v57 = vmul.f32 %v10590_v9, %v10589_v18 }
 0x2a9   : > { %v2527_v59 = vmul.f32 %v10570_v32, %v10572_v29  ;;  %v10582_v43 = vmax.f32 %v10581_v15, 0.0  ;;  %v10584_v32 = vmax.f32 %v10583_v45, 0.0  ;;  %v10595_v15 = vld [vmem:[#allocation75_spill] sm:$0xff]  ;;  %2673 = vst [vmem:[#allocation2 + $0x60] sm:$0xff] %v2526_v24  ;;  %v10598_v50 = vmax.f32 %v10499_v16, 0.0 }
 0x2aa   : > { %v2528_v11 = vmul.f32 %v10575_v4, %v10574_v53  ;;  %v2530_v6 = vmul.f32 %v10580_v40, %v10579_v7  ;;  %v10586_v53 = vld [vmem:[#allocation17_spill] sm:$0xff]  ;;  %2669 = vst [vmem:[#allocation2 + $0x48] sm:$0xff] %v2523_v44  ;;  %v10593_v7 = vld [vmem:[#allocation20_spill] sm:$0xff]  ;;  %v10596_v45 = vld [vmem:[#allocation23_spill] sm:$0xff]  ;;  %v10603_v18 = vmax.f32 %v10602_v21, 0.0 }
 0x2ab   : > { %v2531_v29 = vmul.f32 %v10580_v40, %v10582_v43  ;;  %v2532_v13 = vmul.f32 %v10585_v2, %v10584_v32  ;;  %v10587_v20 = vmax.f32 %v10586_v53, 0.0  ;;  %v10591_v4 = vld [vmem:[#allocation21_spill] sm:$0xff]  ;;  %v10594_v40 = vmax.f32 %v10593_v7, 0.0  ;;  %2674 = vst [vmem:[#allocation2 + $0x68] sm:$0xff] %v2527_v59  ;;  %v10599_v44 = vld [vmem:[#allocation76_spill] sm:$0xff]  ;;  %v10609_v24 = vld [vmem:[#allocation83_spill] sm:$0xff] }
 0x2ac   : > { %v10592_v1 = vmax.f32 %v10591_v4, 0.0  ;;  %v10597_v32 = vmax.f32 %v10596_v45, 0.0  ;;  %2675 = vst [vmem:[#allocation2 + $0x70] sm:$0xff] %v2528_v11  ;;  %v2538_v61 = vmul.f32 %v10599_v44, %v10598_v50  ;;  %v10601_v53 = vmax.f32 %v10600_v19, 0.0  ;;  %2678 = vst [vmem:[#allocation2 + $0x80] sm:$0xff] %v2530_v6  ;;  %v10607_v11 = vld [vmem:[#allocation31_spill] sm:$0xff] }
 0x2ad   : > { %v2533_v51 = vmul.f32 %v10585_v2, %v10587_v20  ;;  %v2536_v43 = vmul.f32 %v10595_v15, %v10594_v40  ;;  %2679 = vst [vmem:[#allocation2 + $0x88] sm:$0xff] %v2531_v29  ;;  %2680 = vst [vmem:[#allocation2 + $0x90] sm:$0xff] %v2532_v13  ;;  %v10608_v16 = vmax.f32 %v10607_v11, 0.0  ;;  %v10611_v45 = vld [vmem:[#allocation28_spill] sm:$0xff]  ;;  %v10613_v50 = vld [vmem:[#allocation85_spill] sm:$0xff]  ;;  %v10616_v6 = vmax.f32 %v10507_v8, 0.0 }
 0x2ae   : > { %v2535_v38 = vmul.f32 %v10590_v9, %v10592_v1  ;;  %v2537_v2 = vmul.f32 %v10595_v15, %v10597_v32  ;;  %v2539_v20 = vmul.f32 %v10599_v44, %v10601_v53  ;;  %v10604_v9 = vld [vmem:[#allocation81_spill] sm:$0xff]  ;;  %v10605_v1 = vld [vmem:[#allocation27_spill] sm:$0xff]  ;;  %v2543_v15 = vmul.f32 %v10609_v24, %v10610_v36  ;;  %v10614_v19 = vld [vmem:[#allocation26_spill] sm:$0xff]  ;;  %2683 = vst [vmem:[#allocation2 + $0xa0] sm:$0xff] %v2534_v57  ;;  %v2422_v57 = vpop.permute.xlu1 %2421 }
 0x2af   : > { %v2540_v4 = vmul.f32 %v10604_v9, %v10603_v18  ;;  %v10606_v7 = vmax.f32 %v10605_v1, 0.0  ;;  %2681 = vst [vmem:[#allocation2 + $0x98] sm:$0xff] %v2533_v51  ;;  %v2542_v59 = vmul.f32 %v10609_v24, %v10608_v16  ;;  %v10612_v32 = vmax.f32 %v10611_v45, 0.0  ;;  %2685 = vst [vmem:[#allocation2 + $0xb0] sm:$0xff] %v2536_v43  ;;  %v10617_v29 = vld [vmem:[#allocation86_spill] sm:$0xff]  ;;  %v10618_v51 = vld [vmem:[#allocation29_spill] sm:$0xff] }
 0x2b0   : > { %v10615_v53 = vmax.f32 %v10614_v19, 0.0  ;;  %2684 = vst [vmem:[#allocation2 + $0xa8] sm:$0xff] %v2535_v38  ;;  %2686 = vst [vmem:[#allocation2 + $0xb8] sm:$0xff] %v2537_v2  ;;  %v2546_v13 = vmul.f32 %v10617_v29, %v10616_v6  ;;  %v10619_v27 = vmax.f32 %v10618_v51, 0.0  ;;  %v10623_v16 = vmax.f32 %v10511_v42, 0.0  ;;  %v10624_v8 = vld [vmem:[#allocation36_spill] sm:$0xff]  ;;  %v2432_v42 = vpop.permute.xlu0 %2431 }
 0x2b1   : > { %v2541_v40 = vmul.f32 %v10604_v9, %v10606_v7  ;;  %v2544_v44 = vmul.f32 %v10613_v50, %v10612_v32  ;;  %v10620_v9 = vld [vmem:[#allocation37_spill] sm:$0xff]  ;;  %v10622_v7 = vld [vmem:[#allocation87_spill] sm:$0xff]  ;;  %2688 = vst [vmem:[#allocation2 + $0xc0] sm:$0xff] %v2538_v61  ;;  %2689 = vst [vmem:[#allocation2 + $0xc8] sm:$0xff] %v2539_v20  ;;  %v10625_v38 = vmax.f32 %v10624_v8, 0.0  ;;  %v10632_v19 = vmax.f32 %v10517_v37, 0.0 }
 0x2b2   : > { %v2545_v21 = vmul.f32 %v10613_v50, %v10615_v53  ;;  %v2547_v18 = vmul.f32 %v10617_v29, %v10619_v27  ;;  %v10621_v1 = vmax.f32 %v10620_v9, 0.0  ;;  %v2549_v24 = vmul.f32 %v10622_v7, %v10623_v16  ;;  %2690 = vst [vmem:[#allocation2 + $0xd0] sm:$0xff] %v2540_v4  ;;  %v10626_v43 = vld [vmem:[#allocation88_spill] sm:$0xff]  ;;  %v10627_v36 = vld [vmem:[#allocation33_spill] sm:$0xff]  ;;  %2693 = vst [vmem:[#allocation2 + $0xe0] sm:$0xff] %v2542_v59 }
 0x2b3   : > { %2691 = vst [vmem:[#allocation2 + $0xd8] sm:$0xff] %v2541_v40  ;;  %v2550_v2 = vmul.f32 %v10626_v43, %v10625_v38  ;;  %v10628_v45 = vmax.f32 %v10627_v36, 0.0  ;;  %2694 = vst [vmem:[#allocation2 + $0xe8] sm:$0xff] %v2543_v15  ;;  %v10629_v50 = vmax.f32 %v10515_v17, 0.0  ;;  %v10630_v61 = vld [vmem:[#allocation90_spill] sm:$0xff]  ;;  %v10631_v4 = vmax.f32 %v10516_v48, 0.0 }
 0x2b4   : > { %v2548_v11 = vmul.f32 %v10622_v7, %v10621_v1  ;;  %2695 = vst [vmem:[#allocation2 + $0xf0] sm:$0xff] %v2544_v44  ;;  %2696 = vst [vmem:[#allocation2 + $0xf8] sm:$0xff] %v2545_v21  ;;  %v10633_v53 = vld [vmem:[#allocation93_spill] sm:$0xff]  ;;  %v10634_v15 = vmax.f32 %v7579_v55, 0.0  ;;  %v10635_v17 = vmax.f32 %v10518_v0, 0.0  ;;  %v10636_v21 = vld [vmem:[#allocation71_spill] sm:$0xff]  ;;  %v2442_v7 = vpop.permute.xlu1 %2441 }
 0x2b5   : > { %v2551_v32 = vmul.f32 %v10626_v43, %v10628_v45  ;;  %v2554_v20 = vmul.f32 %v10630_v61, %v10629_v50  ;;  %v2555_v40 = vmul.f32 %v10630_v61, %v10631_v4  ;;  %2698 = vst [vmem:[#allocation2 + $0x100] sm:$0xff] %v2546_v13  ;;  %2699 = vst [vmem:[#allocation2 + $0x108] sm:$0xff] %v2547_v18  ;;  %v10637_v6 = vmax.f32 %v7587_v35, 0.0  ;;  %v10639_v13 = vld [vmem:[#allocation66_spill] sm:$0xff]  ;;  %v10642_v18 = vld [vmem:[#allocation104_spill] sm:$0xff] }
 0x2b6   : > { %2700 = vst [vmem:[#allocation2 + $0x110] sm:$0xff] %v2548_v11  ;;  %2701 = vst [vmem:[#allocation2 + $0x118] sm:$0xff] %v2549_v24  ;;  %v2558_v59 = vmul.f32 %v10633_v53, %v10632_v19  ;;  %v2559_v44 = vmul.f32 %v10633_v53, %v10634_v15  ;;  %v2562_v48 = vmul.f32 %v10636_v21, %v10635_v17  ;;  %v10638_v37 = vmax.f32 %v10519_v25, 0.0  ;;  %v10645_v11 = vld [vmem:[#allocation38_spill] sm:$0xff]  ;;  %v10648_v8 = vld [vmem:[#allocation55_spill] sm:$0xff] }
 0x2b7   : > { %2703 = vst [vmem:[#allocation2 + $0x120] sm:$0xff] %v2550_v2  ;;  %2704 = vst [vmem:[#allocation2 + $0x128] sm:$0xff] %v2551_v32  ;;  %v2563_v29 = vmul.f32 %v10636_v21, %v10637_v6  ;;  %v10640_v55 = vmax.f32 %v7595_v34, 0.0  ;;  %v10641_v0 = vmax.f32 %v10520_v5, 0.0  ;;  %v10643_v35 = vmax.f32 %v7605_v26, 0.0  ;;  %v2452_v5 = vpop.permute.xlu0 %2451  ;;  %v10651_v2 = vld [vmem:[#allocation122_spill] sm:$0xff] }
 0x2b8   : > { %2708 = vst [vmem:[#allocation2 + $0x140] sm:$0xff] %v2554_v20  ;;  %2709 = vst [vmem:[#allocation2 + $0x148] sm:$0xff] %v2555_v40  ;;  %v2566_v51 = vmul.f32 %v10639_v13, %v10638_v37  ;;  %v10644_v25 = vmax.f32 %v7611_v62, 0.0  ;;  %v10646_v34 = vmax.f32 %v7615_v14, 0.0  ;;  %v10647_v57 = vmax.f32 %v7619_v12, 0.0  ;;  %v10654_v32 = vld [vmem:[#allocation13_spill] sm:$0xff] }
 0x2b9   : > { %v2567_v27 = vmul.f32 %v10639_v13, %v10640_v55  ;;  %2713 = vst [vmem:[#allocation2 + $0x160] sm:$0xff] %v2558_v59  ;;  %2714 = vst [vmem:[#allocation2 + $0x168] sm:$0xff] %v2559_v44  ;;  %v2570_v9 = vmul.f32 %v10642_v18, %v10641_v0  ;;  %v2571_v1 = vmul.f32 %v10642_v18, %v10643_v35  ;;  %v10649_v38 = vmax.f32 %v7623_v31, 0.0  ;;  %v10657_v20 = vld [vmem:[#allocation125_spill] sm:$0xff]  ;;  %v10660_v19 = vld [vmem:[#allocation14_spill] sm:$0xff]  ;;  %v2462_v13 = vpop.permute.xlu1 %2461 }
 0x2ba   : > { %2718 = vst [vmem:[#allocation2 + $0x180] sm:$0xff] %v2562_v48  ;;  %2719 = vst [vmem:[#allocation2 + $0x188] sm:$0xff] %v2563_v29  ;;  %v2574_v16 = vmul.f32 %v10645_v11, %v10644_v25  ;;  %v2575_v24 = vmul.f32 %v10645_v11, %v10646_v34  ;;  %v2578_v26 = vmul.f32 %v10648_v8, %v10647_v57  ;;  %v10650_v62 = vmax.f32 %v7627_v52, 0.0  ;;  %v10663_v15 = vld [vmem:[#allocation127_spill] sm:$0xff]  ;;  %v10675_v0 = vld [vmem:[#allocation132_spill] sm:$0xff] }
 0x2bb   : > { %2723 = vst [vmem:[#allocation2 + $0x1a0] sm:$0xff] %v2566_v51  ;;  %2724 = vst [vmem:[#allocation2 + $0x1a8] sm:$0xff] %v2567_v27  ;;  %v2579_v43 = vmul.f32 %v10648_v8, %v10649_v38  ;;  %v10652_v14 = vmax.f32 %v7631_v10, 0.0  ;;  %v10653_v12 = vmax.f32 %v7635_v60, 0.0  ;;  %v10655_v31 = vmax.f32 %v7639_v28, 0.0  ;;  %v10666_v21 = vld [vmem:[#allocation35_spill] sm:$0xff]  ;;  %v2472_v35 = vpop.permute.xlu0 %2471 }
 0x2bc   : > { %2728 = vst [vmem:[#allocation2 + $0x1c0] sm:$0xff] %v2570_v9  ;;  %2729 = vst [vmem:[#allocation2 + $0x1c8] sm:$0xff] %v2571_v1  ;;  %v2582_v36 = vmul.f32 %v10651_v2, %v10650_v62  ;;  %v10656_v61 = vmax.f32 %v7643_v39, 0.0  ;;  %v10658_v4 = vmax.f32 %v7647_v30, 0.0  ;;  %v10659_v40 = vmax.f32 %v7651_v54, 0.0  ;;  %v10669_v29 = vld [vmem:[#allocation131_spill] sm:$0xff] }
 0x2bd   : > { %v2583_v45 = vmul.f32 %v10651_v2, %v10652_v14  ;;  %2733 = vst [vmem:[#allocation2 + $0x1e0] sm:$0xff] %v2574_v16  ;;  %2734 = vst [vmem:[#allocation2 + $0x1e8] sm:$0xff] %v2575_v24  ;;  %v2586_v42 = vmul.f32 %v10654_v32, %v10653_v12  ;;  %v2587_v50 = vmul.f32 %v10654_v32, %v10655_v31  ;;  %v10661_v53 = vmax.f32 %v7655_v22, 0.0  ;;  %v10672_v51 = vld [vmem:[#allocation34_spill] sm:$0xff]  ;;  %v10679_v7 = vld [vmem:[#allocation47_spill] sm:$0xff] }
 0x2be   : > { %v2588_v52 = vmul.f32 %v10657_v20, %v10656_v61  ;;  %v2589_v10 = vmul.f32 %v10657_v20, %v10658_v4  ;;  %2738 = vst [vmem:[#allocation2 + $0x200] sm:$0xff] %v2578_v26  ;;  %2739 = vst [vmem:[#allocation2 + $0x208] sm:$0xff] %v2579_v43  ;;  %v2590_v60 = vmul.f32 %v10660_v19, %v10659_v40  ;;  %v10662_v59 = vmax.f32 %v7659_v46, 0.0  ;;  %v10684_v24 = vld [vmem:[#allocation22_spill] sm:$0xff]  ;;  %v10687_v26 = vld [vmem:[#allocation109_spill] sm:$0xff] }
 0x2bf   : > { %v2591_v28 = vmul.f32 %v10660_v19, %v10661_v53  ;;  %v10664_v44 = vmax.f32 %v7663_v49, 0.0  ;;  %2743 = vst [vmem:[#allocation2 + $0x220] sm:$0xff] %v2582_v36  ;;  %2744 = vst [vmem:[#allocation2 + $0x228] sm:$0xff] %v2583_v45  ;;  %v10665_v17 = vmax.f32 %v7669_v33, 0.0  ;;  %v10667_v48 = vmax.f32 %v7673_v3, 0.0  ;;  %v10689_v43 = vld [vmem:[#allocation53_spill] sm:$0xff] }
 0x2c0   : > { %v2592_v39 = vmul.f32 %v10663_v15, %v10662_v59  ;;  %v10668_v6 = vmax.f32 %v7677_v41, 0.0  ;;  %v10670_v37 = vmax.f32 %v7681_v47, 0.0  ;;  %2748 = vst [vmem:[#allocation2 + $0x240] sm:$0xff] %v2586_v42  ;;  %2749 = vst [vmem:[#allocation2 + $0x248] sm:$0xff] %v2587_v50  ;;  %v10671_v33 = vmax.f32 %v7687_v58, 0.0  ;;  %v10677_v58 = vld [vmem:[#allocation61_spill] sm:$0xff] }
 0x2c1   : > { %v2593_v30 = vmul.f32 %v10663_v15, %v10664_v44  ;;  %v2594_v54 = vmul.f32 %v10666_v21, %v10665_v17  ;;  %v2595_v22 = vmul.f32 %v10666_v21, %v10667_v48  ;;  %2750 = vst [vmem:[#allocation2 + $0x250] sm:$0xff] %v2588_v52  ;;  %2751 = vst [vmem:[#allocation2 + $0x258] sm:$0xff] %v2589_v10  ;;  %v10673_v3 = vmax.f32 %v7691_v23, 0.0  ;;  %v10680_v23 = vld [vmem:[#allocation106_spill] sm:$0xff]  ;;  %v10692_v45 = vld [vmem:[#allocation111_spill] sm:$0xff] }
 0x2c2   : > { %v2596_v46 = vmul.f32 %v10669_v29, %v10668_v6  ;;  %v2597_v49 = vmul.f32 %v10669_v29, %v10670_v37  ;;  %v2598_v55 = vmul.f32 %v10672_v51, %v10671_v33  ;;  %v10674_v41 = vmax.f32 %v7695_v56, 0.0  ;;  %2753 = vst [vmem:[#allocation2 + $0x260] sm:$0xff] %v2590_v60  ;;  %2754 = vst [vmem:[#allocation2 + $0x268] sm:$0xff] %v2591_v28  ;;  %v10682_v56 = vld [vmem:[#allocation107_spill] sm:$0xff]  ;;  %v10690_v2 = vld [vmem:[#allocation110_spill] sm:$0xff] }
 0x2c3   : > { %v2599_v27 = vmul.f32 %v10672_v51, %v10673_v3  ;;  %v10676_v47 = vmax.f32 %v7699_v63, 0.0  ;;  %2755 = vst [vmem:[#allocation2 + $0x270] sm:$0xff] %v2592_v39  ;;  %2756 = vst [vmem:[#allocation2 + $0x278] sm:$0xff] %v2593_v30  ;;  %v10678_v1 = vmax.f32 %v10677_v58, 0.0  ;;  %v10681_v11 = vmax.f32 %v10680_v23, 0.0  ;;  %v10685_v63 = vld [vmem:[#allocation108_spill] sm:$0xff]  ;;  %v2482_v3 = vpop.permute.xlu1 %2481  ;;  %v2492_v58 = vpop.permute.xlu0 %2491 }
 0x2c4   : > { %v2600_v18 = vmul.f32 %v10675_v0, %v10674_v41  ;;  %v10683_v34 = vmax.f32 %v10682_v56, 0.0  ;;  %v10686_v57 = vmax.f32 %v10685_v63, 0.0  ;;  %2758 = vst [vmem:[#allocation2 + $0x280] sm:$0xff] %v2594_v54  ;;  %2759 = vst [vmem:[#allocation2 + $0x288] sm:$0xff] %v2595_v22  ;;  %v10688_v38 = vmax.f32 %v10687_v26, 0.0  ;;  %v10694_v32 = vld [vmem:[#allocation24_spill] sm:$0xff] }
 0x2c5   : > { %v2601_v9 = vmul.f32 %v10675_v0, %v10676_v47  ;;  %v2602_v25 = vmul.f32 %v10679_v7, %v10678_v1  ;;  %v2603_v16 = vmul.f32 %v10679_v7, %v10681_v11  ;;  %2760 = vst [vmem:[#allocation2 + $0x290] sm:$0xff] %v2596_v46  ;;  %2761 = vst [vmem:[#allocation2 + $0x298] sm:$0xff] %v2597_v49  ;;  %v10691_v36 = vmax.f32 %v10690_v2, 0.0  ;;  %v10695_v31 = vld [vmem:[#allocation112_spill] sm:$0xff]  ;;  %v10697_v20 = vld [vmem:[#allocation113_spill] sm:$0xff] }
 0x2c6   : > { %v2604_v5 = vmul.f32 %v10684_v24, %v10683_v34  ;;  %v2605_v8 = vmul.f32 %v10684_v24, %v10686_v57  ;;  %v2606_v62 = vmul.f32 %v10689_v43, %v10688_v38  ;;  %v10693_v12 = vmax.f32 %v10692_v45, 0.0  ;;  %2763 = vst [vmem:[#allocation2 + $0x2a0] sm:$0xff] %v2598_v55  ;;  %2764 = vst [vmem:[#allocation2 + $0x2a8] sm:$0xff] %v2599_v27  ;;  %v10699_v4 = vld [vmem:[#allocation67_spill] sm:$0xff]  ;;  %v10700_v40 = vld [vmem:[#allocation114_spill] sm:$0xff] }
 0x2c7   : > { %v2607_v14 = vmul.f32 %v10689_v43, %v10691_v36  ;;  %v10696_v50 = vmax.f32 %v10695_v31, 0.0  ;;  %2765 = vst [vmem:[#allocation2 + $0x2b0] sm:$0xff] %v2600_v18  ;;  %2766 = vst [vmem:[#allocation2 + $0x2b8] sm:$0xff] %v2601_v9  ;;  %v10698_v52 = vmax.f32 %v10697_v20, 0.0  ;;  %v10701_v19 = vmax.f32 %v10700_v40, 0.0  ;;  %v10702_v53 = vld [vmem:[#allocation115_spill] sm:$0xff] }
 0x2c8   : > { %v2608_v42 = vmul.f32 %v10694_v32, %v10693_v12  ;;  %v10703_v28 = vmax.f32 %v10702_v53, 0.0  ;;  %v10704_v59 = vld [vmem:[#allocation32_spill] sm:$0xff]  ;;  %2768 = vst [vmem:[#allocation2 + $0x2c0] sm:$0xff] %v2602_v25  ;;  %2769 = vst [vmem:[#allocation2 + $0x2c8] sm:$0xff] %v2603_v16  ;;  %v10707_v17 = vld [vmem:[#allocation117_spill] sm:$0xff] }
 0x2c9   : > { %v2609_v61 = vmul.f32 %v10694_v32, %v10696_v50  ;;  %v2610_v10 = vmul.f32 %v10699_v4, %v10698_v52  ;;  %v2611_v60 = vmul.f32 %v10699_v4, %v10701_v19  ;;  %v10705_v39 = vld [vmem:[#allocation116_spill] sm:$0xff]  ;;  %2770 = vst [vmem:[#allocation2 + $0x2d0] sm:$0xff] %v2604_v5  ;;  %2771 = vst [vmem:[#allocation2 + $0x2d8] sm:$0xff] %v2605_v8  ;;  %v10708_v21 = vmax.f32 %v10707_v17, 0.0  ;;  %v10710_v22 = vld [vmem:[#allocation118_spill] sm:$0xff] }
 0x2ca   : > { %v2612_v15 = vmul.f32 %v10704_v59, %v10703_v28  ;;  %v10706_v44 = vmax.f32 %v10705_v39, 0.0  ;;  %v10709_v54 = vld [vmem:[#allocation100_spill] sm:$0xff]  ;;  %v10711_v6 = vmax.f32 %v10710_v22, 0.0  ;;  %v10712_v46 = vld [vmem:[#allocation119_spill] sm:$0xff]  ;;  %v10714_v49 = vld [vmem:[#allocation30_spill] sm:$0xff]  ;;  %2773 = vst [vmem:[#allocation2 + $0x2e0] sm:$0xff] %v2606_v62 }
 0x2cb   : > { %v2614_v48 = vmul.f32 %v10709_v54, %v10708_v21  ;;  %v10713_v37 = vmax.f32 %v10712_v46, 0.0  ;;  %v10715_v33 = vld [vmem:[#allocation120_spill] sm:$0xff]  ;;  %2774 = vst [vmem:[#allocation2 + $0x2e8] sm:$0xff] %v2607_v14  ;;  %2775 = vst [vmem:[#allocation2 + $0x2f0] sm:$0xff] %v2608_v42  ;;  %v10717_v27 = vld [vmem:[#allocation123_spill] sm:$0xff] }
 0x2cc   : > { %v2613_v30 = vmul.f32 %v10704_v59, %v10706_v44  ;;  %v2615_v29 = vmul.f32 %v10709_v54, %v10711_v6  ;;  %v10716_v51 = vmax.f32 %v10715_v33, 0.0  ;;  %2776 = vst [vmem:[#allocation2 + $0x2f8] sm:$0xff] %v2609_v61  ;;  %2778 = vst [vmem:[#allocation2 + $0x300] sm:$0xff] %v2610_v10  ;;  %v10718_v41 = vmax.f32 %v10717_v27, 0.0  ;;  %v10719_v0 = vld [vmem:[#allocation59_spill] sm:$0xff]  ;;  %v10720_v47 = vld [vmem:[#allocation73_spill] sm:$0xff]  ;;  %v2502_v44 = vpop.permute.xlu1 %2501 }
 0x2cd   : > { %v2616_v13 = vmul.f32 %v10714_v49, %v10713_v37  ;;  %2779 = vst [vmem:[#allocation2 + $0x308] sm:$0xff] %v2611_v60  ;;  %2780 = vst [vmem:[#allocation2 + $0x310] sm:$0xff] %v2612_v15  ;;  %v10721_v9 = vmax.f32 %v10720_v47, 0.0  ;;  %v10722_v1 = vld [vmem:[#allocation77_spill] sm:$0xff]  ;;  %v10725_v11 = vld [vmem:[#allocation79_spill] sm:$0xff] }
 0x2ce   : > { %v2617_v55 = vmul.f32 %v10714_v49, %v10716_v51  ;;  %2781 = vst [vmem:[#allocation2 + $0x318] sm:$0xff] %v2613_v30  ;;  %v2622_v18 = vmul.f32 %v10719_v0, %v10718_v41  ;;  %2783 = vst [vmem:[#allocation2 + $0x320] sm:$0xff] %v2614_v48  ;;  %v10723_v7 = vmax.f32 %v10722_v1, 0.0  ;;  %v10724_v25 = vld [vmem:[#allocation65_spill] sm:$0xff]  ;;  %v10726_v16 = vmax.f32 %v10725_v11, 0.0  ;;  %v10727_v34 = vld [vmem:[#allocation48_spill] sm:$0xff]  ;;  %v2507_v49 = vpop.permute.xlu0 %2506 }
 0x2cf   : > { %v2623_v35 = vmul.f32 %v10719_v0, %v10721_v9  ;;  %2784 = vst [vmem:[#allocation2 + $0x328] sm:$0xff] %v2615_v29  ;;  %2785 = vst [vmem:[#allocation2 + $0x330] sm:$0xff] %v2616_v13  ;;  %v10728_v24 = vmax.f32 %v10727_v34, 0.0  ;;  %v10729_v5 = vld [vmem:[#allocation74_spill] sm:$0xff]  ;;  %v10730_v57 = vld [vmem:[#allocation84_spill] sm:$0xff] }
 0x2d0   : > { %2786 = vst [vmem:[#allocation2 + $0x338] sm:$0xff] %v2617_v55  ;;  %v2626_v23 = vmul.f32 %v10724_v25, %v10723_v7  ;;  %v2627_v56 = vmul.f32 %v10724_v25, %v10726_v16  ;;  %v10731_v8 = vmax.f32 %v10730_v57, 0.0  ;;  %2793 = vst [vmem:[#allocation2 + $0x360] sm:$0xff] %v2622_v18  ;;  %v10732_v38 = vld [vmem:[#allocation54_spill] sm:$0xff]  ;;  %v10734_v62 = vld [vmem:[#allocation101_spill] sm:$0xff] }
 0x2d1   : > { %v2630_v63 = vmul.f32 %v10729_v5, %v10728_v24  ;;  %2794 = vst [vmem:[#allocation2 + $0x368] sm:$0xff] %v2623_v35  ;;  %v10733_v43 = vmax.f32 %v10732_v38, 0.0  ;;  %v10735_v36 = vld [vmem:[#allocation82_spill] sm:$0xff]  ;;  %v10737_v12 = vld [vmem:[#allocation124_spill] sm:$0xff]  ;;  %v10739_v42 = vld [vmem:[#allocation105_spill] sm:$0xff] }
 0x2d2   : > { %v2631_v26 = vmul.f32 %v10729_v5, %v10731_v8  ;;  %v10736_v14 = vmax.f32 %v10735_v36, 0.0  ;;  %2798 = vst [vmem:[#allocation2 + $0x380] sm:$0xff] %v2626_v23  ;;  %2799 = vst [vmem:[#allocation2 + $0x388] sm:$0xff] %v2627_v56  ;;  %v10738_v32 = vmax.f32 %v10737_v12, 0.0  ;;  %v10740_v50 = vld [vmem:[#allocation62_spill] sm:$0xff]  ;;  %v10744_v40 = vld [vmem:[#allocation45_spill] sm:$0xff] }
 0x2d3   : > { %v2634_v2 = vmul.f32 %v10734_v62, %v10733_v43  ;;  %v10741_v61 = vmax.f32 %v10740_v50, 0.0  ;;  %2803 = vst [vmem:[#allocation2 + $0x3a0] sm:$0xff] %v2630_v63  ;;  %v5395_v52 = vld [vmem:[%s7378_s23 + $0x10] ss:$8 sm:$0x3] }
 0x2d4   : > { %v2635_v45 = vmul.f32 %v10734_v62, %v10736_v14  ;;  %v2638_v31 = vmul.f32 %v10739_v42, %v10738_v32  ;;  %2804 = vst [vmem:[#allocation2 + $0x3a8] sm:$0xff] %v2631_v26  ;;  %v10742_v4 = vld [vmem:[#allocation126_spill] sm:$0xff]  ;;  %v10745_v60 = vld [vmem:[#allocation68_spill] sm:$0xff]  ;;  %v2838_v15 = vld [vmem:[#allocation2 + $0x8] sm:$0x7f] }
 0x2d5   : > { %v2639_v20 = vmul.f32 %v10739_v42, %v10741_v61  ;;  %v10743_v10 = vmax.f32 %v10742_v4, 0.0  ;;  %v10746_v53 = vmax.f32 %v10745_v60, 0.0  ;;  %2808 = vst [vmem:[#allocation2 + $0x3c0] sm:$0xff] %v2634_v2  ;;  %v2837_v59 = vld [vmem:[#allocation2] sm:$0x7f]  ;;  %v10747_v30 = vld [vmem:[#allocation128_spill] sm:$0xff] }
 0x2d6   : > { %2809 = vst [vmem:[#allocation2 + $0x3c8] sm:$0xff] %v2635_v45  ;;  %v8246_v39 = vld [vmem:[#allocation2 + $0x20] sm:$0x7f]  ;;  %v10748_v17 = vmax.f32 %v10747_v30, 0.0  ;;  %v10749_v21 = vld [vmem:[#allocation49_spill] sm:$0xff]  ;;  %v10750_v48 = vld [vmem:[#allocation60_spill] sm:$0xff] }
 0x2d7   : > { %v2642_v19 = vmul.f32 %v10744_v40, %v10743_v10  ;;  %v2643_v28 = vmul.f32 %v10744_v40, %v10746_v53  ;;  %v10751_v22 = vmax.f32 %v10750_v48, 0.0  ;;  %2813 = vst [vmem:[#allocation2 + $0x3e0] sm:$0xff] %v2638_v31  ;;  %2814 = vst [vmem:[#allocation2 + $0x3e8] sm:$0xff] %v2639_v20  ;;  %v8254_v29 = vld [vmem:[#allocation2 + $0x28] sm:$0x7f]  ;;  %v10752_v13 = vld [vmem:[#allocation129_spill] sm:$0xff] }
 0x2d8   : > { %v2646_v54 = vmul.f32 %v10749_v21, %v10748_v17  ;;  %v8256_v46 = vld [vmem:[#allocation2 + $0x40] sm:$0x7f]  ;;  %v8258_v37 = vld [vmem:[#allocation2 + $0x48] sm:$0x7f]  ;;  %v10753_v33 = vmax.f32 %v10752_v13, 0.0  ;;  %v10754_v51 = vld [vmem:[#allocation121_spill] sm:$0xff] }
 0x2d9   : > { %v2647_v6 = vmul.f32 %v10749_v21, %v10751_v22  ;;  %v10755_v3 = vld [vmem:[#allocation130_spill] sm:$0xff]  ;;  %2818 = vst [vmem:[#allocation2 + $0x400] sm:$0xff] %v2642_v19  ;;  %2819 = vst [vmem:[#allocation2 + $0x408] sm:$0xff] %v2643_v28  ;;  %v8268_v18 = vld [vmem:[#allocation2 + $0x68] sm:$0x7f] }
 0x2da   : > { %v2650_v55 = vmul.f32 %v10754_v51, %v10753_v33  ;;  %v10756_v27 = vmax.f32 %v10755_v3, 0.0  ;;  %v8266_v0 = vld [vmem:[#allocation2 + $0x60] sm:$0x7f]  ;;  %2823 = vst [vmem:[#allocation2 + $0x420] sm:$0xff] %v2646_v54  ;;  %v8272_v9 = vld [vmem:[#allocation2 + $0x88] sm:$0x7f] }
 0x2db   : > { %v8270_v47 = vld [vmem:[#allocation2 + $0x80] sm:$0x7f]  ;;  %2824 = vst [vmem:[#allocation2 + $0x428] sm:$0xff] %v2647_v6  ;;  %v8276_v58 = vld [vmem:[#allocation2 + $0xa8] sm:$0x7f]  ;;  %v10758_v16 = vld [vmem:[#allocation92_spill] sm:$0xff] }
 0x2dc   : > { %v2651_v41 = vmul.f32 %v10754_v51, %v10756_v27  ;;  %v8274_v35 = vld [vmem:[#allocation2 + $0xa0] sm:$0x7f]  ;;  %2828 = vst [vmem:[#allocation2 + $0x440] sm:$0xff] %v2650_v55  ;;  %v2856_v25 = vld [vmem:[#allocation2 + $0x248] sm:$0x7f]  ;;  %v2921_v56 = vrot.slane %v5395_v52, %v10758_v16  ;;  %v10759_v57 = vld [vmem:[#allocation80_spill] sm:$0xff] }
 0x2dd   : > { %v8278_v1 = vld [vmem:[#allocation2 + $0xc0] sm:$0x7f]  ;;  %v10757_v23 = vld [vmem:[#allocation91_spill] sm:$0xff]  ;;  %v2883_v8 = vmul.f32 %v10759_v57, %v2837_v59  ;;  %v10760_v26 = vld [vmem:[#allocation72_spill] sm:$0xff]  ;;  %v2885_v43 = vmul.f32 %v10759_v57, %v8246_v39  ;;  %v2887_v45 = vmul.f32 %v10759_v57, %v8256_v46  ;;  %v2889_v32 = vmul.f32 %v10759_v57, %v8266_v0 }
 0x2de   : > { %2829 = vst [vmem:[#allocation2 + $0x448] sm:$0xff] %v2651_v41  ;;  %v2855_v7 = vld [vmem:[#allocation2 + $0x240] sm:$0x7f]  ;;  %v2917_v11 = vrot.slane %v5395_v52, %v10757_v23  ;;  %v8282_v34 = vld [vmem:[#allocation2 + $0xc8] sm:$0x7f]  ;;  %v2884_v38 = vmul.f32 %v10760_v26, %v2838_v15  ;;  %v2886_v62 = vmul.f32 %v10760_v26, %v8254_v29  ;;  %v2888_v12 = vmul.f32 %v10760_v26, %v8258_v37 }
 0x2df   : > { %v8284_v24 = vld [vmem:[#allocation2 + $0x260] sm:$0x7f]  ;;  %v8286_v5 = vld [vmem:[#allocation2 + $0x268] sm:$0x7f]  ;;  %v2890_v42 = vmul.f32 %v10760_v26, %v8268_v18  ;;  %v2891_v20 = vmul.f32 %v10759_v57, %v8270_v47  ;;  %v2892_v52 = vmul.f32 %v10760_v26, %v8272_v9  ;;  %v2893_v4 = vmul.f32 %v10759_v57, %v8274_v35 }
 0x2e0   : > { %v8288_v63 = vld [vmem:[#allocation2 + $0x280] sm:$0x7f]  ;;  %v8296_v2 = vld [vmem:[#allocation2 + $0x288] sm:$0x7f]  ;;  %v2894_v10 = vmul.f32 %v10760_v26, %v8276_v58  ;;  %v2895_v53 = vmul.f32 %v10759_v57, %v8278_v1  ;;  %v2924_v28 = vmul.f32 %v2917_v11, %v2855_v7  ;;  %v2925_v59 = vmul.f32 %v2921_v56, %v2856_v25 }
 0x2e1   : > { %10761 = vst [vmem:[#allocation43_spill] sm:$0xff] %v8296_v2  ;;  %v8298_v36 = vld [vmem:[#allocation2 + $0x2a0] sm:$0x7f]  ;;  %v8300_v14 = vld [vmem:[#allocation2 + $0x2a8] sm:$0x7f]  ;;  %v2926_v15 = vmul.f32 %v2917_v11, %v8284_v24  ;;  %v2927_v44 = vmul.f32 %v2921_v56, %v8286_v5  ;;  %v2928_v30 = vmul.f32 %v2917_v11, %v8288_v63  ;;  %v2929_v17 = vmul.f32 %v2921_v56, %v8296_v2 }
 0x2e2   : > { %10762 = vst [vmem:[#allocation39_spill] sm:$0xff] %v8298_v36  ;;  %10763 = vst [vmem:[#allocation40_spill] sm:$0xff] %v8300_v14  ;;  %v8310_v31 = vld [vmem:[#allocation2 + $0x2c0] sm:$0x7f]  ;;  %v8312_v50 = vld [vmem:[#allocation2 + $0x2c8] sm:$0x7f]  ;;  %v2930_v21 = vmul.f32 %v2917_v11, %v8298_v36  ;;  %v2896_v48 = vmul.f32 %v10760_v26, %v8282_v34  ;;  %v2931_v22 = vmul.f32 %v2921_v56, %v8300_v14 }
 0x2e3   : > { %10764 = vst [vmem:[#allocation41_spill] sm:$0xff] %v8310_v31  ;;  %10765 = vst [vmem:[#allocation42_spill] sm:$0xff] %v8312_v50  ;;  %v8314_v61 = vld [vmem:[#allocation2 + $0x2e0] sm:$0x7f]  ;;  %v8324_v40 = vld [vmem:[#allocation2 + $0x2e8] sm:$0x7f]  ;;  %v2932_v6 = vmul.f32 %v2917_v11, %v8310_v31  ;;  %v2933_v49 = vmul.f32 %v2921_v56, %v8312_v50  ;;  %v2938_v3 = vadd.f32 %v2924_v28, %v2883_v8 }
 0x2e4   : > { %10766 = vst [vmem:[#allocation44_spill] sm:$0xff] %v8314_v61  ;;  %10767 = vst [vmem:[#allocation46_spill] sm:$0xff] %v8324_v40  ;;  %v8326_v19 = vld [vmem:[#allocation2 + $0x300] sm:$0x7f]  ;;  %v8328_v60 = vld [vmem:[#allocation2 + $0x308] sm:$0x7f]  ;;  %v2934_v13 = vmul.f32 %v2917_v11, %v8314_v61  ;;  %v2935_v33 = vmul.f32 %v2921_v56, %v8324_v40  ;;  %v2939_v27 = vadd.f32 %v2925_v59, %v2884_v38 }
 0x2e5   : > { %v5396_v54 = vld [vmem:[%s7378_s23 + $0x20] ss:$8 sm:$0x3]  ;;  %v2936_v51 = vmul.f32 %v2917_v11, %v8326_v19  ;;  %v2937_v55 = vmul.f32 %v2921_v56, %v8328_v60  ;;  %v2940_v41 = vadd.f32 %v2926_v15, %v2885_v43  ;;  %v2941_v25 = vadd.f32 %v2927_v44, %v2886_v62  ;;  %v5397_v28 = vld [vmem:[%s7378_s23 + $0x30] ss:$8 sm:$0x3] }
 0x2e6   : > { %v2958_v7 = vrot.slane %v5396_v54, %v10757_v23  ;;  %v2942_v57 = vadd.f32 %v2928_v30, %v2887_v45  ;;  %v2943_v26 = vadd.f32 %v2929_v17, %v2888_v12  ;;  %v2944_v14 = vadd.f32 %v2930_v21, %v2889_v32  ;;  %v8348_v31 = vld [vmem:[#allocation2 + $0xe0] sm:$0x7f]  ;;  %v8351_v38 = vld [vmem:[#allocation2 + $0xe8] sm:$0x7f] }
 0x2e7   : > { %10768 = vst [vmem:[#allocation78_spill] sm:$0xff] %v8348_v31  ;;  %v2945_v50 = vadd.f32 %v2931_v22, %v2890_v42  ;;  %v2946_v36 = vadd.f32 %v2932_v6, %v2891_v20  ;;  %v2947_v61 = vadd.f32 %v2933_v49, %v2892_v52  ;;  %v2962_v40 = vrot.slane %v5396_v54, %v10758_v16 }
 0x2e8   : > { %v2948_v2 = vadd.f32 %v2934_v13, %v2893_v4  ;;  %v2949_v11 = vadd.f32 %v2935_v33, %v2894_v10  ;;  %v2950_v56 = vadd.f32 %v2936_v51, %v2895_v53  ;;  %v2951_v8 = vadd.f32 %v2937_v55, %v2896_v48  ;;  %v5398_v48 = vld [vmem:[%s7378_s23 + $0x40] ss:$8 sm:$0x3]  ;;  %v5399_v33 = vld [vmem:[%s7378_s23 + $0x1] ss:$8 sm:$0x3] }
 0x2e9   : > { %v2965_v43 = vmul.f32 %v2958_v7, %v8246_v39  ;;  %v2967_v62 = vmul.f32 %v2958_v7, %v8256_v46  ;;  %v2969_v45 = vmul.f32 %v2958_v7, %v8266_v0  ;;  %v2971_v12 = vmul.f32 %v2958_v7, %v8270_v47  ;;  %v8373_v51 = vld [vmem:[%s7378_s23 + $0x11] ss:$8 sm:$0x3] }
 0x2ea   : > { %v2966_v32 = vmul.f32 %v2962_v40, %v8254_v29  ;;  %v2973_v42 = vmul.f32 %v2958_v7, %v8274_v35  ;;  %v2975_v20 = vmul.f32 %v2958_v7, %v8278_v1  ;;  %v2977_v52 = vmul.f32 %v2958_v7, %v8348_v31  ;;  %10769 = vst [vmem:[#allocation94_spill] sm:$0xff] %v8373_v51 }
 0x2eb   : > { %v2968_v4 = vmul.f32 %v2962_v40, %v8258_v37  ;;  %v2970_v10 = vmul.f32 %v2962_v40, %v8268_v18  ;;  %v2972_v39 = vmul.f32 %v2962_v40, %v8272_v9  ;;  %v2974_v53 = vmul.f32 %v2962_v40, %v8276_v58 }
 0x2ec   : > { %v2976_v29 = vmul.f32 %v2962_v40, %v8282_v34  ;;  %v2978_v59 = vmul.f32 %v2962_v40, %v8351_v38  ;;  %v2979_v15 = vadd.f32 %v2965_v43, %v2938_v3  ;;  %v2980_v44 = vadd.f32 %v2966_v32, %v2939_v27  ;;  %v10772_v43 = vld [vmem:[#allocation39_spill] sm:$0xff] }
 0x2ed   : > { %v2981_v30 = vadd.f32 %v2967_v62, %v2940_v41  ;;  %v2982_v17 = vadd.f32 %v2968_v4, %v2941_v25  ;;  %v2983_v21 = vadd.f32 %v2969_v45, %v2942_v57  ;;  %v2984_v54 = vadd.f32 %v2970_v10, %v2943_v26  ;;  %v2869_v57 = vld [vmem:[#allocation2 + $0x320] sm:$0x7f] }
 0x2ee   : > { %v2985_v22 = vadd.f32 %v2971_v12, %v2944_v14  ;;  %v2986_v6 = vadd.f32 %v2972_v39, %v2945_v50  ;;  %v2999_v49 = vrot.slane %v5397_v28, %v10757_v23  ;;  %v3003_v13 = vrot.slane %v5397_v28, %v10758_v16  ;;  %v10774_v12 = vld [vmem:[#allocation41_spill] sm:$0xff]  ;;  %v10777_v10 = vld [vmem:[#allocation46_spill] sm:$0xff] }
 0x2ef   : > { %v2987_v55 = vadd.f32 %v2973_v42, %v2946_v36  ;;  %v2988_v7 = vadd.f32 %v2974_v53, %v2947_v61  ;;  %v2989_v31 = vadd.f32 %v2975_v20, %v2948_v2  ;;  %v2990_v40 = vadd.f32 %v2976_v29, %v2949_v11  ;;  %v2870_v2 = vld [vmem:[#allocation2 + $0x328] sm:$0x7f]  ;;  %v10775_v42 = vld [vmem:[#allocation42_spill] sm:$0xff] }
 0x2f0   : > { %v2991_v3 = vadd.f32 %v2977_v52, %v2950_v56  ;;  %v2992_v27 = vadd.f32 %v2978_v59, %v2951_v8  ;;  %v3040_v41 = vrot.slane %v5398_v48, %v10757_v23  ;;  %v3044_v25 = vrot.slane %v5398_v48, %v10758_v16  ;;  %v10771_v56 = vld [vmem:[#allocation43_spill] sm:$0xff]  ;;  %v10776_v52 = vld [vmem:[#allocation44_spill] sm:$0xff] }
 0x2f1   : > { %v3006_v14 = vmul.f32 %v2999_v49, %v8284_v24  ;;  %v8379_v50 = vrot.slane %v5399_v33, %v10757_v23  ;;  %v8382_v26 = vrot.slane %v5399_v33, %v10758_v16  ;;  %v8386_v36 = vrot.slane %v8373_v51, %v10757_v23  ;;  %v10773_v24 = vld [vmem:[#allocation40_spill] sm:$0xff] }
 0x2f2   : > { %v3007_v61 = vmul.f32 %v3003_v13, %v8286_v5  ;;  %v3008_v11 = vmul.f32 %v2999_v49, %v8288_v63  ;;  %v3009_v8 = vmul.f32 %v3003_v13, %v10771_v56  ;;  %v3010_v62 = vmul.f32 %v2999_v49, %v10772_v43 }
 0x2f3   : > { %10770 = vst [vmem:[#allocation51_spill] sm:$0xff] %v8386_v36  ;;  %v3011_v45 = vmul.f32 %v3003_v13, %v10773_v24  ;;  %v3012_v32 = vmul.f32 %v2999_v49, %v10774_v12  ;;  %v3013_v20 = vmul.f32 %v3003_v13, %v10775_v42  ;;  %v3014_v4 = vmul.f32 %v2999_v49, %v10776_v52  ;;  %v2853_v52 = vld [vmem:[#allocation2 + $0x100] sm:$0x7f] }
 0x2f4   : > { %v3015_v39 = vmul.f32 %v3003_v13, %v10777_v10  ;;  %v3016_v53 = vmul.f32 %v2999_v49, %v8326_v19  ;;  %v3017_v5 = vmul.f32 %v3003_v13, %v8328_v60  ;;  %v3018_v28 = vmul.f32 %v2999_v49, %v2869_v57  ;;  %v2854_v60 = vld [vmem:[#allocation2 + $0x108] sm:$0x7f] }
 0x2f5   : > { %v3019_v63 = vmul.f32 %v3003_v13, %v2870_v2  ;;  %v3020_v29 = vadd.f32 %v3006_v14, %v2979_v15  ;;  %v3021_v59 = vadd.f32 %v3007_v61, %v2980_v44  ;;  %v3022_v48 = vadd.f32 %v3008_v11, %v2981_v30  ;;  %v8417_v57 = vld [vmem:[#allocation2 + $0x168] sm:$0x7f]  ;;  %v8423_v11 = vld [vmem:[#allocation2 + $0x1a0] sm:$0x7f] }
 0x2f6   : > { %v3023_v33 = vadd.f32 %v3009_v8, %v2982_v17  ;;  %v3024_v56 = vadd.f32 %v3010_v62, %v2983_v21  ;;  %v3025_v43 = vadd.f32 %v3011_v45, %v2984_v54  ;;  %v3026_v24 = vadd.f32 %v3012_v32, %v2985_v22  ;;  %v8421_v61 = vld [vmem:[#allocation2 + $0x188] sm:$0x7f] }
 0x2f7   : > { %v3027_v12 = vadd.f32 %v3013_v20, %v2986_v6  ;;  %v3028_v23 = vadd.f32 %v3014_v4, %v2987_v55  ;;  %v3029_v42 = vadd.f32 %v3015_v39, %v2988_v7  ;;  %v3030_v36 = vadd.f32 %v3016_v53, %v2989_v31  ;;  %v8425_v8 = vld [vmem:[#allocation2 + $0x1a8] sm:$0x7f]  ;;  %v8427_v20 = vld [vmem:[#allocation2 + $0x1c0] sm:$0x7f] }
 0x2f8   : > { %v3031_v51 = vadd.f32 %v3017_v5, %v2990_v40  ;;  %v3032_v10 = vadd.f32 %v3018_v28, %v2991_v3  ;;  %v3033_v16 = vadd.f32 %v3019_v63, %v2992_v27  ;;  %v3047_v19 = vmul.f32 %v3040_v41, %v8256_v46  ;;  %v10778_v46 = vld [vmem:[#allocation78_spill] sm:$0xff]  ;;  %v3076_v40 = vld [vmem:[#allocation2 + $0x128] sm:$0x7f] }
 0x2f9   : > { %v3048_v49 = vmul.f32 %v3044_v25, %v8258_v37  ;;  %v3049_v15 = vmul.f32 %v3040_v41, %v8266_v0  ;;  %v3050_v44 = vmul.f32 %v3044_v25, %v8268_v18  ;;  %v3051_v30 = vmul.f32 %v3040_v41, %v8270_v47  ;;  %v3075_v0 = vld [vmem:[#allocation2 + $0x120] sm:$0x7f]  ;;  %v8429_v4 = vld [vmem:[#allocation2 + $0x1c8] sm:$0x7f] }
 0x2fa   : > { %v3052_v17 = vmul.f32 %v3044_v25, %v8272_v9  ;;  %v3053_v21 = vmul.f32 %v3040_v41, %v8274_v35  ;;  %v3054_v31 = vmul.f32 %v3044_v25, %v8276_v58  ;;  %v3055_v54 = vmul.f32 %v3040_v41, %v8278_v1  ;;  %v8411_v9 = vld [vmem:[#allocation2 + $0x140] sm:$0x7f]  ;;  %v8413_v35 = vld [vmem:[#allocation2 + $0x148] sm:$0x7f] }
 0x2fb   : > { %v3056_v22 = vmul.f32 %v3044_v25, %v8282_v34  ;;  %v3057_v6 = vmul.f32 %v3040_v41, %v10778_v46  ;;  %v3058_v37 = vmul.f32 %v3044_v25, %v8351_v38  ;;  %v3059_v13 = vmul.f32 %v3040_v41, %v2853_v52  ;;  %v8415_v34 = vld [vmem:[#allocation2 + $0x160] sm:$0x7f] }
 0x2fc   : > { %v3060_v55 = vmul.f32 %v3044_v25, %v2854_v60  ;;  %v3061_v18 = vadd.f32 %v3047_v19, %v3020_v29  ;;  %v3062_v7 = vadd.f32 %v3048_v49, %v3021_v59  ;;  %v3063_v47 = vadd.f32 %v3049_v15, %v3022_v48  ;;  %v8419_v38 = vld [vmem:[#allocation2 + $0x180] sm:$0x7f]  ;;  %v8463_v49 = vld [vmem:[#allocation2 + $0x388] sm:$0x7f] }
 0x2fd   : > { %v3064_v58 = vadd.f32 %v3050_v44, %v3023_v33  ;;  %v3065_v3 = vadd.f32 %v3051_v30, %v3024_v56  ;;  %v3066_v1 = vadd.f32 %v3052_v17, %v3025_v43  ;;  %v3067_v27 = vadd.f32 %v3053_v21, %v3026_v24  ;;  %v8431_v39 = vld [vmem:[#allocation2 + $0x1e0] sm:$0x7f] }
 0x2fe   : > { %v3068_v41 = vadd.f32 %v3054_v31, %v3027_v12  ;;  %v3069_v25 = vadd.f32 %v3055_v54, %v3028_v23  ;;  %v3070_v14 = vadd.f32 %v3056_v22, %v3029_v42  ;;  %v3071_v2 = vadd.f32 %v3057_v6, %v3030_v36  ;;  %10779 = vst [vmem:[#allocation95_spill] sm:$0xff] %v8431_v39  ;;  %v8434_v23 = vld [vmem:[#allocation2 + $0x1e8] sm:$0x7f]  ;;  %v3093_v24 = vld [vmem:[#allocation2 + $0x360] sm:$0x7f] }
 0x2ff   : > { %v3072_v62 = vadd.f32 %v3058_v37, %v3031_v51  ;;  %v3073_v45 = vadd.f32 %v3059_v13, %v3032_v10  ;;  %v3074_v32 = vadd.f32 %v3060_v55, %v3033_v16  ;;  %v3122_v53 = vmul.f32 %v8379_v50, %v3075_v0  ;;  %10780 = vst [vmem:[#allocation96_spill] sm:$0xff] %v8434_v23  ;;  %v3094_v12 = vld [vmem:[#allocation2 + $0x368] sm:$0x7f]  ;;  %v8459_v42 = vld [vmem:[#allocation2 + $0x380] sm:$0x7f]  ;;  %v10785_v37 = vld [vmem:[#allocation92_spill] sm:$0xff] }
 0x300   : > { %v3123_v36 = vmul.f32 %v8382_v26, %v3076_v40  ;;  %v3124_v5 = vmul.f32 %v8379_v50, %v8411_v9  ;;  %v3125_v51 = vmul.f32 %v8382_v26, %v8413_v35  ;;  %v3126_v16 = vmul.f32 %v8379_v50, %v8415_v34  ;;  %v8465_v15 = vld [vmem:[#allocation2 + $0x3a0] sm:$0x7f]  ;;  %v8477_v55 = vld [vmem:[#allocation2 + $0x3a8] sm:$0x7f] }
 0x301   : > { %v3127_v28 = vmul.f32 %v8382_v26, %v8417_v57  ;;  %v3128_v63 = vmul.f32 %v8379_v50, %v8419_v38  ;;  %v3129_v29 = vmul.f32 %v8382_v26, %v8421_v61  ;;  %v3130_v59 = vmul.f32 %v8379_v50, %v8423_v11  ;;  %v8467_v44 = vld [vmem:[#allocation2 + $0x3c0] sm:$0x7f]  ;;  %10787 = vst [vmem:[#allocation99_spill] sm:$0xff] %v8477_v55 }
 0x302   : > { %v3131_v48 = vmul.f32 %v8382_v26, %v8425_v8  ;;  %v3132_v33 = vmul.f32 %v8379_v50, %v8427_v20  ;;  %v3133_v56 = vmul.f32 %v8382_v26, %v8429_v4  ;;  %v3134_v43 = vmul.f32 %v8379_v50, %v8431_v39  ;;  %10781 = vst [vmem:[#allocation50_spill] sm:$0xff] %v8467_v44  ;;  %v8469_v31 = vld [vmem:[#allocation2 + $0x3e0] sm:$0x7f] }
 0x303   : > { %v3135_v52 = vmul.f32 %v8382_v26, %v8434_v23  ;;  %v3136_v10 = vadd.f32 %v3122_v53, %v3061_v18  ;;  %v3137_v19 = vadd.f32 %v3123_v36, %v3062_v7  ;;  %v3138_v60 = vadd.f32 %v3124_v5, %v3063_v47  ;;  %10782 = vst [vmem:[#allocation97_spill] sm:$0xff] %v8469_v31  ;;  %v8471_v54 = vld [vmem:[#allocation2 + $0x400] sm:$0x7f]  ;;  %v8479_v18 = vld [vmem:[#allocation2 + $0x3c8] sm:$0x7f] }
 0x304   : > { %v3139_v30 = vadd.f32 %v3125_v51, %v3064_v58  ;;  %v3140_v17 = vadd.f32 %v3126_v16, %v3065_v3  ;;  %v3141_v21 = vadd.f32 %v3127_v28, %v3066_v1  ;;  %v3142_v50 = vadd.f32 %v3128_v63, %v3067_v27  ;;  %10783 = vst [vmem:[#allocation98_spill] sm:$0xff] %v8471_v54  ;;  %v8473_v22 = vld [vmem:[#allocation2 + $0x420] sm:$0x7f]  ;;  %v8481_v7 = vld [vmem:[#allocation2 + $0x3e8] sm:$0x7f] }
 0x305   : > { %10784 = vst [vmem:[#allocation52_spill] sm:$0xff] %v8473_v22  ;;  %v3143_v26 = vadd.f32 %v3129_v29, %v3068_v41  ;;  %v3144_v46 = vadd.f32 %v3130_v59, %v3069_v25  ;;  %v3145_v6 = vadd.f32 %v3131_v48, %v3070_v14  ;;  %v10786_v13 = vld [vmem:[#allocation94_spill] sm:$0xff]  ;;  %10788 = vst [vmem:[#allocation11_spill] sm:$0xff] %v8479_v18  ;;  %v8483_v1 = vld [vmem:[#allocation2 + $0x408] sm:$0x7f] }
 0x306   : > { %v3160_v0 = vrot.slane %v10786_v13, %v10785_v37  ;;  %10789 = vst [vmem:[#allocation56_spill] sm:$0xff] %v8481_v7  ;;  %v3146_v47 = vadd.f32 %v3132_v33, %v3071_v2  ;;  %v3147_v40 = vadd.f32 %v3133_v56, %v3072_v62  ;;  %v3148_v58 = vadd.f32 %v3134_v43, %v3073_v45  ;;  %v8485_v27 = vld [vmem:[#allocation2 + $0x428] sm:$0x7f] }
 0x307   : > { %v3149_v3 = vadd.f32 %v3135_v52, %v3074_v32  ;;  %10790 = vst [vmem:[#allocation7_spill] sm:$0xff] %v8483_v1  ;;  %v10791_v41 = vld [vmem:[#allocation51_spill] sm:$0xff] }
 0x308   : > { %v3163_v25 = vmul.f32 %v10791_v41, %v3093_v24  ;;  %v3165_v14 = vmul.f32 %v10791_v41, %v8459_v42  ;;  %v3167_v53 = vmul.f32 %v10791_v41, %v8465_v15  ;;  %v3169_v36 = vmul.f32 %v10791_v41, %v8467_v44  ;;  %v5401_v63 = vld [vmem:[%s7378_s23 + $0x21] ss:$8 sm:$0x3]  ;;  %v5402_v52 = vld [vmem:[%s7378_s23 + $0x31] ss:$8 sm:$0x3] }
 0x309   : > { %v3164_v2 = vmul.f32 %v3160_v0, %v3094_v12  ;;  %v3171_v62 = vmul.f32 %v10791_v41, %v8469_v31  ;;  %v3173_v45 = vmul.f32 %v10791_v41, %v8471_v54  ;;  %v3175_v32 = vmul.f32 %v10791_v41, %v8473_v22  ;;  %v10792_v22 = vld [vmem:[#allocation91_spill] sm:$0xff] }
 0x30a   : > { %v3166_v5 = vmul.f32 %v3160_v0, %v8463_v49  ;;  %v3168_v51 = vmul.f32 %v3160_v0, %v8477_v55  ;;  %v3170_v16 = vmul.f32 %v3160_v0, %v8479_v18  ;;  %v3172_v28 = vmul.f32 %v3160_v0, %v8481_v7  ;;  %v5403_v7 = vld [vmem:[%s7378_s23 + $0x41] ss:$8 sm:$0x3]  ;;  %v8512_v18 = vld [vmem:[%s7378_s23 + $0x2] ss:$8 sm:$0x3] }
 0x30b   : > { %v3174_v29 = vmul.f32 %v3160_v0, %v8483_v1  ;;  %v3176_v59 = vmul.f32 %v3160_v0, %v8485_v27  ;;  %v3177_v48 = vadd.f32 %v3163_v25, %v3136_v10  ;;  %v3178_v33 = vadd.f32 %v3164_v2, %v3137_v19  ;;  %10793 = vst [vmem:[#allocation10_spill] sm:$0xff] %v8512_v18 }
 0x30c   : > { %v3179_v56 = vadd.f32 %v3165_v14, %v3138_v60  ;;  %v3180_v43 = vadd.f32 %v3166_v5, %v3139_v30  ;;  %v3181_v24 = vadd.f32 %v3167_v53, %v3140_v17  ;;  %v3182_v12 = vadd.f32 %v3168_v51, %v3141_v21  ;;  %v8516_v17 = vld [vmem:[#allocation2 + $0x200] sm:$0x7f] }
 0x30d   : > { %v3183_v13 = vadd.f32 %v3169_v36, %v3142_v50  ;;  %v3184_v41 = vadd.f32 %v3170_v16, %v3143_v26  ;;  %v3197_v54 = vrot.slane %v5401_v63, %v10792_v22  ;;  %v3201_v31 = vrot.slane %v5401_v63, %v10785_v37 }
 0x30e   : > { %v3185_v44 = vadd.f32 %v3171_v62, %v3144_v46  ;;  %v3186_v1 = vadd.f32 %v3172_v28, %v3145_v6  ;;  %v3187_v55 = vadd.f32 %v3173_v45, %v3146_v47  ;;  %v3188_v0 = vadd.f32 %v3174_v29, %v3147_v40  ;;  %v8529_v6 = vld [vmem:[#allocation2 + $0x208] sm:$0x7f] }
 0x30f   : > { %v3189_v10 = vadd.f32 %v3175_v32, %v3148_v58  ;;  %v3190_v19 = vadd.f32 %v3176_v59, %v3149_v3  ;;  %v3238_v60 = vrot.slane %v5402_v52, %v10792_v22  ;;  %v3242_v30 = vrot.slane %v5402_v52, %v10785_v37 }
 0x310   : > { %v3204_v21 = vmul.f32 %v3197_v54, %v8411_v9  ;;  %v8520_v50 = vrot.slane %v5403_v7, %v10792_v22  ;;  %v8523_v26 = vrot.slane %v5403_v7, %v10785_v37  ;;  %v8527_v46 = vrot.slane %v8512_v18, %v10792_v22 }
 0x311   : > { %v3205_v47 = vmul.f32 %v3201_v31, %v8413_v35  ;;  %v3206_v40 = vmul.f32 %v3197_v54, %v8415_v34  ;;  %v3207_v58 = vmul.f32 %v3201_v31, %v8417_v57  ;;  %v3208_v9 = vmul.f32 %v3197_v54, %v8419_v38 }
 0x312   : > { %10794 = vst [vmem:[#allocation57_spill] sm:$0xff] %v8527_v46  ;;  %v3209_v3 = vmul.f32 %v3201_v31, %v8421_v61  ;;  %v3210_v25 = vmul.f32 %v3197_v54, %v8423_v11  ;;  %v3211_v7 = vmul.f32 %v3201_v31, %v8425_v8  ;;  %v3212_v14 = vmul.f32 %v3197_v54, %v8427_v20  ;;  %v3107_v46 = vld [vmem:[#allocation2 + $0x440] sm:$0x7f] }
 0x313   : > { %v3213_v53 = vmul.f32 %v3201_v31, %v8429_v4  ;;  %v3214_v36 = vmul.f32 %v3197_v54, %v8431_v39  ;;  %v3215_v35 = vmul.f32 %v3201_v31, %v8434_v23  ;;  %v3216_v2 = vmul.f32 %v3197_v54, %v8516_v17  ;;  %v3108_v54 = vld [vmem:[#allocation2 + $0x448] sm:$0x7f] }
 0x314   : > { %v3217_v62 = vmul.f32 %v3201_v31, %v8529_v6  ;;  %v3218_v45 = vadd.f32 %v3204_v21, %v3177_v48  ;;  %v3219_v32 = vadd.f32 %v3205_v47, %v3178_v33  ;;  %v3220_v5 = vadd.f32 %v3206_v40, %v3179_v56  ;;  %v10795_v33 = vld [vmem:[#allocation99_spill] sm:$0xff] }
 0x315   : > { %v3221_v51 = vadd.f32 %v3207_v58, %v3180_v43  ;;  %v3222_v16 = vadd.f32 %v3208_v9, %v3181_v24  ;;  %v3223_v28 = vadd.f32 %v3209_v3, %v3182_v12  ;;  %v3224_v63 = vadd.f32 %v3210_v25, %v3183_v13  ;;  %v10796_v43 = vld [vmem:[#allocation50_spill] sm:$0xff]  ;;  %v10797_v12 = vld [vmem:[#allocation11_spill] sm:$0xff] }
 0x316   : > { %v3225_v29 = vadd.f32 %v3211_v7, %v3184_v41  ;;  %v3226_v59 = vadd.f32 %v3212_v14, %v3185_v44  ;;  %v3227_v52 = vadd.f32 %v3213_v53, %v3186_v1  ;;  %v3228_v22 = vadd.f32 %v3214_v36, %v3187_v55  ;;  %v10798_v44 = vld [vmem:[#allocation97_spill] sm:$0xff]  ;;  %v10799_v55 = vld [vmem:[#allocation56_spill] sm:$0xff] }
 0x317   : > { %v3229_v18 = vadd.f32 %v3215_v35, %v3188_v0  ;;  %v3230_v37 = vadd.f32 %v3216_v2, %v3189_v10  ;;  %v3231_v39 = vadd.f32 %v3217_v62, %v3190_v19  ;;  %v3245_v23 = vmul.f32 %v3238_v60, %v8459_v42  ;;  %v10800_v0 = vld [vmem:[#allocation98_spill] sm:$0xff]  ;;  %v10801_v19 = vld [vmem:[#allocation7_spill] sm:$0xff]  ;;  %v10802_v42 = vld [vmem:[#allocation52_spill] sm:$0xff] }
 0x318   : > { %v3246_v31 = vmul.f32 %v3242_v30, %v8463_v49  ;;  %v3247_v48 = vmul.f32 %v3238_v60, %v8465_v15  ;;  %v3248_v56 = vmul.f32 %v3242_v30, %v10795_v33  ;;  %v3249_v24 = vmul.f32 %v3238_v60, %v10796_v43  ;;  %v3091_v33 = vld [vmem:[#allocation2 + $0x220] sm:$0x7f] }
 0x319   : > { %v3250_v13 = vmul.f32 %v3242_v30, %v10797_v12  ;;  %v3251_v1 = vmul.f32 %v3238_v60, %v10798_v44  ;;  %v3252_v41 = vmul.f32 %v3242_v30, %v10799_v55  ;;  %v3253_v10 = vmul.f32 %v3238_v60, %v10800_v0  ;;  %v10805_v55 = vld [vmem:[#allocation92_spill] sm:$0xff] }
 0x31a   : > { %v3254_v21 = vmul.f32 %v3242_v30, %v10801_v19  ;;  %v3255_v47 = vmul.f32 %v3238_v60, %v10802_v42  ;;  %v3256_v49 = vmul.f32 %v3242_v30, %v8485_v27  ;;  %v3257_v40 = vmul.f32 %v3238_v60, %v3107_v46  ;;  %v3092_v60 = vld [vmem:[#allocation2 + $0x228] sm:$0x7f]  ;;  %v8604_v42 = vld [vmem:[#allocation2 + $0xc0] sm:$0xfe] }
 0x31b   : > { %v3258_v15 = vmul.f32 %v3242_v30, %v3108_v54  ;;  %v3259_v58 = vadd.f32 %v3245_v23, %v3218_v45  ;;  %v3260_v9 = vadd.f32 %v3246_v31, %v3219_v32  ;;  %v3261_v3 = vadd.f32 %v3247_v48, %v3220_v5  ;;  %v10804_v45 = vld [vmem:[#allocation96_spill] sm:$0xff]  ;;  %v3314_v32 = vld [vmem:[#allocation2] sm:$0xfe]  ;;  %v3315_v5 = vld [vmem:[#allocation2 + $0x8] sm:$0xfe] }
 0x31c   : > { %v3262_v25 = vadd.f32 %v3248_v56, %v3221_v51  ;;  %v3263_v7 = vadd.f32 %v3249_v24, %v3222_v16  ;;  %v3264_v14 = vadd.f32 %v3250_v13, %v3223_v28  ;;  %v3265_v53 = vadd.f32 %v3251_v1, %v3224_v63  ;;  %v8582_v28 = vld [vmem:[#allocation2 + $0x20] sm:$0xfe]  ;;  %v8584_v63 = vld [vmem:[#allocation2 + $0x28] sm:$0xfe] }
 0x31d   : > { %v3266_v36 = vadd.f32 %v3252_v41, %v3225_v29  ;;  %v3267_v35 = vadd.f32 %v3253_v10, %v3226_v59  ;;  %v3268_v2 = vadd.f32 %v3254_v21, %v3227_v52  ;;  %v3269_v62 = vadd.f32 %v3255_v47, %v3228_v22  ;;  %v8586_v29 = vld [vmem:[#allocation2 + $0x40] sm:$0xfe]  ;;  %v8592_v31 = vld [vmem:[#allocation2 + $0x68] sm:$0xfe] }
 0x31e   : > { %v3270_v43 = vadd.f32 %v3256_v49, %v3229_v18  ;;  %v3271_v12 = vadd.f32 %v3257_v40, %v3230_v37  ;;  %v3272_v44 = vadd.f32 %v3258_v15, %v3231_v39  ;;  %v3286_v27 = vmul.f32 %v8520_v50, %v8415_v34  ;;  %v10803_v18 = vld [vmem:[#allocation95_spill] sm:$0xff]  ;;  %v8594_v24 = vld [vmem:[#allocation2 + $0x80] sm:$0xfe]  ;;  %v10807_v49 = vld [vmem:[#allocation57_spill] sm:$0xff] }
 0x31f   : > { %v3287_v23 = vmul.f32 %v8523_v26, %v8417_v57  ;;  %v3288_v30 = vmul.f32 %v8520_v50, %v8419_v38  ;;  %v3289_v46 = vmul.f32 %v8523_v26, %v8421_v61  ;;  %v3290_v22 = vmul.f32 %v8520_v50, %v8423_v11  ;;  %v8596_v13 = vld [vmem:[#allocation2 + $0x88] sm:$0xfe]  ;;  %v8598_v1 = vld [vmem:[#allocation2 + $0xa0] sm:$0xfe] }
 0x320   : > { %v3291_v37 = vmul.f32 %v8523_v26, %v8425_v8  ;;  %v3292_v39 = vmul.f32 %v8520_v50, %v8427_v20  ;;  %v3293_v34 = vmul.f32 %v8523_v26, %v8429_v4  ;;  %v3294_v57 = vmul.f32 %v8520_v50, %v10803_v18  ;;  %v10806_v41 = vld [vmem:[#allocation10_spill] sm:$0xff]  ;;  %v8602_v21 = vld [vmem:[#allocation2 + $0xa8] sm:$0xfe] }
 0x321   : > { %v3295_v38 = vmul.f32 %v8523_v26, %v10804_v45  ;;  %v3296_v61 = vmul.f32 %v8520_v50, %v8516_v17  ;;  %v3297_v11 = vmul.f32 %v8523_v26, %v8529_v6  ;;  %v3298_v8 = vmul.f32 %v8520_v50, %v3091_v33  ;;  %v8588_v6 = vld [vmem:[#allocation2 + $0x48] sm:$0xfe]  ;;  %v8590_v50 = vld [vmem:[#allocation2 + $0x60] sm:$0xfe] }
 0x322   : > { %v3299_v20 = vmul.f32 %v8523_v26, %v3092_v60  ;;  %v3300_v51 = vadd.f32 %v3286_v27, %v3259_v58  ;;  %v3301_v4 = vadd.f32 %v3287_v23, %v3260_v9  ;;  %v3302_v16 = vadd.f32 %v3288_v30, %v3261_v3  ;;  %v8606_v47 = vld [vmem:[#allocation2 + $0xc8] sm:$0xfe] }
 0x323   : > { %v3303_v59 = vadd.f32 %v3289_v46, %v3262_v25  ;;  %v3304_v17 = vadd.f32 %v3290_v22, %v3263_v7  ;;  %v3305_v52 = vadd.f32 %v3291_v37, %v3264_v14  ;;  %v3306_v54 = vadd.f32 %v3292_v39, %v3265_v53  ;;  %v5405_v30 = vld [vmem:[%s7378_s23 + $0x12] ss:$8 sm:$0x3] }
 0x324   : > { %v3307_v26 = vadd.f32 %v3293_v34, %v3266_v36  ;;  %v3308_v48 = vadd.f32 %v3294_v57, %v3267_v35  ;;  %v3309_v56 = vadd.f32 %v3295_v38, %v3268_v2  ;;  %v3358_v0 = vrot.slane %v10806_v41, %v10805_v55  ;;  %v3332_v41 = vld [vmem:[#allocation2 + $0x240] sm:$0xfe] }
 0x325   : > { %v3310_v10 = vadd.f32 %v3296_v61, %v3269_v62  ;;  %v3311_v19 = vadd.f32 %v3297_v11, %v3270_v43  ;;  %v3361_v40 = vmul.f32 %v10807_v49, %v3314_v32  ;;  %v3363_v15 = vmul.f32 %v10807_v49, %v8582_v28 }
 0x326   : > { %v3362_v58 = vmul.f32 %v3358_v0, %v3315_v5  ;;  %v3364_v9 = vmul.f32 %v3358_v0, %v8584_v63  ;;  %v3365_v3 = vmul.f32 %v10807_v49, %v8586_v29  ;;  %v3366_v25 = vmul.f32 %v3358_v0, %v8588_v6  ;;  %v5406_v5 = vld [vmem:[%s7378_s23 + $0x22] ss:$8 sm:$0x3] }
 0x327   : > { %v3367_v7 = vmul.f32 %v10807_v49, %v8590_v50  ;;  %v3368_v14 = vmul.f32 %v3358_v0, %v8592_v31  ;;  %v3369_v53 = vmul.f32 %v10807_v49, %v8594_v24  ;;  %v3370_v36 = vmul.f32 %v3358_v0, %v8596_v13 }
 0x328   : > { %v3371_v35 = vmul.f32 %v10807_v49, %v8598_v1  ;;  %v3372_v2 = vmul.f32 %v3358_v0, %v8602_v21  ;;  %v3373_v62 = vmul.f32 %v10807_v49, %v8604_v42  ;;  %v3374_v33 = vmul.f32 %v3358_v0, %v8606_v47  ;;  %v8629_v49 = vld [vmem:[#allocation2 + $0x260] sm:$0xfe] }
 0x329   : > { %v3312_v43 = vadd.f32 %v3298_v8, %v3271_v12  ;;  %v3313_v27 = vadd.f32 %v3299_v20, %v3272_v44  ;;  %v3389_v60 = vrot.slane %v3361_v40, 1  ;;  %v3390_v23 = vrot.slane %v3362_v58, 1  ;;  %v3333_v12 = vld [vmem:[#allocation2 + $0x248] sm:$0xfe]  ;;  %10808 = vst [vmem:[#allocation9_spill] sm:$0xff] %v8629_v49 }
 0x32a   : > { %v3391_v46 = vrot.slane %v3363_v15, 1  ;;  %v3392_v22 = vrot.slane %v3364_v9, 1  ;;  %v3393_v37 = vrot.slane %v3365_v3, 1  ;;  %v3394_v39 = vrot.slane %v3366_v25, 1  ;;  %v8631_v40 = vld [vmem:[#allocation2 + $0x268] sm:$0xfe] }
 0x32b   : > { %v3395_v34 = vrot.slane %v3367_v7, 1  ;;  %v3396_v18 = vrot.slane %v3368_v14, 1  ;;  %v3397_v57 = vrot.slane %v3369_v53, 1  ;;  %v3398_v45 = vrot.slane %v3370_v36, 1  ;;  %10809 = vst [vmem:[#allocation12_spill] sm:$0xff] %v8631_v40  ;;  %v10811_v25 = vld [vmem:[#allocation91_spill] sm:$0xff] }
 0x32c   : > { %v3399_v38 = vrot.slane %v3371_v35, 1  ;;  %v3400_v61 = vrot.slane %v3372_v2, 1  ;;  %v3401_v11 = vrot.slane %v3373_v62, 1  ;;  %v3402_v32 = vrot.slane %v3374_v33, 1  ;;  %v8633_v15 = vld [vmem:[#allocation2 + $0x280] sm:$0xfe] }
 0x32d   : > { %v3417_v44 = vadd.f32 %v3389_v60, %v3300_v51  ;;  %v3418_v8 = vadd.f32 %v3390_v23, %v3301_v4  ;;  %v3419_v20 = vadd.f32 %v3391_v46, %v3302_v16  ;;  %v3420_v0 = vadd.f32 %v3392_v22, %v3303_v59  ;;  %10810 = vst [vmem:[#allocation58_spill] sm:$0xff] %v8633_v15  ;;  %v8636_v14 = vld [vmem:[#allocation2 + $0x288] sm:$0xfe]  ;;  %v8638_v53 = vld [vmem:[#allocation2 + $0x2a0] sm:$0xfe] }
 0x32e   : > { %v3421_v58 = vadd.f32 %v3393_v37, %v3304_v17  ;;  %v3422_v9 = vadd.f32 %v3394_v39, %v3305_v52  ;;  %v3423_v3 = vadd.f32 %v3395_v34, %v3306_v54  ;;  %v3437_v7 = vrot.slane %v5405_v30, %v10811_v25  ;;  %10812 = vst [vmem:[#allocation6_spill] sm:$0xff] %v8636_v14  ;;  %v8640_v36 = vld [vmem:[#allocation2 + $0x2a8] sm:$0xfe]  ;;  %v8643_v35 = vld [vmem:[#allocation2 + $0x2c0] sm:$0xfe] }
 0x32f   : > { %10813 = vst [vmem:[#allocation102_spill] sm:$0xff] %v8638_v53  ;;  %10814 = vst [vmem:[#allocation63_spill] sm:$0xff] %v8640_v36  ;;  %v3424_v51 = vadd.f32 %v3396_v18, %v3307_v26  ;;  %v3425_v4 = vadd.f32 %v3397_v57, %v3308_v48  ;;  %v3426_v16 = vadd.f32 %v3398_v45, %v3309_v56  ;;  %v8645_v2 = vld [vmem:[#allocation2 + $0x2c8] sm:$0xfe]  ;;  %v8647_v17 = vld [vmem:[#allocation2 + $0x2e0] sm:$0xfe] }
 0x330   : > { %v3441_v59 = vrot.slane %v5405_v30, %v10805_v55  ;;  %10815 = vst [vmem:[#allocation8_spill] sm:$0xff] %v8643_v35  ;;  %10816 = vst [vmem:[#allocation19_spill] sm:$0xff] %v8645_v2  ;;  %v3427_v52 = vadd.f32 %v3399_v38, %v3310_v10  ;;  %v3428_v54 = vadd.f32 %v3400_v61, %v3311_v19  ;;  %v8653_v60 = vld [vmem:[#allocation2 + $0x2e8] sm:$0xfe]  ;;  %v8655_v26 = vld [vmem:[#allocation2 + $0x300] sm:$0xfe] }
 0x331   : > { %10817 = vst [vmem:[#allocation64_spill] sm:$0xff] %v8647_v17  ;;  %v8649_v62 = vadd.f32 %v3401_v11, %v3312_v43  ;;  %v8651_v33 = vadd.f32 %v3402_v32, %v3313_v27  ;;  %10818 = vst [vmem:[#allocation15_spill] sm:$0xff] %v8653_v60  ;;  %v8657_v48 = vld [vmem:[#allocation2 + $0x308] sm:$0xfe]  ;;  %v3444_v56 = vmul.f32 %v3437_v7, %v3332_v41 }
 0x332   : > { %10819 = vst [vmem:[#allocation16_spill] sm:$0xff] %v8655_v26  ;;  %10820 = vst [vmem:[#allocation69_spill] sm:$0xff] %v8657_v48  ;;  %v3445_v23 = vmul.f32 %v3441_v59, %v3333_v12  ;;  %v3446_v30 = vmul.f32 %v3437_v7, %v8629_v49  ;;  %v3520_v46 = vrot.slane %v5406_v5, %v10811_v25  ;;  %v8666_v27 = vld [vmem:[%s7378_s23 + $0x32] ss:$8 sm:$0x3] }
 0x333   : > { %v3447_v22 = vmul.f32 %v3441_v59, %v8631_v40  ;;  %v3448_v10 = vmul.f32 %v3437_v7, %v8633_v15  ;;  %v3449_v19 = vmul.f32 %v3441_v59, %v8636_v14  ;;  %v3450_v43 = vmul.f32 %v3437_v7, %v8638_v53 }
 0x334   : > { %v3451_v37 = vmul.f32 %v3441_v59, %v8640_v36  ;;  %v3452_v39 = vmul.f32 %v3437_v7, %v8643_v35  ;;  %v3453_v34 = vmul.f32 %v3441_v59, %v8645_v2  ;;  %v3454_v18 = vmul.f32 %v3437_v7, %v8647_v17 }
 0x335   : > { %v3455_v57 = vmul.f32 %v3441_v59, %v8653_v60  ;;  %v3456_v45 = vmul.f32 %v3437_v7, %v8655_v26  ;;  %v3457_v38 = vmul.f32 %v3441_v59, %v8657_v48  ;;  %v3524_v61 = vrot.slane %v5406_v5, %v10805_v55 }
 0x336   : > { %v3472_v11 = vrot.slane %v3444_v56, 1  ;;  %v3473_v32 = vrot.slane %v3445_v23, 1  ;;  %v3474_v41 = vrot.slane %v3446_v30, 1  ;;  %v8678_v12 = vrot.slane %v8666_v27, %v10811_v25 }
 0x337   : > { %v3475_v35 = vrot.slane %v3447_v22, 1  ;;  %v3476_v36 = vrot.slane %v3448_v10, 1  ;;  %v3477_v2 = vrot.slane %v3449_v19, 1  ;;  %v3478_v53 = vrot.slane %v3450_v43, 1  ;;  %v8680_v22 = vld [vmem:[#allocation2 + $0xe0] sm:$0xfe] }
 0x338   : > { %10821 = vst [vmem:[#allocation17_spill] sm:$0xff] %v8678_v12  ;;  %v3479_v17 = vrot.slane %v3451_v37, 1  ;;  %v3480_v14 = vrot.slane %v3452_v39, 1  ;;  %v3481_v60 = vrot.slane %v3453_v34, 1  ;;  %v3482_v40 = vrot.slane %v3454_v18, 1 }
 0x339   : > { %v3483_v7 = vrot.slane %v3455_v57, 1  ;;  %v3484_v26 = vrot.slane %v3456_v45, 1  ;;  %v3485_v59 = vrot.slane %v3457_v38, 1  ;;  %v3500_v48 = vadd.f32 %v3472_v11, %v3417_v44  ;;  %v8683_v39 = vld [vmem:[#allocation2 + $0xe8] sm:$0xfe] }
 0x33a   : > { %v3501_v5 = vadd.f32 %v3473_v32, %v3418_v8  ;;  %v3502_v56 = vadd.f32 %v3474_v41, %v3419_v20  ;;  %v3503_v23 = vadd.f32 %v3475_v35, %v3420_v0  ;;  %v3504_v30 = vadd.f32 %v3476_v36, %v3421_v58 }
 0x33b   : > { %v3505_v15 = vadd.f32 %v3477_v2, %v3422_v9  ;;  %v3506_v49 = vadd.f32 %v3478_v53, %v3423_v3  ;;  %v3507_v25 = vadd.f32 %v3479_v17, %v3424_v51  ;;  %v3508_v12 = vadd.f32 %v3480_v14, %v3425_v4 }
 0x33c   : > { %v3509_v10 = vadd.f32 %v3481_v60, %v3426_v16  ;;  %v3510_v19 = vadd.f32 %v3482_v40, %v3427_v52  ;;  %v3511_v43 = vadd.f32 %v3483_v7, %v3428_v54  ;;  %v3527_v37 = vmul.f32 %v3520_v46, %v8582_v28 }
 0x33d   : > { %v3528_v34 = vmul.f32 %v3524_v61, %v8584_v63  ;;  %v3529_v44 = vmul.f32 %v3520_v46, %v8586_v29  ;;  %v3530_v8 = vmul.f32 %v3524_v61, %v8588_v6  ;;  %v3531_v20 = vmul.f32 %v3520_v46, %v8590_v50 }
 0x33e   : > { %v3532_v0 = vmul.f32 %v3524_v61, %v8592_v31  ;;  %v3533_v58 = vmul.f32 %v3520_v46, %v8594_v24  ;;  %v3534_v9 = vmul.f32 %v3524_v61, %v8596_v13  ;;  %v3535_v40 = vmul.f32 %v3520_v46, %v8598_v1 }
 0x33f   : > { %v3536_v28 = vmul.f32 %v3524_v61, %v8602_v21  ;;  %v3537_v3 = vmul.f32 %v3520_v46, %v8604_v42  ;;  %v3538_v63 = vmul.f32 %v3524_v61, %v8606_v47  ;;  %v3539_v14 = vmul.f32 %v3520_v46, %v8680_v22 }
 0x340   : > { %v3512_v53 = vadd.f32 %v3484_v26, %v8649_v62  ;;  %v3513_v36 = vadd.f32 %v3485_v59, %v8651_v33  ;;  %v3540_v51 = vmul.f32 %v3524_v61, %v8683_v39  ;;  %v3555_v4 = vrot.slane %v3527_v37, 1 }
 0x341   : > { %v3556_v16 = vrot.slane %v3528_v34, 1  ;;  %v3557_v35 = vrot.slane %v3529_v44, 1  ;;  %v3558_v2 = vrot.slane %v3530_v8, 1  ;;  %v3559_v17 = vrot.slane %v3531_v20, 1  ;;  %v3346_v8 = vld [vmem:[#allocation2 + $0x320] sm:$0xfe] }
 0x342   : > { %v3560_v52 = vrot.slane %v3532_v0, 1  ;;  %v3561_v54 = vrot.slane %v3533_v58, 1  ;;  %v3562_v60 = vrot.slane %v3534_v9, 1  ;;  %v3563_v18 = vrot.slane %v3535_v40, 1  ;;  %v3347_v20 = vld [vmem:[#allocation2 + $0x328] sm:$0xfe] }
 0x343   : > { %v3564_v57 = vrot.slane %v3536_v28, 1  ;;  %v3565_v45 = vrot.slane %v3537_v3, 1  ;;  %v3566_v38 = vrot.slane %v3538_v63, 1  ;;  %v3567_v11 = vrot.slane %v3539_v14, 1  ;;  %v10822_v9 = vld [vmem:[#allocation9_spill] sm:$0xff]  ;;  %v10831_v63 = vld [vmem:[#allocation64_spill] sm:$0xff] }
 0x344   : > { %v3568_v46 = vrot.slane %v3540_v51, 1  ;;  %v3583_v32 = vadd.f32 %v3555_v4, %v3500_v48  ;;  %v3584_v62 = vadd.f32 %v3556_v16, %v3501_v5  ;;  %v3585_v26 = vadd.f32 %v3557_v35, %v3502_v56  ;;  %v10823_v40 = vld [vmem:[#allocation17_spill] sm:$0xff]  ;;  %v10824_v48 = vld [vmem:[#allocation58_spill] sm:$0xff]  ;;  %v10825_v56 = vld [vmem:[#allocation12_spill] sm:$0xff] }
 0x345   : > { %v3586_v33 = vadd.f32 %v3558_v2, %v3503_v23  ;;  %v3587_v41 = vadd.f32 %v3559_v17, %v3504_v30  ;;  %v3588_v61 = vadd.f32 %v3560_v52, %v3505_v15  ;;  %v3589_v7 = vadd.f32 %v3561_v54, %v3506_v49  ;;  %v10826_v15 = vld [vmem:[#allocation6_spill] sm:$0xff]  ;;  %v10828_v30 = vld [vmem:[#allocation63_spill] sm:$0xff]  ;;  %v10833_v16 = vld [vmem:[#allocation16_spill] sm:$0xff] }
 0x346   : > { %v3590_v59 = vadd.f32 %v3562_v60, %v3507_v25  ;;  %v3591_v37 = vadd.f32 %v3563_v18, %v3508_v12  ;;  %v3592_v34 = vadd.f32 %v3564_v57, %v3509_v10  ;;  %v3607_v44 = vrot.slane %v8666_v27, %v10805_v55  ;;  %v10827_v25 = vld [vmem:[#allocation102_spill] sm:$0xff]  ;;  %v10829_v10 = vld [vmem:[#allocation8_spill] sm:$0xff]  ;;  %v10832_v51 = vld [vmem:[#allocation15_spill] sm:$0xff] }
 0x347   : > { %v3593_v0 = vadd.f32 %v3565_v45, %v3510_v19  ;;  %v3594_v58 = vadd.f32 %v3566_v38, %v3511_v43  ;;  %v3610_v28 = vmul.f32 %v10823_v40, %v10822_v9  ;;  %v3612_v5 = vmul.f32 %v10823_v40, %v10824_v48  ;;  %v10830_v43 = vld [vmem:[#allocation19_spill] sm:$0xff]  ;;  %v10834_v2 = vld [vmem:[#allocation69_spill] sm:$0xff] }
 0x348   : > { %v3611_v23 = vmul.f32 %v3607_v44, %v10825_v56  ;;  %v3613_v49 = vmul.f32 %v3607_v44, %v10826_v15  ;;  %v3614_v12 = vmul.f32 %v10823_v40, %v10827_v25  ;;  %v3615_v27 = vmul.f32 %v3607_v44, %v10828_v30  ;;  %v5408_v38 = vld [vmem:[%s7378_s23 + $0x42] ss:$8 sm:$0x3] }
 0x349   : > { %v3616_v19 = vmul.f32 %v10823_v40, %v10829_v10  ;;  %v3617_v3 = vmul.f32 %v3607_v44, %v10830_v43  ;;  %v3618_v14 = vmul.f32 %v10823_v40, %v10831_v63  ;;  %v3619_v4 = vmul.f32 %v3607_v44, %v10832_v51 }
 0x34a   : > { %v3620_v35 = vmul.f32 %v10823_v40, %v10833_v16  ;;  %v3621_v17 = vmul.f32 %v3607_v44, %v10834_v2  ;;  %v3622_v52 = vmul.f32 %v10823_v40, %v3346_v8  ;;  %v3623_v54 = vmul.f32 %v3607_v44, %v3347_v20  ;;  %v10835_v40 = vld [vmem:[#allocation91_spill] sm:$0xff] }
 0x34b   : > { %v3595_v60 = vadd.f32 %v3567_v11, %v3512_v53  ;;  %v3596_v18 = vadd.f32 %v3568_v46, %v3513_v36  ;;  %v3638_v57 = vrot.slane %v3610_v28, 1  ;;  %v3639_v45 = vrot.slane %v3611_v23, 1 }
 0x34c   : > { %v3640_v9 = vrot.slane %v3612_v5, 1  ;;  %v3641_v48 = vrot.slane %v3613_v49, 1  ;;  %v3642_v56 = vrot.slane %v3614_v12, 1  ;;  %v3643_v15 = vrot.slane %v3615_v27, 1 }
 0x34d   : > { %v3644_v25 = vrot.slane %v3616_v19, 1  ;;  %v3645_v30 = vrot.slane %v3617_v3, 1  ;;  %v3646_v10 = vrot.slane %v3618_v14, 1  ;;  %v3647_v43 = vrot.slane %v3619_v4, 1 }
 0x34e   : > { %v3648_v63 = vrot.slane %v3620_v35, 1  ;;  %v3649_v51 = vrot.slane %v3621_v17, 1  ;;  %v3650_v16 = vrot.slane %v3622_v52, 1  ;;  %v3651_v2 = vrot.slane %v3623_v54, 1 }
 0x34f   : > { %v3666_v8 = vadd.f32 %v3638_v57, %v3583_v32  ;;  %v3667_v44 = vadd.f32 %v3639_v45, %v3584_v62  ;;  %v3668_v53 = vadd.f32 %v3640_v9, %v3585_v26  ;;  %v3669_v36 = vadd.f32 %v3641_v48, %v3586_v33  ;;  %v5409_v5 = vld [vmem:[%s7378_s23 + $0x3] ss:$8 sm:$0x3] }
 0x350   : > { %v3670_v11 = vadd.f32 %v3642_v56, %v3587_v41  ;;  %v3671_v46 = vadd.f32 %v3643_v15, %v3588_v61  ;;  %v3672_v20 = vadd.f32 %v3644_v25, %v3589_v7  ;;  %v3686_v28 = vrot.slane %v5408_v38, %v10835_v40  ;;  %v3330_v62 = vld [vmem:[#allocation2 + $0x100] sm:$0xfe]  ;;  %v3331_v26 = vld [vmem:[#allocation2 + $0x108] sm:$0xfe] }
 0x351   : > { %v3673_v23 = vadd.f32 %v3645_v30, %v3590_v59  ;;  %v3674_v49 = vadd.f32 %v3646_v10, %v3591_v37  ;;  %v3675_v12 = vadd.f32 %v3647_v43, %v3592_v34  ;;  %v3690_v27 = vrot.slane %v5408_v38, %v10805_v55  ;;  %v3764_v38 = vld [vmem:[#allocation2 + $0x128] sm:$0xfe]  ;;  %v8752_v9 = vld [vmem:[#allocation2 + $0x140] sm:$0xfe] }
 0x352   : > { %v3676_v19 = vadd.f32 %v3648_v63, %v3593_v0  ;;  %v3677_v3 = vadd.f32 %v3649_v51, %v3594_v58  ;;  %v8725_v14 = vadd.f32 %v3650_v16, %v3595_v60  ;;  %v8727_v32 = vadd.f32 %v3651_v2, %v3596_v18  ;;  %v8740_v58 = vld [vmem:[%s7378_s23 + $0x13] ss:$8 sm:$0x3] }
 0x353   : > { %v3693_v33 = vmul.f32 %v3686_v28, %v8586_v29  ;;  %v3694_v41 = vmul.f32 %v3690_v27, %v8588_v6  ;;  %v3695_v61 = vmul.f32 %v3686_v28, %v8590_v50  ;;  %v8733_v7 = vrot.slane %v5409_v5, %v10835_v40  ;;  %v8754_v30 = vld [vmem:[#allocation2 + $0x148] sm:$0xfe]  ;;  %v8756_v16 = vld [vmem:[#allocation2 + $0x160] sm:$0xfe] }
 0x354   : > { %v3696_v59 = vmul.f32 %v3690_v27, %v8592_v31  ;;  %v3697_v37 = vmul.f32 %v3686_v28, %v8594_v24  ;;  %v3698_v34 = vmul.f32 %v3690_v27, %v8596_v13  ;;  %v3699_v0 = vmul.f32 %v3686_v28, %v8598_v1  ;;  %v8758_v2 = vld [vmem:[#allocation2 + $0x168] sm:$0xfe] }
 0x355   : > { %v3700_v4 = vmul.f32 %v3690_v27, %v8602_v21  ;;  %v3701_v29 = vmul.f32 %v3686_v28, %v8604_v42  ;;  %v3702_v6 = vmul.f32 %v3690_v27, %v8606_v47  ;;  %v3703_v50 = vmul.f32 %v3686_v28, %v8680_v22  ;;  %v3763_v47 = vld [vmem:[#allocation2 + $0x120] sm:$0xfe] }
 0x356   : > { %v3704_v35 = vmul.f32 %v3690_v27, %v8683_v39  ;;  %v3705_v17 = vmul.f32 %v3686_v28, %v3330_v62  ;;  %v3706_v31 = vmul.f32 %v3690_v27, %v3331_v26  ;;  %v3807_v24 = vrot.slane %v5409_v5, %v10805_v55  ;;  %v8760_v28 = vld [vmem:[#allocation2 + $0x180] sm:$0xfe] }
 0x357   : > { %v3721_v52 = vrot.slane %v3693_v33, 1  ;;  %v3722_v13 = vrot.slane %v3694_v41, 1  ;;  %v3723_v54 = vrot.slane %v3695_v61, 1  ;;  %v8750_v1 = vrot.slane %v8740_v58, %v10835_v40  ;;  %v8762_v33 = vld [vmem:[#allocation2 + $0x188] sm:$0xfe] }
 0x358   : > { %v3724_v21 = vrot.slane %v3696_v59, 1  ;;  %v3725_v60 = vrot.slane %v3697_v37, 1  ;;  %v3726_v42 = vrot.slane %v3698_v34, 1  ;;  %v3727_v18 = vrot.slane %v3699_v0, 1  ;;  %v8764_v41 = vld [vmem:[#allocation2 + $0x1a0] sm:$0xfe] }
 0x359   : > { %v3728_v57 = vrot.slane %v3700_v4, 1  ;;  %v3729_v22 = vrot.slane %v3701_v29, 1  ;;  %v3730_v45 = vrot.slane %v3702_v6, 1  ;;  %v3731_v39 = vrot.slane %v3703_v50, 1  ;;  %v8770_v61 = vld [vmem:[#allocation2 + $0x1c8] sm:$0xfe] }
 0x35a   : > { %v3732_v48 = vrot.slane %v3704_v35, 1  ;;  %v3733_v56 = vrot.slane %v3705_v17, 1  ;;  %v3734_v15 = vrot.slane %v3706_v31, 1  ;;  %v3749_v25 = vadd.f32 %v3721_v52, %v3666_v8  ;;  %v8766_v8 = vld [vmem:[#allocation2 + $0x1a8] sm:$0xfe] }
 0x35b   : > { %v3750_v10 = vadd.f32 %v3722_v13, %v3667_v44  ;;  %v3751_v43 = vadd.f32 %v3723_v54, %v3668_v53  ;;  %v3752_v63 = vadd.f32 %v3724_v21, %v3669_v36  ;;  %v3753_v51 = vadd.f32 %v3725_v60, %v3670_v11  ;;  %v8768_v11 = vld [vmem:[#allocation2 + $0x1c0] sm:$0xfe] }
 0x35c   : > { %v3754_v5 = vadd.f32 %v3726_v42, %v3671_v46  ;;  %v3755_v27 = vadd.f32 %v3727_v18, %v3672_v20  ;;  %v3756_v62 = vadd.f32 %v3728_v57, %v3673_v23  ;;  %v3757_v26 = vadd.f32 %v3729_v22, %v3674_v49  ;;  %v8772_v59 = vld [vmem:[#allocation2 + $0x1e0] sm:$0xfe]  ;;  %v8775_v20 = vld [vmem:[#allocation2 + $0x1e8] sm:$0xfe] }
 0x35d   : > { %v3758_v44 = vadd.f32 %v3730_v45, %v3675_v12  ;;  %v3759_v53 = vadd.f32 %v3731_v39, %v3676_v19  ;;  %v3760_v36 = vadd.f32 %v3732_v48, %v3677_v3  ;;  %v3810_v46 = vmul.f32 %v8733_v7, %v3763_v47  ;;  %v3781_v42 = vld [vmem:[#allocation2 + $0x360] sm:$0xfe]  ;;  %v3782_v45 = vld [vmem:[#allocation2 + $0x368] sm:$0xfe] }
 0x35e   : > { %v3811_v23 = vmul.f32 %v3807_v24, %v3764_v38  ;;  %v3812_v49 = vmul.f32 %v8733_v7, %v8752_v9  ;;  %v3813_v37 = vmul.f32 %v3807_v24, %v8754_v30  ;;  %v3814_v12 = vmul.f32 %v8733_v7, %v8756_v16  ;;  %v8797_v39 = vld [vmem:[#allocation2 + $0x380] sm:$0xfe] }
 0x35f   : > { %v3815_v19 = vmul.f32 %v3807_v24, %v8758_v2  ;;  %v3816_v3 = vmul.f32 %v8733_v7, %v8760_v28  ;;  %v3817_v34 = vmul.f32 %v3807_v24, %v8762_v33  ;;  %v3818_v0 = vmul.f32 %v8733_v7, %v8764_v41  ;;  %10836 = vst [vmem:[#allocation18_spill] sm:$0xff] %v8797_v39 }
 0x360   : > { %v3819_v4 = vmul.f32 %v3807_v24, %v8766_v8  ;;  %v3820_v29 = vmul.f32 %v8733_v7, %v8768_v11  ;;  %v3821_v6 = vmul.f32 %v3807_v24, %v8770_v61  ;;  %v3822_v50 = vmul.f32 %v8733_v7, %v8772_v59 }
 0x361   : > { %v3761_v35 = vadd.f32 %v3733_v56, %v8725_v14  ;;  %v3762_v17 = vadd.f32 %v3734_v15, %v8727_v32  ;;  %v3823_v31 = vmul.f32 %v3807_v24, %v8775_v20  ;;  %v3838_v52 = vrot.slane %v3810_v46, 1  ;;  %v8799_v32 = vld [vmem:[#allocation2 + $0x388] sm:$0xfe]  ;;  %v8801_v24 = vld [vmem:[#allocation2 + $0x3a0] sm:$0xfe] }
 0x362   : > { %v3839_v13 = vrot.slane %v3811_v23, 1  ;;  %v3840_v54 = vrot.slane %v3812_v49, 1  ;;  %v3841_v21 = vrot.slane %v3813_v37, 1  ;;  %v3842_v60 = vrot.slane %v3814_v12, 1  ;;  %10837 = vst [vmem:[#allocation70_spill] sm:$0xff] %v8799_v32  ;;  %10838 = vst [vmem:[#allocation21_spill] sm:$0xff] %v8801_v24 }
 0x363   : > { %v3843_v18 = vrot.slane %v3815_v19, 1  ;;  %v3844_v47 = vrot.slane %v3816_v3, 1  ;;  %v3845_v57 = vrot.slane %v3817_v34, 1  ;;  %v3846_v22 = vrot.slane %v3818_v0, 1  ;;  %v8803_v49 = vld [vmem:[#allocation2 + $0x3a8] sm:$0xfe] }
 0x364   : > { %v3847_v7 = vrot.slane %v3819_v4, 1  ;;  %v3848_v38 = vrot.slane %v3820_v29, 1  ;;  %v3849_v14 = vrot.slane %v3821_v6, 1  ;;  %v3850_v48 = vrot.slane %v3822_v50, 1  ;;  %10839 = vst [vmem:[#allocation20_spill] sm:$0xff] %v8803_v49 }
 0x365   : > { %v3851_v56 = vrot.slane %v3823_v31, 1  ;;  %v3866_v15 = vadd.f32 %v3838_v52, %v3749_v25  ;;  %v3867_v46 = vadd.f32 %v3839_v13, %v3750_v10  ;;  %v3868_v23 = vadd.f32 %v3840_v54, %v3751_v43  ;;  %v8805_v37 = vld [vmem:[#allocation2 + $0x3c0] sm:$0xfe]  ;;  %v8807_v12 = vld [vmem:[#allocation2 + $0x3c8] sm:$0xfe] }
 0x366   : > { %10840 = vst [vmem:[#allocation75_spill] sm:$0xff] %v8805_v37  ;;  %10841 = vst [vmem:[#allocation23_spill] sm:$0xff] %v8807_v12  ;;  %v3869_v19 = vadd.f32 %v3841_v21, %v3752_v63  ;;  %v3870_v3 = vadd.f32 %v3842_v60, %v3753_v51  ;;  %v3871_v34 = vadd.f32 %v3843_v18, %v3754_v5  ;;  %v8809_v4 = vld [vmem:[#allocation2 + $0x3e0] sm:$0xfe]  ;;  %v8811_v29 = vld [vmem:[#allocation2 + $0x3e8] sm:$0xfe] }
 0x367   : > { %v3872_v0 = vadd.f32 %v3844_v47, %v3755_v27  ;;  %10842 = vst [vmem:[#allocation76_spill] sm:$0xff] %v8809_v4  ;;  %10843 = vst [vmem:[#allocation25_spill] sm:$0xff] %v8811_v29  ;;  %v8813_v6 = vld [vmem:[#allocation2 + $0x400] sm:$0xfe]  ;;  %v3873_v50 = vadd.f32 %v3845_v57, %v3756_v62  ;;  %v3874_v25 = vadd.f32 %v3846_v22, %v3757_v26  ;;  %v8817_v31 = vld [vmem:[#allocation2 + $0x408] sm:$0xfe] }
 0x368   : > { %10844 = vst [vmem:[#allocation103_spill] sm:$0xff] %v8813_v6  ;;  %v3875_v10 = vadd.f32 %v3847_v7, %v3758_v44  ;;  %v3890_v43 = vrot.slane %v8740_v58, %v10805_v55  ;;  %10845 = vst [vmem:[#allocation81_spill] sm:$0xff] %v8817_v31  ;;  %v8819_v52 = vld [vmem:[#allocation2 + $0x420] sm:$0xfe]  ;;  %v8821_v63 = vld [vmem:[#allocation2 + $0x428] sm:$0xfe]  ;;  %v3876_v51 = vadd.f32 %v3848_v38, %v3759_v53 }
 0x369   : > { %10846 = vst [vmem:[#allocation27_spill] sm:$0xff] %v8819_v52  ;;  %v3877_v5 = vadd.f32 %v3849_v14, %v3760_v36  ;;  %v3893_v27 = vmul.f32 %v8750_v1, %v3781_v42  ;;  %v3895_v13 = vmul.f32 %v8750_v1, %v8797_v39  ;;  %v3897_v58 = vmul.f32 %v8750_v1, %v8801_v24  ;;  %v5411_v38 = vld [vmem:[%s7378_s23 + $0x23] ss:$8 sm:$0x3] }
 0x36a   : > { %v3894_v54 = vmul.f32 %v3890_v43, %v3782_v45  ;;  %v3896_v62 = vmul.f32 %v3890_v43, %v8799_v32  ;;  %v3898_v26 = vmul.f32 %v3890_v43, %v8803_v49  ;;  %v3899_v44 = vmul.f32 %v8750_v1, %v8805_v37 }
 0x36b   : > { %v3900_v53 = vmul.f32 %v3890_v43, %v8807_v12  ;;  %v3901_v36 = vmul.f32 %v8750_v1, %v8809_v4  ;;  %v3902_v21 = vmul.f32 %v3890_v43, %v8811_v29  ;;  %v3903_v60 = vmul.f32 %v8750_v1, %v8813_v6 }
 0x36c   : > { %v3904_v42 = vmul.f32 %v3890_v43, %v8817_v31  ;;  %v3905_v18 = vmul.f32 %v8750_v1, %v8819_v52  ;;  %v3906_v47 = vmul.f32 %v3890_v43, %v8821_v63  ;;  %v3878_v57 = vadd.f32 %v3850_v48, %v3761_v35 }
 0x36d   : > { %v3879_v22 = vadd.f32 %v3851_v56, %v3762_v17  ;;  %v3921_v45 = vrot.slane %v3893_v27, 1  ;;  %v3922_v7 = vrot.slane %v3894_v54, 1  ;;  %v3923_v14 = vrot.slane %v3895_v13, 1  ;;  %v5412_v54 = vld [vmem:[%s7378_s23 + $0x33] ss:$8 sm:$0x3] }
 0x36e   : > { %v3924_v12 = vrot.slane %v3896_v62, 1  ;;  %v3925_v4 = vrot.slane %v3897_v58, 1  ;;  %v3926_v37 = vrot.slane %v3898_v26, 1  ;;  %v3927_v29 = vrot.slane %v3899_v44, 1 }
 0x36f   : > { %v3928_v49 = vrot.slane %v3900_v53, 1  ;;  %v3929_v6 = vrot.slane %v3901_v36, 1  ;;  %v3930_v24 = vrot.slane %v3902_v21, 1  ;;  %v3931_v31 = vrot.slane %v3903_v60, 1 }
 0x370   : > { %v3932_v32 = vrot.slane %v3904_v42, 1  ;;  %v3933_v39 = vrot.slane %v3905_v18, 1  ;;  %v3934_v1 = vrot.slane %v3906_v47, 1  ;;  %v3949_v52 = vadd.f32 %v3921_v45, %v3866_v15 }
 0x371   : > { %v3950_v43 = vadd.f32 %v3922_v7, %v3867_v46  ;;  %v3951_v35 = vadd.f32 %v3923_v14, %v3868_v23  ;;  %v3952_v17 = vadd.f32 %v3924_v12, %v3869_v19  ;;  %v3953_v48 = vadd.f32 %v3925_v4, %v3870_v3  ;;  %v8850_v46 = vld [vmem:[#allocation2 + $0x200] sm:$0xfe]  ;;  %v8852_v23 = vld [vmem:[#allocation2 + $0x208] sm:$0xfe] }
 0x372   : > { %v3954_v56 = vadd.f32 %v3926_v37, %v3871_v34  ;;  %v3955_v27 = vadd.f32 %v3927_v29, %v3872_v0  ;;  %v3969_v13 = vrot.slane %v5411_v38, %v10835_v40  ;;  %v3956_v62 = vadd.f32 %v3928_v49, %v3873_v50  ;;  %10847 = vst [vmem:[#allocation31_spill] sm:$0xff] %v8850_v46  ;;  %v8863_v34 = vld [vmem:[%s7378_s23 + $0x43] ss:$8 sm:$0x3] }
 0x373   : > { %v3957_v58 = vadd.f32 %v3929_v6, %v3874_v25  ;;  %v3958_v26 = vadd.f32 %v3930_v24, %v3875_v10  ;;  %v3973_v44 = vrot.slane %v5411_v38, %v10805_v55  ;;  %v3959_v53 = vadd.f32 %v3931_v31, %v3876_v51  ;;  %10848 = vst [vmem:[#allocation83_spill] sm:$0xff] %v8852_v23 }
 0x374   : > { %v3960_v36 = vadd.f32 %v3932_v32, %v3877_v5  ;;  %v8846_v21 = vadd.f32 %v3933_v39, %v3878_v57  ;;  %v8848_v15 = vadd.f32 %v3934_v1, %v3879_v22  ;;  %v3976_v37 = vmul.f32 %v3969_v13, %v8752_v9 }
 0x375   : > { %v3977_v12 = vmul.f32 %v3973_v44, %v8754_v30  ;;  %v3978_v49 = vmul.f32 %v3969_v13, %v8756_v16  ;;  %v4052_v24 = vrot.slane %v5412_v54, %v10835_v40  ;;  %v3979_v19 = vmul.f32 %v3973_v44, %v8758_v2 }
 0x376   : > { %v3980_v32 = vmul.f32 %v3969_v13, %v8760_v28  ;;  %v3981_v39 = vmul.f32 %v3973_v44, %v8762_v33  ;;  %v3982_v3 = vmul.f32 %v3969_v13, %v8764_v41  ;;  %v3983_v0 = vmul.f32 %v3973_v44, %v8766_v8 }
 0x377   : > { %v3984_v9 = vmul.f32 %v3969_v13, %v8768_v11  ;;  %v3985_v30 = vmul.f32 %v3973_v44, %v8770_v61  ;;  %v3986_v4 = vmul.f32 %v3969_v13, %v8772_v59  ;;  %v3987_v29 = vmul.f32 %v3973_v44, %v8775_v20 }
 0x378   : > { %v3988_v6 = vmul.f32 %v3969_v13, %v8850_v46  ;;  %v3989_v50 = vmul.f32 %v3973_v44, %v8852_v23  ;;  %v4056_v25 = vrot.slane %v5412_v54, %v10805_v55  ;;  %v4004_v10 = vrot.slane %v3976_v37, 1 }
 0x379   : > { %v4005_v31 = vrot.slane %v3977_v12, 1  ;;  %v4006_v51 = vrot.slane %v3978_v49, 1  ;;  %v8875_v5 = vrot.slane %v8863_v34, %v10835_v40  ;;  %v4007_v60 = vrot.slane %v3979_v19, 1  ;;  %v3795_v19 = vld [vmem:[#allocation2 + $0x440] sm:$0xfe] }
 0x37a   : > { %v4008_v42 = vrot.slane %v3980_v32, 1  ;;  %v4009_v18 = vrot.slane %v3981_v39, 1  ;;  %v4010_v47 = vrot.slane %v3982_v3, 1  ;;  %v4011_v57 = vrot.slane %v3983_v0, 1  ;;  %v10849_v0 = vld [vmem:[#allocation18_spill] sm:$0xff] }
 0x37b   : > { %v4012_v22 = vrot.slane %v3984_v9, 1  ;;  %v4013_v45 = vrot.slane %v3985_v30, 1  ;;  %v4014_v7 = vrot.slane %v3986_v4, 1  ;;  %v4015_v38 = vrot.slane %v3987_v29, 1  ;;  %v3796_v30 = vld [vmem:[#allocation2 + $0x448] sm:$0xfe] }
 0x37c   : > { %v4016_v14 = vrot.slane %v3988_v6, 1  ;;  %v4017_v1 = vrot.slane %v3989_v50, 1  ;;  %v4032_v13 = vadd.f32 %v4004_v10, %v3949_v52  ;;  %v4033_v54 = vadd.f32 %v4005_v31, %v3950_v43  ;;  %v10850_v4 = vld [vmem:[#allocation70_spill] sm:$0xff]  ;;  %v10851_v6 = vld [vmem:[#allocation21_spill] sm:$0xff]  ;;  %v10852_v52 = vld [vmem:[#allocation20_spill] sm:$0xff] }
 0x37d   : > { %v4034_v44 = vadd.f32 %v4006_v51, %v3951_v35  ;;  %v4035_v37 = vadd.f32 %v4007_v60, %v3952_v17  ;;  %v4036_v12 = vadd.f32 %v4008_v42, %v3953_v48  ;;  %v4037_v49 = vadd.f32 %v4009_v18, %v3954_v56  ;;  %v10853_v35 = vld [vmem:[#allocation75_spill] sm:$0xff] }
 0x37e   : > { %v4038_v23 = vadd.f32 %v4010_v47, %v3955_v27  ;;  %v4039_v40 = vadd.f32 %v4011_v57, %v3956_v62  ;;  %v4040_v46 = vadd.f32 %v4012_v22, %v3957_v58  ;;  %v4041_v32 = vadd.f32 %v4013_v45, %v3958_v26  ;;  %v10854_v48 = vld [vmem:[#allocation23_spill] sm:$0xff]  ;;  %v10855_v27 = vld [vmem:[#allocation76_spill] sm:$0xff]  ;;  %v10856_v58 = vld [vmem:[#allocation25_spill] sm:$0xff] }
 0x37f   : > { %v4042_v39 = vadd.f32 %v4014_v7, %v3959_v53  ;;  %v4043_v3 = vadd.f32 %v4015_v38, %v3960_v36  ;;  %v4059_v9 = vmul.f32 %v4052_v24, %v10849_v0  ;;  %v4060_v29 = vmul.f32 %v4056_v25, %v10850_v4  ;;  %v10857_v26 = vld [vmem:[#allocation103_spill] sm:$0xff]  ;;  %v10858_v36 = vld [vmem:[#allocation81_spill] sm:$0xff] }
 0x380   : > { %v4061_v50 = vmul.f32 %v4052_v24, %v10851_v6  ;;  %v4062_v43 = vmul.f32 %v4056_v25, %v10852_v52  ;;  %v4063_v17 = vmul.f32 %v4052_v24, %v10853_v35  ;;  %v4064_v56 = vmul.f32 %v4056_v25, %v10854_v48  ;;  %v10859_v51 = vld [vmem:[#allocation27_spill] sm:$0xff] }
 0x381   : > { %v4065_v62 = vmul.f32 %v4052_v24, %v10855_v27  ;;  %v4066_v10 = vmul.f32 %v4056_v25, %v10856_v58  ;;  %v4067_v53 = vmul.f32 %v4052_v24, %v10857_v26  ;;  %v4068_v31 = vmul.f32 %v4056_v25, %v10858_v36 }
 0x382   : > { %v4069_v60 = vmul.f32 %v4052_v24, %v10859_v51  ;;  %v4070_v42 = vmul.f32 %v4056_v25, %v8821_v63  ;;  %v4071_v18 = vmul.f32 %v4052_v24, %v3795_v19  ;;  %v4044_v47 = vadd.f32 %v4016_v14, %v8846_v21 }
 0x383   : > { %v4045_v57 = vadd.f32 %v4017_v1, %v8848_v15  ;;  %v4072_v22 = vmul.f32 %v4056_v25, %v3796_v30  ;;  %v4087_v45 = vrot.slane %v4059_v9, 1  ;;  %v4088_v7 = vrot.slane %v4060_v29, 1 }
 0x384   : > { %v4089_v38 = vrot.slane %v4061_v50, 1  ;;  %v4090_v0 = vrot.slane %v4062_v43, 1  ;;  %v4091_v4 = vrot.slane %v4063_v17, 1  ;;  %v4092_v6 = vrot.slane %v4064_v56, 1  ;;  %v3779_v43 = vld [vmem:[#allocation2 + $0x220] sm:$0xfe] }
 0x385   : > { %v4093_v52 = vrot.slane %v4065_v62, 1  ;;  %v4094_v35 = vrot.slane %v4066_v10, 1  ;;  %v4095_v48 = vrot.slane %v4067_v53, 1  ;;  %v4096_v27 = vrot.slane %v4068_v31, 1  ;;  %v3780_v17 = vld [vmem:[#allocation2 + $0x228] sm:$0xfe] }
 0x386   : > { %v4097_v58 = vrot.slane %v4069_v60, 1  ;;  %v4098_v26 = vrot.slane %v4070_v42, 1  ;;  %v4099_v36 = vrot.slane %v4071_v18, 1  ;;  %v4100_v63 = vrot.slane %v4072_v22, 1 }
 0x387   : > { %v4115_v24 = vadd.f32 %v4087_v45, %v4032_v13  ;;  %v4116_v19 = vadd.f32 %v4088_v7, %v4033_v54  ;;  %v4117_v21 = vadd.f32 %v4089_v38, %v4034_v44  ;;  %v4118_v14 = vadd.f32 %v4090_v0, %v4035_v37  ;;  %v10860_v37 = vld [vmem:[#allocation31_spill] sm:$0xff] }
 0x388   : > { %v4119_v15 = vadd.f32 %v4091_v4, %v4036_v12  ;;  %v4120_v25 = vadd.f32 %v4092_v6, %v4037_v49  ;;  %v4121_v1 = vadd.f32 %v4093_v52, %v4038_v23  ;;  %v4122_v9 = vadd.f32 %v4094_v35, %v4039_v40  ;;  %v10861_v12 = vld [vmem:[#allocation83_spill] sm:$0xff]  ;;  %v4214_v6 = vld [vmem:[#allocation2 + $0x10] sm:$0x1]  ;;  %v8921_v52 = vld [vmem:[#allocation2 + $0x20] sm:$0xfc] }
 0x389   : > { %v4123_v30 = vadd.f32 %v4095_v48, %v4040_v46  ;;  %v4124_v29 = vadd.f32 %v4096_v27, %v4041_v32  ;;  %v4139_v50 = vrot.slane %v8863_v34, %v10805_v55  ;;  %v4125_v56 = vadd.f32 %v4097_v58, %v4042_v39  ;;  %v4213_v4 = vld [vmem:[#allocation2 + $0x8] sm:$0xfc]  ;;  %10862 = vst [vmem:[#allocation28_spill] sm:$0xff] %v8921_v52  ;;  %v4215_v58 = vld [vmem:[#allocation2 + $0x18] sm:$0x1] }
 0x38a   : > { %v4126_v62 = vadd.f32 %v4098_v26, %v4043_v3  ;;  %v4142_v10 = vmul.f32 %v8875_v5, %v8756_v16  ;;  %v4144_v13 = vmul.f32 %v8875_v5, %v8760_v28  ;;  %v4146_v46 = vmul.f32 %v8875_v5, %v8764_v41  ;;  %v8929_v26 = vld [vmem:[#allocation2 + $0x28] sm:$0xfc] }
 0x38b   : > { %v4143_v54 = vmul.f32 %v4139_v50, %v8758_v2  ;;  %v4145_v40 = vmul.f32 %v4139_v50, %v8762_v33  ;;  %v4147_v23 = vmul.f32 %v4139_v50, %v8766_v8  ;;  %v4148_v34 = vmul.f32 %v8875_v5, %v8768_v11  ;;  %v5414_v11 = vld [vmem:[%s7378_s23 + $0x4] ss:$8 sm:$0x3]  ;;  %10863 = vst [vmem:[#allocation85_spill] sm:$0xff] %v8929_v26 }
 0x38c   : > { %v4149_v44 = vmul.f32 %v4139_v50, %v8770_v61  ;;  %v4150_v16 = vmul.f32 %v8875_v5, %v8772_v59  ;;  %v4151_v28 = vmul.f32 %v4139_v50, %v8775_v20  ;;  %v4152_v2 = vmul.f32 %v8875_v5, %v10860_v37 }
 0x38d   : > { %v4153_v33 = vmul.f32 %v4139_v50, %v10861_v12  ;;  %v4154_v49 = vmul.f32 %v8875_v5, %v3779_v43  ;;  %v4155_v41 = vmul.f32 %v4139_v50, %v3780_v17  ;;  %v4127_v32 = vadd.f32 %v4099_v36, %v4044_v47  ;;  %v4212_v5 = vld [vmem:[#allocation2] sm:$0xfc]  ;;  %v8931_v36 = vld [vmem:[#allocation2 + $0x30] sm:$0x1] }
 0x38e   : > { %v4128_v8 = vadd.f32 %v4100_v63, %v4045_v57  ;;  %v4170_v39 = vrot.slane %v4142_v10, 1  ;;  %v4171_v3 = vrot.slane %v4143_v54, 1  ;;  %v4172_v53 = vrot.slane %v4144_v13, 1  ;;  %10864 = vst [vmem:[#allocation26_spill] sm:$0xff] %v8931_v36  ;;  %v10865_v63 = vld [vmem:[#allocation91_spill] sm:$0xff] }
 0x38f   : > { %v4173_v61 = vrot.slane %v4145_v40, 1  ;;  %v4174_v31 = vrot.slane %v4146_v46, 1  ;;  %v4175_v51 = vrot.slane %v4147_v23, 1  ;;  %v4176_v59 = vrot.slane %v4148_v34, 1  ;;  %v8962_v54 = vld [vmem:[#allocation2 + $0x60] sm:$0xfc] }
 0x390   : > { %v4177_v60 = vrot.slane %v4149_v44, 1  ;;  %v4178_v20 = vrot.slane %v4150_v16, 1  ;;  %v4179_v42 = vrot.slane %v4151_v28, 1  ;;  %v4180_v18 = vrot.slane %v4152_v2, 1  ;;  %10871 = vst [vmem:[#allocation88_spill] sm:$0xff] %v8962_v54 }
 0x391   : > { %v4181_v22 = vrot.slane %v4153_v33, 1  ;;  %v4182_v45 = vrot.slane %v4154_v49, 1  ;;  %v4183_v7 = vrot.slane %v4155_v41, 1  ;;  %v8913_v38 = vadd.f32 %v4170_v39, %v4115_v24  ;;  %v8964_v40 = vld [vmem:[#allocation2 + $0x68] sm:$0xfc] }
 0x392   : > { %v8915_v47 = vadd.f32 %v4171_v3, %v4116_v19  ;;  %v8917_v57 = vadd.f32 %v4172_v53, %v4117_v21  ;;  %v8919_v0 = vadd.f32 %v4173_v61, %v4118_v14  ;;  %v8923_v35 = vadd.f32 %v4174_v31, %v4119_v15  ;;  %v5415_v19 = vld [vmem:[%s7378_s23 + $0x14] ss:$8 sm:$0x3]  ;;  %v8943_v15 = vld [vmem:[#allocation2 + $0x38] sm:$0x1]  ;;  %10872 = vst [vmem:[#allocation33_spill] sm:$0xff] %v8964_v40 }
 0x393   : > { %v8925_v48 = vadd.f32 %v4175_v51, %v4120_v25  ;;  %v8927_v27 = vadd.f32 %v4176_v59, %v4121_v1  ;;  %v8934_v24 = vrot.slane %v5414_v11, %v10865_v63  ;;  %v8937_v21 = vadd.f32 %v4177_v60, %v4122_v9  ;;  %10866 = vst [vmem:[#allocation86_spill] sm:$0xff] %v8943_v15  ;;  %v8945_v25 = vld [vmem:[#allocation2 + $0x40] sm:$0xfc]  ;;  %v8947_v1 = vld [vmem:[#allocation2 + $0x48] sm:$0xfc] }
 0x394   : > { %v8939_v14 = vadd.f32 %v4178_v20, %v4123_v30  ;;  %v8941_v50 = vadd.f32 %v4179_v42, %v4124_v29  ;;  %10867 = vst [vmem:[#allocation29_spill] sm:$0xff] %v8945_v25  ;;  %10868 = vst [vmem:[#allocation37_spill] sm:$0xff] %v8947_v1  ;;  %v4290_v43 = vrot.slane %v5414_v11, %v10805_v55  ;;  %v8958_v30 = vld [vmem:[#allocation2 + $0x50] sm:$0x1]  ;;  %v8960_v29 = vld [vmem:[#allocation2 + $0x58] sm:$0x1] }
 0x395   : > { %v8950_v17 = vadd.f32 %v4180_v18, %v4125_v56  ;;  %v8952_v10 = vadd.f32 %v4181_v22, %v4126_v62  ;;  %v8954_v13 = vadd.f32 %v4182_v45, %v4127_v32  ;;  %v8956_v9 = vadd.f32 %v4183_v7, %v4128_v8  ;;  %10869 = vst [vmem:[#allocation87_spill] sm:$0xff] %v8958_v30  ;;  %v8966_v46 = vld [vmem:[#allocation2 + $0x70] sm:$0x1]  ;;  %v8975_v34 = vld [vmem:[#allocation2 + $0x78] sm:$0x1] }
 0x396   : > { %10870 = vst [vmem:[#allocation36_spill] sm:$0xff] %v8960_v29  ;;  %10873 = vst [vmem:[#allocation90_spill] sm:$0xff] %v8966_v46  ;;  %v4293_v23 = vmul.f32 %v8934_v24, %v4212_v5  ;;  %v8970_v56 = vrot.slane %v5415_v19, %v10865_v63  ;;  %v8973_v62 = vrot.slane %v5415_v19, %v10805_v55  ;;  %v8977_v44 = vld [vmem:[#allocation2 + $0x80] sm:$0xfc]  ;;  %v8979_v16 = vld [vmem:[#allocation2 + $0x88] sm:$0xfc] }
 0x397   : > { %10874 = vst [vmem:[#allocation93_spill] sm:$0xff] %v8975_v34  ;;  %10875 = vst [vmem:[#allocation71_spill] sm:$0xff] %v8977_v44  ;;  %v4294_v28 = vmul.f32 %v4290_v43, %v4213_v4  ;;  %v4295_v37 = vmul.f32 %v8934_v24, %v4214_v6  ;;  %v4297_v2 = vmul.f32 %v8934_v24, %v8921_v52  ;;  %v8986_v33 = vld [vmem:[#allocation2 + $0x90] sm:$0x1]  ;;  %v8988_v49 = vld [vmem:[#allocation2 + $0x98] sm:$0x1] }
 0x398   : > { %10876 = vst [vmem:[#allocation66_spill] sm:$0xff] %v8979_v16  ;;  %v4299_v12 = vmul.f32 %v8934_v24, %v8931_v36  ;;  %10877 = vst [vmem:[#allocation104_spill] sm:$0xff] %v8986_v33  ;;  %v8990_v41 = vld [vmem:[#allocation2 + $0xa0] sm:$0xfc]  ;;  %v4296_v32 = vmul.f32 %v4290_v43, %v4215_v58  ;;  %v4298_v8 = vmul.f32 %v4290_v43, %v8929_v26  ;;  %v8996_v11 = vld [vmem:[#allocation2 + $0xa8] sm:$0xfc] }
 0x399   : > { %10878 = vst [vmem:[#allocation38_spill] sm:$0xff] %v8988_v49  ;;  %10879 = vst [vmem:[#allocation55_spill] sm:$0xff] %v8990_v41  ;;  %v4300_v39 = vmul.f32 %v4290_v43, %v8943_v15  ;;  %v4301_v3 = vmul.f32 %v8934_v24, %v8945_v25  ;;  %v4302_v53 = vmul.f32 %v4290_v43, %v8947_v1  ;;  %v9004_v59 = vld [vmem:[#allocation2 + $0xb0] sm:$0x1]  ;;  %v9006_v60 = vld [vmem:[#allocation2 + $0xb8] sm:$0x1] }
 0x39a   : > { %10880 = vst [vmem:[#allocation122_spill] sm:$0xff] %v8996_v11  ;;  %v4303_v61 = vmul.f32 %v8934_v24, %v8958_v30  ;;  %v4304_v31 = vmul.f32 %v4290_v43, %v8960_v29  ;;  %v4305_v51 = vmul.f32 %v8934_v24, %v8962_v54  ;;  %10881 = vst [vmem:[#allocation13_spill] sm:$0xff] %v9004_v59  ;;  %v9008_v20 = vld [vmem:[#allocation2 + $0xc0] sm:$0xfc]  ;;  %v9016_v7 = vld [vmem:[#allocation2 + $0xc8] sm:$0xfc] }
 0x39b   : > { %10882 = vst [vmem:[#allocation125_spill] sm:$0xff] %v9006_v60  ;;  %10883 = vst [vmem:[#allocation14_spill] sm:$0xff] %v9008_v20  ;;  %v4306_v42 = vmul.f32 %v4290_v43, %v8964_v40  ;;  %v4307_v18 = vmul.f32 %v8934_v24, %v8966_v46  ;;  %v4308_v22 = vmul.f32 %v4290_v43, %v8975_v34  ;;  %v9018_v5 = vld [vmem:[#allocation2 + $0xd0] sm:$0x1]  ;;  %v9020_v4 = vld [vmem:[#allocation2 + $0xd8] sm:$0x1] }
 0x39c   : > { %v4309_v45 = vmul.f32 %v8934_v24, %v8977_v44  ;;  %10884 = vst [vmem:[#allocation127_spill] sm:$0xff] %v9016_v7  ;;  %10885 = vst [vmem:[#allocation35_spill] sm:$0xff] %v9018_v5  ;;  %v4310_v6 = vmul.f32 %v4290_v43, %v8979_v16  ;;  %v4311_v58 = vmul.f32 %v8934_v24, %v8986_v33  ;;  %v4350_v34 = vrot.slane %v4293_v23, 2 }
 0x39d   : > { %10886 = vst [vmem:[#allocation131_spill] sm:$0xff] %v9020_v4  ;;  %v4312_v19 = vmul.f32 %v4290_v43, %v8988_v49  ;;  %v4313_v46 = vmul.f32 %v8934_v24, %v8990_v41  ;;  %v4351_v40 = vrot.slane %v4295_v37, 2  ;;  %v4353_v54 = vrot.slane %v4294_v28, 2 }
 0x39e   : > { %v4354_v44 = vrot.slane %v4296_v32, 2  ;;  %v4314_v29 = vmul.f32 %v4290_v43, %v8996_v11  ;;  %v4315_v30 = vmul.f32 %v8934_v24, %v9004_v59  ;;  %v4316_v1 = vmul.f32 %v4290_v43, %v9006_v60 }
 0x39f   : > { %v4317_v16 = vmul.f32 %v8934_v24, %v9008_v20  ;;  %v4318_v33 = vmul.f32 %v4290_v43, %v9016_v7  ;;  %v4319_v49 = vmul.f32 %v8934_v24, %v9018_v5  ;;  %v4320_v23 = vmul.f32 %v4290_v43, %v9020_v4 }
 0x3a0   : > { %v4356_v37 = vrot.slane %v4297_v2, 2  ;;  %v4352_v28 = vsel %vm4349_vm0, %v4350_v34, %v4351_v40  ;;  %v4357_v32 = vrot.slane %v4299_v12, 2  ;;  %v4359_v11 = vrot.slane %v4298_v8, 2 }
 0x3a1   : > { %v4360_v41 = vrot.slane %v4300_v39, 2  ;;  %v4355_v59 = vsel %vm4349_vm0, %v4353_v54, %v4354_v44  ;;  %v4362_v25 = vrot.slane %v4301_v3, 2  ;;  %v4363_v60 = vrot.slane %v4303_v61, 2 }
 0x3a2   : > { %v4365_v15 = vrot.slane %v4302_v53, 2  ;;  %v4366_v36 = vrot.slane %v4304_v31, 2  ;;  %v4368_v20 = vrot.slane %v4305_v51, 2  ;;  %v4369_v26 = vrot.slane %v4307_v18, 2 }
 0x3a3   : > { %v4371_v7 = vrot.slane %v4306_v42, 2  ;;  %v4372_v52 = vrot.slane %v4308_v22, 2  ;;  %v4374_v55 = vrot.slane %v4309_v45, 2  ;;  %v4375_v24 = vrot.slane %v4311_v58, 2  ;;  %v4250_v42 = vld [vmem:[#allocation2 + $0x250] sm:$0x1] }
 0x3a4   : > { %v4377_v5 = vrot.slane %v4310_v6, 2  ;;  %v4378_v43 = vrot.slane %v4312_v19, 2  ;;  %v4380_v2 = vrot.slane %v4313_v46, 2  ;;  %v4381_v4 = vrot.slane %v4315_v30, 2  ;;  %v4249_v46 = vld [vmem:[#allocation2 + $0x248] sm:$0xfc] }
 0x3a5   : > { %v4383_v40 = vrot.slane %v4314_v29, 2  ;;  %v4358_v34 = vsel %vm4349_vm0, %v4356_v37, %v4357_v32  ;;  %v4384_v12 = vrot.slane %v4316_v1, 2  ;;  %v4386_v8 = vrot.slane %v4317_v16, 2  ;;  %v4248_v29 = vld [vmem:[#allocation2 + $0x240] sm:$0xfc] }
 0x3a6   : > { %v4387_v54 = vrot.slane %v4319_v49, 2  ;;  %v4361_v44 = vsel %vm4349_vm0, %v4359_v11, %v4360_v41  ;;  %v4364_v39 = vsel %vm4349_vm0, %v4362_v25, %v4363_v60  ;;  %v4389_v3 = vrot.slane %v4318_v33, 2  ;;  %v4251_v33 = vld [vmem:[#allocation2 + $0x258] sm:$0x1]  ;;  %v9065_v11 = vld [vmem:[#allocation2 + $0x270] sm:$0x1] }
 0x3a7   : > { %v4390_v53 = vrot.slane %v4320_v23, 2  ;;  %v4367_v61 = vsel %vm4349_vm0, %v4365_v15, %v4366_v36  ;;  %v4370_v31 = vsel %vm4349_vm0, %v4368_v20, %v4369_v26  ;;  %v4373_v51 = vsel %vm4349_vm0, %v4371_v7, %v4372_v52  ;;  %v9053_v36 = vld [vmem:[#allocation2 + $0x260] sm:$0xfc]  ;;  %v9055_v26 = vld [vmem:[#allocation2 + $0x268] sm:$0xfc]  ;;  %10887 = vst [vmem:[#allocation34_spill] sm:$0xff] %v9065_v11 }
 0x3a8   : > { %v4376_v30 = vsel %vm4349_vm0, %v4374_v55, %v4375_v24  ;;  %v4379_v1 = vsel %vm4349_vm0, %v4377_v5, %v4378_v43  ;;  %v4382_v16 = vsel %vm4349_vm0, %v4380_v2, %v4381_v4  ;;  %v4385_v49 = vsel %vm4349_vm0, %v4383_v40, %v4384_v12  ;;  %v9067_v60 = vld [vmem:[#allocation2 + $0x278] sm:$0x1]  ;;  %v9103_v5 = vld [vmem:[#allocation2 + $0x2a8] sm:$0xfc]  ;;  %v9105_v4 = vld [vmem:[#allocation2 + $0x2b0] sm:$0x1] }
 0x3a9   : > { %v9051_v25 = vadd.f32 %v4352_v28, %v8913_v38  ;;  %v4388_v52 = vsel %vm4349_vm0, %v4386_v8, %v4387_v54  ;;  %v4391_v55 = vsel %vm4349_vm0, %v4389_v3, %v4390_v53  ;;  %v9060_v15 = vadd.f32 %v4355_v59, %v8915_v47  ;;  %10888 = vst [vmem:[#allocation132_spill] sm:$0xff] %v9067_v60  ;;  %v9069_v38 = vld [vmem:[#allocation2 + $0x280] sm:$0xfc]  ;;  %v9085_v59 = vld [vmem:[#allocation2 + $0x290] sm:$0x1] }
 0x3aa   : > { %v9063_v41 = vadd.f32 %v4358_v34, %v8917_v57  ;;  %10889 = vst [vmem:[#allocation61_spill] sm:$0xff] %v9069_v38  ;;  %v9072_v20 = vadd.f32 %v4361_v44, %v8919_v0  ;;  %v9075_v18 = vadd.f32 %v4364_v39, %v8923_v35  ;;  %v9078_v22 = vadd.f32 %v4367_v61, %v8925_v48  ;;  %v9083_v57 = vld [vmem:[#allocation2 + $0x288] sm:$0xfc]  ;;  %v9087_v45 = vld [vmem:[#allocation2 + $0x298] sm:$0x1] }
 0x3ab   : > { %v9081_v47 = vadd.f32 %v4370_v31, %v8927_v27  ;;  %10890 = vst [vmem:[#allocation47_spill] sm:$0xff] %v9083_v57  ;;  %10891 = vst [vmem:[#allocation106_spill] sm:$0xff] %v9085_v59  ;;  %v9090_v7 = vadd.f32 %v4373_v51, %v8937_v21  ;;  %v9093_v0 = vadd.f32 %v4376_v30, %v8939_v14  ;;  %v9101_v27 = vld [vmem:[#allocation2 + $0x2a0] sm:$0xfc]  ;;  %v9117_v58 = vld [vmem:[#allocation2 + $0x2b8] sm:$0x1] }
 0x3ac   : > { %10892 = vst [vmem:[#allocation107_spill] sm:$0xff] %v9087_v45  ;;  %v9096_v35 = vadd.f32 %v4379_v1, %v8941_v50  ;;  %v9099_v48 = vadd.f32 %v4382_v16, %v8950_v17  ;;  %10893 = vst [vmem:[#allocation22_spill] sm:$0xff] %v9101_v27  ;;  %v9108_v6 = vadd.f32 %v4385_v49, %v8952_v10  ;;  %v9119_v17 = vld [vmem:[#allocation2 + $0x2c0] sm:$0xfc]  ;;  %v9121_v19 = vld [vmem:[#allocation2 + $0x2c8] sm:$0xfc] }
 0x3ad   : > { %10894 = vst [vmem:[#allocation108_spill] sm:$0xff] %v9103_v5  ;;  %10895 = vst [vmem:[#allocation109_spill] sm:$0xff] %v9105_v4  ;;  %v9111_v21 = vadd.f32 %v4388_v52, %v8954_v13  ;;  %v9114_v14 = vadd.f32 %v4391_v55, %v8956_v9  ;;  %v4433_v50 = vmul.f32 %v8970_v56, %v4248_v29  ;;  %v9128_v28 = vld [vmem:[#allocation2 + $0x2d0] sm:$0x1]  ;;  %v9130_v9 = vld [vmem:[#allocation2 + $0x2d8] sm:$0x1] }
 0x3ae   : > { %10896 = vst [vmem:[#allocation53_spill] sm:$0xff] %v9117_v58  ;;  %10897 = vst [vmem:[#allocation110_spill] sm:$0xff] %v9119_v17  ;;  %v4434_v23 = vmul.f32 %v8973_v62, %v4249_v46  ;;  %v4435_v37 = vmul.f32 %v8970_v56, %v4250_v42  ;;  %v4436_v10 = vmul.f32 %v8973_v62, %v4251_v33  ;;  %v9132_v32 = vld [vmem:[#allocation2 + $0x2e0] sm:$0xfc]  ;;  %v9142_v34 = vld [vmem:[#allocation2 + $0x2e8] sm:$0xfc] }
 0x3af   : > { %10898 = vst [vmem:[#allocation111_spill] sm:$0xff] %v9121_v19  ;;  %v4437_v13 = vmul.f32 %v8970_v56, %v9053_v36  ;;  %10899 = vst [vmem:[#allocation24_spill] sm:$0xff] %v9128_v28  ;;  %v4438_v24 = vmul.f32 %v8973_v62, %v9055_v26  ;;  %v4439_v43 = vmul.f32 %v8970_v56, %v9065_v11  ;;  %v9152_v39 = vld [vmem:[#allocation2 + $0x2f0] sm:$0x1]  ;;  %v9154_v3 = vld [vmem:[#allocation2 + $0x2f8] sm:$0x1] }
 0x3b0   : > { %10900 = vst [vmem:[#allocation112_spill] sm:$0xff] %v9130_v9  ;;  %10901 = vst [vmem:[#allocation113_spill] sm:$0xff] %v9132_v32  ;;  %v4440_v2 = vmul.f32 %v8973_v62, %v9067_v60  ;;  %v4441_v40 = vmul.f32 %v8970_v56, %v9069_v38  ;;  %v4442_v12 = vmul.f32 %v8973_v62, %v9083_v57  ;;  %v9156_v53 = vld [vmem:[#allocation2 + $0x300] sm:$0xfc]  ;;  %v9166_v29 = vld [vmem:[#allocation2 + $0x308] sm:$0xfc] }
 0x3b1   : > { %10902 = vst [vmem:[#allocation67_spill] sm:$0xff] %v9142_v34  ;;  %v4443_v8 = vmul.f32 %v8970_v56, %v9085_v59  ;;  %v4444_v54 = vmul.f32 %v8973_v62, %v9087_v45  ;;  %v4445_v44 = vmul.f32 %v8970_v56, %v9101_v27  ;;  %10903 = vst [vmem:[#allocation114_spill] sm:$0xff] %v9152_v39  ;;  %v9168_v46 = vld [vmem:[#allocation2 + $0x310] sm:$0x1]  ;;  %v9170_v42 = vld [vmem:[#allocation2 + $0x318] sm:$0x1] }
 0x3b2   : > { %10904 = vst [vmem:[#allocation115_spill] sm:$0xff] %v9154_v3  ;;  %10905 = vst [vmem:[#allocation32_spill] sm:$0xff] %v9156_v53  ;;  %v4446_v61 = vmul.f32 %v8973_v62, %v9103_v5  ;;  %v4447_v31 = vmul.f32 %v8970_v56, %v9105_v4  ;;  %v4448_v51 = vmul.f32 %v8973_v62, %v9117_v58  ;;  %v4489_v52 = vrot.slane %v4433_v50, 2 }
 0x3b3   : > { %v4449_v30 = vmul.f32 %v8970_v56, %v9119_v17  ;;  %10906 = vst [vmem:[#allocation116_spill] sm:$0xff] %v9166_v29  ;;  %10907 = vst [vmem:[#allocation117_spill] sm:$0xff] %v9168_v46  ;;  %v4450_v1 = vmul.f32 %v8973_v62, %v9121_v19  ;;  %v4451_v16 = vmul.f32 %v8970_v56, %v9128_v28  ;;  %v4490_v55 = vrot.slane %v4435_v37, 2 }
 0x3b4   : > { %10908 = vst [vmem:[#allocation100_spill] sm:$0xff] %v9170_v42  ;;  %v4452_v49 = vmul.f32 %v8973_v62, %v9130_v9  ;;  %v4453_v33 = vmul.f32 %v8970_v56, %v9132_v32  ;;  %v4492_v17 = vrot.slane %v4434_v23, 2  ;;  %v4493_v58 = vrot.slane %v4436_v10, 2 }
 0x3b5   : > { %v4454_v4 = vmul.f32 %v8973_v62, %v9142_v34  ;;  %v4455_v5 = vmul.f32 %v8970_v56, %v9152_v39  ;;  %v4456_v19 = vmul.f32 %v8973_v62, %v9154_v3  ;;  %v4457_v28 = vmul.f32 %v8970_v56, %v9156_v53 }
 0x3b6   : > { %v4458_v9 = vmul.f32 %v8973_v62, %v9166_v29  ;;  %v4459_v50 = vmul.f32 %v8970_v56, %v9168_v46  ;;  %v4460_v23 = vmul.f32 %v8973_v62, %v9170_v42  ;;  %v4495_v37 = vrot.slane %v4437_v13, 2 }
 0x3b7   : > { %v4491_v10 = vsel %vm4349_vm0, %v4489_v52, %v4490_v55  ;;  %v4496_v34 = vrot.slane %v4439_v43, 2  ;;  %v4498_v39 = vrot.slane %v4438_v24, 2  ;;  %v4499_v32 = vrot.slane %v4440_v2, 2 }
 0x3b8   : > { %v4494_v3 = vsel %vm4349_vm0, %v4492_v17, %v4493_v58  ;;  %v4501_v27 = vrot.slane %v4441_v40, 2  ;;  %v4502_v45 = vrot.slane %v4443_v8, 2  ;;  %v4504_v53 = vrot.slane %v4442_v12, 2 }
 0x3b9   : > { %v4505_v59 = vrot.slane %v4444_v54, 2  ;;  %v4507_v57 = vrot.slane %v4445_v44, 2  ;;  %v4508_v29 = vrot.slane %v4447_v31, 2  ;;  %v4510_v38 = vrot.slane %v4446_v61, 2 }
 0x3ba   : > { %v4511_v60 = vrot.slane %v4448_v51, 2  ;;  %v4513_v56 = vrot.slane %v4449_v30, 2  ;;  %v4514_v46 = vrot.slane %v4451_v16, 2  ;;  %v4516_v11 = vrot.slane %v4450_v1, 2  ;;  %v10917_v16 = vld [vmem:[#allocation29_spill] sm:$0xff] }
 0x3bb   : > { %v4517_v62 = vrot.slane %v4452_v49, 2  ;;  %v4519_v13 = vrot.slane %v4453_v33, 2  ;;  %v4520_v42 = vrot.slane %v4455_v5, 2  ;;  %v4522_v52 = vrot.slane %v4454_v4, 2  ;;  %v10918_v33 = vld [vmem:[#allocation37_spill] sm:$0xff] }
 0x3bc   : > { %v4497_v24 = vsel %vm4349_vm0, %v4495_v37, %v4496_v34  ;;  %v4523_v43 = vrot.slane %v4456_v19, 2  ;;  %v4525_v58 = vrot.slane %v4457_v28, 2  ;;  %v4526_v17 = vrot.slane %v4459_v50, 2  ;;  %v10919_v50 = vld [vmem:[#allocation87_spill] sm:$0xff]  ;;  %v10920_v37 = vld [vmem:[#allocation36_spill] sm:$0xff] }
 0x3bd   : > { %v4500_v2 = vsel %vm4349_vm0, %v4498_v39, %v4499_v32  ;;  %v4503_v40 = vsel %vm4349_vm0, %v4501_v27, %v4502_v45  ;;  %v4528_v12 = vrot.slane %v4458_v9, 2  ;;  %v4529_v8 = vrot.slane %v4460_v23, 2  ;;  %v5416_v27 = vld [vmem:[%s7378_s23 + $0x24] ss:$8 sm:$0x3] }
 0x3be   : > { %v4506_v54 = vsel %vm4349_vm0, %v4504_v53, %v4505_v59  ;;  %v4509_v44 = vsel %vm4349_vm0, %v4507_v57, %v4508_v29  ;;  %v4512_v5 = vsel %vm4349_vm0, %v4510_v38, %v4511_v60  ;;  %v4515_v4 = vsel %vm4349_vm0, %v4513_v56, %v4514_v46  ;;  %v5417_v39 = vld [vmem:[%s7378_s23 + $0x34] ss:$8 sm:$0x3]  ;;  %v5418_v53 = vld [vmem:[%s7378_s23 + $0x44] ss:$8 sm:$0x3] }
 0x3bf   : > { %v4518_v19 = vsel %vm4349_vm0, %v4516_v11, %v4517_v62  ;;  %v4521_v28 = vsel %vm4349_vm0, %v4519_v13, %v4520_v42  ;;  %v4524_v32 = vsel %vm4349_vm0, %v4522_v52, %v4523_v43  ;;  %v9207_v45 = vadd.f32 %v4491_v10, %v9051_v25  ;;  %v10913_v29 = vld [vmem:[#allocation85_spill] sm:$0xff]  ;;  %v10921_v56 = vld [vmem:[#allocation88_spill] sm:$0xff] }
 0x3c0   : > { %v4527_v59 = vsel %vm4349_vm0, %v4525_v58, %v4526_v17  ;;  %v4530_v57 = vsel %vm4349_vm0, %v4528_v12, %v4529_v8  ;;  %v9213_v9 = vadd.f32 %v4494_v3, %v9060_v15  ;;  %v9216_v60 = vadd.f32 %v4497_v24, %v9063_v41  ;;  %v10909_v3 = vld [vmem:[#allocation92_spill] sm:$0xff]  ;;  %v10922_v13 = vld [vmem:[#allocation33_spill] sm:$0xff]  ;;  %v10923_v24 = vld [vmem:[#allocation90_spill] sm:$0xff] }
 0x3c1   : > { %v9219_v11 = vadd.f32 %v4500_v2, %v9072_v20  ;;  %v9222_v38 = vadd.f32 %v4503_v40, %v9075_v18  ;;  %v9225_v25 = vadd.f32 %v4506_v54, %v9078_v22  ;;  %v9228_v34 = vadd.f32 %v4509_v44, %v9081_v47  ;;  %v10924_v58 = vld [vmem:[#allocation93_spill] sm:$0xff]  ;;  %v10925_v2 = vld [vmem:[#allocation71_spill] sm:$0xff]  ;;  %v10926_v12 = vld [vmem:[#allocation66_spill] sm:$0xff] }
 0x3c2   : > { %v9233_v15 = vadd.f32 %v4512_v5, %v9090_v7  ;;  %v9236_v41 = vadd.f32 %v4515_v4, %v9093_v0  ;;  %v4565_v20 = vrot.slane %v5416_v27, %v10865_v63  ;;  %v4569_v61 = vrot.slane %v5416_v27, %v10909_v3  ;;  %v9281_v54 = vld [vmem:[#allocation2 + $0xe0] sm:$0xfc]  ;;  %v9283_v44 = vld [vmem:[#allocation2 + $0xe8] sm:$0xfc]  ;;  %v10929_v5 = vld [vmem:[#allocation104_spill] sm:$0xff] }
 0x3c3   : > { %v9241_v18 = vadd.f32 %v4518_v19, %v9096_v35  ;;  %v9244_v22 = vadd.f32 %v4521_v28, %v9099_v48  ;;  %v9247_v47 = vadd.f32 %v4524_v32, %v9108_v6  ;;  %v9250_v31 = vadd.f32 %v4527_v59, %v9111_v21  ;;  %v10912_v48 = vld [vmem:[#allocation28_spill] sm:$0xff]  ;;  %v10915_v21 = vld [vmem:[#allocation26_spill] sm:$0xff]  ;;  %10927 = vst [vmem:[#allocation120_spill] sm:$0xff] %v9281_v54  ;;  %v10931_v32 = vld [vmem:[#allocation55_spill] sm:$0xff] }
 0x3c4   : > { %v9253_v7 = vadd.f32 %v4530_v57, %v9114_v14  ;;  %v9256_v0 = vrot.slane %v5417_v39, %v10865_v63  ;;  %v9259_v51 = vrot.slane %v5417_v39, %v10909_v3  ;;  %v9262_v35 = vrot.slane %v5418_v53, %v10865_v63  ;;  %v10916_v14 = vld [vmem:[#allocation86_spill] sm:$0xff]  ;;  %10928 = vst [vmem:[#allocation123_spill] sm:$0xff] %v9283_v44  ;;  %v9289_v39 = vld [vmem:[#allocation2 + $0xf0] sm:$0x1] }
 0x3c5   : > { %v4572_v30 = vmul.f32 %v4565_v20, %v10912_v48  ;;  %v4573_v6 = vmul.f32 %v4569_v61, %v10913_v29  ;;  %v9267_v46 = vrot.slane %v5418_v53, %v10909_v3  ;;  %v4574_v42 = vmul.f32 %v4565_v20, %v10915_v21  ;;  %v10930_v19 = vld [vmem:[#allocation38_spill] sm:$0xff]  ;;  %10933 = vst [vmem:[#allocation59_spill] sm:$0xff] %v9289_v39  ;;  %v9291_v53 = vld [vmem:[#allocation2 + $0xf8] sm:$0x1] }
 0x3c6   : > { %10910 = vst [vmem:[#allocation118_spill] sm:$0xff] %v9259_v51  ;;  %10911 = vst [vmem:[#allocation119_spill] sm:$0xff] %v9262_v35  ;;  %v4575_v1 = vmul.f32 %v4569_v61, %v10916_v14  ;;  %v4576_v49 = vmul.f32 %v4565_v20, %v10917_v16  ;;  %v4577_v55 = vmul.f32 %v4569_v61, %v10918_v33  ;;  %v10932_v59 = vld [vmem:[#allocation122_spill] sm:$0xff]  ;;  %v10934_v48 = vld [vmem:[#allocation13_spill] sm:$0xff] }
 0x3c7   : > { %10914 = vst [vmem:[#allocation30_spill] sm:$0xff] %v9267_v46  ;;  %v4578_v23 = vmul.f32 %v4565_v20, %v10919_v50  ;;  %v4579_v10 = vmul.f32 %v4569_v61, %v10920_v37  ;;  %v4580_v62 = vmul.f32 %v4565_v20, %v10921_v56  ;;  %v4581_v52 = vmul.f32 %v4569_v61, %v10922_v13  ;;  %v10935_v21 = vld [vmem:[#allocation125_spill] sm:$0xff]  ;;  %v10936_v3 = vld [vmem:[#allocation14_spill] sm:$0xff]  ;;  %v10938_v13 = vld [vmem:[#allocation35_spill] sm:$0xff] }
 0x3c8   : > { %v4582_v43 = vmul.f32 %v4565_v20, %v10923_v24  ;;  %v4583_v17 = vmul.f32 %v4569_v61, %v10924_v58  ;;  %v4584_v40 = vmul.f32 %v4565_v20, %v10925_v2  ;;  %v4585_v8 = vmul.f32 %v4569_v61, %v10926_v12  ;;  %v10937_v12 = vld [vmem:[#allocation127_spill] sm:$0xff] }
 0x3c9   : > { %v4586_v4 = vmul.f32 %v4565_v20, %v10929_v5  ;;  %v4587_v28 = vmul.f32 %v4569_v61, %v10930_v19  ;;  %v4588_v27 = vmul.f32 %v4565_v20, %v10931_v32  ;;  %v4589_v57 = vmul.f32 %v4569_v61, %v10932_v59  ;;  %v10939_v56 = vld [vmem:[#allocation131_spill] sm:$0xff] }
 0x3ca   : > { %v4590_v29 = vmul.f32 %v4565_v20, %v10934_v48  ;;  %v4591_v14 = vmul.f32 %v4569_v61, %v10935_v21  ;;  %v4592_v63 = vmul.f32 %v4565_v20, %v10936_v3  ;;  %v4593_v2 = vmul.f32 %v4569_v61, %v10937_v12 }
 0x3cb   : > { %v4628_v58 = vrot.slane %v4572_v30, 2  ;;  %v4629_v5 = vrot.slane %v4574_v42, 2  ;;  %v4631_v24 = vrot.slane %v4573_v6, 2  ;;  %v4632_v19 = vrot.slane %v4575_v1, 2 }
 0x3cc   : > { %v4594_v32 = vmul.f32 %v4565_v20, %v10938_v13  ;;  %v4595_v59 = vmul.f32 %v4569_v61, %v10939_v56  ;;  %v4596_v37 = vmul.f32 %v4565_v20, %v9281_v54  ;;  %v4597_v50 = vmul.f32 %v4569_v61, %v9283_v44 }
 0x3cd   : > { %v4598_v48 = vmul.f32 %v4565_v20, %v9289_v39  ;;  %v4599_v21 = vmul.f32 %v4569_v61, %v9291_v53  ;;  %v4634_v46 = vrot.slane %v4576_v49, 2  ;;  %v4635_v3 = vrot.slane %v4578_v23, 2 }
 0x3ce   : > { %v4630_v12 = vsel %vm4349_vm0, %v4628_v58, %v4629_v5  ;;  %v4633_v30 = vsel %vm4349_vm0, %v4631_v24, %v4632_v19  ;;  %v4637_v6 = vrot.slane %v4577_v55, 2  ;;  %v4638_v42 = vrot.slane %v4579_v10, 2 }
 0x3cf   : > { %v4640_v1 = vrot.slane %v4580_v62, 2  ;;  %v4641_v13 = vrot.slane %v4582_v43, 2  ;;  %v4643_v33 = vrot.slane %v4581_v52, 2  ;;  %v4644_v56 = vrot.slane %v4583_v17, 2 }
 0x3d0   : > { %v4646_v35 = vrot.slane %v4584_v40, 2  ;;  %v4647_v54 = vrot.slane %v4586_v4, 2  ;;  %v4649_v16 = vrot.slane %v4585_v8, 2  ;;  %v4650_v44 = vrot.slane %v4587_v28, 2 }
 0x3d1   : > { %v4652_v51 = vrot.slane %v4588_v27, 2  ;;  %v4653_v20 = vrot.slane %v4590_v29, 2  ;;  %v4655_v39 = vrot.slane %v4589_v57, 2  ;;  %v4656_v61 = vrot.slane %v4591_v14, 2  ;;  %v10947_v57 = vld [vmem:[#allocation22_spill] sm:$0xff]  ;;  %v10949_v29 = vld [vmem:[#allocation109_spill] sm:$0xff] }
 0x3d2   : > { %v4636_v49 = vsel %vm4349_vm0, %v4634_v46, %v4635_v3  ;;  %v4658_v23 = vrot.slane %v4592_v63, 2  ;;  %v4659_v58 = vrot.slane %v4594_v32, 2  ;;  %v4661_v5 = vrot.slane %v4593_v2, 2  ;;  %v10950_v14 = vld [vmem:[#allocation53_spill] sm:$0xff] }
 0x3d3   : > { %v4639_v55 = vsel %vm4349_vm0, %v4637_v6, %v4638_v42  ;;  %v4662_v10 = vrot.slane %v4595_v59, 2  ;;  %v4664_v62 = vrot.slane %v4596_v37, 2  ;;  %v4665_v24 = vrot.slane %v4598_v48, 2  ;;  %v10946_v59 = vld [vmem:[#allocation107_spill] sm:$0xff]  ;;  %v10951_v6 = vld [vmem:[#allocation110_spill] sm:$0xff] }
 0x3d4   : > { %v4642_v52 = vsel %vm4349_vm0, %v4640_v1, %v4641_v13  ;;  %v4645_v43 = vsel %vm4349_vm0, %v4643_v33, %v4644_v56  ;;  %v4667_v17 = vrot.slane %v4597_v50, 2  ;;  %v4668_v40 = vrot.slane %v4599_v21, 2  ;;  %v10952_v1 = vld [vmem:[#allocation111_spill] sm:$0xff] }
 0x3d5   : > { %v4648_v8 = vsel %vm4349_vm0, %v4646_v35, %v4647_v54  ;;  %v4651_v4 = vsel %vm4349_vm0, %v4649_v16, %v4650_v44  ;;  %v4654_v3 = vsel %vm4349_vm0, %v4652_v51, %v4653_v20  ;;  %v4657_v63 = vsel %vm4349_vm0, %v4655_v39, %v4656_v61  ;;  %v10948_v39 = vld [vmem:[#allocation108_spill] sm:$0xff]  ;;  %v4276_v61 = vld [vmem:[#allocation2 + $0x320] sm:$0xfc] }
 0x3d6   : > { %v4660_v46 = vsel %vm4349_vm0, %v4658_v23, %v4659_v58  ;;  %v4663_v2 = vsel %vm4349_vm0, %v4661_v5, %v4662_v10  ;;  %v4666_v37 = vsel %vm4349_vm0, %v4664_v62, %v4665_v24  ;;  %v9317_v13 = vadd.f32 %v4630_v12, %v9207_v45  ;;  %v10953_v23 = vld [vmem:[#allocation24_spill] sm:$0xff]  ;;  %v10955_v10 = vld [vmem:[#allocation113_spill] sm:$0xff]  ;;  %v10956_v24 = vld [vmem:[#allocation67_spill] sm:$0xff] }
 0x3d7   : > { %v4669_v33 = vsel %vm4349_vm0, %v4667_v17, %v4668_v40  ;;  %v9321_v50 = vadd.f32 %v4633_v30, %v9213_v9  ;;  %v9324_v35 = vadd.f32 %v4636_v49, %v9216_v60  ;;  %v9327_v51 = vadd.f32 %v4639_v55, %v9219_v11  ;;  %v4277_v49 = vld [vmem:[#allocation2 + $0x328] sm:$0xfc]  ;;  %v10954_v5 = vld [vmem:[#allocation112_spill] sm:$0xff]  ;;  %v4279_v17 = vld [vmem:[#allocation2 + $0x338] sm:$0x1] }
 0x3d8   : > { %v9330_v16 = vadd.f32 %v4642_v52, %v9222_v38  ;;  %v9333_v56 = vadd.f32 %v4645_v43, %v9225_v25  ;;  %v9336_v45 = vadd.f32 %v4648_v8, %v9228_v34  ;;  %v9339_v12 = vadd.f32 %v4651_v4, %v9233_v15  ;;  %v4278_v43 = vld [vmem:[#allocation2 + $0x330] sm:$0x1]  ;;  %v10957_v40 = vld [vmem:[#allocation114_spill] sm:$0xff]  ;;  %v10958_v4 = vld [vmem:[#allocation115_spill] sm:$0xff] }
 0x3d9   : > { %v9342_v9 = vadd.f32 %v4654_v3, %v9236_v41  ;;  %v9345_v60 = vadd.f32 %v4657_v63, %v9241_v18  ;;  %v9348_v11 = vadd.f32 %v4660_v46, %v9244_v22  ;;  %v9351_v38 = vadd.f32 %v4663_v2, %v9247_v47  ;;  %v10940_v41 = vld [vmem:[#allocation118_spill] sm:$0xff]  ;;  %v10942_v22 = vld [vmem:[#allocation132_spill] sm:$0xff]  ;;  %v10943_v47 = vld [vmem:[#allocation61_spill] sm:$0xff] }
 0x3da   : > { %v9354_v25 = vadd.f32 %v4666_v37, %v9250_v31  ;;  %v9357_v34 = vadd.f32 %v4669_v33, %v9253_v7  ;;  %v4711_v15 = vmul.f32 %v9256_v0, %v9053_v36  ;;  %v4712_v54 = vmul.f32 %v10940_v41, %v9055_v26  ;;  %v10941_v18 = vld [vmem:[#allocation34_spill] sm:$0xff]  ;;  %v10944_v31 = vld [vmem:[#allocation47_spill] sm:$0xff]  ;;  %v10959_v63 = vld [vmem:[#allocation32_spill] sm:$0xff] }
 0x3db   : > { %v4713_v44 = vmul.f32 %v9256_v0, %v10941_v18  ;;  %v4714_v19 = vmul.f32 %v10940_v41, %v10942_v22  ;;  %v4715_v28 = vmul.f32 %v9256_v0, %v10943_v47  ;;  %v4716_v32 = vmul.f32 %v10940_v41, %v10944_v31  ;;  %v10945_v7 = vld [vmem:[#allocation106_spill] sm:$0xff]  ;;  %v10960_v2 = vld [vmem:[#allocation116_spill] sm:$0xff]  ;;  %v10961_v31 = vld [vmem:[#allocation117_spill] sm:$0xff] }
 0x3dc   : > { %v4717_v27 = vmul.f32 %v9256_v0, %v10945_v7  ;;  %v4718_v36 = vmul.f32 %v10940_v41, %v10946_v59  ;;  %v4719_v26 = vmul.f32 %v9256_v0, %v10947_v57  ;;  %v4720_v48 = vmul.f32 %v10940_v41, %v10948_v39  ;;  %v10962_v59 = vld [vmem:[#allocation100_spill] sm:$0xff] }
 0x3dd   : > { %v4721_v21 = vmul.f32 %v9256_v0, %v10949_v29  ;;  %v4722_v30 = vmul.f32 %v10940_v41, %v10950_v14  ;;  %v4723_v42 = vmul.f32 %v9256_v0, %v10951_v6  ;;  %v4724_v20 = vmul.f32 %v10940_v41, %v10952_v1 }
 0x3de   : > { %v4725_v58 = vmul.f32 %v9256_v0, %v10953_v23  ;;  %v4726_v55 = vmul.f32 %v10940_v41, %v10954_v5  ;;  %v4727_v62 = vmul.f32 %v9256_v0, %v10955_v10  ;;  %v4728_v52 = vmul.f32 %v10940_v41, %v10956_v24 }
 0x3df   : > { %v4729_v8 = vmul.f32 %v9256_v0, %v10957_v40  ;;  %v4730_v3 = vmul.f32 %v10940_v41, %v10958_v4  ;;  %v4731_v46 = vmul.f32 %v9256_v0, %v10959_v63  ;;  %v4732_v37 = vmul.f32 %v10940_v41, %v10960_v2 }
 0x3e0   : > { %v4767_v33 = vrot.slane %v4711_v15, 2  ;;  %v4768_v18 = vrot.slane %v4713_v44, 2  ;;  %v4770_v22 = vrot.slane %v4712_v54, 2  ;;  %v4771_v47 = vrot.slane %v4714_v19, 2 }
 0x3e1   : > { %v4733_v7 = vmul.f32 %v9256_v0, %v10961_v31  ;;  %v4734_v57 = vmul.f32 %v10940_v41, %v10962_v59  ;;  %v4735_v39 = vmul.f32 %v9256_v0, %v4276_v61  ;;  %v4736_v29 = vmul.f32 %v10940_v41, %v4277_v49 }
 0x3e2   : > { %v4737_v14 = vmul.f32 %v9256_v0, %v4278_v43  ;;  %v4738_v6 = vmul.f32 %v10940_v41, %v4279_v17  ;;  %v4773_v1 = vrot.slane %v4715_v28, 2  ;;  %v4774_v23 = vrot.slane %v4717_v27, 2 }
 0x3e3   : > { %v4769_v15 = vsel %vm4349_vm0, %v4767_v33, %v4768_v18  ;;  %v4772_v54 = vsel %vm4349_vm0, %v4770_v22, %v4771_v47  ;;  %v4776_v44 = vrot.slane %v4716_v32, 2  ;;  %v4777_v19 = vrot.slane %v4718_v36, 2 }
 0x3e4   : > { %v4779_v5 = vrot.slane %v4719_v26, 2  ;;  %v4780_v10 = vrot.slane %v4721_v21, 2  ;;  %v4782_v24 = vrot.slane %v4720_v48, 2  ;;  %v4783_v40 = vrot.slane %v4722_v30, 2 }
 0x3e5   : > { %v4785_v4 = vrot.slane %v4723_v42, 2  ;;  %v4786_v61 = vrot.slane %v4725_v58, 2  ;;  %v4788_v63 = vrot.slane %v4724_v20, 2  ;;  %v4789_v49 = vrot.slane %v4726_v55, 2 }
 0x3e6   : > { %v4791_v2 = vrot.slane %v4727_v62, 2  ;;  %v4792_v0 = vrot.slane %v4729_v8, 2  ;;  %v4794_v43 = vrot.slane %v4728_v52, 2  ;;  %v4795_v41 = vrot.slane %v4730_v3, 2 }
 0x3e7   : > { %v4775_v28 = vsel %vm4349_vm0, %v4773_v1, %v4774_v23  ;;  %v4797_v27 = vrot.slane %v4731_v46, 2  ;;  %v4798_v17 = vrot.slane %v4733_v7, 2  ;;  %v4800_v33 = vrot.slane %v4732_v37, 2 }
 0x3e8   : > { %v4778_v32 = vsel %vm4349_vm0, %v4776_v44, %v4777_v19  ;;  %v4801_v36 = vrot.slane %v4734_v57, 2  ;;  %v4803_v26 = vrot.slane %v4735_v39, 2  ;;  %v4804_v21 = vrot.slane %v4737_v14, 2  ;;  %v10964_v39 = vld [vmem:[#allocation119_spill] sm:$0xff]  ;;  %v10966_v14 = vld [vmem:[#allocation30_spill] sm:$0xff]  ;;  %v10972_v19 = vld [vmem:[#allocation93_spill] sm:$0xff] }
 0x3e9   : > { %v4781_v48 = vsel %vm4349_vm0, %v4779_v5, %v4780_v10  ;;  %v4784_v30 = vsel %vm4349_vm0, %v4782_v24, %v4783_v40  ;;  %v4806_v42 = vrot.slane %v4736_v29, 2  ;;  %v4807_v20 = vrot.slane %v4738_v6, 2  ;;  %v10973_v10 = vld [vmem:[#allocation71_spill] sm:$0xff]  ;;  %v10974_v40 = vld [vmem:[#allocation66_spill] sm:$0xff] }
 0x3ea   : > { %v4787_v58 = vsel %vm4349_vm0, %v4785_v4, %v4786_v61  ;;  %v4790_v55 = vsel %vm4349_vm0, %v4788_v63, %v4789_v49  ;;  %v4793_v62 = vsel %vm4349_vm0, %v4791_v2, %v4792_v0  ;;  %v4796_v52 = vsel %vm4349_vm0, %v4794_v43, %v4795_v41  ;;  %v10975_v61 = vld [vmem:[#allocation104_spill] sm:$0xff]  ;;  %v10976_v49 = vld [vmem:[#allocation38_spill] sm:$0xff]  ;;  %v10977_v0 = vld [vmem:[#allocation55_spill] sm:$0xff] }
 0x3eb   : > { %v4799_v8 = vsel %vm4349_vm0, %v4797_v27, %v4798_v17  ;;  %v4802_v3 = vsel %vm4349_vm0, %v4800_v33, %v4801_v36  ;;  %v4805_v46 = vsel %vm4349_vm0, %v4803_v26, %v4804_v21  ;;  %v9425_v37 = vadd.f32 %v4769_v15, %v9317_v13  ;;  %v10978_v41 = vld [vmem:[#allocation122_spill] sm:$0xff]  ;;  %v10979_v17 = vld [vmem:[#allocation13_spill] sm:$0xff] }
 0x3ec   : > { %v4808_v18 = vsel %vm4349_vm0, %v4806_v42, %v4807_v20  ;;  %v9429_v22 = vadd.f32 %v4772_v54, %v9321_v50  ;;  %v9432_v47 = vadd.f32 %v4775_v28, %v9324_v35  ;;  %v9435_v31 = vadd.f32 %v4778_v32, %v9327_v51  ;;  %v4244_v27 = vld [vmem:[#allocation2 + $0x100] sm:$0xfc]  ;;  %v10980_v32 = vld [vmem:[#allocation125_spill] sm:$0xff]  ;;  %v4245_v42 = vld [vmem:[#allocation2 + $0x108] sm:$0xfc] }
 0x3ed   : > { %v9438_v7 = vadd.f32 %v4781_v48, %v9330_v16  ;;  %v9441_v59 = vadd.f32 %v4784_v30, %v9333_v56  ;;  %v9444_v13 = vadd.f32 %v4787_v58, %v9336_v45  ;;  %v9447_v57 = vadd.f32 %v4790_v55, %v9339_v12  ;;  %v10963_v12 = vld [vmem:[#allocation29_spill] sm:$0xff]  ;;  %v10981_v26 = vld [vmem:[#allocation14_spill] sm:$0xff]  ;;  %v10982_v48 = vld [vmem:[#allocation127_spill] sm:$0xff] }
 0x3ee   : > { %v9450_v50 = vadd.f32 %v4793_v62, %v9342_v9  ;;  %v9453_v35 = vadd.f32 %v4796_v52, %v9345_v60  ;;  %v9456_v51 = vadd.f32 %v4799_v8, %v9348_v11  ;;  %v9459_v16 = vadd.f32 %v4802_v3, %v9351_v38  ;;  %v10965_v9 = vld [vmem:[#allocation37_spill] sm:$0xff]  ;;  %v10967_v60 = vld [vmem:[#allocation87_spill] sm:$0xff]  ;;  %v10968_v11 = vld [vmem:[#allocation36_spill] sm:$0xff] }
 0x3ef   : > { %v9462_v56 = vadd.f32 %v4805_v46, %v9354_v25  ;;  %v9465_v45 = vadd.f32 %v4808_v18, %v9357_v34  ;;  %v4850_v29 = vmul.f32 %v10964_v39, %v10963_v12  ;;  %v4851_v6 = vmul.f32 %v10966_v14, %v10965_v9  ;;  %v10969_v38 = vld [vmem:[#allocation88_spill] sm:$0xff]  ;;  %v10970_v25 = vld [vmem:[#allocation33_spill] sm:$0xff]  ;;  %v10971_v34 = vld [vmem:[#allocation90_spill] sm:$0xff] }
 0x3f0   : > { %v4852_v1 = vmul.f32 %v10964_v39, %v10967_v60  ;;  %v4853_v23 = vmul.f32 %v10966_v14, %v10968_v11  ;;  %v4854_v15 = vmul.f32 %v10964_v39, %v10969_v38  ;;  %v4855_v54 = vmul.f32 %v10966_v14, %v10970_v25  ;;  %v4246_v20 = vld [vmem:[#allocation2 + $0x110] sm:$0x1]  ;;  %v4247_v58 = vld [vmem:[#allocation2 + $0x118] sm:$0x1]  ;;  %v10983_v55 = vld [vmem:[#allocation35_spill] sm:$0xff] }
 0x3f1   : > { %v4856_v44 = vmul.f32 %v10964_v39, %v10971_v34  ;;  %v4857_v5 = vmul.f32 %v10966_v14, %v10972_v19  ;;  %v4858_v24 = vmul.f32 %v10964_v39, %v10973_v10  ;;  %v4859_v4 = vmul.f32 %v10966_v14, %v10974_v40  ;;  %v10984_v52 = vld [vmem:[#allocation131_spill] sm:$0xff]  ;;  %v10985_v3 = vld [vmem:[#allocation120_spill] sm:$0xff] }
 0x3f2   : > { %v4860_v63 = vmul.f32 %v10964_v39, %v10975_v61  ;;  %v4861_v2 = vmul.f32 %v10966_v14, %v10976_v49  ;;  %v4862_v43 = vmul.f32 %v10964_v39, %v10977_v0  ;;  %v4863_v28 = vmul.f32 %v10966_v14, %v10978_v41  ;;  %v10986_v18 = vld [vmem:[#allocation123_spill] sm:$0xff] }
 0x3f3   : > { %v4864_v33 = vmul.f32 %v10964_v39, %v10979_v17  ;;  %v4865_v36 = vmul.f32 %v10966_v14, %v10980_v32  ;;  %v4866_v21 = vmul.f32 %v10964_v39, %v10981_v26  ;;  %v4867_v30 = vmul.f32 %v10966_v14, %v10982_v48  ;;  %v10987_v25 = vld [vmem:[#allocation59_spill] sm:$0xff] }
 0x3f4   : > { %v4868_v62 = vmul.f32 %v10964_v39, %v10983_v55  ;;  %v4869_v8 = vmul.f32 %v10966_v14, %v10984_v52  ;;  %v4870_v46 = vmul.f32 %v10964_v39, %v10985_v3  ;;  %v4871_v12 = vmul.f32 %v10966_v14, %v10986_v18 }
 0x3f5   : > { %v4906_v9 = vrot.slane %v4850_v29, 2  ;;  %v4907_v60 = vrot.slane %v4852_v1, 2  ;;  %v4909_v11 = vrot.slane %v4851_v6, 2  ;;  %v4910_v38 = vrot.slane %v4853_v23, 2 }
 0x3f6   : > { %v4872_v34 = vmul.f32 %v10964_v39, %v10987_v25  ;;  %v4873_v19 = vmul.f32 %v10966_v14, %v9291_v53  ;;  %v4912_v10 = vrot.slane %v4854_v15, 2  ;;  %v4913_v40 = vrot.slane %v4856_v44, 2 }
 0x3f7   : > { %v4874_v61 = vmul.f32 %v10964_v39, %v4244_v27  ;;  %v4875_v49 = vmul.f32 %v10966_v14, %v4245_v42  ;;  %v4876_v0 = vmul.f32 %v10964_v39, %v4246_v20  ;;  %v4877_v41 = vmul.f32 %v10966_v14, %v4247_v58 }
 0x3f8   : > { %v4908_v29 = vsel %vm4349_vm0, %v4906_v9, %v4907_v60  ;;  %v4911_v6 = vsel %vm4349_vm0, %v4909_v11, %v4910_v38  ;;  %v4915_v1 = vrot.slane %v4855_v54, 2  ;;  %v4916_v23 = vrot.slane %v4857_v5, 2 }
 0x3f9   : > { %v4914_v17 = vsel %vm4349_vm0, %v4912_v10, %v4913_v40  ;;  %v4918_v53 = vrot.slane %v4858_v24, 2  ;;  %v4919_v15 = vrot.slane %v4860_v63, 2  ;;  %v4921_v44 = vrot.slane %v4859_v4, 2 }
 0x3fa   : > { %v4922_v32 = vrot.slane %v4861_v2, 2  ;;  %v4924_v27 = vrot.slane %v4862_v43, 2  ;;  %v4925_v26 = vrot.slane %v4864_v33, 2  ;;  %v4927_v48 = vrot.slane %v4863_v28, 2 }
 0x3fb   : > { %v4928_v42 = vrot.slane %v4865_v36, 2  ;;  %v4930_v39 = vrot.slane %v4866_v21, 2  ;;  %v4931_v20 = vrot.slane %v4868_v62, 2  ;;  %v4933_v14 = vrot.slane %v4867_v30, 2 }
 0x3fc   : > { %v4934_v58 = vrot.slane %v4869_v8, 2  ;;  %v4936_v55 = vrot.slane %v4870_v46, 2  ;;  %v4937_v52 = vrot.slane %v4872_v34, 2  ;;  %v4939_v3 = vrot.slane %v4871_v12, 2 }
 0x3fd   : > { %v4917_v54 = vsel %vm4349_vm0, %v4915_v1, %v4916_v23  ;;  %v4940_v5 = vrot.slane %v4873_v19, 2  ;;  %v4942_v18 = vrot.slane %v4874_v61, 2  ;;  %v4943_v9 = vrot.slane %v4876_v0, 2 }
 0x3fe   : > { %v4920_v24 = vsel %vm4349_vm0, %v4918_v53, %v4919_v15  ;;  %v4923_v4 = vsel %vm4349_vm0, %v4921_v44, %v4922_v32  ;;  %v4945_v63 = vrot.slane %v4875_v49, 2  ;;  %v4946_v2 = vrot.slane %v4877_v41, 2 }
 0x3ff   : > { %v4926_v43 = vsel %vm4349_vm0, %v4924_v27, %v4925_v26  ;;  %v4929_v28 = vsel %vm4349_vm0, %v4927_v48, %v4928_v42  ;;  %v9528_v33 = vadd.f32 %v4908_v29, %v9425_v37  ;;  %v9531_v36 = vadd.f32 %v4914_v17, %v9432_v47 }
 0x400   : > { %v4932_v21 = vsel %vm4349_vm0, %v4930_v39, %v4931_v20  ;;  %v4935_v30 = vsel %vm4349_vm0, %v4933_v14, %v4934_v58  ;;  %v4938_v62 = vsel %vm4349_vm0, %v4936_v55, %v4937_v52  ;;  %v4941_v8 = vsel %vm4349_vm0, %v4939_v3, %v4940_v5 }
 0x401   : > { %v4944_v46 = vsel %vm4349_vm0, %v4942_v18, %v4943_v9  ;;  %v9539_v12 = vadd.f32 %v4911_v6, %v9429_v22  ;;  %v9542_v60 = vadd.f32 %v4917_v54, %v9435_v31  ;;  %v9545_v37 = vadd.f32 %v4920_v24, %v9438_v7 }
 0x402   : > { %v4947_v47 = vsel %vm4349_vm0, %v4945_v63, %v4946_v2  ;;  %v9549_v11 = vadd.f32 %v4923_v4, %v9441_v59  ;;  %v9552_v38 = vadd.f32 %v4926_v43, %v9444_v13  ;;  %v9555_v25 = vadd.f32 %v4932_v21, %v9450_v50 }
 0x403   : > { %v9558_v22 = vadd.f32 %v4938_v62, %v9456_v51  ;;  %v9561_v31 = vadd.f32 %v4944_v46, %v9462_v56  ;;  %v4977_v7 = vsel %vm4976_vm1, %v9528_v33, 0.0  ;;  %v4978_v34 = vsel %vm4976_vm1, %v9531_v36, 0.0 }
 0x404   : > { %v9568_v59 = vadd.f32 %v4929_v28, %v9447_v57  ;;  %v9571_v13 = vadd.f32 %v4935_v30, %v9453_v35  ;;  %v9574_v50 = vadd.f32 %v4941_v8, %v9459_v16  ;;  %v4979_v51 = vadd.f32 %v4978_v34, %v4977_v7 }
 0x405   : > { %v9577_v19 = vadd.f32 %v4947_v47, %v9465_v45  ;;  %v4980_v56 = vsel %vm4976_vm1, %v9545_v37, 0.0  ;;  %v4996_v10 = vsel %vm4976_vm1, %v9539_v12, 0.0  ;;  %v4997_v57 = vsel %vm4976_vm1, %v9542_v60, 0.0 }
 0x406   : > { %v4981_v40 = vadd.f32 %v4980_v56, %v4979_v51  ;;  %v4982_v35 = vsel %vm4976_vm1, %v9552_v38, 0.0  ;;  %v4984_v16 = vsel %vm4976_vm1, %v9555_v25, 0.0  ;;  %v4998_v61 = vadd.f32 %v4997_v57, %v4996_v10 }
 0x407   : > { %v4986_v45 = vsel %vm4976_vm1, %v9558_v22, 0.0  ;;  %v4988_v49 = vsel %vm4976_vm1, %v9561_v31, 0.0  ;;  %v4999_v0 = vsel %vm4976_vm1, %v9549_v11, 0.0  ;;  %v5015_v41 = vmul.f32 %v9528_v33, %v9528_v33 }
 0x408   : > { %v4983_v29 = vadd.f32 %v4982_v35, %v4981_v40  ;;  %v5000_v6 = vadd.f32 %v4999_v0, %v4998_v61  ;;  %v5001_v1 = vsel %vm4976_vm1, %v9568_v59, 0.0  ;;  %v5017_v23 = vmul.f32 %v9531_v36, %v9531_v36  ;;  %v2512_v0 = vpop.permute.xlu1 %2511 }
 0x409   : > { %v5003_v17 = vsel %vm4976_vm1, %v9571_v13, 0.0  ;;  %v5005_v53 = vsel %vm4976_vm1, %v9574_v50, 0.0  ;;  %v5007_v15 = vsel %vm4976_vm1, %v9577_v19, 0.0  ;;  %v5016_v44 = vmul.f32 %v9539_v12, %v9539_v12 }
 0x40a   : > { %v4985_v32 = vadd.f32 %v4984_v16, %v4983_v29  ;;  %v5002_v27 = vadd.f32 %v5001_v1, %v5000_v6  ;;  %v5018_v26 = vmul.f32 %v9542_v60, %v9542_v60  ;;  %v5019_v48 = vmul.f32 %v9545_v37, %v9545_v37 }
 0x40b   : > { %v5020_v42 = vmul.f32 %v9549_v11, %v9549_v11  ;;  %v5021_v39 = vmul.f32 %v9552_v38, %v9552_v38  ;;  %v5022_v20 = vmul.f32 %v9568_v59, %v9568_v59  ;;  %v5029_v14 = vsel %vm4976_vm1, %v5015_v41, 0.0 }
 0x40c   : > { %v4987_v58 = vadd.f32 %v4986_v45, %v4985_v32  ;;  %v5004_v55 = vadd.f32 %v5003_v17, %v5002_v27  ;;  %v5023_v52 = vmul.f32 %v9555_v25, %v9555_v25  ;;  %v5030_v3 = vsel %vm4976_vm1, %v5017_v23, 0.0 }
 0x40d   : > { %v5024_v54 = vmul.f32 %v9571_v13, %v9571_v13  ;;  %v5025_v5 = vmul.f32 %v9558_v22, %v9558_v22  ;;  %v5026_v18 = vmul.f32 %v9574_v50, %v9574_v50  ;;  %v5031_v9 = vadd.f32 %v5030_v3, %v5029_v14 }
 0x40e   : > { %v4989_v24 = vadd.f32 %v4988_v49, %v4987_v58  ;;  %v5006_v4 = vadd.f32 %v5005_v53, %v5004_v55  ;;  %v5032_v63 = vsel %vm4976_vm1, %v5019_v48, 0.0  ;;  %v5048_v2 = vsel %vm4976_vm1, %v5016_v44, 0.0 }
 0x40f   : > { %v5027_v43 = vmul.f32 %v9561_v31, %v9561_v31  ;;  %v5028_v28 = vmul.f32 %v9577_v19, %v9577_v19  ;;  %v5033_v21 = vadd.f32 %v5032_v63, %v5031_v9  ;;  %v5049_v30 = vsel %vm4976_vm1, %v5018_v26, 0.0 }
 0x410   : > { %v4990_v62 = vrot.slane %v4989_v24, 4  ;;  %v5008_v8 = vadd.f32 %v5007_v15, %v5006_v4  ;;  %v5034_v46 = vsel %vm4976_vm1, %v5021_v39, 0.0  ;;  %v5050_v47 = vadd.f32 %v5049_v30, %v5048_v2 }
 0x411   : > { %v5035_v7 = vadd.f32 %v5034_v46, %v5033_v21  ;;  %v5036_v34 = vsel %vm4976_vm1, %v5023_v52, 0.0  ;;  %v5051_v51 = vsel %vm4976_vm1, %v5020_v42, 0.0  ;;  %v5038_v35 = vsel %vm4976_vm1, %v5025_v5, 0.0 }
 0x412   : > { %v4991_v56 = vadd.f32 %v4990_v62, %v4989_v24  ;;  %v5009_v10 = vrot.slane %v5008_v8, 4  ;;  %v5052_v57 = vadd.f32 %v5051_v51, %v5050_v47  ;;  %v5053_v16 = vsel %vm4976_vm1, %v5022_v20, 0.0 }
 0x413   : > { %v5037_v40 = vadd.f32 %v5036_v34, %v5035_v7  ;;  %v5040_v29 = vsel %vm4976_vm1, %v5027_v43, 0.0  ;;  %v5055_v6 = vsel %vm4976_vm1, %v5024_v54, 0.0  ;;  %v5057_v15 = vsel %vm4976_vm1, %v5026_v18, 0.0 }
 0x414   : > { %v4992_v61 = vrot.slane %v4991_v56, 2  ;;  %v5010_v45 = vadd.f32 %v5009_v10, %v5008_v8  ;;  %v5054_v49 = vadd.f32 %v5053_v16, %v5052_v57  ;;  %v5059_v48 = vsel %vm4976_vm1, %v5028_v28, 0.0  ;;  %v5077_v16 = vld [vmem:[%s511_s26] sm:$0x3] }
 0x415   : > { %v5039_v41 = vadd.f32 %v5038_v35, %v5037_v40  ;;  %v10988_v40 = vld [vmem:[#allocation89_spill] sm:$0xff] }
 0x416   : > { %v4993_v1 = vadd.f32 %v4992_v61, %v4991_v56  ;;  %v5011_v23 = vrot.slane %v5010_v45, 2  ;;  %v5056_v17 = vadd.f32 %v5055_v6, %v5054_v49  ;;  %v10989_v49 = vld [vmem:[#allocation91_spill] sm:$0xff] }
 0x417   : > { %v5041_v53 = vadd.f32 %v5040_v29, %v5039_v41  ;;  %v10990_v41 = vld [vmem:[#allocation92_spill] sm:$0xff] }
 0x418   : > { %v4994_v44 = vrot.slane %v4993_v1, 1  ;;  %v5012_v32 = vadd.f32 %v5011_v23, %v5010_v45  ;;  %v5058_v27 = vadd.f32 %v5057_v15, %v5056_v17 }
 0x419   : > { %v5042_v26 = vrot.slane %v5041_v53, 4 }
 0x41a   : > { %v5013_v42 = vrot.slane %v5012_v32, 1  ;;  %v5060_v39 = vadd.f32 %v5059_v48, %v5058_v27  ;;  %v4995_v20 = vadd.f32 %v4994_v44, %v4993_v1 }
 0x41b   : > { %v5043_v14 = vadd.f32 %v5042_v26, %v5041_v53 }
 0x41c   : > { %v5061_v58 = vrot.slane %v5060_v39, 4  ;;  %v5014_v52 = vadd.f32 %v5013_v42, %v5012_v32  ;;  %v5067_v5 = vmul.f32 0.020408163, %v4995_v20  ;;  %v5101_v32 = vld [vmem:[%s516_s15] sm:$0x3] }
 0x41d   : > { %v5044_v55 = vrot.slane %v5043_v14, 2 }
 0x41e   : > { %v5062_v3 = vadd.f32 %v5061_v58, %v5060_v39  ;;  %v5068_v18 = vmul.f32 0.020408163, %v5014_v52  ;;  %v5071_v2 = vmul.f32 %v5067_v5, %v5067_v5 }
 0x41f   : > { %v5045_v54 = vadd.f32 %v5044_v55, %v5043_v14 }
 0x420   : > { %v5063_v9 = vrot.slane %v5062_v3, 2  ;;  %v5072_v30 = vmul.f32 %v5068_v18, %v5068_v18 }
 0x421   : > { %v5046_v24 = vrot.slane %v5045_v54, 1 }
 0x422   : > { %v5064_v4 = vadd.f32 %v5063_v9, %v5062_v3 }
 0x423   : > { %v5047_v63 = vadd.f32 %v5046_v24, %v5045_v54 }
 0x424   : > { %v5065_v43 = vrot.slane %v5064_v4, 1 }
 0x425   : > { %v5069_v21 = vmul.f32 0.020408163, %v5047_v63 }
 0x426   : > { %v5066_v28 = vadd.f32 %v5065_v43, %v5064_v4 }
 0x427   : > { %v5073_v62 = vsub.f32 %v5069_v21, %v5071_v2 }
 0x428   : > { %v5070_v8 = vmul.f32 0.020408163, %v5066_v28 }
 0x429   : > { %v5075_v46 = vmax.f32 %v5073_v62, 0.0 }
 0x42a   : > { %v5074_v47 = vsub.f32 %v5070_v8, %v5072_v30 }
 0x42b   : > { %v5078_v7 = vadd.f32 0.001, %v5075_v46 }
 0x42c   : > { %v5076_v34 = vmax.f32 %v5074_v47, 0.0 }
 0x42d   : > { %5510 = vrsqrt.f32 %v5078_v7 }
 0x42e   : > { %v5079_v51 = vadd.f32 0.001, %v5076_v34 }
 0x430   : > { %5512 = vrsqrt.f32 %v5079_v51 }
 0x437   : > { %v5511_v56 = vpop.eup %5510 }
 0x43a   : > { %v5513_v10 = vpop.eup %5512 }
 0x43b   : > { %v5084_v57 = vcombine.low %v5511_v56, %v5513_v10 }
 0x43d   : > { %v5091_v35 = vrot.slane %v5084_v57, %v10988_v40 }
 0x43f   : > { %v5098_v61 = vrot.slane %v5091_v35, %v10988_v40 }
 0x441   : > { %v5100_v45 = vmul.f32 %v5098_v61, %v5077_v16 }
 0x443   : > { %v5106_v0 = vrot.slane %v5100_v45, %v10989_v49  ;;  %v5110_v29 = vrot.slane %v5100_v45, %v10990_v41 }
 0x445   : > { %v5113_v6 = vmul.f32 %v5106_v0, %v5067_v5  ;;  %v5114_v1 = vmul.f32 %v5110_v29, %v5068_v18  ;;  %v5135_v23 = vmul.f32 %v5110_v29, %v9539_v12  ;;  %v5140_v53 = vmul.f32 %v5106_v0, %v9552_v38 }
 0x446   : > { %v5141_v15 = vmul.f32 %v5110_v29, %v9568_v59  ;;  %v5134_v48 = vmul.f32 %v5106_v0, %v9528_v33  ;;  %v5136_v42 = vmul.f32 %v5106_v0, %v9531_v36  ;;  %v5137_v12 = vmul.f32 %v5110_v29, %v9542_v60 }
 0x447   : > { %v5117_v17 = vcombine.low %v5113_v6, %v5114_v1  ;;  %v5138_v39 = vmul.f32 %v5106_v0, %v9545_v37  ;;  %v5139_v20 = vmul.f32 %v5110_v29, %v9549_v11  ;;  %v5142_v38 = vmul.f32 %v5106_v0, %v9555_v25 }
 0x448   : > { %v5143_v59 = vmul.f32 %v5110_v29, %v9571_v13  ;;  %v5144_v55 = vmul.f32 %v5106_v0, %v9558_v22  ;;  %v5145_v33 = vmul.f32 %v5110_v29, %v9574_v50  ;;  %v5146_v36 = vmul.f32 %v5106_v0, %v9561_v31 }
 0x449   : > { %v5124_v44 = vrot.slane %v5117_v17, %v10988_v40  ;;  %v5147_v60 = vmul.f32 %v5110_v29, %v9577_v19 }
 0x44b   : > { %v5131_v27 = vrot.slane %v5124_v44, %v10988_v40 }
 0x44d   : > { %v5133_v26 = vsub.f32 %v5101_v32, %v5131_v27 }
 0x44f   : > { %v5152_v14 = vrot.slane %v5133_v26, %v10989_v49  ;;  %v5156_v58 = vrot.slane %v5133_v26, %v10990_v41 }
 0x451   : > { %v5159_v37 = vadd.f32 %v5152_v14, %v5134_v48  ;;  %v5160_v52 = vadd.f32 %v5156_v58, %v5135_v23  ;;  %v5161_v11 = vadd.f32 %v5152_v14, %v5136_v42  ;;  %v5162_v3 = vadd.f32 %v5156_v58, %v5137_v12 }
 0x452   : > { %v5163_v54 = vadd.f32 %v5152_v14, %v5138_v39  ;;  %v5164_v25 = vadd.f32 %v5156_v58, %v5139_v20  ;;  %v5165_v5 = vadd.f32 %v5152_v14, %v5140_v53  ;;  %v5166_v13 = vadd.f32 %v5156_v58, %v5141_v15 }
 0x453   : > { %v5167_v9 = vadd.f32 %v5152_v14, %v5142_v38  ;;  %v5168_v24 = vadd.f32 %v5156_v58, %v5143_v59  ;;  %v5169_v4 = vadd.f32 %v5152_v14, %v5144_v55  ;;  %v5170_v18 = vadd.f32 %v5156_v58, %v5145_v33 }
 0x454   : > { %v5171_v22 = vadd.f32 %v5152_v14, %v5146_v36  ;;  %v5172_v63 = vadd.f32 %v5156_v58, %v5147_v60  ;;  %v5173_v50 = vmax.f32 %v5159_v37, 0.0  ;;  %v5174_v2 = vmax.f32 %v5160_v52, 0.0 }
 0x455   : > { %v5175_v31 = vmax.f32 %v5161_v11, 0.0  ;;  %v5176_v43 = vmax.f32 %v5162_v3, 0.0  ;;  %v5177_v19 = vmax.f32 %v5163_v54, 0.0  ;;  %v5178_v21 = vmax.f32 %v5164_v25, 0.0 }
 0x456   : > { %v5179_v28 = vmax.f32 %v5165_v5, 0.0  ;;  %v5180_v30 = vmax.f32 %v5166_v13, 0.0  ;;  %v5181_v62 = vmax.f32 %v5167_v9, 0.0  ;;  %v5182_v8 = vmax.f32 %v5168_v24, 0.0  ;;  %5187 = vst [vmem:[%s9678_s27] sm:$0x7f] %v5173_v50 }
 0x457   : > { %5188 = vst [vmem:[%s9678_s27 + $0x8] sm:$0x7f] %v5174_v2  ;;  %v5183_v46 = vmax.f32 %v5169_v4, 0.0  ;;  %v5184_v47 = vmax.f32 %v5170_v18, 0.0  ;;  %v5185_v7 = vmax.f32 %v5171_v22, 0.0  ;;  %v5186_v34 = vmax.f32 %v5172_v63, 0.0 }
 0x458   : > { %5189 = vst [vmem:[%s9678_s27 + $0x10] sm:$0x7f] %v5175_v31  ;;  %5190 = vst [vmem:[%s9678_s27 + $0x18] sm:$0x7f] %v5176_v43  ;;  %5207 = sbr.rel (!%p5621_p5) target bundleno = 1126 (0x466), region = 102 }
 0x459   : > { %5191 = vst [vmem:[%s9678_s27 + $0x20] sm:$0x7f] %v5177_v19  ;;  %5192 = vst [vmem:[%s9678_s27 + $0x28] sm:$0x7f] %v5178_v21 }
 0x45a   : > { %5193 = vst [vmem:[%s9678_s27 + $0x30] sm:$0x7f] %v5179_v28  ;;  %5194 = vst [vmem:[%s9678_s27 + $0x38] sm:$0x7f] %v5180_v30 }
 0x45b   : > { %5195 = vst [vmem:[%s9678_s27 + $0x40] sm:$0x7f] %v5181_v62  ;;  %5196 = vst [vmem:[%s9678_s27 + $0x48] sm:$0x7f] %v5182_v8 }
 0x45c   : > { %5197 = vst [vmem:[%s9678_s27 + $0x50] sm:$0x7f] %v5183_v46  ;;  %5198 = vst [vmem:[%s9678_s27 + $0x58] sm:$0x7f] %v5184_v47 }
 0x45d   : > { %5199 = vst [vmem:[%s9678_s27 + $0x60] sm:$0x7f] %v5185_v7  ;;  %5200 = vst [vmem:[%s9678_s27 + $0x68] sm:$0x7f] %v5186_v34  ;;  %v5223_v51 = vld [vmem:[%s9678_s27] sm:$0xff] (%p5621_p5) }
 0x45e   : > { %v5225_v56 = vld [vmem:[%s9678_s27 + $0x8] sm:$0xff] (%p5621_p5)  ;;  %5224 = vst [vmem:[%s5210_s18] sm:$0xff] (%p5621_p5), %v5223_v51 }
 0x45f   : > { %v5227_v10 = vld [vmem:[%s9678_s27 + $0x10] sm:$0xff]  ;;  %v5229_v57 = vld [vmem:[%s9678_s27 + $0x18] sm:$0xff]  ;;  %5226 = vst [vmem:[%s5210_s18 + $0x8] sm:$0xff] %v5225_v56 }
 0x460   : > { %v5231_v40 = vld [vmem:[%s9678_s27 + $0x20] sm:$0xff]  ;;  %v5233_v35 = vld [vmem:[%s9678_s27 + $0x28] sm:$0xff]  ;;  %5228 = vst [vmem:[%s5210_s18 + $0x30] sm:$0xff] %v5227_v10  ;;  %5230 = vst [vmem:[%s5210_s18 + $0x38] sm:$0xff] %v5229_v57 }
 0x461   : > { %5232 = vst [vmem:[%s5210_s18 + $0x60] sm:$0xff] %v5231_v40  ;;  %5234 = vst [vmem:[%s5210_s18 + $0x68] sm:$0xff] %v5233_v35  ;;  %v5235_v16 = vld [vmem:[%s9678_s27 + $0x30] sm:$0xff]  ;;  %v5237_v61 = vld [vmem:[%s9678_s27 + $0x38] sm:$0xff] }
 0x462   : > { %v5239_v45 = vld [vmem:[%s9678_s27 + $0x40] sm:$0xff]  ;;  %5236 = vst [vmem:[%s5210_s18 + $0x90] sm:$0xff] %v5235_v16  ;;  %5238 = vst [vmem:[%s5210_s18 + $0x98] sm:$0xff] %v5237_v61  ;;  %v5241_v49 = vld [vmem:[%s9678_s27 + $0x48] sm:$0xff] }
 0x463   : > { %5240 = vst [vmem:[%s5210_s18 + $0xc0] sm:$0xff] %v5239_v45  ;;  %v5243_v0 = vld [vmem:[%s9678_s27 + $0x50] sm:$0xff]  ;;  %v5245_v41 = vld [vmem:[%s9678_s27 + $0x58] sm:$0xff]  ;;  %5242 = vst [vmem:[%s5210_s18 + $0xc8] sm:$0xff] %v5241_v49 }
 0x464   : > { %5244 = vst [vmem:[%s5210_s18 + $0xf0] sm:$0xff] %v5243_v0  ;;  %5246 = vst [vmem:[%s5210_s18 + $0xf8] sm:$0xff] %v5245_v41  ;;  %v5247_v29 = vld [vmem:[%s9678_s27 + $0x60] sm:$0xff]  ;;  %v5249_v6 = vld [vmem:[%s9678_s27 + $0x68] sm:$0xff] }
 0x465   : > { %5248 = vst [vmem:[%s5210_s18 + $0x120] sm:$0xff] %v5247_v29  ;;  %5250 = vst [vmem:[%s5210_s18 + $0x128] sm:$0xff] %v5249_v6 }
 0x466 PF: > { %p15_p11 = scmp.ge.s32.totalorder %s5605_s9, 5   ;;  %s10991_s27 = smov %s5532_s28 }
 0x467   : > { %s10992_s28 = smov %s5615_s12  ;;  %s10993_s29 = smov %s5605_s9 }
 0x468   :  { %17 = sbr.rel (!%p15_p11) target bundleno = 2 (0x2), region = 235 }

</bundles_post_ra>
